<compile_context>
chip_gen: v7x
topology: tpu7x:2x2x1
jax: 0.10.0
libtpu: 0.0.40
codegen_flags: <defaults>
</compile_context>

<pallas_src>
import jax
import jax.numpy as jnp
from jax.experimental import pallas as pl
from jax.experimental.pallas import tpu as pltpu


def _round_up(x, m):
    return ((x + m - 1) // m) * m


def generator_kernel(x_ref, w1_ref, b1_ref, w2_ref, b2_ref, o_ref):
    # Linear 1: bf16 MXU operands, f32 accumulation.  (TB, Z) @ (Z, H)
    h = jnp.dot(x_ref[...], w1_ref[...], preferred_element_type=jnp.float32)
    h = h + b1_ref[...]
    # LeakyReLU(0.01) on the VPU in f32.
    h = jnp.where(h > 0, h, 0.01 * h)
    # Linear 2: bf16 MXU operands, f32 accumulation.  (TB, H) @ (H, Dp)
    y = jnp.dot(h.astype(jnp.bfloat16), w2_ref[...],
                preferred_element_type=jnp.float32)
    y = y + b2_ref[...]
    # Tanh on the EUP in f32.
    o_ref[...] = jnp.tanh(y)


def prepare_generator_params(w1, b1, w2, b2):
    """One-time parameter preparation (call once at init, NOT per forward).

    * casts weights to bf16 (halves weight HBM traffic, native MXU path)
    * zero-pads the output feature dim to a multiple of 128 so output stores
      are lane-dense (no masked vst) and the MXU N-tiling is clean
    * reshapes biases to (1, feat) f32 rows
    """
    H = w1.shape[1]
    D = w2.shape[1]
    Dp = _round_up(D, 128)
    if Dp != D:
        w2 = jnp.pad(w2, ((0, 0), (0, Dp - D)))
        b2 = jnp.pad(b2, ((0, Dp - D),))
    w1b = w1.astype(jnp.bfloat16)
    w2b = w2.astype(jnp.bfloat16)
    b1r = b1.reshape(1, H).astype(jnp.float32)
    b2r = b2.reshape(1, Dp).astype(jnp.float32)
    return w1b, b1r, w2b, b2r


def _choose_batch_tile(B, tb_max=512):
    # Tile rows: multiple of 16 (bf16 sublane packing), capped at 512 so the
    # f32 out tile + f32 intermediate + resident weights stay inside v7x's
    # 64 MiB VMEM.  Sized from cdiv(B, n_steps) so awkward batch sizes don't
    # over-pad, and forced to >= 2 grid steps once the batch is big enough so
    # the "parallel" axis actually shards across both v7x TensorCores.
    n_steps = max(1, -(-B // tb_max))
    if B >= 32:
        n_steps = max(n_steps, 2)
    tb = _round_up(-(-B // n_steps), 16)
    return min(tb, tb_max)


def generator_forward(x, w1b, b1r, w2b, b2r, *, img_dim):
    """Forward pass. Params must come from prepare_generator_params().

    x: (B, Z) f32.  Returns (B, img_dim) f32.
    """
    B, Z = x.shape
    H = w1b.shape[1]
    Dp = w2b.shape[1]

    # Activations to bf16 once in the wrapper.
    x = x.astype(jnp.bfloat16)

    TB = _choose_batch_tile(B)
    Bp = _round_up(B, TB)
    if Bp != B:
        x = jnp.pad(x, ((0, Bp - B), (0, 0)))
    grid = (Bp // TB,)

    cost = pl.CostEstimate(
        flops=2 * Bp * (Z * H + H * Dp),
        transcendentals=Bp * Dp,
        bytes_accessed=(x.size * 2 + w1b.size * 2 + w2b.size * 2
                        + b1r.size * 4 + b2r.size * 4 + Bp * Dp * 4),
    )

    # Weights/biases: constant block index -> VMEM-resident across all grid
    # steps; single-buffered since they never change (frees ~5.5 MiB VMEM).
    def resident(shape):
        return pl.BlockSpec(shape, lambda i: (0, 0),
                            pipeline_mode=pl.Buffered(1))

    out = pl.pallas_call(
        generator_kernel,
        out_shape=jax.ShapeDtypeStruct((Bp, Dp), jnp.float32),
        grid=grid,
        in_specs=[
            pl.BlockSpec((TB, Z), lambda i: (i, 0)),   # x tile per grid step
            resident((Z, H)),                          # w1 (bf16, resident)
            resident((1, H)),                          # b1 (f32, resident)
            resident((H, Dp)),                         # w2 (bf16, resident)
            resident((1, Dp)),                         # b2 (f32, resident)
        ],
        out_specs=pl.BlockSpec((TB, Dp), lambda i: (i, 0)),
        compiler_params=pltpu.CompilerParams(
            dimension_semantics=("parallel",),
            vmem_limit_bytes=48 << 20,
        ),
        cost_estimate=cost,
    )(x, w1b, b1r, w2b, b2r)

    return out[:B, :img_dim]


def init_params(key, z_dim, hidden, img_dim):
    # Deterministic init mimicking PyTorch nn.Linear default:
    # U(-1/sqrt(fan_in), 1/sqrt(fan_in)) for both weights and biases.
    k1, k2, k3, k4 = jax.random.split(key, 4)
    lim1 = 1.0 / (z_dim ** 0.5)
    lim2 = 1.0 / (hidden ** 0.5)
    w1 = jax.random.uniform(k1, (z_dim, hidden), jnp.float32, -lim1, lim1)
    b1 = jax.random.uniform(k2, (hidden,), jnp.float32, -lim1, lim1)
    w2 = jax.random.uniform(k3, (hidden, img_dim), jnp.float32, -lim2, lim2)
    b2 = jax.random.uniform(k4, (img_dim,), jnp.float32, -lim2, lim2)
    return w1, b1, w2, b2


if __name__ == "__main__":
    z_dim = 64 * 8      # 512, as in the PyTorch script
    hidden = 256 * 8    # 2048
    img_dim = 784       # 28*28 MNIST image dim
    batch = 2

    key = jax.random.PRNGKey(0)
    kx, kp = jax.random.split(key)
    x = jax.random.normal(kx, (batch, z_dim), jnp.float32)
    w1, b1, w2, b2 = init_params(kp, z_dim, hidden, img_dim)

    # One-time param prep (bf16 cast + lane-dense padding), hoisted out of the
    # per-call forward path.
    prepared = prepare_generator_params(w1, b1, w2, b2)
    prepared = jax.block_until_ready(prepared)

    fwd = jax.jit(generator_forward, static_argnames=("img_dim",))
    out = fwd(x, *prepared, img_dim=img_dim)
    out = jax.block_until_ready(out)
    assert out.shape == (batch, img_dim)

    # Reference mirroring the kernel's bf16-operand / f32-accumulate math.
    w1b = w1.astype(jnp.bfloat16).astype(jnp.float32)
    w2b = w2.astype(jnp.bfloat16).astype(jnp.float32)
    xb = x.astype(jnp.bfloat16).astype(jnp.float32)
    h = xb @ w1b + b1
    h = jnp.where(h > 0, h, 0.01 * h)
    hb = h.astype(jnp.bfloat16).astype(jnp.float32)
    ref_bf16 = jnp.tanh(hb @ w2b + b2)
    assert jnp.allclose(out, ref_bf16, atol=2e-3, rtol=2e-3), float(
        jnp.max(jnp.abs(out - ref_bf16)))

    # Sanity vs the full-f32 PyTorch-equivalent math (looser: bf16 operands).
    h32 = x @ w1 + b1
    h32 = jnp.where(h32 > 0, h32, 0.01 * h32)
    ref_f32 = jnp.tanh(h32 @ w2 + b2)
    assert jnp.allclose(out, ref_f32, atol=3e-2, rtol=3e-2)

    print("KERNEL_OK")
</pallas_src>

<mosaic_0001>
module attributes {stable_mosaic.version = 11 : i64} {
  func.func @generator_kernel(%arg0: i32, %arg1: memref<16x512xbf16, #tpu.memory_space<vmem>>, %arg2: memref<512x2048xbf16, #tpu.memory_space<vmem>>, %arg3: memref<1x2048xf32, #tpu.memory_space<vmem>>, %arg4: memref<2048x896xbf16, #tpu.memory_space<vmem>>, %arg5: memref<1x896xf32, #tpu.memory_space<vmem>>, %arg6: memref<16x896xf32, #tpu.memory_space<vmem>>) attributes {dimension_semantics = [#tpu.dimension_semantics<parallel>], iteration_bounds = array<i64: 1>, scalar_prefetch = 0 : i64, scratch_operands = 0 : i64, tpu.core_type = #tpu.core_type<tc>, window_params = [{transform_indices = @transform_0, window_bounds = array<i64: 16, 512>}, {pipeline_mode = #tpu.pipeline_mode<synchronous>, transform_indices = @transform_1, window_bounds = array<i64: 512, 2048>}, {pipeline_mode = #tpu.pipeline_mode<synchronous>, transform_indices = @transform_2, window_bounds = array<i64: 1, 2048>}, {pipeline_mode = #tpu.pipeline_mode<synchronous>, transform_indices = @transform_3, window_bounds = array<i64: 2048, 896>}, {pipeline_mode = #tpu.pipeline_mode<synchronous>, transform_indices = @transform_4, window_bounds = array<i64: 1, 896>}, {transform_indices = @transform_5, window_bounds = array<i64: 16, 896>}]} {
    %c0 = arith.constant 0 : index
    %c0_0 = arith.constant 0 : index
    %0 = vector.load %arg1[%c0, %c0_0] : memref<16x512xbf16, #tpu.memory_space<vmem>>, vector<16x512xbf16>
    %c0_1 = arith.constant 0 : index
    %c0_2 = arith.constant 0 : index
    %1 = vector.load %arg2[%c0_1, %c0_2] : memref<512x2048xbf16, #tpu.memory_space<vmem>>, vector<512x2048xbf16>
    %cst = arith.constant dense<0.000000e+00> : vector<16x2048xf32>
    %2 = tpu.matmul %0, %1, %cst {dimension_numbers = #tpu.dot_dimension_numbers<[1], [0], [0], [1], [0, 0, 1, 1], [], []>} : vector<16x512xbf16>, vector<512x2048xbf16>, vector<16x2048xf32> -> vector<16x2048xf32>
    %c0_3 = arith.constant 0 : index
    %c0_4 = arith.constant 0 : index
    %3 = vector.load %arg3[%c0_3, %c0_4] : memref<1x2048xf32, #tpu.memory_space<vmem>>, vector<1x2048xf32>
    %4 = vector.broadcast %3 : vector<1x2048xf32> to vector<16x2048xf32>
    %5 = arith.addf %2, %4 : vector<16x2048xf32>
    %cst_5 = arith.constant 0.000000e+00 : f32
    %6 = vector.broadcast %cst_5 : f32 to vector<16x2048xf32>
    %7 = arith.cmpf ogt, %5, %6 : vector<16x2048xf32>
    %cst_6 = arith.constant 0.00999999977 : f32
    %8 = vector.broadcast %cst_6 : f32 to vector<16x2048xf32>
    %9 = arith.mulf %8, %5 : vector<16x2048xf32>
    %10 = arith.select %7, %5, %9 : vector<16x2048xi1>, vector<16x2048xf32>
    %11 = arith.truncf %10 : vector<16x2048xf32> to vector<16x2048xbf16>
    %c0_7 = arith.constant 0 : index
    %c0_8 = arith.constant 0 : index
    %12 = vector.load %arg4[%c0_7, %c0_8] : memref<2048x896xbf16, #tpu.memory_space<vmem>>, vector<2048x896xbf16>
    %cst_9 = arith.constant dense<0.000000e+00> : vector<16x896xf32>
    %13 = tpu.matmul %11, %12, %cst_9 {dimension_numbers = #tpu.dot_dimension_numbers<[1], [0], [0], [1], [0, 0, 1, 1], [], []>} : vector<16x2048xbf16>, vector<2048x896xbf16>, vector<16x896xf32> -> vector<16x896xf32>
    %c0_10 = arith.constant 0 : index
    %c0_11 = arith.constant 0 : index
    %14 = vector.load %arg5[%c0_10, %c0_11] : memref<1x896xf32, #tpu.memory_space<vmem>>, vector<1x896xf32>
    %15 = vector.broadcast %14 : vector<1x896xf32> to vector<16x896xf32>
    %16 = arith.addf %13, %15 : vector<16x896xf32>
    %17 = math.tanh %16 : vector<16x896xf32>
    %c0_12 = arith.constant 0 : index
    %c0_13 = arith.constant 0 : index
    %18 = vector.load %arg6[%c0_12, %c0_13] : memref<16x896xf32, #tpu.memory_space<vmem>>, vector<16x896xf32>
    tpu.vector_store %arg6[%c0_12, %c0_13], %17 {strides = array<i32>} : memref<16x896xf32, #tpu.memory_space<vmem>>, vector<16x896xf32>,
    return
  }
  func.func @transform_0(%arg0: i32) -> (i32, i32) {
    %c0_i32 = arith.constant 0 : i32
    %c0_i32_0 = arith.constant 0 : i32
    return %arg0, %c0_i32 : i32, i32
  }
  func.func @transform_1(%arg0: i32) -> (i32, i32) {
    %c0_i32 = arith.constant 0 : i32
    %c0_i32_0 = arith.constant 0 : i32
    %c0_i32_1 = arith.constant 0 : i32
    return %c0_i32, %c0_i32_0 : i32, i32
  }
  func.func @transform_2(%arg0: i32) -> (i32, i32) {
    %c0_i32 = arith.constant 0 : i32
    %c0_i32_0 = arith.constant 0 : i32
    %c0_i32_1 = arith.constant 0 : i32
    return %c0_i32, %c0_i32_0 : i32, i32
  }
  func.func @transform_3(%arg0: i32) -> (i32, i32) {
    %c0_i32 = arith.constant 0 : i32
    %c0_i32_0 = arith.constant 0 : i32
    %c0_i32_1 = arith.constant 0 : i32
    return %c0_i32, %c0_i32_0 : i32, i32
  }
  func.func @transform_4(%arg0: i32) -> (i32, i32) {
    %c0_i32 = arith.constant 0 : i32
    %c0_i32_0 = arith.constant 0 : i32
    %c0_i32_1 = arith.constant 0 : i32
    return %c0_i32, %c0_i32_0 : i32, i32
  }
  func.func @transform_5(%arg0: i32) -> (i32, i32) {
    %c0_i32 = arith.constant 0 : i32
    %c0_i32_0 = arith.constant 0 : i32
    return %arg0, %c0_i32 : i32, i32
  }
}

</mosaic_0001>

<bundles_post_ra>
// kernel: generator_forward.1
= control target key start
LH: loop header
LB: loop body
LE: loop exit
PB: predicated region body
PF: predicated region fallthrough
CT: control target
= control target key end

     0   :  { %10 = vsyncpa [#allocation3], 0  ;;  %s14741_s0 = inlined_call_operand.vmem [shape: bf16[16,512], index: 0, kind: input, shape index: {}]   ;;  %s14742_s1 = inlined_call_operand.hbm [shape: bf16[512,2048], index: 1, kind: input, shape index: {}]   ;;  %s14743_s2 = inlined_call_operand.hbm [shape: f32[1,2048], index: 2, kind: input, shape index: {}]   ;;  %s14744_s3 = inlined_call_operand.hbm [shape: bf16[2048,896], index: 3, kind: input, shape index: {}]   ;;  %s14745_s4 = inlined_call_operand.hbm [shape: f32[1,896], index: 4, kind: input, shape index: {}]   ;;  %s14746_s5 = inlined_call_operand.vmem [shape: f32[16,896], index: 5, kind: output, shape index: {}]  }
   0x1   :  { %11 = vsyncpa [#allocation5], 0 }
   0x2   :  { %12 = vsyncpa [#allocation8], 0  ;;  %s14300_s18 = smov [#allocation4]   ;;  %s14301_s20 = smov [#allocation2]  }
   0x3   :  { %s33_s19 = sshll.u32 %s14300_s18, 4  ;;  %s20_s21 = sshll.u32 %s14301_s20, 4  ;;  %s34_s19 = int_to_ptr.vmem [resolvable:$true] %s33_s19  ;;  %s14338_s21 = int_to_ptr.vmem [resolvable:$true] %s20_s21 }
   0x4   :  { %s14206_s24 = scalar_lea.hbm %s14743_s2, 256 }
   0x5   :  { %p14207_p0 = scmp.ne.s32.totalorder %s14743_s2, %s14206_s24  ;;  %p14210_p1 = scmp.lt.u32.totalorder %s14206_s24, %s14743_s2 }
   0x7   :  { %p14212_p2 = pnand %p14210_p1, %p14207_p0 }
   0x9   :  { %14215 = shalt.err (!%p14212_p2)
}
   0xa   :  { %s14216_s29 = scalar_lea.vmem %s34_s19, 256  ;;  %p14221_p4 = scmp.lt.s32.totalorder %s34_s19, %s34_s19 }
   0xb   :  { %p14217_p3 = scmp.ne.s32.totalorder %s34_s19, %s14216_s29  ;;  %p14222_p5 = scmp.lt.s32.totalorder %s14216_s29, %s14216_s29 }
   0xd   :  { %p14223_p6 = por %p14222_p5, %p14221_p4 }
   0xf   :  { %p14224_p7 = pnand %p14223_p6, %p14217_p3 }
  0x11   :  { %14227 = shalt.err (!%p14224_p7)
}
  0x12   :  { %36 = dma.hbm_to_vmem [thread:$0]  %s14743_s2, 256, %s34_s19, [#allocation5]  }
  0x13   :  { %s14228_s9 = scalar_lea.hbm %s14742_s1, 65536 }
  0x14   :  { %p14229_p8 = scmp.ne.s32.totalorder %s14742_s1, %s14228_s9  ;;  %p14232_p9 = scmp.lt.u32.totalorder %s14228_s9, %s14742_s1 }
  0x16   :  { %p14234_p10 = pnand %p14232_p9, %p14229_p8 }
  0x18   :  { %14237 = shalt.err (!%p14234_p10)
}
  0x19   :  { %s14238_s14 = scalar_lea.vmem %s14338_s21, 65536  ;;  %p14243_p12 = scmp.lt.s32.totalorder %s14338_s21, %s14338_s21 }
  0x1a   :  { %p14239_p11 = scmp.ne.s32.totalorder %s14338_s21, %s14238_s14  ;;  %p14244_p13 = scmp.lt.s32.totalorder %s14238_s14, %s14238_s14 }
  0x1c   :  { %p14245_p0 = por %p14244_p13, %p14243_p12 }
  0x1e   :  { %p14246_p1 = pnand %p14245_p0, %p14239_p11 }
  0x20   :  { %14249 = shalt.err (!%p14246_p1)
}
  0x21   :  { %s14302_s2 = smov 1024   ;;  %s14303_s15 = smov 64  }
  0x22   :  { %26 = dma.hbm_to_vmem [thread:$0]  %s14742_s1, 65536, %s14338_s21, [#allocation3], %s14302_s2, %s14302_s2, %s14303_s15  }
  0x23   :  { %s14304_s18 = smov [#allocation6]   ;;  %s14250_s23 = scalar_lea.hbm %s14744_s3, 114688 }
  0x24   :  { %s42_s19 = sshll.u32 %s14304_s18, 4  ;;  %p14251_p2 = scmp.ne.s32.totalorder %s14744_s3, %s14250_s23  ;;  %s43_s19 = int_to_ptr.vmem [resolvable:$true] %s42_s19 }
  0x25   :  { %p14254_p3 = scmp.lt.u32.totalorder %s14250_s23, %s14744_s3 }
  0x27   :  { %p14256_p4 = pnand %p14254_p3, %p14251_p2 }
  0x29   :  { %14259 = shalt.err (!%p14256_p4)
}
  0x2a   :  { %s14260_s28 = scalar_lea.vmem %s43_s19, 114688  ;;  %p14265_p6 = scmp.lt.s32.totalorder %s43_s19, %s43_s19 }
  0x2b   :  { %p14261_p5 = scmp.ne.s32.totalorder %s43_s19, %s14260_s28  ;;  %p14266_p7 = scmp.lt.s32.totalorder %s14260_s28, %s14260_s28 }
  0x2d   :  { %p14267_p8 = por %p14266_p7, %p14265_p6 }
  0x2f   :  { %p14268_p9 = pnand %p14267_p8, %p14261_p5 }
  0x31   :  { %14271 = shalt.err (!%p14268_p9)
}
  0x32   :  { %s14305_s1 = smov 448   ;;  %s14306_s21 = smov 28  }
  0x33   :  { %48 = dma.hbm_to_vmem [thread:$0]  %s14744_s3, 114688, %s43_s19, [#allocation5], %s14305_s1, %s14305_s1, %s14306_s21  }
  0x34   :  { %s14307_s6 = smov [#allocation7]   ;;  %s14272_s10 = scalar_lea.hbm %s14745_s4, 112 }
  0x35   :  { %s55_s7 = sshll.u32 %s14307_s6, 4  ;;  %p14273_p10 = scmp.ne.s32.totalorder %s14745_s4, %s14272_s10  ;;  %s56_s7 = int_to_ptr.vmem [resolvable:$true] %s55_s7 }
  0x36   :  { %p14276_p11 = scmp.lt.u32.totalorder %s14272_s10, %s14745_s4 }
  0x38   :  { %p14278_p12 = pnand %p14276_p11, %p14273_p10 }
  0x3a   :  { %14281 = shalt.err (!%p14278_p12)
}
  0x3b   :  { %s14282_s2 = scalar_lea.vmem %s56_s7, 112  ;;  %s14286_s3 = scalar_lea.vmem %s56_s7, 128 }
  0x3c   :  { %p14283_p13 = scmp.ne.s32.totalorder %s56_s7, %s14282_s2  ;;  %p14287_p0 = scmp.lt.s32.totalorder %s56_s7, %s56_s7 }
  0x3d   :  { %p14288_p1 = scmp.lt.s32.totalorder %s14286_s3, %s14282_s2 }
  0x3f   :  { %p14289_p2 = por %p14288_p1, %p14287_p0 }
  0x41   :  { %p14290_p3 = pnand %p14289_p2, %p14283_p13 }
  0x43   :  { %14293 = shalt.err (!%p14290_p3)
}
  0x44   :  { %58 = dma.hbm_to_vmem [thread:$0]  %s14745_s4, 112, %s56_s7, [#allocation8]  }
  0x45   :  { %14294 = dma.done.wait [#allocation3], 65536  }
  0x46   :  { %14295 = vsyncadd [#allocation3], 4294901760 }
  0x47   :  { %14296 = dma.done.wait [#allocation5], 114944  }
  0x48   :  { %14297 = vsyncadd [#allocation5], 4294852352 }
  0x49   :  { %14298 = dma.done.wait [#allocation8], 112  }
  0x4a   :  { %14299 = vsyncadd [#allocation8], 4294967184  ;;  %v76_v0 = vld [vmem:[#allocation2] sm:$0xff]  ;;  %v78_v2 = vld [vmem:[#allocation2 + $0x10] sm:$0xff] }
  0x4b   :  { %v84_v1 = vld [vmem:[#allocation2 + $0x40] sm:$0xff]  ;;  %v86_v4 = vld [vmem:[#allocation2 + $0x50] sm:$0xff] }
  0x4c   :  { %v11121_v3 = vcombine.high %v76_v0, %v84_v1  ;;  %v11120_v5 = vcombine.low %v76_v0, %v84_v1  ;;  %v92_v6 = vld [vmem:[#allocation2 + $0x80] sm:$0xff]  ;;  %v11125_v8 = vcombine.high %v78_v2, %v86_v4  ;;  %v11124_v9 = vcombine.low %v78_v2, %v86_v4  ;;  %v94_v11 = vld [vmem:[#allocation2 + $0x90] sm:$0xff] }
  0x4d   :  { %v100_v7 = vld [vmem:[#allocation2 + $0xc0] sm:$0xff]  ;;  %v102_v12 = vld [vmem:[#allocation2 + $0xd0] sm:$0xff] }
  0x4e   :  { %v11137_v10 = vcombine.high %v92_v6, %v100_v7  ;;  %v108_v13 = vld [vmem:[#allocation2 + $0x100] sm:$0xff]  ;;  %3252 = vmatprep.subr.bf16.mxu1 %v11121_v3  ;;  %v11141_v14 = vcombine.high %v94_v11, %v102_v12  ;;  %v110_v16 = vld [vmem:[#allocation2 + $0x110] sm:$0xff]  ;;  %3424 = vmatprep.subr.bf16.mxu0 %v11125_v8  ;;  %v11136_v18 = vcombine.low %v92_v6, %v100_v7 }
  0x4f   :  { %v116_v15 = vld [vmem:[#allocation2 + $0x140] sm:$0xff]  ;;  %v118_v17 = vld [vmem:[#allocation2 + $0x150] sm:$0xff]  ;;  %3253 = vmatpush1.bf16.msra.mxu1 %v11120_v5  ;;  %3425 = vmatpush1.bf16.msra.mxu0 %v11124_v9  ;;  %v11140_v19 = vcombine.low %v94_v11, %v102_v12 }
  0x50   :  { %3254 = vmatprep.subr.bf16.mxu1 %v11137_v10  ;;  %v11153_v20 = vcombine.high %v108_v13, %v116_v15  ;;  %3426 = vmatprep.subr.bf16.mxu0 %v11141_v14  ;;  %v11157_v21 = vcombine.high %v110_v16, %v118_v17  ;;  %v124_v22 = vld [vmem:[#allocation2 + $0x180] sm:$0xff]  ;;  %v126_v24 = vld [vmem:[#allocation2 + $0x190] sm:$0xff]  ;;  %v11152_v26 = vcombine.low %v108_v13, %v116_v15 }
  0x51   :  { %v132_v23 = vld [vmem:[#allocation2 + $0x1c0] sm:$0xff]  ;;  %v134_v25 = vld [vmem:[#allocation2 + $0x1d0] sm:$0xff]  ;;  %v11156_v27 = vcombine.low %v110_v16, %v118_v17 }
  0x52   :  { %v11169_v28 = vcombine.high %v124_v22, %v132_v23  ;;  %v11173_v29 = vcombine.high %v126_v24, %v134_v25  ;;  %v140_v30 = vld [vmem:[#allocation2 + $0x200] sm:$0xff]  ;;  %v142_v32 = vld [vmem:[#allocation2 + $0x210] sm:$0xff]  ;;  %v11168_v34 = vcombine.low %v124_v22, %v132_v23  ;;  %v11172_v35 = vcombine.low %v126_v24, %v134_v25 }
  0x53   :  { %3255 = vmatpush1.bf16.msra.mxu1 %v11136_v18  ;;  %3427 = vmatpush1.bf16.msra.mxu0 %v11140_v19  ;;  %v148_v31 = vld [vmem:[#allocation2 + $0x240] sm:$0xff]  ;;  %v150_v33 = vld [vmem:[#allocation2 + $0x250] sm:$0xff] }
  0x54   :  { %3256 = vmatprep.subr.bf16.mxu1 %v11153_v20  ;;  %3428 = vmatprep.subr.bf16.mxu0 %v11157_v21  ;;  %v11185_v36 = vcombine.high %v140_v30, %v148_v31  ;;  %v11189_v37 = vcombine.high %v142_v32, %v150_v33  ;;  %v156_v38 = vld [vmem:[#allocation2 + $0x280] sm:$0xff]  ;;  %v158_v40 = vld [vmem:[#allocation2 + $0x290] sm:$0xff]  ;;  %v11184_v42 = vcombine.low %v140_v30, %v148_v31 }
  0x55   :  { %v164_v39 = vld [vmem:[#allocation2 + $0x2c0] sm:$0xff]  ;;  %v166_v41 = vld [vmem:[#allocation2 + $0x2d0] sm:$0xff]  ;;  %v11188_v43 = vcombine.low %v142_v32, %v150_v33 }
  0x56   :  { %v11201_v44 = vcombine.high %v156_v38, %v164_v39  ;;  %v11205_v45 = vcombine.high %v158_v40, %v166_v41  ;;  %v172_v46 = vld [vmem:[#allocation2 + $0x300] sm:$0xff]  ;;  %v174_v48 = vld [vmem:[#allocation2 + $0x310] sm:$0xff]  ;;  %v11200_v50 = vcombine.low %v156_v38, %v164_v39  ;;  %v11204_v51 = vcombine.low %v158_v40, %v166_v41 }
  0x57   :  { %3257 = vmatpush1.bf16.msra.mxu1 %v11152_v26  ;;  %3429 = vmatpush1.bf16.msra.mxu0 %v11156_v27  ;;  %v180_v47 = vld [vmem:[#allocation2 + $0x340] sm:$0xff]  ;;  %v182_v49 = vld [vmem:[#allocation2 + $0x350] sm:$0xff] }
  0x58   :  { %3258 = vmatprep.subr.bf16.mxu1 %v11169_v28  ;;  %3430 = vmatprep.subr.bf16.mxu0 %v11173_v29  ;;  %v11217_v52 = vcombine.high %v172_v46, %v180_v47  ;;  %v11221_v53 = vcombine.high %v174_v48, %v182_v49  ;;  %v188_v54 = vld [vmem:[#allocation2 + $0x380] sm:$0xff]  ;;  %v190_v57 = vld [vmem:[#allocation2 + $0x390] sm:$0xff]  ;;  %v11216_v59 = vcombine.low %v172_v46, %v180_v47 }
  0x59   :  { %v196_v55 = vld [vmem:[#allocation2 + $0x3c0] sm:$0xff]  ;;  %v198_v58 = vld [vmem:[#allocation2 + $0x3d0] sm:$0xff]  ;;  %v11220_v60 = vcombine.low %v174_v48, %v182_v49 }
  0x5a   :  { %v14396_v56 = vld [vmem:[%s14741_s0 + $0x4] ss:$16 sps:$4 sm:$0xff]   ;;  %v11233_v61 = vcombine.high %v188_v54, %v196_v55  ;;  %v11237_v62 = vcombine.high %v190_v57, %v198_v58  ;;  %v11232_v3 = vcombine.low %v188_v54, %v196_v55  ;;  %v11236_v4 = vcombine.low %v190_v57, %v198_v58 }
  0x5b   :  { %3259 = vmatpush1.bf16.msra.mxu1 %v11168_v34  ;;  %3431 = vmatpush1.bf16.msra.mxu0 %v11172_v35  ;;  %v204_v63 = vld [vmem:[#allocation2 + $0x400] sm:$0xff]  ;;  %v206_v1 = vld [vmem:[#allocation2 + $0x410] sm:$0xff] }
  0x5c   :  { %3260 = vmatprep.subr.bf16.mxu1 %v11185_v36  ;;  %3432 = vmatprep.subr.bf16.mxu0 %v11189_v37  ;;  %v212_v0 = vld [vmem:[#allocation2 + $0x440] sm:$0xff]  ;;  %v214_v2 = vld [vmem:[#allocation2 + $0x450] sm:$0xff] }
  0x5d   :  { %3284 = vmatprep.mubr.bf16.mxu1 %v14396_v56  ;;  %3456 = vmatprep.mubr.bf16.mxu0 %v14396_v56  ;;  %v11249_v5 = vcombine.high %v204_v63, %v212_v0  ;;  %v11253_v6 = vcombine.high %v206_v1, %v214_v2  ;;  %v220_v7 = vld [vmem:[#allocation2 + $0x480] sm:$0xff]  ;;  %v222_v9 = vld [vmem:[#allocation2 + $0x490] sm:$0xff]  ;;  %v11248_v11 = vcombine.low %v204_v63, %v212_v0 }
  0x5e   :  { %v228_v8 = vld [vmem:[#allocation2 + $0x4c0] sm:$0xff]  ;;  %v230_v10 = vld [vmem:[#allocation2 + $0x4d0] sm:$0xff]  ;;  %v11252_v12 = vcombine.low %v206_v1, %v214_v2 }
  0x5f   :  { %3261 = vmatpush1.bf16.msra.mxu1 %v11184_v42  ;;  %3433 = vmatpush1.bf16.msra.mxu0 %v11188_v43  ;;  %v11265_v13 = vcombine.high %v220_v7, %v228_v8  ;;  %v11269_v14 = vcombine.high %v222_v9, %v230_v10  ;;  %v236_v15 = vld [vmem:[#allocation2 + $0x500] sm:$0xff]  ;;  %v238_v17 = vld [vmem:[#allocation2 + $0x510] sm:$0xff]  ;;  %v11264_v19 = vcombine.low %v220_v7, %v228_v8 }
  0x60   :  { %3262 = vmatprep.subr.bf16.mxu1 %v11201_v44  ;;  %3434 = vmatprep.subr.bf16.mxu0 %v11205_v45  ;;  %v244_v16 = vld [vmem:[#allocation2 + $0x540] sm:$0xff]  ;;  %v246_v18 = vld [vmem:[#allocation2 + $0x550] sm:$0xff]  ;;  %v11268_v20 = vcombine.low %v222_v9, %v230_v10 }
  0x61   :  { %v11281_v21 = vcombine.high %v236_v15, %v244_v16  ;;  %v11285_v22 = vcombine.high %v238_v17, %v246_v18  ;;  %v252_v23 = vld [vmem:[#allocation2 + $0x580] sm:$0xff]  ;;  %v254_v25 = vld [vmem:[#allocation2 + $0x590] sm:$0xff]  ;;  %v11280_v27 = vcombine.low %v236_v15, %v244_v16  ;;  %v11284_v28 = vcombine.low %v238_v17, %v246_v18 }
  0x62   :  { %v260_v24 = vld [vmem:[#allocation2 + $0x5c0] sm:$0xff]  ;;  %v262_v26 = vld [vmem:[#allocation2 + $0x5d0] sm:$0xff] }
  0x63   :  { %3263 = vmatpush1.bf16.msra.mxu1 %v11200_v50  ;;  %3435 = vmatpush1.bf16.msra.mxu0 %v11204_v51  ;;  %v11297_v29 = vcombine.high %v252_v23, %v260_v24  ;;  %v11301_v30 = vcombine.high %v254_v25, %v262_v26  ;;  %v268_v31 = vld [vmem:[#allocation2 + $0x600] sm:$0xff]  ;;  %v270_v33 = vld [vmem:[#allocation2 + $0x610] sm:$0xff]  ;;  %v11296_v35 = vcombine.low %v252_v23, %v260_v24 }
  0x64   :  { %3264 = vmatprep.subr.bf16.mxu1 %v11217_v52  ;;  %3436 = vmatprep.subr.bf16.mxu0 %v11221_v53  ;;  %v276_v32 = vld [vmem:[#allocation2 + $0x640] sm:$0xff]  ;;  %v278_v34 = vld [vmem:[#allocation2 + $0x650] sm:$0xff]  ;;  %v11300_v36 = vcombine.low %v254_v25, %v262_v26 }
  0x65   :  { %v11313_v37 = vcombine.high %v268_v31, %v276_v32  ;;  %v11317_v38 = vcombine.high %v270_v33, %v278_v34  ;;  %v284_v39 = vld [vmem:[#allocation2 + $0x680] sm:$0xff]  ;;  %v286_v41 = vld [vmem:[#allocation2 + $0x690] sm:$0xff]  ;;  %v11312_v43 = vcombine.low %v268_v31, %v276_v32  ;;  %v11316_v44 = vcombine.low %v270_v33, %v278_v34 }
  0x66   :  { %v292_v40 = vld [vmem:[#allocation2 + $0x6c0] sm:$0xff]  ;;  %v294_v42 = vld [vmem:[#allocation2 + $0x6d0] sm:$0xff] }
  0x67   :  { %3265 = vmatpush1.bf16.msra.mxu1 %v11216_v59  ;;  %3437 = vmatpush1.bf16.msra.mxu0 %v11220_v60  ;;  %v11329_v45 = vcombine.high %v284_v39, %v292_v40  ;;  %v11333_v46 = vcombine.high %v286_v41, %v294_v42  ;;  %v300_v47 = vld [vmem:[#allocation2 + $0x700] sm:$0xff]  ;;  %v302_v49 = vld [vmem:[#allocation2 + $0x710] sm:$0xff]  ;;  %v11328_v51 = vcombine.low %v284_v39, %v292_v40 }
  0x68   :  { %3266 = vmatprep.subr.bf16.mxu1 %v11233_v61  ;;  %3438 = vmatprep.subr.bf16.mxu0 %v11237_v62  ;;  %v308_v48 = vld [vmem:[#allocation2 + $0x740] sm:$0xff]  ;;  %v310_v50 = vld [vmem:[#allocation2 + $0x750] sm:$0xff]  ;;  %v11332_v52 = vcombine.low %v286_v41, %v294_v42 }
  0x69   :  { %v11345_v53 = vcombine.high %v300_v47, %v308_v48  ;;  %v11349_v54 = vcombine.high %v302_v49, %v310_v50  ;;  %v316_v55 = vld [vmem:[#allocation2 + $0x780] sm:$0xff]  ;;  %v318_v58 = vld [vmem:[#allocation2 + $0x790] sm:$0xff]  ;;  %v11344_v60 = vcombine.low %v300_v47, %v308_v48  ;;  %v11348_v61 = vcombine.low %v302_v49, %v310_v50 }
  0x6a   :  { %v324_v57 = vld [vmem:[#allocation2 + $0x7c0] sm:$0xff]  ;;  %v326_v59 = vld [vmem:[#allocation2 + $0x7d0] sm:$0xff] }
  0x6b   :  { %3267 = vmatpush1.bf16.msra.mxu1 %v11232_v3  ;;  %3439 = vmatpush1.bf16.msra.mxu0 %v11236_v4  ;;  %v11361_v62 = vcombine.high %v316_v55, %v324_v57  ;;  %v11365_v63 = vcombine.high %v318_v58, %v326_v59  ;;  %v332_v0 = vld [vmem:[#allocation2 + $0x800] sm:$0xff]  ;;  %v334_v2 = vld [vmem:[#allocation2 + $0x810] sm:$0xff]  ;;  %v11360_v4 = vcombine.low %v316_v55, %v324_v57 }
  0x6c   :  { %3268 = vmatprep.subr.bf16.mxu1 %v11249_v5  ;;  %3440 = vmatprep.subr.bf16.mxu0 %v11253_v6  ;;  %v340_v1 = vld [vmem:[#allocation2 + $0x840] sm:$0xff]  ;;  %v342_v3 = vld [vmem:[#allocation2 + $0x850] sm:$0xff]  ;;  %v11364_v5 = vcombine.low %v318_v58, %v326_v59 }
  0x6d   :  { %v11377_v6 = vcombine.high %v332_v0, %v340_v1  ;;  %v11381_v7 = vcombine.high %v334_v2, %v342_v3  ;;  %v348_v8 = vld [vmem:[#allocation2 + $0x880] sm:$0xff] }
  0x6e   :  { %v356_v9 = vld [vmem:[#allocation2 + $0x8c0] sm:$0xff] }
  0x6f   :  { %3269 = vmatpush1.bf16.msra.mxu1 %v11248_v11  ;;  %3441 = vmatpush1.bf16.msra.mxu0 %v11252_v12  ;;  %v12874_v10 = vld [vmem:[%s14741_s0] ss:$16 sps:$4 sm:$0xff]   ;;  %v11393_v15 = vcombine.high %v348_v8, %v356_v9 }
  0x70   :  { %3270 = vmatprep.subr.bf16.mxu1 %v11265_v13  ;;  %3442 = vmatprep.subr.bf16.mxu0 %v11269_v14  ;;  %v350_v11 = vld [vmem:[#allocation2 + $0x890] sm:$0xff]  ;;  %v11376_v13 = vcombine.low %v332_v0, %v340_v1  ;;  %v11380_v14 = vcombine.low %v334_v2, %v342_v3  ;;  %v364_v17 = vld [vmem:[#allocation2 + $0x900] sm:$0xff] }
  0x71   :  { %v358_v12 = vld [vmem:[#allocation2 + $0x8d0] sm:$0xff]  ;;  %v372_v18 = vld [vmem:[#allocation2 + $0x940] sm:$0xff] }
  0x72   :  { %v11397_v16 = vcombine.high %v350_v11, %v358_v12  ;;  %v11396_v23 = vcombine.low %v350_v11, %v358_v12  ;;  %v11409_v24 = vcombine.high %v364_v17, %v372_v18  ;;  %v380_v25 = vld [vmem:[#allocation2 + $0x980] sm:$0xff]  ;;  %v478_v12 = vld [vmem:[#allocation2 + $0xc90] sm:$0xff] }
  0x73   :  { %3271 = vmatpush1.bf16.msra.mxu1 %v11264_v19  ;;  %3443 = vmatpush1.bf16.msra.mxu0 %v11268_v20  ;;  %v12875_v19 = vld [vmem:[%s14741_s0 + $0xc] ss:$16 sps:$4 sm:$0xff]   ;;  %v366_v20 = vld [vmem:[#allocation2 + $0x910] sm:$0xff]  ;;  %v388_v26 = vld [vmem:[#allocation2 + $0x9c0] sm:$0xff] }
  0x74   :  { %3272 = vmatprep.subr.bf16.mxu1 %v11281_v21  ;;  %3444 = vmatprep.subr.bf16.mxu0 %v11285_v22  ;;  %v374_v21 = vld [vmem:[#allocation2 + $0x950] sm:$0xff]  ;;  %v11392_v22 = vcombine.low %v348_v8, %v356_v9  ;;  %v11425_v32 = vcombine.high %v380_v25, %v388_v26  ;;  %v396_v33 = vld [vmem:[#allocation2 + $0xa00] sm:$0xff] }
  0x75   :  { %v11412_v31 = vcombine.low %v366_v20, %v374_v21  ;;  %v404_v34 = vld [vmem:[#allocation2 + $0xa40] sm:$0xff] }
  0x76   :  { %v11441_v40 = vcombine.high %v396_v33, %v404_v34  ;;  %v412_v41 = vld [vmem:[#allocation2 + $0xa80] sm:$0xff] }
  0x77   :  { %3273 = vmatpush1.bf16.msra.mxu1 %v11280_v27  ;;  %3445 = vmatpush1.bf16.msra.mxu0 %v11284_v28  ;;  %v382_v27 = vld [vmem:[#allocation2 + $0x990] sm:$0xff]  ;;  %v11413_v28 = vcombine.high %v366_v20, %v374_v21  ;;  %v420_v42 = vld [vmem:[#allocation2 + $0xac0] sm:$0xff] }
  0x78   :  { %3274 = vmatprep.subr.bf16.mxu1 %v11297_v29  ;;  %3446 = vmatprep.subr.bf16.mxu0 %v11301_v30  ;;  %v390_v29 = vld [vmem:[#allocation2 + $0x9d0] sm:$0xff]  ;;  %v11408_v30 = vcombine.low %v364_v17, %v372_v18  ;;  %v11457_v48 = vcombine.high %v412_v41, %v420_v42  ;;  %v428_v49 = vld [vmem:[#allocation2 + $0xb00] sm:$0xff] }
  0x79   :  { %v11428_v39 = vcombine.low %v382_v27, %v390_v29  ;;  %v436_v50 = vld [vmem:[#allocation2 + $0xb40] sm:$0xff]  ;;  %v494_v20 = vld [vmem:[#allocation2 + $0xd10] sm:$0xff] }
  0x7a   :  { %v11473_v57 = vcombine.high %v428_v49, %v436_v50  ;;  %v444_v58 = vld [vmem:[#allocation2 + $0xb80] sm:$0xff] }
  0x7b   :  { %3275 = vmatpush1.bf16.msra.mxu1 %v11296_v35  ;;  %3447 = vmatpush1.bf16.msra.mxu0 %v11300_v36  ;;  %v398_v35 = vld [vmem:[#allocation2 + $0xa10] sm:$0xff]  ;;  %v11429_v36 = vcombine.high %v382_v27, %v390_v29  ;;  %v452_v59 = vld [vmem:[#allocation2 + $0xbc0] sm:$0xff] }
  0x7c   :  { %3276 = vmatprep.subr.bf16.mxu1 %v11313_v37  ;;  %3448 = vmatprep.subr.bf16.mxu0 %v11317_v38  ;;  %v406_v37 = vld [vmem:[#allocation2 + $0xa50] sm:$0xff]  ;;  %v11424_v38 = vcombine.low %v380_v25, %v388_v26  ;;  %v11489_v1 = vcombine.high %v444_v58, %v452_v59  ;;  %v460_v2 = vld [vmem:[#allocation2 + $0xc00] sm:$0xff] }
  0x7d   :  { %v11444_v47 = vcombine.low %v398_v35, %v406_v37  ;;  %v468_v3 = vld [vmem:[#allocation2 + $0xc40] sm:$0xff] }
  0x7e   :  { %v11505_v9 = vcombine.high %v460_v2, %v468_v3  ;;  %v484_v11 = vld [vmem:[#allocation2 + $0xcc0] sm:$0xff] }
  0x7f   :  { %3277 = vmatpush1.bf16.msra.mxu1 %v11312_v43  ;;  %3449 = vmatpush1.bf16.msra.mxu0 %v11316_v44  ;;  %v414_v43 = vld [vmem:[#allocation2 + $0xa90] sm:$0xff]  ;;  %v11445_v44 = vcombine.high %v398_v35, %v406_v37  ;;  %v492_v18 = vld [vmem:[#allocation2 + $0xd00] sm:$0xff] }
  0x80   :  { %3278 = vmatprep.subr.bf16.mxu1 %v11329_v45  ;;  %3450 = vmatprep.subr.bf16.mxu0 %v11333_v46  ;;  %v422_v45 = vld [vmem:[#allocation2 + $0xad0] sm:$0xff]  ;;  %v11440_v46 = vcombine.low %v396_v33, %v404_v34  ;;  %v508_v26 = vld [vmem:[#allocation2 + $0xd80] sm:$0xff] }
  0x81   :  { %v11460_v55 = vcombine.low %v414_v43, %v422_v45  ;;  %v516_v27 = vld [vmem:[#allocation2 + $0xdc0] sm:$0xff] }
  0x82   :  { %v11553_v33 = vcombine.high %v508_v26, %v516_v27  ;;  %v524_v34 = vld [vmem:[#allocation2 + $0xe00] sm:$0xff] }
  0x83   :  { %3279 = vmatpush1.bf16.msra.mxu1 %v11328_v51  ;;  %3451 = vmatpush1.bf16.msra.mxu0 %v11332_v52  ;;  %v430_v51 = vld [vmem:[#allocation2 + $0xb10] sm:$0xff]  ;;  %v11461_v52 = vcombine.high %v414_v43, %v422_v45  ;;  %v532_v35 = vld [vmem:[#allocation2 + $0xe40] sm:$0xff] }
  0x84   :  { %3280 = vmatprep.subr.bf16.mxu1 %v11345_v53  ;;  %3452 = vmatprep.subr.bf16.mxu0 %v11349_v54  ;;  %v438_v53 = vld [vmem:[#allocation2 + $0xb50] sm:$0xff]  ;;  %v11456_v54 = vcombine.low %v412_v41, %v420_v42  ;;  %v11569_v41 = vcombine.high %v524_v34, %v532_v35  ;;  %v540_v42 = vld [vmem:[#allocation2 + $0xe80] sm:$0xff] }
  0x85   :  { %v11476_v0 = vcombine.low %v430_v51, %v438_v53  ;;  %v548_v43 = vld [vmem:[#allocation2 + $0xec0] sm:$0xff] }
  0x87   :  { %3281 = vmatpush1.bf16.msra.mxu1 %v11344_v60  ;;  %3453 = vmatpush1.bf16.msra.mxu0 %v11348_v61  ;;  %v446_v60 = vld [vmem:[#allocation2 + $0xb90] sm:$0xff]  ;;  %v11477_v61 = vcombine.high %v430_v51, %v438_v53  ;;  %v564_v51 = vld [vmem:[#allocation2 + $0xf40] sm:$0xff] }
  0x88   :  { %3282 = vmatprep.subr.bf16.mxu1 %v11361_v62  ;;  %3454 = vmatprep.subr.bf16.mxu0 %v11365_v63  ;;  %v454_v62 = vld [vmem:[#allocation2 + $0xbd0] sm:$0xff]  ;;  %v11472_v63 = vcombine.low %v428_v49, %v436_v50  ;;  %v11585_v49 = vcombine.high %v540_v42, %v548_v43  ;;  %v556_v50 = vld [vmem:[#allocation2 + $0xf00] sm:$0xff] }
  0x89   :  { %v11492_v8 = vcombine.low %v446_v60, %v454_v62 }
  0x8b   :  { %3283 = vmatpush1.bf16.msra.mxu1 %v11360_v4  ;;  %3455 = vmatpush1.bf16.msra.mxu0 %v11364_v5  ;;  %v462_v4 = vld [vmem:[#allocation2 + $0xc10] sm:$0xff]  ;;  %v11493_v5 = vcombine.high %v446_v60, %v454_v62  ;;  %v580_v60 = vld [vmem:[#allocation2 + $0xfc0] sm:$0xff] }
  0x8c   :  { %3295 = vmatprep.subr.bf16.mxu1 %v11377_v6  ;;  %3467 = vmatprep.subr.bf16.mxu0 %v11381_v7  ;;  %v470_v6 = vld [vmem:[#allocation2 + $0xc50] sm:$0xff]  ;;  %v11488_v7 = vcombine.low %v444_v58, %v452_v59  ;;  %v11601_v58 = vcombine.high %v556_v50, %v564_v51  ;;  %v572_v59 = vld [vmem:[#allocation2 + $0xf80] sm:$0xff] }
  0x8e   :  { %3285 = vmatmul.mubr.bf16.vlgmr.msra.gmra.mrb[0].mxu1 %v12874_v10  ;;  %3457 = vmatmul.mubr.bf16.vlgmr.msra.gmra.mrb[0].mxu0 %v12874_v10  ;;  %v476_v10 = vld [vmem:[#allocation2 + $0xc80] sm:$0xff] }
  0x8f   :  { %3296 = vmatpush1.bf16.msra.mxu1 %v11376_v13  ;;  %3468 = vmatpush1.bf16.msra.mxu0 %v11380_v14  ;;  %v11509_v13 = vcombine.high %v462_v4, %v470_v6  ;;  %v486_v14 = vld [vmem:[#allocation2 + $0xcd0] sm:$0xff]  ;;  %v11521_v17 = vcombine.high %v476_v10, %v484_v11 }
  0x90   :  { %3297 = vmatprep.subr.bf16.mxu1 %v11393_v15  ;;  %3469 = vmatprep.subr.bf16.mxu0 %v11397_v16  ;;  %v11504_v15 = vcombine.low %v460_v2, %v468_v3  ;;  %v11508_v16 = vcombine.low %v462_v4, %v470_v6  ;;  %v11525_v21 = vcombine.high %v478_v12, %v486_v14  ;;  %v77_v3 = vld [vmem:[#allocation2 + $0x8] sm:$0xff] }
  0x91   :  { %3327 = vmatprep.mubr.bf16.mxu1 %v12875_v19  ;;  %3499 = vmatprep.mubr.bf16.mxu0 %v12875_v19  ;;  %v500_v19 = vld [vmem:[#allocation2 + $0xd40] sm:$0xff]  ;;  %v11617_v2 = vcombine.high %v572_v59, %v580_v60  ;;  %v85_v4 = vld [vmem:[#allocation2 + $0x48] sm:$0xff] }
  0x92   :  { %v11537_v25 = vcombine.high %v492_v18, %v500_v19 }
  0x93   :  { %3298 = vmatpush1.bf16.msra.mxu1 %v11392_v22  ;;  %3470 = vmatpush1.bf16.msra.mxu0 %v11396_v23  ;;  %v502_v22 = vld [vmem:[#allocation2 + $0xd50] sm:$0xff]  ;;  %v11520_v23 = vcombine.low %v476_v10, %v484_v11  ;;  %v12877_v10 = vld [vmem:[%s14741_s0 + $0x8] ss:$16 sps:$4 sm:$0xff]   ;;  %v11123_v11 = vcombine.high %v77_v3, %v85_v4 }
  0x94   :  { %3299 = vmatprep.subr.bf16.mxu1 %v11409_v24  ;;  %3471 = vmatprep.subr.bf16.mxu0 %v11413_v28  ;;  %v11524_v24 = vcombine.low %v478_v12, %v486_v14  ;;  %v510_v28 = vld [vmem:[#allocation2 + $0xd90] sm:$0xff]  ;;  %v11541_v29 = vcombine.high %v494_v20, %v502_v22  ;;  %v93_v12 = vld [vmem:[#allocation2 + $0x88] sm:$0xff]  ;;  %v96_v14 = vld [vmem:[#allocation2 + $0xa0] sm:$0xff] }
  0x97   :  { %3300 = vmatpush1.bf16.msra.mxu1 %v11408_v30  ;;  %3472 = vmatpush1.bf16.msra.mxu0 %v11412_v31  ;;  %v518_v30 = vld [vmem:[#allocation2 + $0xdd0] sm:$0xff]  ;;  %v11536_v31 = vcombine.low %v492_v18, %v500_v19 }
  0x98   :  { %3301 = vmatprep.subr.bf16.mxu1 %v11425_v32  ;;  %3473 = vmatprep.subr.bf16.mxu0 %v11429_v36  ;;  %v11540_v32 = vcombine.low %v494_v20, %v502_v22  ;;  %v526_v36 = vld [vmem:[#allocation2 + $0xe10] sm:$0xff]  ;;  %v11557_v37 = vcombine.high %v510_v28, %v518_v30  ;;  %v109_v20 = vld [vmem:[#allocation2 + $0x108] sm:$0xff]  ;;  %v112_v22 = vld [vmem:[#allocation2 + $0x120] sm:$0xff] }
  0x9b   :  { %3302 = vmatpush1.bf16.msra.mxu1 %v11424_v38  ;;  %3474 = vmatpush1.bf16.msra.mxu0 %v11428_v39  ;;  %v534_v38 = vld [vmem:[#allocation2 + $0xe50] sm:$0xff]  ;;  %v11552_v39 = vcombine.low %v508_v26, %v516_v27 }
  0x9c   :  { %3303 = vmatprep.subr.bf16.mxu1 %v11441_v40  ;;  %3475 = vmatprep.subr.bf16.mxu0 %v11445_v44  ;;  %v11556_v40 = vcombine.low %v510_v28, %v518_v30  ;;  %v542_v44 = vld [vmem:[#allocation2 + $0xe90] sm:$0xff]  ;;  %v11573_v45 = vcombine.high %v526_v36, %v534_v38  ;;  %v125_v28 = vld [vmem:[#allocation2 + $0x188] sm:$0xff]  ;;  %v128_v30 = vld [vmem:[#allocation2 + $0x1a0] sm:$0xff] }
  0x9f   :  { %3304 = vmatpush1.bf16.msra.mxu1 %v11440_v46  ;;  %3476 = vmatpush1.bf16.msra.mxu0 %v11444_v47  ;;  %v550_v46 = vld [vmem:[#allocation2 + $0xed0] sm:$0xff]  ;;  %v11568_v47 = vcombine.low %v524_v34, %v532_v35 }
  0xa0   :  { %3305 = vmatprep.subr.bf16.mxu1 %v11457_v48  ;;  %3477 = vmatprep.subr.bf16.mxu0 %v11461_v52  ;;  %v11572_v48 = vcombine.low %v526_v36, %v534_v38  ;;  %v558_v52 = vld [vmem:[#allocation2 + $0xf10] sm:$0xff]  ;;  %v11589_v53 = vcombine.high %v542_v44, %v550_v46  ;;  %v141_v36 = vld [vmem:[#allocation2 + $0x208] sm:$0xff]  ;;  %v144_v38 = vld [vmem:[#allocation2 + $0x220] sm:$0xff] }
  0xa3   :  { %3306 = vmatpush1.bf16.msra.mxu1 %v11456_v54  ;;  %3478 = vmatpush1.bf16.msra.mxu0 %v11460_v55  ;;  %v566_v54 = vld [vmem:[#allocation2 + $0xf50] sm:$0xff]  ;;  %v11584_v55 = vcombine.low %v540_v42, %v548_v43 }
  0xa4   :  { %3307 = vmatprep.subr.bf16.mxu1 %v11473_v57  ;;  %3479 = vmatprep.subr.bf16.mxu0 %v11477_v61  ;;  %v11588_v57 = vcombine.low %v542_v44, %v550_v46  ;;  %v574_v61 = vld [vmem:[#allocation2 + $0xf90] sm:$0xff]  ;;  %v11605_v62 = vcombine.high %v558_v52, %v566_v54  ;;  %v157_v44 = vld [vmem:[#allocation2 + $0x288] sm:$0xff] }
  0xa7   :  { %3308 = vmatpush1.bf16.msra.mxu1 %v11472_v63  ;;  %3480 = vmatpush1.bf16.msra.mxu0 %v11476_v0  ;;  %v582_v63 = vld [vmem:[#allocation2 + $0xfd0] sm:$0xff]  ;;  %v11600_v0 = vcombine.low %v556_v50, %v564_v51  ;;  %v173_v51 = vld [vmem:[#allocation2 + $0x308] sm:$0xff] }
  0xa8   :  { %3309 = vmatprep.subr.bf16.mxu1 %v11489_v1  ;;  %3481 = vmatprep.subr.bf16.mxu0 %v11493_v5  ;;  %v11604_v1 = vcombine.low %v558_v52, %v566_v54  ;;  %v80_v5 = vld [vmem:[#allocation2 + $0x20] sm:$0xff]  ;;  %v11621_v6 = vcombine.high %v574_v61, %v582_v63  ;;  %v181_v52 = vld [vmem:[#allocation2 + $0x348] sm:$0xff] }
  0xab   :  { %3310 = vmatpush1.bf16.msra.mxu1 %v11488_v7  ;;  %3482 = vmatpush1.bf16.msra.mxu0 %v11492_v8  ;;  %v88_v7 = vld [vmem:[#allocation2 + $0x60] sm:$0xff]  ;;  %v11616_v8 = vcombine.low %v572_v59, %v580_v60  ;;  %v11219_v59 = vcombine.high %v173_v51, %v181_v52  ;;  %v189_v60 = vld [vmem:[#allocation2 + $0x388] sm:$0xff] }
  0xac   :  { %3311 = vmatprep.subr.bf16.mxu1 %v11505_v9  ;;  %3483 = vmatprep.subr.bf16.mxu0 %v11509_v13  ;;  %v11620_v9 = vcombine.low %v574_v61, %v582_v63  ;;  %v101_v13 = vld [vmem:[#allocation2 + $0xc8] sm:$0xff]  ;;  %v11128_v18 = vcombine.low %v80_v5, %v88_v7 }
  0xad   :  { %v11139_v19 = vcombine.high %v93_v12, %v101_v13  ;;  %v197_v61 = vld [vmem:[#allocation2 + $0x3c8] sm:$0xff] }
  0xaf   :  { %3312 = vmatpush1.bf16.msra.mxu1 %v11504_v15  ;;  %3484 = vmatpush1.bf16.msra.mxu0 %v11508_v16  ;;  %v11129_v15 = vcombine.high %v80_v5, %v88_v7  ;;  %v104_v16 = vld [vmem:[#allocation2 + $0xe0] sm:$0xff]  ;;  %v213_v5 = vld [vmem:[#allocation2 + $0x448] sm:$0xff] }
  0xb0   :  { %3313 = vmatprep.subr.bf16.mxu1 %v11521_v17  ;;  %3485 = vmatprep.subr.bf16.mxu0 %v11525_v21  ;;  %v11122_v17 = vcombine.low %v77_v3, %v85_v4  ;;  %v117_v21 = vld [vmem:[#allocation2 + $0x148] sm:$0xff]  ;;  %v11144_v26 = vcombine.low %v96_v14, %v104_v16  ;;  %v11235_v3 = vcombine.high %v189_v60, %v197_v61 }
  0xb1   :  { %v11155_v27 = vcombine.high %v109_v20, %v117_v21  ;;  %v205_v4 = vld [vmem:[#allocation2 + $0x408] sm:$0xff] }
  0xb3   :  { %3314 = vmatpush1.bf16.msra.mxu1 %v11520_v23  ;;  %3486 = vmatpush1.bf16.msra.mxu0 %v11524_v24  ;;  %v11145_v23 = vcombine.high %v96_v14, %v104_v16  ;;  %v120_v24 = vld [vmem:[#allocation2 + $0x160] sm:$0xff] }
  0xb4   :  { %3315 = vmatprep.subr.bf16.mxu1 %v11537_v25  ;;  %3487 = vmatprep.subr.bf16.mxu0 %v11541_v29  ;;  %v11138_v25 = vcombine.low %v93_v12, %v101_v13  ;;  %v133_v29 = vld [vmem:[#allocation2 + $0x1c8] sm:$0xff]  ;;  %v11160_v34 = vcombine.low %v112_v22, %v120_v24  ;;  %v224_v14 = vld [vmem:[#allocation2 + $0x4a0] sm:$0xff] }
  0xb5   :  { %v11171_v35 = vcombine.high %v125_v28, %v133_v29  ;;  %v221_v12 = vld [vmem:[#allocation2 + $0x488] sm:$0xff]  ;;  %v232_v16 = vld [vmem:[#allocation2 + $0x4e0] sm:$0xff] }
  0xb6   :  { %v229_v13 = vld [vmem:[#allocation2 + $0x4c8] sm:$0xff] }
  0xb7   :  { %3316 = vmatpush1.bf16.msra.mxu1 %v11536_v31  ;;  %3488 = vmatpush1.bf16.msra.mxu0 %v11540_v32  ;;  %v11161_v31 = vcombine.high %v112_v22, %v120_v24  ;;  %v136_v32 = vld [vmem:[#allocation2 + $0x1e0] sm:$0xff] }
  0xb8   :  { %3317 = vmatprep.subr.bf16.mxu1 %v11553_v33  ;;  %3489 = vmatprep.subr.bf16.mxu0 %v11557_v37  ;;  %v11154_v33 = vcombine.low %v109_v20, %v117_v21  ;;  %v149_v37 = vld [vmem:[#allocation2 + $0x248] sm:$0xff]  ;;  %v11176_v42 = vcombine.low %v128_v30, %v136_v32  ;;  %v240_v22 = vld [vmem:[#allocation2 + $0x520] sm:$0xff] }
  0xb9   :  { %v11187_v43 = vcombine.high %v141_v36, %v149_v37  ;;  %v237_v20 = vld [vmem:[#allocation2 + $0x508] sm:$0xff]  ;;  %v248_v24 = vld [vmem:[#allocation2 + $0x560] sm:$0xff] }
  0xba   :  { %v245_v21 = vld [vmem:[#allocation2 + $0x548] sm:$0xff] }
  0xbb   :  { %3318 = vmatpush1.bf16.msra.mxu1 %v11552_v39  ;;  %3490 = vmatpush1.bf16.msra.mxu0 %v11556_v40  ;;  %v11177_v39 = vcombine.high %v128_v30, %v136_v32  ;;  %v152_v40 = vld [vmem:[#allocation2 + $0x260] sm:$0xff] }
  0xbc   :  { %3319 = vmatprep.subr.bf16.mxu1 %v11569_v41  ;;  %3491 = vmatprep.subr.bf16.mxu0 %v11573_v45  ;;  %v11170_v41 = vcombine.low %v125_v28, %v133_v29  ;;  %v160_v45 = vld [vmem:[#allocation2 + $0x2a0] sm:$0xff]  ;;  %v11193_v46 = vcombine.high %v144_v38, %v152_v40  ;;  %v253_v28 = vld [vmem:[#allocation2 + $0x588] sm:$0xff] }
  0xbd   :  { %v261_v29 = vld [vmem:[#allocation2 + $0x5c8] sm:$0xff]  ;;  %v256_v30 = vld [vmem:[#allocation2 + $0x5a0] sm:$0xff] }
  0xbe   :  { %v264_v32 = vld [vmem:[#allocation2 + $0x5e0] sm:$0xff] }
  0xbf   :  { %3320 = vmatpush1.bf16.msra.mxu1 %v11568_v47  ;;  %3492 = vmatpush1.bf16.msra.mxu0 %v11572_v48  ;;  %v168_v47 = vld [vmem:[#allocation2 + $0x2e0] sm:$0xff]  ;;  %v11186_v48 = vcombine.low %v141_v36, %v149_v37  ;;  %v269_v36 = vld [vmem:[#allocation2 + $0x608] sm:$0xff] }
  0xc0   :  { %3321 = vmatprep.subr.bf16.mxu1 %v11585_v49  ;;  %3493 = vmatprep.subr.bf16.mxu0 %v11589_v53  ;;  %v11192_v49 = vcombine.low %v144_v38, %v152_v40  ;;  %v176_v53 = vld [vmem:[#allocation2 + $0x320] sm:$0xff]  ;;  %v11209_v54 = vcombine.high %v160_v45, %v168_v47  ;;  %v277_v37 = vld [vmem:[#allocation2 + $0x648] sm:$0xff] }
  0xc1   :  { %v272_v38 = vld [vmem:[#allocation2 + $0x620] sm:$0xff] }
  0xc2   :  { %v280_v40 = vld [vmem:[#allocation2 + $0x660] sm:$0xff] }
  0xc3   :  { %3322 = vmatpush1.bf16.msra.mxu1 %v11584_v55  ;;  %3494 = vmatpush1.bf16.msra.mxu0 %v11588_v57  ;;  %v184_v55 = vld [vmem:[#allocation2 + $0x360] sm:$0xff] }
  0xc4   :  { %3323 = vmatprep.subr.bf16.mxu1 %v11601_v58  ;;  %3495 = vmatprep.subr.bf16.mxu0 %v11605_v62  ;;  %v11208_v58 = vcombine.low %v160_v45, %v168_v47  ;;  %v192_v62 = vld [vmem:[#allocation2 + $0x3a0] sm:$0xff]  ;;  %v11225_v63 = vcombine.high %v176_v53, %v184_v55 }
  0xc5   :  { %v288_v45 = vld [vmem:[#allocation2 + $0x6a0] sm:$0xff] }
  0xc6   :  { %v296_v47 = vld [vmem:[#allocation2 + $0x6e0] sm:$0xff] }
  0xc7   :  { %3324 = vmatpush1.bf16.msra.mxu1 %v11600_v0  ;;  %3496 = vmatpush1.bf16.msra.mxu0 %v11604_v1  ;;  %v200_v0 = vld [vmem:[#allocation2 + $0x3e0] sm:$0xff]  ;;  %v11218_v1 = vcombine.low %v173_v51, %v181_v52  ;;  %v301_v51 = vld [vmem:[#allocation2 + $0x708] sm:$0xff] }
  0xc8   :  { %3325 = vmatprep.subr.bf16.mxu1 %v11617_v2  ;;  %3497 = vmatprep.subr.bf16.mxu0 %v11621_v6  ;;  %v11224_v2 = vcombine.low %v176_v53, %v184_v55  ;;  %v208_v6 = vld [vmem:[#allocation2 + $0x420] sm:$0xff]  ;;  %v11241_v7 = vcombine.high %v192_v62, %v200_v0  ;;  %v309_v52 = vld [vmem:[#allocation2 + $0x748] sm:$0xff] }
  0xc9   :  { %v304_v53 = vld [vmem:[#allocation2 + $0x720] sm:$0xff] }
  0xca   :  { %v312_v55 = vld [vmem:[#allocation2 + $0x760] sm:$0xff] }
  0xcb   :  { %3326 = vmatpush1.bf16.msra.mxu1 %v11616_v8  ;;  %3498 = vmatpush1.bf16.msra.mxu0 %v11620_v9  ;;  %v216_v8 = vld [vmem:[#allocation2 + $0x460] sm:$0xff]  ;;  %v11234_v9 = vcombine.low %v189_v60, %v197_v61  ;;  %v317_v60 = vld [vmem:[#allocation2 + $0x788] sm:$0xff] }
  0xcc   :  { %3338 = vmatprep.subr.bf16.mxu1 %v11123_v11  ;;  %3596 = vmatprep.subr.bf16.mxu0 %v11129_v15  ;;  %v11251_v11 = vcombine.high %v205_v4, %v213_v5  ;;  %v11257_v15 = vcombine.high %v208_v6, %v216_v8  ;;  %v325_v61 = vld [vmem:[#allocation2 + $0x7c8] sm:$0xff] }
  0xce   :  { %3328 = vmatmul.mubr.bf16.vlgmr.msra.gmra.mrb[0].mxu1 %v12877_v10  ;;  %3500 = vmatmul.mubr.bf16.vlgmr.msra.gmra.mrb[0].mxu0 %v12877_v10  ;;  %v11240_v10 = vcombine.low %v192_v62, %v200_v0  ;;  %v320_v62 = vld [vmem:[#allocation2 + $0x7a0] sm:$0xff] }
  0xcf   :  { %3339 = vmatpush1.bf16.msra.mxu1 %v11122_v17  ;;  %3597 = vmatpush1.bf16.msra.mxu0 %v11128_v18  ;;  %v11250_v17 = vcombine.low %v205_v4, %v213_v5  ;;  %v11256_v18 = vcombine.low %v208_v6, %v216_v8  ;;  %v328_v0 = vld [vmem:[#allocation2 + $0x7e0] sm:$0xff]  ;;  %v333_v4 = vld [vmem:[#allocation2 + $0x808] sm:$0xff] }
  0xd0   :  { %3340 = vmatprep.subr.bf16.mxu1 %v11139_v19  ;;  %3598 = vmatprep.subr.bf16.mxu0 %v11145_v23  ;;  %v11267_v19 = vcombine.high %v221_v12, %v229_v13  ;;  %v11273_v23 = vcombine.high %v224_v14, %v232_v16  ;;  %v341_v5 = vld [vmem:[#allocation2 + $0x848] sm:$0xff]  ;;  %v336_v6 = vld [vmem:[#allocation2 + $0x820] sm:$0xff] }
  0xd1   :  { %3370 = vmatprep.mubr.bf16.mxu1 %v14396_v56  ;;  %3628 = vmatprep.mubr.bf16.mxu0 %v14396_v56  ;;  %v165_v56 = vld [vmem:[#allocation2 + $0x2c8] sm:$0xff]  ;;  %v344_v8 = vld [vmem:[#allocation2 + $0x860] sm:$0xff] }
  0xd2   :  { %v11203_v50 = vcombine.high %v157_v44, %v165_v56  ;;  %v11202_v57 = vcombine.low %v157_v44, %v165_v56  ;;  %v285_v44 = vld [vmem:[#allocation2 + $0x688] sm:$0xff] }
  0xd3   :  { %3341 = vmatpush1.bf16.msra.mxu1 %v11138_v25  ;;  %3599 = vmatpush1.bf16.msra.mxu0 %v11144_v26  ;;  %v11266_v25 = vcombine.low %v221_v12, %v229_v13  ;;  %v11272_v26 = vcombine.low %v224_v14, %v232_v16  ;;  %v293_v56 = vld [vmem:[#allocation2 + $0x6c8] sm:$0xff]  ;;  %v352_v14 = vld [vmem:[#allocation2 + $0x8a0] sm:$0xff] }
  0xd4   :  { %3342 = vmatprep.subr.bf16.mxu1 %v11155_v27  ;;  %3600 = vmatprep.subr.bf16.mxu0 %v11161_v31  ;;  %v11283_v27 = vcombine.high %v237_v20, %v245_v21  ;;  %v11289_v31 = vcombine.high %v240_v22, %v248_v24  ;;  %v349_v12 = vld [vmem:[#allocation2 + $0x888] sm:$0xff]  ;;  %v360_v16 = vld [vmem:[#allocation2 + $0x8e0] sm:$0xff] }
  0xd5   :  { %v357_v13 = vld [vmem:[#allocation2 + $0x8c8] sm:$0xff] }
  0xd7   :  { %3343 = vmatpush1.bf16.msra.mxu1 %v11154_v33  ;;  %3601 = vmatpush1.bf16.msra.mxu0 %v11160_v34  ;;  %v11282_v33 = vcombine.low %v237_v20, %v245_v21  ;;  %v11288_v34 = vcombine.low %v240_v22, %v248_v24  ;;  %v365_v20 = vld [vmem:[#allocation2 + $0x908] sm:$0xff]  ;;  %v368_v22 = vld [vmem:[#allocation2 + $0x920] sm:$0xff] }
  0xd8   :  { %3344 = vmatprep.subr.bf16.mxu1 %v11171_v35  ;;  %3602 = vmatprep.subr.bf16.mxu0 %v11177_v39  ;;  %v11299_v35 = vcombine.high %v253_v28, %v261_v29  ;;  %v11305_v39 = vcombine.high %v256_v30, %v264_v32  ;;  %v373_v21 = vld [vmem:[#allocation2 + $0x948] sm:$0xff]  ;;  %v376_v24 = vld [vmem:[#allocation2 + $0x960] sm:$0xff] }
  0xdb   :  { %3345 = vmatpush1.bf16.msra.mxu1 %v11170_v41  ;;  %3603 = vmatpush1.bf16.msra.mxu0 %v11176_v42  ;;  %v11298_v41 = vcombine.low %v253_v28, %v261_v29  ;;  %v11304_v42 = vcombine.low %v256_v30, %v264_v32  ;;  %v11411_v28 = vcombine.high %v365_v20, %v373_v21  ;;  %v381_v29 = vld [vmem:[#allocation2 + $0x988] sm:$0xff] }
  0xdc   :  { %3346 = vmatprep.subr.bf16.mxu1 %v11187_v43  ;;  %3604 = vmatprep.subr.bf16.mxu0 %v11193_v46  ;;  %v11315_v43 = vcombine.high %v269_v36, %v277_v37  ;;  %v11321_v46 = vcombine.high %v272_v38, %v280_v40  ;;  %v389_v30 = vld [vmem:[#allocation2 + $0x9c8] sm:$0xff]  ;;  %v11417_v32 = vcombine.high %v368_v22, %v376_v24 }
  0xdf   :  { %3347 = vmatpush1.bf16.msra.mxu1 %v11186_v48  ;;  %3605 = vmatpush1.bf16.msra.mxu0 %v11192_v49  ;;  %v11314_v48 = vcombine.low %v269_v36, %v277_v37  ;;  %v11320_v49 = vcombine.low %v272_v38, %v280_v40  ;;  %v11416_v36 = vcombine.low %v368_v22, %v376_v24  ;;  %v397_v38 = vld [vmem:[#allocation2 + $0xa08] sm:$0xff]  ;;  %v400_v40 = vld [vmem:[#allocation2 + $0xa20] sm:$0xff] }
  0xe0   :  { %3348 = vmatprep.subr.bf16.mxu1 %v11203_v50  ;;  %3606 = vmatprep.subr.bf16.mxu0 %v11209_v54  ;;  %v11331_v50 = vcombine.high %v285_v44, %v293_v56  ;;  %v11337_v54 = vcombine.high %v288_v45, %v296_v47  ;;  %v11427_v37 = vcombine.high %v381_v29, %v389_v30 }
  0xe3   :  { %3349 = vmatpush1.bf16.msra.mxu1 %v11202_v57  ;;  %3607 = vmatpush1.bf16.msra.mxu0 %v11208_v58  ;;  %v11330_v57 = vcombine.low %v285_v44, %v293_v56  ;;  %v11336_v58 = vcombine.low %v288_v45, %v296_v47  ;;  %v413_v45 = vld [vmem:[#allocation2 + $0xa88] sm:$0xff]  ;;  %v416_v47 = vld [vmem:[#allocation2 + $0xaa0] sm:$0xff] }
  0xe4   :  { %3350 = vmatprep.subr.bf16.mxu1 %v11219_v59  ;;  %3608 = vmatprep.subr.bf16.mxu0 %v11225_v63  ;;  %v11347_v59 = vcombine.high %v301_v51, %v309_v52  ;;  %v11353_v63 = vcombine.high %v304_v53, %v312_v55 }
  0xe7   :  { %3351 = vmatpush1.bf16.msra.mxu1 %v11218_v1  ;;  %3609 = vmatpush1.bf16.msra.mxu0 %v11224_v2  ;;  %v11346_v1 = vcombine.low %v301_v51, %v309_v52  ;;  %v11352_v2 = vcombine.low %v304_v53, %v312_v55  ;;  %v429_v53 = vld [vmem:[#allocation2 + $0xb08] sm:$0xff]  ;;  %v432_v55 = vld [vmem:[#allocation2 + $0xb20] sm:$0xff] }
  0xe8   :  { %3352 = vmatprep.subr.bf16.mxu1 %v11235_v3  ;;  %3610 = vmatprep.subr.bf16.mxu0 %v11241_v7  ;;  %v11363_v3 = vcombine.high %v317_v60, %v325_v61  ;;  %v11369_v7 = vcombine.high %v320_v62, %v328_v0 }
  0xeb   :  { %3353 = vmatpush1.bf16.msra.mxu1 %v11234_v9  ;;  %3611 = vmatpush1.bf16.msra.mxu0 %v11240_v10  ;;  %v11362_v9 = vcombine.low %v317_v60, %v325_v61  ;;  %v11368_v10 = vcombine.low %v320_v62, %v328_v0  ;;  %v445_v62 = vld [vmem:[#allocation2 + $0xb88] sm:$0xff] }
  0xec   :  { %3354 = vmatprep.subr.bf16.mxu1 %v11251_v11  ;;  %3612 = vmatprep.subr.bf16.mxu0 %v11257_v15  ;;  %v11379_v11 = vcombine.high %v333_v4, %v341_v5  ;;  %v11385_v15 = vcombine.high %v336_v6, %v344_v8 }
  0xef   :  { %3355 = vmatpush1.bf16.msra.mxu1 %v11250_v17  ;;  %3613 = vmatpush1.bf16.msra.mxu0 %v11256_v18  ;;  %v11378_v17 = vcombine.low %v333_v4, %v341_v5  ;;  %v11384_v18 = vcombine.low %v336_v6, %v344_v8  ;;  %v461_v4 = vld [vmem:[#allocation2 + $0xc08] sm:$0xff]  ;;  %v464_v8 = vld [vmem:[#allocation2 + $0xc20] sm:$0xff] }
  0xf0   :  { %3356 = vmatprep.subr.bf16.mxu1 %v11267_v19  ;;  %3614 = vmatprep.subr.bf16.mxu0 %v11273_v23  ;;  %v11395_v19 = vcombine.high %v349_v12, %v357_v13  ;;  %v11401_v23 = vcombine.high %v352_v14, %v360_v16  ;;  %v469_v5 = vld [vmem:[#allocation2 + $0xc48] sm:$0xff] }
  0xf3   :  { %3357 = vmatpush1.bf16.msra.mxu1 %v11266_v25  ;;  %3615 = vmatpush1.bf16.msra.mxu0 %v11272_v26  ;;  %v14186_v25 = vld [vmem:[%s14741_s0] ss:$16 sps:$4 sm:$0xff]   ;;  %v11394_v26 = vcombine.low %v349_v12, %v357_v13  ;;  %v477_v12 = vld [vmem:[#allocation2 + $0xc88] sm:$0xff] }
  0xf4   :  { %3358 = vmatprep.subr.bf16.mxu1 %v11283_v27  ;;  %3616 = vmatprep.subr.bf16.mxu0 %v11289_v31  ;;  %v11400_v27 = vcombine.low %v352_v14, %v360_v16  ;;  %v384_v31 = vld [vmem:[#allocation2 + $0x9a0] sm:$0xff]  ;;  %v485_v13 = vld [vmem:[#allocation2 + $0xcc8] sm:$0xff] }
  0xf5   :  { %v480_v16 = vld [vmem:[#allocation2 + $0xca0] sm:$0xff]  ;;  %v11523_v22 = vcombine.high %v477_v12, %v485_v13 }
  0xf7   :  { %3359 = vmatpush1.bf16.msra.mxu1 %v11282_v33  ;;  %3617 = vmatpush1.bf16.msra.mxu0 %v11288_v34  ;;  %v392_v33 = vld [vmem:[#allocation2 + $0x9e0] sm:$0xff]  ;;  %v14187_v34 = vld [vmem:[%s14741_s0 + $0xc] ss:$16 sps:$4 sm:$0xff]  }
  0xf8   :  { %3360 = vmatprep.subr.bf16.mxu1 %v11299_v35  ;;  %3618 = vmatprep.subr.bf16.mxu0 %v11305_v39  ;;  %v11410_v35 = vcombine.low %v365_v20, %v373_v21  ;;  %v405_v39 = vld [vmem:[#allocation2 + $0xa48] sm:$0xff]  ;;  %v11432_v44 = vcombine.low %v384_v31, %v392_v33 }
  0xf9   :  { %v11443_v56 = vcombine.high %v397_v38, %v405_v39  ;;  %v493_v20 = vld [vmem:[#allocation2 + $0xd08] sm:$0xff] }
  0xfb   :  { %3361 = vmatpush1.bf16.msra.mxu1 %v11298_v41  ;;  %3619 = vmatpush1.bf16.msra.mxu0 %v11304_v42  ;;  %v11433_v41 = vcombine.high %v384_v31, %v392_v33  ;;  %v408_v42 = vld [vmem:[#allocation2 + $0xa60] sm:$0xff]  ;;  %v517_v31 = vld [vmem:[#allocation2 + $0xdc8] sm:$0xff] }
  0xfc   :  { %3362 = vmatprep.subr.bf16.mxu1 %v11315_v43  ;;  %3620 = vmatprep.subr.bf16.mxu0 %v11321_v46  ;;  %v11426_v43 = vcombine.low %v381_v29, %v389_v30  ;;  %v421_v46 = vld [vmem:[#allocation2 + $0xac8] sm:$0xff]  ;;  %v11448_v51 = vcombine.low %v400_v40, %v408_v42 }
  0xfd   :  { %v11459_v52 = vcombine.high %v413_v45, %v421_v46  ;;  %v509_v30 = vld [vmem:[#allocation2 + $0xd88] sm:$0xff] }
  0xff   :  { %3363 = vmatpush1.bf16.msra.mxu1 %v11314_v48  ;;  %3621 = vmatpush1.bf16.msra.mxu0 %v11320_v49  ;;  %v11449_v48 = vcombine.high %v400_v40, %v408_v42  ;;  %v424_v49 = vld [vmem:[#allocation2 + $0xae0] sm:$0xff] }
 0x100   :  { %3364 = vmatprep.subr.bf16.mxu1 %v11331_v50  ;;  %3622 = vmatprep.subr.bf16.mxu0 %v11337_v54  ;;  %v11442_v50 = vcombine.low %v397_v38, %v405_v39  ;;  %v437_v54 = vld [vmem:[#allocation2 + $0xb48] sm:$0xff]  ;;  %v11464_v60 = vcombine.low %v416_v47, %v424_v49  ;;  %v528_v40 = vld [vmem:[#allocation2 + $0xe20] sm:$0xff] }
 0x101   :  { %v11475_v61 = vcombine.high %v429_v53, %v437_v54  ;;  %v525_v38 = vld [vmem:[#allocation2 + $0xe08] sm:$0xff]  ;;  %v536_v42 = vld [vmem:[#allocation2 + $0xe60] sm:$0xff] }
 0x102   :  { %v533_v39 = vld [vmem:[#allocation2 + $0xe48] sm:$0xff] }
 0x103   :  { %3365 = vmatpush1.bf16.msra.mxu1 %v11330_v57  ;;  %3623 = vmatpush1.bf16.msra.mxu0 %v11336_v58  ;;  %v11465_v57 = vcombine.high %v416_v47, %v424_v49  ;;  %v440_v58 = vld [vmem:[#allocation2 + $0xb60] sm:$0xff] }
 0x104   :  { %3366 = vmatprep.subr.bf16.mxu1 %v11347_v59  ;;  %3624 = vmatprep.subr.bf16.mxu0 %v11353_v63  ;;  %v11458_v59 = vcombine.low %v413_v45, %v421_v46  ;;  %v453_v63 = vld [vmem:[#allocation2 + $0xbc8] sm:$0xff]  ;;  %v11481_v0 = vcombine.high %v432_v55, %v440_v58  ;;  %v11480_v6 = vcombine.low %v432_v55, %v440_v58  ;;  %v544_v47 = vld [vmem:[#allocation2 + $0xea0] sm:$0xff] }
 0x105   :  { %v541_v45 = vld [vmem:[#allocation2 + $0xe88] sm:$0xff]  ;;  %v552_v49 = vld [vmem:[#allocation2 + $0xee0] sm:$0xff] }
 0x106   :  { %v549_v46 = vld [vmem:[#allocation2 + $0xec8] sm:$0xff]  ;;  %v560_v55 = vld [vmem:[#allocation2 + $0xf20] sm:$0xff] }
 0x107   :  { %3367 = vmatpush1.bf16.msra.mxu1 %v11346_v1  ;;  %3625 = vmatpush1.bf16.msra.mxu0 %v11352_v2  ;;  %v448_v1 = vld [vmem:[#allocation2 + $0xba0] sm:$0xff] }
 0x108   :  { %3368 = vmatprep.subr.bf16.mxu1 %v11363_v3  ;;  %3626 = vmatprep.subr.bf16.mxu0 %v11369_v7  ;;  %v456_v2 = vld [vmem:[#allocation2 + $0xbe0] sm:$0xff]  ;;  %v11474_v3 = vcombine.low %v429_v53, %v437_v54  ;;  %v11491_v7 = vcombine.high %v445_v62, %v453_v63  ;;  %v557_v53 = vld [vmem:[#allocation2 + $0xf08] sm:$0xff] }
 0x109   :  { %v11496_v14 = vcombine.low %v448_v1, %v456_v2  ;;  %v565_v54 = vld [vmem:[#allocation2 + $0xf48] sm:$0xff]  ;;  %v568_v58 = vld [vmem:[#allocation2 + $0xf60] sm:$0xff] }
 0x10b   :  { %3369 = vmatpush1.bf16.msra.mxu1 %v11362_v9  ;;  %3627 = vmatpush1.bf16.msra.mxu0 %v11368_v10  ;;  %v472_v9 = vld [vmem:[#allocation2 + $0xc60] sm:$0xff]  ;;  %v11497_v10 = vcombine.high %v448_v1, %v456_v2  ;;  %v11609_v1 = vcombine.high %v560_v55, %v568_v58 }
 0x10c   :  { %3381 = vmatprep.subr.bf16.mxu1 %v11379_v11  ;;  %3639 = vmatprep.subr.bf16.mxu0 %v11385_v15  ;;  %v11490_v11 = vcombine.low %v445_v62, %v453_v63  ;;  %v11507_v15 = vcombine.high %v461_v4, %v469_v5  ;;  %v11512_v21 = vcombine.low %v464_v8, %v472_v9  ;;  %v573_v62 = vld [vmem:[#allocation2 + $0xf88] sm:$0xff]  ;;  %v584_v2 = vld [vmem:[#allocation2 + $0xfe0] sm:$0xff] }
 0x10d   :  { %v581_v63 = vld [vmem:[#allocation2 + $0xfc8] sm:$0xff] }
 0x10e   :  { %3371 = vmatmul.mubr.bf16.vlgmr.msra.gmra.mrb[4].mxu1 %v14186_v25  ;;  %3629 = vmatmul.mubr.bf16.vlgmr.msra.gmra.mrb[4].mxu0 %v14186_v25  ;;  %v496_v25 = vld [vmem:[#allocation2 + $0xd20] sm:$0xff] }
 0x10f   :  { %3382 = vmatpush1.bf16.msra.mxu1 %v11378_v17  ;;  %3640 = vmatpush1.bf16.msra.mxu0 %v11384_v18  ;;  %v488_v17 = vld [vmem:[#allocation2 + $0xce0] sm:$0xff]  ;;  %v11513_v18 = vcombine.high %v464_v8, %v472_v9  ;;  %v82_v8 = vld [vmem:[#allocation2 + $0x30] sm:$0xff] }
 0x110   :  { %3383 = vmatprep.subr.bf16.mxu1 %v11395_v19  ;;  %3641 = vmatprep.subr.bf16.mxu0 %v11401_v23  ;;  %v11506_v19 = vcombine.low %v461_v4, %v469_v5  ;;  %v501_v23 = vld [vmem:[#allocation2 + $0xd48] sm:$0xff]  ;;  %v11529_v24 = vcombine.high %v480_v16, %v488_v17  ;;  %v11608_v4 = vcombine.low %v560_v55, %v568_v58  ;;  %v175_v55 = vld [vmem:[#allocation2 + $0x318] sm:$0xff]  ;;  %v178_v58 = vld [vmem:[#allocation2 + $0x330] sm:$0xff] }
 0x111   :  { %3413 = vmatprep.mubr.bf16.mxu1 %v14187_v34  ;;  %3671 = vmatprep.mubr.bf16.mxu0 %v14187_v34  ;;  %v11539_v29 = vcombine.high %v493_v20, %v501_v23  ;;  %v520_v34 = vld [vmem:[#allocation2 + $0xde0] sm:$0xff]  ;;  %v11619_v5 = vcombine.high %v573_v62, %v581_v63 }
 0x113   :  { %3384 = vmatpush1.bf16.msra.mxu1 %v11394_v26  ;;  %3642 = vmatpush1.bf16.msra.mxu0 %v11400_v27  ;;  %v504_v26 = vld [vmem:[#allocation2 + $0xd60] sm:$0xff]  ;;  %v11522_v27 = vcombine.low %v477_v12, %v485_v13 }
 0x114   :  { %3385 = vmatprep.subr.bf16.mxu1 %v11411_v28  ;;  %3643 = vmatprep.subr.bf16.mxu0 %v11417_v32  ;;  %v11528_v28 = vcombine.low %v480_v16, %v488_v17  ;;  %v512_v32 = vld [vmem:[#allocation2 + $0xda0] sm:$0xff]  ;;  %v11545_v33 = vcombine.high %v496_v25, %v504_v26  ;;  %v98_v16 = vld [vmem:[#allocation2 + $0xb0] sm:$0xff] }
 0x117   :  { %3386 = vmatpush1.bf16.msra.mxu1 %v11410_v35  ;;  %3644 = vmatpush1.bf16.msra.mxu0 %v11416_v36  ;;  %v11538_v35 = vcombine.low %v493_v20, %v501_v23  ;;  %v11544_v36 = vcombine.low %v496_v25, %v504_v26  ;;  %v111_v20 = vld [vmem:[#allocation2 + $0x118] sm:$0xff]  ;;  %v114_v26 = vld [vmem:[#allocation2 + $0x130] sm:$0xff] }
 0x118   :  { %3387 = vmatprep.subr.bf16.mxu1 %v11427_v37  ;;  %3645 = vmatprep.subr.bf16.mxu0 %v11433_v41  ;;  %v11555_v37 = vcombine.high %v509_v30, %v517_v31  ;;  %v11561_v41 = vcombine.high %v512_v32, %v520_v34  ;;  %v14188_v25 = vld [vmem:[%s14741_s0 + $0x8] ss:$16 sps:$4 sm:$0xff]  }
 0x11b   :  { %3388 = vmatpush1.bf16.msra.mxu1 %v11426_v43  ;;  %3646 = vmatpush1.bf16.msra.mxu0 %v11432_v44  ;;  %v11554_v43 = vcombine.low %v509_v30, %v517_v31  ;;  %v11560_v44 = vcombine.low %v512_v32, %v520_v34  ;;  %v127_v31 = vld [vmem:[#allocation2 + $0x198] sm:$0xff]  ;;  %v130_v34 = vld [vmem:[#allocation2 + $0x1b0] sm:$0xff] }
 0x11c   :  { %3389 = vmatprep.subr.bf16.mxu1 %v11443_v56  ;;  %3647 = vmatprep.subr.bf16.mxu0 %v11449_v48  ;;  %v11571_v56 = vcombine.high %v525_v38, %v533_v39  ;;  %v11577_v48 = vcombine.high %v528_v40, %v536_v42  ;;  %v135_v32 = vld [vmem:[#allocation2 + $0x1d8] sm:$0xff] }
 0x11f   :  { %3390 = vmatpush1.bf16.msra.mxu1 %v11442_v50  ;;  %3648 = vmatpush1.bf16.msra.mxu0 %v11448_v51  ;;  %v11570_v50 = vcombine.low %v525_v38, %v533_v39  ;;  %v11576_v51 = vcombine.low %v528_v40, %v536_v42  ;;  %v11175_v39 = vcombine.high %v127_v31, %v135_v32  ;;  %v143_v40 = vld [vmem:[#allocation2 + $0x218] sm:$0xff]  ;;  %v146_v42 = vld [vmem:[#allocation2 + $0x230] sm:$0xff] }
 0x120   :  { %3391 = vmatprep.subr.bf16.mxu1 %v11459_v52  ;;  %3649 = vmatprep.subr.bf16.mxu0 %v11465_v57  ;;  %v11587_v52 = vcombine.high %v541_v45, %v549_v46  ;;  %v11593_v57 = vcombine.high %v544_v47, %v552_v49 }
 0x123   :  { %3392 = vmatpush1.bf16.msra.mxu1 %v11458_v59  ;;  %3650 = vmatpush1.bf16.msra.mxu0 %v11464_v60  ;;  %v11586_v59 = vcombine.low %v541_v45, %v549_v46  ;;  %v11592_v60 = vcombine.low %v544_v47, %v552_v49  ;;  %v159_v47 = vld [vmem:[#allocation2 + $0x298] sm:$0xff]  ;;  %v162_v49 = vld [vmem:[#allocation2 + $0x2b0] sm:$0xff] }
 0x124   :  { %3393 = vmatprep.subr.bf16.mxu1 %v11475_v61  ;;  %3651 = vmatprep.subr.bf16.mxu0 %v11481_v0  ;;  %v11603_v61 = vcombine.high %v557_v53, %v565_v54  ;;  %v576_v0 = vld [vmem:[#allocation2 + $0xfa0] sm:$0xff] }
 0x125   :  { %v11625_v9 = vcombine.high %v576_v0, %v584_v2  ;;  %v11624_v12 = vcombine.low %v576_v0, %v584_v2  ;;  %v191_v0 = vld [vmem:[#allocation2 + $0x398] sm:$0xff]  ;;  %v194_v2 = vld [vmem:[#allocation2 + $0x3b0] sm:$0xff] }
 0x127   :  { %3394 = vmatpush1.bf16.msra.mxu1 %v11474_v3  ;;  %3652 = vmatpush1.bf16.msra.mxu0 %v11480_v6  ;;  %v11602_v3 = vcombine.low %v557_v53, %v565_v54  ;;  %v79_v6 = vld [vmem:[#allocation2 + $0x18] sm:$0xff] }
 0x128   :  { %3395 = vmatprep.subr.bf16.mxu1 %v11491_v7  ;;  %3653 = vmatprep.subr.bf16.mxu0 %v11497_v10  ;;  %v87_v7 = vld [vmem:[#allocation2 + $0x58] sm:$0xff]  ;;  %v90_v10 = vld [vmem:[#allocation2 + $0x70] sm:$0xff] }
 0x129   :  { %v11127_v13 = vcombine.high %v79_v6, %v87_v7  ;;  %v11133_v17 = vcombine.high %v82_v8, %v90_v10 }
 0x12b   :  { %3396 = vmatpush1.bf16.msra.mxu1 %v11490_v11  ;;  %3654 = vmatpush1.bf16.msra.mxu0 %v11496_v14  ;;  %v11618_v11 = vcombine.low %v573_v62, %v581_v63  ;;  %v95_v14 = vld [vmem:[#allocation2 + $0x98] sm:$0xff] }
 0x12c   :  { %3397 = vmatprep.subr.bf16.mxu1 %v11507_v15  ;;  %3655 = vmatprep.subr.bf16.mxu0 %v11513_v18  ;;  %v103_v15 = vld [vmem:[#allocation2 + $0xd8] sm:$0xff]  ;;  %v106_v18 = vld [vmem:[#allocation2 + $0xf0] sm:$0xff] }
 0x12d   :  { %v11143_v23 = vcombine.high %v95_v14, %v103_v15 }
 0x12f   :  { %3398 = vmatpush1.bf16.msra.mxu1 %v11506_v19  ;;  %3656 = vmatpush1.bf16.msra.mxu0 %v11512_v21  ;;  %v11126_v19 = vcombine.low %v79_v6, %v87_v7  ;;  %v119_v21 = vld [vmem:[#allocation2 + $0x158] sm:$0xff] }
 0x130   :  { %3399 = vmatprep.subr.bf16.mxu1 %v11523_v22  ;;  %3657 = vmatprep.subr.bf16.mxu0 %v11529_v24  ;;  %v11132_v22 = vcombine.low %v82_v8, %v90_v10  ;;  %v11149_v24 = vcombine.high %v98_v16, %v106_v18  ;;  %v11159_v30 = vcombine.high %v111_v20, %v119_v21  ;;  %v207_v8 = vld [vmem:[#allocation2 + $0x418] sm:$0xff]  ;;  %v210_v10 = vld [vmem:[#allocation2 + $0x430] sm:$0xff] }
 0x133   :  { %3400 = vmatpush1.bf16.msra.mxu1 %v11522_v27  ;;  %3658 = vmatpush1.bf16.msra.mxu0 %v11528_v28  ;;  %v122_v27 = vld [vmem:[#allocation2 + $0x170] sm:$0xff]  ;;  %v11142_v28 = vcombine.low %v95_v14, %v103_v15 }
 0x134   :  { %3401 = vmatprep.subr.bf16.mxu1 %v11539_v29  ;;  %3659 = vmatprep.subr.bf16.mxu0 %v11545_v33  ;;  %v11148_v29 = vcombine.low %v98_v16, %v106_v18  ;;  %v11165_v33 = vcombine.high %v114_v26, %v122_v27  ;;  %v11164_v38 = vcombine.low %v114_v26, %v122_v27  ;;  %v223_v16 = vld [vmem:[#allocation2 + $0x498] sm:$0xff]  ;;  %v226_v18 = vld [vmem:[#allocation2 + $0x4b0] sm:$0xff] }
 0x135   :  { %v242_v26 = vld [vmem:[#allocation2 + $0x530] sm:$0xff] }
 0x137   :  { %3402 = vmatpush1.bf16.msra.mxu1 %v11538_v35  ;;  %3660 = vmatpush1.bf16.msra.mxu0 %v11544_v36  ;;  %v138_v35 = vld [vmem:[#allocation2 + $0x1f0] sm:$0xff] }
 0x138   :  { %3403 = vmatprep.subr.bf16.mxu1 %v11555_v37  ;;  %3661 = vmatprep.subr.bf16.mxu0 %v11561_v41  ;;  %v14189_v36 = vld [vmem:[%s14741_s0 + $0x4] ss:$16 sps:$4 sm:$0xff]   ;;  %v11158_v37 = vcombine.low %v111_v20, %v119_v21  ;;  %v151_v41 = vld [vmem:[#allocation2 + $0x258] sm:$0xff]  ;;  %v11180_v45 = vcombine.low %v130_v34, %v138_v35 }
 0x139   :  { %v11191_v46 = vcombine.high %v143_v40, %v151_v41  ;;  %v234_v20 = vld [vmem:[#allocation2 + $0x4f0] sm:$0xff] }
 0x13a   :  { %v11277_v27 = vcombine.high %v226_v18, %v234_v20 }
 0x13b   :  { %3404 = vmatpush1.bf16.msra.mxu1 %v11554_v43  ;;  %3662 = vmatpush1.bf16.msra.mxu0 %v11560_v44  ;;  %v11181_v43 = vcombine.high %v130_v34, %v138_v35  ;;  %v154_v44 = vld [vmem:[#allocation2 + $0x270] sm:$0xff] }
 0x13c   :  { %3405 = vmatprep.subr.bf16.mxu1 %v11571_v56  ;;  %3663 = vmatprep.subr.bf16.mxu0 %v11577_v48  ;;  %v11174_v56 = vcombine.low %v127_v31, %v135_v32  ;;  %v167_v48 = vld [vmem:[#allocation2 + $0x2d8] sm:$0xff]  ;;  %v11196_v53 = vcombine.low %v146_v42, %v154_v44  ;;  %v258_v34 = vld [vmem:[#allocation2 + $0x5b0] sm:$0xff] }
 0x13d   :  { %v11207_v54 = vcombine.high %v159_v47, %v167_v48  ;;  %v255_v32 = vld [vmem:[#allocation2 + $0x598] sm:$0xff] }
 0x13f   :  { %3406 = vmatpush1.bf16.msra.mxu1 %v11570_v50  ;;  %3664 = vmatpush1.bf16.msra.mxu0 %v11576_v51  ;;  %v11197_v50 = vcombine.high %v146_v42, %v154_v44  ;;  %v170_v51 = vld [vmem:[#allocation2 + $0x2f0] sm:$0xff] }
 0x140   :  { %3407 = vmatprep.subr.bf16.mxu1 %v11587_v52  ;;  %3665 = vmatprep.subr.bf16.mxu0 %v11593_v57  ;;  %v11190_v52 = vcombine.low %v143_v40, %v151_v41  ;;  %v183_v57 = vld [vmem:[#allocation2 + $0x358] sm:$0xff]  ;;  %v11212_v62 = vcombine.low %v162_v49, %v170_v51  ;;  %v274_v42 = vld [vmem:[#allocation2 + $0x630] sm:$0xff] }
 0x141   :  { %v11223_v63 = vcombine.high %v175_v55, %v183_v57  ;;  %v271_v40 = vld [vmem:[#allocation2 + $0x618] sm:$0xff]  ;;  %v282_v44 = vld [vmem:[#allocation2 + $0x670] sm:$0xff] }
 0x142   :  { %v279_v41 = vld [vmem:[#allocation2 + $0x658] sm:$0xff] }
 0x143   :  { %3408 = vmatpush1.bf16.msra.mxu1 %v11586_v59  ;;  %3666 = vmatpush1.bf16.msra.mxu0 %v11592_v60  ;;  %v11213_v59 = vcombine.high %v162_v49, %v170_v51  ;;  %v186_v60 = vld [vmem:[#allocation2 + $0x370] sm:$0xff] }
 0x144   :  { %3409 = vmatprep.subr.bf16.mxu1 %v11603_v61  ;;  %3667 = vmatprep.subr.bf16.mxu0 %v11609_v1  ;;  %v11206_v61 = vcombine.low %v159_v47, %v167_v48  ;;  %v199_v1 = vld [vmem:[#allocation2 + $0x3d8] sm:$0xff]  ;;  %v11228_v6 = vcombine.low %v178_v58, %v186_v60  ;;  %v290_v49 = vld [vmem:[#allocation2 + $0x6b0] sm:$0xff] }
 0x145   :  { %v11239_v7 = vcombine.high %v191_v0, %v199_v1  ;;  %v287_v47 = vld [vmem:[#allocation2 + $0x698] sm:$0xff]  ;;  %v298_v51 = vld [vmem:[#allocation2 + $0x6f0] sm:$0xff] }
 0x146   :  { %v295_v48 = vld [vmem:[#allocation2 + $0x6d8] sm:$0xff] }
 0x147   :  { %3410 = vmatpush1.bf16.msra.mxu1 %v11602_v3  ;;  %3668 = vmatpush1.bf16.msra.mxu0 %v11608_v4  ;;  %v11229_v3 = vcombine.high %v178_v58, %v186_v60  ;;  %v202_v4 = vld [vmem:[#allocation2 + $0x3f0] sm:$0xff] }
 0x148   :  { %3411 = vmatprep.subr.bf16.mxu1 %v11619_v5  ;;  %3669 = vmatprep.subr.bf16.mxu0 %v11625_v9  ;;  %v11222_v5 = vcombine.low %v175_v55, %v183_v57  ;;  %v215_v9 = vld [vmem:[#allocation2 + $0x458] sm:$0xff]  ;;  %v11244_v14 = vcombine.low %v194_v2, %v202_v4  ;;  %v306_v58 = vld [vmem:[#allocation2 + $0x730] sm:$0xff] }
 0x149   :  { %v11255_v15 = vcombine.high %v207_v8, %v215_v9  ;;  %v11254_v21 = vcombine.low %v207_v8, %v215_v9  ;;  %v303_v55 = vld [vmem:[#allocation2 + $0x718] sm:$0xff]  ;;  %v314_v60 = vld [vmem:[#allocation2 + $0x770] sm:$0xff] }
 0x14a   :  { %v311_v57 = vld [vmem:[#allocation2 + $0x758] sm:$0xff] }
 0x14b   :  { %3412 = vmatpush1.bf16.msra.mxu1 %v11618_v11  ;;  %3670 = vmatpush1.bf16.msra.mxu0 %v11624_v12  ;;  %v11245_v11 = vcombine.high %v194_v2, %v202_v4  ;;  %v218_v12 = vld [vmem:[#allocation2 + $0x470] sm:$0xff]  ;;  %v335_v8 = vld [vmem:[#allocation2 + $0x818] sm:$0xff] }
 0x14c   :  { %3510 = vmatprep.subr.bf16.mxu1 %v11127_v13  ;;  %3768 = vmatprep.subr.bf16.mxu0 %v11133_v17  ;;  %v11238_v13 = vcombine.low %v191_v0, %v199_v1  ;;  %v231_v17 = vld [vmem:[#allocation2 + $0x4d8] sm:$0xff]  ;;  %v322_v2 = vld [vmem:[#allocation2 + $0x7b0] sm:$0xff] }
 0x14d   :  { %v319_v0 = vld [vmem:[#allocation2 + $0x798] sm:$0xff]  ;;  %v330_v4 = vld [vmem:[#allocation2 + $0x7f0] sm:$0xff] }
 0x14e   :  { %3414 = vmatmul.mubr.bf16.vlgmr.msra.gmra.mrb[4].mxu1 %v14188_v25  ;;  %3672 = vmatmul.mubr.bf16.vlgmr.msra.gmra.mrb[4].mxu0 %v14188_v25  ;;  %v247_v25 = vld [vmem:[#allocation2 + $0x558] sm:$0xff] }
 0x14f   :  { %3511 = vmatpush1.bf16.msra.mxu1 %v11126_v19  ;;  %3769 = vmatpush1.bf16.msra.mxu0 %v11132_v22  ;;  %v11261_v19 = vcombine.high %v210_v10, %v218_v12  ;;  %v11260_v22 = vcombine.low %v210_v10, %v218_v12  ;;  %v327_v1 = vld [vmem:[#allocation2 + $0x7d8] sm:$0xff]  ;;  %v338_v10 = vld [vmem:[#allocation2 + $0x830] sm:$0xff] }
 0x150   :  { %3512 = vmatprep.subr.bf16.mxu1 %v11143_v23  ;;  %3770 = vmatprep.subr.bf16.mxu0 %v11149_v24  ;;  %v11271_v23 = vcombine.high %v223_v16, %v231_v17  ;;  %v239_v24 = vld [vmem:[#allocation2 + $0x518] sm:$0xff]  ;;  %v346_v12 = vld [vmem:[#allocation2 + $0x870] sm:$0xff] }
 0x151   :  { %3542 = vmatprep.mubr.bf16.mxu1 %v14189_v36  ;;  %3800 = vmatprep.mubr.bf16.mxu0 %v14189_v36  ;;  %v11287_v31 = vcombine.high %v239_v24, %v247_v25  ;;  %v266_v36 = vld [vmem:[#allocation2 + $0x5f0] sm:$0xff]  ;;  %v343_v9 = vld [vmem:[#allocation2 + $0x858] sm:$0xff] }
 0x153   :  { %3513 = vmatpush1.bf16.msra.mxu1 %v11142_v28  ;;  %3771 = vmatpush1.bf16.msra.mxu0 %v11148_v29  ;;  %v250_v28 = vld [vmem:[#allocation2 + $0x570] sm:$0xff]  ;;  %v11270_v29 = vcombine.low %v223_v16, %v231_v17  ;;  %v351_v16 = vld [vmem:[#allocation2 + $0x898] sm:$0xff] }
 0x154   :  { %3514 = vmatprep.subr.bf16.mxu1 %v11159_v30  ;;  %3772 = vmatprep.subr.bf16.mxu0 %v11165_v33  ;;  %v11276_v30 = vcombine.low %v226_v18, %v234_v20  ;;  %v263_v33 = vld [vmem:[#allocation2 + $0x5d8] sm:$0xff]  ;;  %v11293_v35 = vcombine.high %v242_v26, %v250_v28  ;;  %v354_v18 = vld [vmem:[#allocation2 + $0x8b0] sm:$0xff] }
 0x155   :  { %v359_v17 = vld [vmem:[#allocation2 + $0x8d8] sm:$0xff]  ;;  %v362_v20 = vld [vmem:[#allocation2 + $0x8f0] sm:$0xff] }
 0x157   :  { %3515 = vmatpush1.bf16.msra.mxu1 %v11158_v37  ;;  %3773 = vmatpush1.bf16.msra.mxu0 %v11164_v38  ;;  %v11286_v37 = vcombine.low %v239_v24, %v247_v25  ;;  %v11292_v38 = vcombine.low %v242_v26, %v250_v28  ;;  %v11388_v24 = vcombine.low %v338_v10, %v346_v12  ;;  %v370_v26 = vld [vmem:[#allocation2 + $0x930] sm:$0xff] }
 0x158   :  { %3516 = vmatprep.subr.bf16.mxu1 %v11175_v39  ;;  %3774 = vmatprep.subr.bf16.mxu0 %v11181_v43  ;;  %v11303_v39 = vcombine.high %v255_v32, %v263_v33  ;;  %v11309_v43 = vcombine.high %v258_v34, %v266_v36  ;;  %v11399_v25 = vcombine.high %v351_v16, %v359_v17 }
 0x159   :  { %v11405_v28 = vcombine.high %v354_v18, %v362_v20 }
 0x15b   :  { %3517 = vmatpush1.bf16.msra.mxu1 %v11174_v56  ;;  %3775 = vmatpush1.bf16.msra.mxu0 %v11180_v45  ;;  %v11302_v56 = vcombine.low %v255_v32, %v263_v33  ;;  %v11308_v45 = vcombine.low %v258_v34, %v266_v36  ;;  %v383_v33 = vld [vmem:[#allocation2 + $0x998] sm:$0xff] }
 0x15c   :  { %3518 = vmatprep.subr.bf16.mxu1 %v11191_v46  ;;  %3776 = vmatprep.subr.bf16.mxu0 %v11197_v50  ;;  %v11319_v46 = vcombine.high %v271_v40, %v279_v41  ;;  %v11325_v50 = vcombine.high %v274_v42, %v282_v44  ;;  %v391_v34 = vld [vmem:[#allocation2 + $0x9d8] sm:$0xff] }
 0x15f   :  { %3519 = vmatpush1.bf16.msra.mxu1 %v11190_v52  ;;  %3777 = vmatpush1.bf16.msra.mxu0 %v11196_v53  ;;  %v11318_v52 = vcombine.low %v271_v40, %v279_v41  ;;  %v11324_v53 = vcombine.low %v274_v42, %v282_v44  ;;  %v11431_v42 = vcombine.high %v383_v33, %v391_v34  ;;  %v407_v44 = vld [vmem:[#allocation2 + $0xa58] sm:$0xff] }
 0x160   :  { %3520 = vmatprep.subr.bf16.mxu1 %v11207_v54  ;;  %3778 = vmatprep.subr.bf16.mxu0 %v11213_v59  ;;  %v11335_v54 = vcombine.high %v287_v47, %v295_v48  ;;  %v11341_v59 = vcombine.high %v290_v49, %v298_v51 }
 0x163   :  { %3521 = vmatpush1.bf16.msra.mxu1 %v11206_v61  ;;  %3779 = vmatpush1.bf16.msra.mxu0 %v11212_v62  ;;  %v11334_v61 = vcombine.low %v287_v47, %v295_v48  ;;  %v11340_v62 = vcombine.low %v290_v49, %v298_v51  ;;  %v11430_v48 = vcombine.low %v383_v33, %v391_v34  ;;  %v415_v51 = vld [vmem:[#allocation2 + $0xa98] sm:$0xff] }
 0x164   :  { %3522 = vmatprep.subr.bf16.mxu1 %v11223_v63  ;;  %3780 = vmatprep.subr.bf16.mxu0 %v11229_v3  ;;  %v11351_v63 = vcombine.high %v303_v55, %v311_v57  ;;  %v11357_v3 = vcombine.high %v306_v58, %v314_v60 }
 0x167   :  { %3523 = vmatpush1.bf16.msra.mxu1 %v11222_v5  ;;  %3781 = vmatpush1.bf16.msra.mxu0 %v11228_v6  ;;  %v11350_v5 = vcombine.low %v303_v55, %v311_v57  ;;  %v11356_v6 = vcombine.low %v306_v58, %v314_v60  ;;  %v588_v55 = vld [vmem:[#allocation4] sm:$0xff]  ;;  %v426_v57 = vld [vmem:[#allocation2 + $0xaf0] sm:$0xff] }
 0x168   :  { %3524 = vmatprep.subr.bf16.mxu1 %v11239_v7  ;;  %3782 = vmatprep.subr.bf16.mxu0 %v11245_v11  ;;  %v11367_v7 = vcombine.high %v319_v0, %v327_v1  ;;  %v11373_v11 = vcombine.high %v322_v2, %v330_v4 }
 0x16b   :  { %3525 = vmatpush1.bf16.msra.mxu1 %v11238_v13  ;;  %3783 = vmatpush1.bf16.msra.mxu0 %v11244_v14  ;;  %v11366_v13 = vcombine.low %v319_v0, %v327_v1  ;;  %v11372_v14 = vcombine.low %v322_v2, %v330_v4  ;;  %v439_v2 = vld [vmem:[#allocation2 + $0xb58] sm:$0xff]  ;;  %v14447_v4 = vld [vmem:[#allocation2 + $0xb70] sm:$0xff] }
 0x16c   :  { %3526 = vmatprep.subr.bf16.mxu1 %v11255_v15  ;;  %3784 = vmatprep.subr.bf16.mxu0 %v11261_v19  ;;  %v11383_v15 = vcombine.high %v335_v8, %v343_v9  ;;  %v11389_v19 = vcombine.high %v338_v10, %v346_v12  ;;  %v14456_v10 = vld [vmem:[#allocation2 + $0xbf0] sm:$0xff] }
 0x16f   :  { %3527 = vmatpush1.bf16.msra.mxu1 %v11254_v21  ;;  %3785 = vmatpush1.bf16.msra.mxu0 %v11260_v22  ;;  %v11382_v21 = vcombine.low %v335_v8, %v343_v9  ;;  %v367_v22 = vld [vmem:[#allocation2 + $0x918] sm:$0xff]  ;;  %v14454_v9 = vld [vmem:[#allocation2 + $0xbb0] sm:$0xff] }
 0x170   :  { %3528 = vmatprep.subr.bf16.mxu1 %v11271_v23  ;;  %3786 = vmatprep.subr.bf16.mxu0 %v11277_v27  ;;  %v375_v23 = vld [vmem:[#allocation2 + $0x958] sm:$0xff]  ;;  %v378_v27 = vld [vmem:[#allocation2 + $0x970] sm:$0xff]  ;;  %v11500_v34 = vcombine.low %v14454_v9, %v14456_v10 }
 0x171   :  { %v11415_v32 = vcombine.high %v367_v22, %v375_v23  ;;  %v11421_v36 = vcombine.high %v370_v26, %v378_v27  ;;  %v11414_v40 = vcombine.low %v367_v22, %v375_v23  ;;  %v11420_v41 = vcombine.low %v370_v26, %v378_v27 }
 0x173   :  { %3529 = vmatpush1.bf16.msra.mxu1 %v11270_v29  ;;  %3787 = vmatpush1.bf16.msra.mxu0 %v11276_v30  ;;  %v14190_v29 = vld [vmem:[%s14741_s0] ss:$16 sps:$4 sm:$0xff]   ;;  %v11398_v30 = vcombine.low %v351_v16, %v359_v17  ;;  %v14462_v17 = vld [vmem:[#allocation2 + $0xc18] sm:$0xff] }
 0x174   :  { %3530 = vmatprep.subr.bf16.mxu1 %v11287_v31  ;;  %3788 = vmatprep.subr.bf16.mxu0 %v11293_v35  ;;  %v11404_v31 = vcombine.low %v354_v18, %v362_v20  ;;  %v386_v35 = vld [vmem:[#allocation2 + $0x9b0] sm:$0xff]  ;;  %v14464_v18 = vld [vmem:[#allocation2 + $0xc58] sm:$0xff] }
 0x175   :  { %v14468_v20 = vld [vmem:[#allocation2 + $0xc70] sm:$0xff] }
 0x177   :  { %3531 = vmatpush1.bf16.msra.mxu1 %v11286_v37  ;;  %3789 = vmatpush1.bf16.msra.mxu0 %v11292_v38  ;;  %v394_v37 = vld [vmem:[#allocation2 + $0x9f0] sm:$0xff]  ;;  %v14191_v38 = vld [vmem:[%s14741_s0 + $0xc] ss:$16 sps:$4 sm:$0xff]  }
 0x178   :  { %3532 = vmatprep.subr.bf16.mxu1 %v11303_v39  ;;  %3790 = vmatprep.subr.bf16.mxu0 %v11309_v43  ;;  %v592_v39 = vlaneseq  ;;  %v399_v43 = vld [vmem:[#allocation2 + $0xa18] sm:$0xff]  ;;  %v11436_v49 = vcombine.low %v386_v35, %v394_v37 }
 0x17a   :  { %v14429_v47 = vshrl.u32 %v592_v39, 7 }
 0x17b   :  { %3533 = vmatpush1.bf16.msra.mxu1 %v11302_v56  ;;  %3791 = vmatpush1.bf16.msra.mxu0 %v11308_v45  ;;  %v402_v56 = vld [vmem:[#allocation2 + $0xa30] sm:$0xff]  ;;  %v11437_v45 = vcombine.high %v386_v35, %v394_v37 }
 0x17c   :  { %3534 = vmatprep.subr.bf16.mxu1 %v11319_v46  ;;  %3792 = vmatprep.subr.bf16.mxu0 %v11325_v50  ;;  %v410_v46 = vld [vmem:[#allocation2 + $0xa70] sm:$0xff]  ;;  %v11447_v50 = vcombine.high %v399_v43, %v407_v44  ;;  %v14432_v58 = vsub.s32 0, %v14429_v47  ;;  %v14435_v60 = vsub.s32 4, %v14429_v47  ;;  %v14443_v0 = vsub.s32 5, %v14429_v47 }
 0x17e   :  { %v595_v8 = vrot.slane %v588_v55, %v14432_v58 }
 0x17f   :  { %3535 = vmatpush1.bf16.msra.mxu1 %v11318_v52  ;;  %3793 = vmatpush1.bf16.msra.mxu0 %v11324_v53  ;;  %v423_v52 = vld [vmem:[#allocation2 + $0xad8] sm:$0xff]  ;;  %v418_v53 = vld [vmem:[#allocation2 + $0xab0] sm:$0xff] }
 0x180   :  { %3536 = vmatprep.subr.bf16.mxu1 %v11335_v54  ;;  %3794 = vmatprep.subr.bf16.mxu0 %v11341_v59  ;;  %v11453_v54 = vcombine.high %v402_v56, %v410_v46  ;;  %v11446_v59 = vcombine.low %v399_v43, %v407_v44  ;;  %v11463_v1 = vcombine.high %v415_v51, %v423_v52 }
 0x183   :  { %3537 = vmatpush1.bf16.msra.mxu1 %v11334_v61  ;;  %3795 = vmatpush1.bf16.msra.mxu0 %v11340_v62  ;;  %v14438_v61 = vsub.s32 1, %v14429_v47  ;;  %v14440_v62 = vld [vmem:[#allocation2 + $0xb18] sm:$0xff] }
 0x184   :  { %3538 = vmatprep.subr.bf16.mxu1 %v11351_v63  ;;  %3796 = vmatprep.subr.bf16.mxu0 %v11357_v3  ;;  %v11452_v63 = vcombine.low %v402_v56, %v410_v46  ;;  %v14445_v3 = vld [vmem:[#allocation2 + $0xb30] sm:$0xff]  ;;  %v11479_v16 = vcombine.high %v14440_v62, %v439_v2  ;;  %v11478_v26 = vcombine.low %v14440_v62, %v439_v2 }
 0x185   :  { %v599_v12 = vrot.slane %v588_v55, %v14438_v61  ;;  %v11485_v22 = vcombine.high %v14445_v3, %v14447_v4  ;;  %v11484_v27 = vcombine.low %v14445_v3, %v14447_v4 }
 0x187   :  { %3539 = vmatpush1.bf16.msra.mxu1 %v11350_v5  ;;  %3797 = vmatpush1.bf16.msra.mxu0 %v11356_v6  ;;  %v11469_v5 = vcombine.high %v418_v53, %v426_v57  ;;  %v14449_v6 = vld [vmem:[#allocation2 + $0xb98] sm:$0xff] }
 0x188   :  { %3540 = vmatprep.subr.bf16.mxu1 %v11367_v7  ;;  %3798 = vmatprep.subr.bf16.mxu0 %v11373_v11  ;;  %v14451_v7 = vld [vmem:[#allocation2 + $0xbd8] sm:$0xff]  ;;  %v611_v11 = vrot.slane %v588_v55, %v14435_v60 }
 0x189   :  { %v11494_v33 = vcombine.low %v14449_v6, %v14451_v7 }
 0x18b   :  { %3541 = vmatpush1.bf16.msra.mxu1 %v11366_v13  ;;  %3799 = vmatpush1.bf16.msra.mxu0 %v11372_v14  ;;  %v11462_v13 = vcombine.low %v415_v51, %v423_v52  ;;  %v615_v14 = vrot.slane %v588_v55, %v14443_v0  ;;  %v482_v55 = vld [vmem:[#allocation2 + $0xcb0] sm:$0xff] }
 0x18c   :  { %3553 = vmatprep.subr.bf16.mxu1 %v11383_v15  ;;  %3811 = vmatprep.subr.bf16.mxu0 %v11389_v19  ;;  %v11468_v15 = vcombine.low %v418_v53, %v426_v57  ;;  %v14466_v19 = vld [vmem:[#allocation2 + $0xc30] sm:$0xff] }
 0x18d   :  { %v11516_v43 = vcombine.low %v14466_v19, %v14468_v20  ;;  %v490_v57 = vld [vmem:[#allocation2 + $0xcf0] sm:$0xff] }
 0x18e   :  { %3543 = vmatmul.mubr.bf16.vlgmr.msra.gmra.mrb[8].mxu1 %v14190_v29  ;;  %3801 = vmatmul.mubr.bf16.vlgmr.msra.gmra.mrb[8].mxu0 %v14190_v29 }
 0x18f   :  { %3554 = vmatpush1.bf16.msra.mxu1 %v11382_v21  ;;  %3812 = vmatpush1.bf16.msra.mxu0 %v11388_v24 }
 0x190   :  { %3555 = vmatprep.subr.bf16.mxu1 %v11399_v25  ;;  %3813 = vmatprep.subr.bf16.mxu0 %v11405_v28  ;;  %v11495_v28 = vcombine.high %v14449_v6, %v14451_v7  ;;  %v495_v7 = vld [vmem:[#allocation2 + $0xd18] sm:$0xff] }
 0x191   :  { %3585 = vmatprep.mubr.bf16.mxu1 %v14191_v38  ;;  %3843 = vmatprep.mubr.bf16.mxu0 %v14191_v38 }
 0x193   :  { %3556 = vmatpush1.bf16.msra.mxu1 %v11398_v30  ;;  %3814 = vmatpush1.bf16.msra.mxu0 %v11404_v31 }
 0x194   :  { %3557 = vmatprep.subr.bf16.mxu1 %v11415_v32  ;;  %3815 = vmatprep.subr.bf16.mxu0 %v11421_v36 }
 0x197   :  { %3558 = vmatpush1.bf16.msra.mxu1 %v11414_v40  ;;  %3816 = vmatpush1.bf16.msra.mxu0 %v11420_v41  ;;  %v11501_v40 = vcombine.high %v14454_v9, %v14456_v10  ;;  %v11510_v41 = vcombine.low %v14462_v17, %v14464_v18 }
 0x198   :  { %3559 = vmatprep.subr.bf16.mxu1 %v11431_v42  ;;  %3817 = vmatprep.subr.bf16.mxu0 %v11437_v45  ;;  %v11511_v42 = vcombine.high %v14462_v17, %v14464_v18  ;;  %v11517_v45 = vcombine.high %v14466_v19, %v14468_v20  ;;  %v506_v17 = vld [vmem:[#allocation2 + $0xd70] sm:$0xff]  ;;  %v11532_v20 = vcombine.low %v482_v55, %v490_v57 }
 0x19b   :  { %3560 = vmatpush1.bf16.msra.mxu1 %v11430_v48  ;;  %3818 = vmatpush1.bf16.msra.mxu0 %v11436_v49 }
 0x19c   :  { %3561 = vmatprep.subr.bf16.mxu1 %v11447_v50  ;;  %3819 = vmatprep.subr.bf16.mxu0 %v11453_v54  ;;  %v479_v50 = vld [vmem:[#allocation2 + $0xc98] sm:$0xff] }
 0x19d   :  { %v487_v54 = vld [vmem:[#allocation2 + $0xcd8] sm:$0xff] }
 0x19e   :  { %v11527_v6 = vcombine.high %v479_v50, %v487_v54  ;;  %v11526_v19 = vcombine.low %v479_v50, %v487_v54  ;;  %v570_v50 = vld [vmem:[#allocation2 + $0xf70] sm:$0xff]  ;;  %v575_v54 = vld [vmem:[#allocation2 + $0xf98] sm:$0xff] }
 0x19f   :  { %3562 = vmatpush1.bf16.msra.mxu1 %v11446_v59  ;;  %3820 = vmatpush1.bf16.msra.mxu0 %v11452_v63 }
 0x1a0   :  { %3563 = vmatprep.subr.bf16.mxu1 %v11463_v1  ;;  %3821 = vmatprep.subr.bf16.mxu0 %v11469_v5 }
 0x1a1   :  { %v3329_v21 = vpop.f32.mrb[0].mxu1  ;;  %v3501_v24 = vpop.f32.mrb[0].mxu0 }
 0x1a2   :  { %v12704_v23 = vadd.f32 %v3329_v21, %v595_v8  ;;  %v3331_v25 = vpop.f32.mrb[1].mxu1  ;;  %v12712_v29 = vadd.f32 %v3501_v24, %v611_v11  ;;  %v3503_v31 = vpop.f32.mrb[1].mxu0 }
 0x1a3   :  { %v12705_v30 = vadd.f32 %v3331_v25, %v599_v12  ;;  %v3333_v32 = vpop.f32.mrb[2].mxu1  ;;  %3564 = vmatpush1.bf16.msra.mxu1 %v11462_v13  ;;  %v12713_v36 = vadd.f32 %v3503_v31, %v615_v14  ;;  %v3505_v38 = vpop.f32.mrb[2].mxu0  ;;  %3822 = vmatpush1.bf16.msra.mxu0 %v11468_v15  ;;  %v514_v25 = vld [vmem:[#allocation2 + $0xdb0] sm:$0xff]  ;;  %v535_v31 = vld [vmem:[#allocation2 + $0xe58] sm:$0xff] }
 0x1a4   :  { %v3972_v35 = vmul.f32 0.01, %v12704_v23  ;;  %v12706_v37 = vadd.f32 %v3333_v32, %v595_v8  ;;  %v3335_v39 = vpop.f32.mrb[3].mxu1  ;;  %3565 = vmatprep.subr.bf16.mxu1 %v11479_v16  ;;  %vm3940_vm0 = vcmp.gt.f32.partialorder %v12704_v23, 0.0  ;;  %3823 = vmatprep.subr.bf16.mxu0 %v11485_v22  ;;  %vm3944_vm1 = vcmp.gt.f32.partialorder %v12712_v29, 0.0  ;;  %v3507_v56 = vpop.f32.mrb[3].mxu0 }
 0x1a5   :  { %v3976_v44 = vmul.f32 0.01, %v12712_v29  ;;  %vm3941_vm3 = vcmp.gt.f32.partialorder %v12705_v30, 0.0  ;;  %v3973_v46 = vmul.f32 0.01, %v12705_v30  ;;  %v12714_v49 = vadd.f32 %v3505_v38, %v611_v11  ;;  %v503_v8 = vld [vmem:[#allocation2 + $0xd58] sm:$0xff] }
 0x1a6   :  { %vm3956_vm2 = vcmp.gt.f32.partialorder %v12706_v37, 0.0  ;;  %v3988_v48 = vmul.f32 0.01, %v12706_v37  ;;  %v4004_v51 = vsel %vm3940_vm0, %v12704_v23, %v3972_v35  ;;  %vm3945_vm4 = vcmp.gt.f32.partialorder %v12713_v36, 0.0  ;;  %v511_v22 = vld [vmem:[#allocation2 + $0xd98] sm:$0xff]  ;;  %v530_v32 = vld [vmem:[#allocation2 + $0xe30] sm:$0xff] }
 0x1a7   :  { %3566 = vmatpush1.bf16.msra.mxu1 %v11478_v26  ;;  %v12707_v52 = vadd.f32 %v3335_v39, %v599_v12  ;;  %v12715_v53 = vadd.f32 %v3507_v56, %v615_v14  ;;  %3824 = vmatpush1.bf16.msra.mxu0 %v11484_v27  ;;  %v3977_v59 = vmul.f32 0.01, %v12713_v36  ;;  %vm3960_vm5 = vcmp.gt.f32.partialorder %v12714_v49, 0.0  ;;  %v498_v12 = vld [vmem:[#allocation2 + $0xd30] sm:$0xff]  ;;  %v519_v23 = vld [vmem:[#allocation2 + $0xdd8] sm:$0xff] }
 0x1a8   :  { %3567 = vmatprep.subr.bf16.mxu1 %v11495_v28  ;;  %v4020_v62 = vsel %vm3956_vm2, %v12706_v37, %v3988_v48  ;;  %v3992_v63 = vmul.f32 0.01, %v12714_v49  ;;  %3825 = vmatprep.subr.bf16.mxu0 %v11501_v40  ;;  %v4008_v3 = vsel %vm3944_vm1, %v12712_v29, %v3976_v44  ;;  %v4005_v9 = vsel %vm3941_vm3, %v12705_v30, %v3973_v46  ;;  %v522_v26 = vld [vmem:[#allocation2 + $0xdf0] sm:$0xff]  ;;  %v527_v30 = vld [vmem:[#allocation2 + $0xe18] sm:$0xff] }
 0x1a9   :  { %v14493_v1 = vpack.c.bf16 %v4020_v62, %v4004_v51  ;;  %vm3957_vm6 = vcmp.gt.f32.partialorder %v12707_v52, 0.0  ;;  %v3989_v2 = vmul.f32 0.01, %v12707_v52  ;;  %vm3961_vm7 = vcmp.gt.f32.partialorder %v12715_v53, 0.0  ;;  %v543_v38 = vld [vmem:[#allocation2 + $0xe98] sm:$0xff]  ;;  %v546_v40 = vld [vmem:[#allocation2 + $0xeb0] sm:$0xff] }
 0x1aa   :  { %v4024_v4 = vsel %vm3960_vm5, %v12714_v49, %v3992_v63  ;;  %v3993_v5 = vmul.f32 0.01, %v12715_v53  ;;  %v4009_v13 = vsel %vm3945_vm4, %v12713_v36, %v3977_v59  ;;  %v11533_v16 = vcombine.high %v482_v55, %v490_v57  ;;  %v551_v39 = vld [vmem:[#allocation2 + $0xed8] sm:$0xff]  ;;  %v562_v48 = vld [vmem:[#allocation2 + $0xf30] sm:$0xff] }
 0x1ab   :  { %3568 = vmatpush1.bf16.msra.mxu1 %v11494_v33  ;;  %v14497_v10 = vpack.c.bf16 %v4024_v4, %v4008_v3  ;;  %v4021_v11 = vsel %vm3957_vm6, %v12707_v52, %v3989_v2  ;;  %3826 = vmatpush1.bf16.msra.mxu0 %v11500_v34  ;;  %v11543_v21 = vcombine.high %v495_v7, %v503_v8  ;;  %v538_v34 = vld [vmem:[#allocation2 + $0xe70] sm:$0xff]  ;;  %v567_v46 = vld [vmem:[#allocation2 + $0xf58] sm:$0xff]  ;;  %v81_v4 = vld [vmem:[#allocation2 + $0x28] sm:$0xff] }
 0x1ac   :  { %3569 = vmatprep.subr.bf16.mxu1 %v11511_v42  ;;  %v14500_v14 = vpack.c.bf16 %v4021_v11, %v4005_v9  ;;  %v4025_v15 = vsel %vm3961_vm7, %v12715_v53, %v3993_v5  ;;  %3827 = vmatprep.subr.bf16.mxu0 %v11517_v45  ;;  %v11549_v24 = vcombine.high %v498_v12, %v506_v17  ;;  %v554_v42 = vld [vmem:[#allocation2 + $0xef0] sm:$0xff]  ;;  %v559_v45 = vld [vmem:[#allocation2 + $0xf18] sm:$0xff] }
 0x1ad   :  { %v14503_v18 = vpack.c.bf16 %v4025_v15, %v4009_v13  ;;  %v11542_v27 = vcombine.low %v495_v7, %v503_v8  ;;  %v11548_v28 = vcombine.low %v498_v12, %v506_v17  ;;  %v11559_v29 = vcombine.high %v511_v22, %v519_v23  ;;  %v583_v55 = vld [vmem:[#allocation2 + $0xfd8] sm:$0xff]  ;;  %v578_v57 = vld [vmem:[#allocation2 + $0xfb0] sm:$0xff]  ;;  %v97_v12 = vld [vmem:[#allocation2 + $0xa8] sm:$0xff] }
 0x1ae   :  { %v11565_v33 = vcombine.high %v514_v25, %v522_v26  ;;  %v11558_v35 = vcombine.low %v511_v22, %v519_v23  ;;  %v11564_v36 = vcombine.low %v514_v25, %v522_v26  ;;  %v11575_v37 = vcombine.high %v527_v30, %v535_v31  ;;  %v586_v62 = vld [vmem:[#allocation2 + $0xff0] sm:$0xff]  ;;  %v105_v13 = vld [vmem:[#allocation2 + $0xe8] sm:$0xff]  ;;  %v12886_v26 = vld [vmem:[#allocation6 + $0x74] ss:$28 sps:$4 sm:$0xff]  }
 0x1af   :  { %3570 = vmatpush1.bf16.msra.mxu1 %v11510_v41  ;;  %3828 = vmatpush1.bf16.msra.mxu0 %v11516_v43  ;;  %v11581_v41 = vcombine.high %v530_v32, %v538_v34  ;;  %v11574_v43 = vcombine.low %v527_v30, %v535_v31  ;;  %v11580_v44 = vcombine.low %v530_v32, %v538_v34  ;;  %v12880_v11 = vld [vmem:[#allocation6 + $0x4] ss:$28 sps:$4 sm:$0xff]   ;;  %v12883_v17 = vld [vmem:[#allocation6 + $0x3c] ss:$28 sps:$4 sm:$0xff]   ;;  %v12884_v31 = vld [vmem:[#allocation6 + $0x70] ss:$28 sps:$4 sm:$0xff]  }
 0x1b0   :  { %3571 = vmatprep.subr.bf16.mxu1 %v11527_v6  ;;  %3829 = vmatprep.subr.bf16.mxu0 %v11533_v16  ;;  %v11591_v56 = vcombine.high %v543_v38, %v551_v39  ;;  %v11597_v49 = vcombine.high %v546_v40, %v554_v42  ;;  %v11590_v51 = vcombine.low %v543_v38, %v551_v39  ;;  %v89_v6 = vld [vmem:[#allocation2 + $0x68] sm:$0xff]  ;;  %v12892_v39 = vld [vmem:[#allocation6 + $0xe4] ss:$28 sps:$4 sm:$0xff]  }
 0x1b1   :  { %v11596_v52 = vcombine.low %v546_v40, %v554_v42  ;;  %v11607_v53 = vcombine.high %v559_v45, %v567_v46  ;;  %v11613_v59 = vcombine.high %v562_v48, %v570_v50  ;;  %v11606_v63 = vcombine.low %v559_v45, %v567_v46  ;;  %v12878_v15 = vld [vmem:[#allocation6] ss:$28 sps:$4 sm:$0xff]   ;;  %v14192_v22 = vld [vmem:[%s14741_s0 + $0x8] ss:$16 sps:$4 sm:$0xff]  }
 0x1b2   :  { %v11612_v2 = vcombine.low %v562_v48, %v570_v50  ;;  %v11623_v3 = vcombine.high %v575_v54, %v583_v55  ;;  %v11629_v5 = vcombine.high %v578_v57, %v586_v62  ;;  %v11622_v7 = vcombine.low %v575_v54, %v583_v55  ;;  %v145_v34 = vld [vmem:[#allocation2 + $0x228] sm:$0xff]  ;;  %v12896_v55 = vld [vmem:[#allocation6 + $0x150] ss:$28 sps:$4 sm:$0xff]  }
 0x1b3   :  { %3572 = vmatpush1.bf16.msra.mxu1 %v11526_v19  ;;  %3830 = vmatpush1.bf16.msra.mxu0 %v11532_v20  ;;  %v11628_v8 = vcombine.low %v578_v57, %v586_v62  ;;  %v11131_v9 = vcombine.high %v81_v4, %v89_v6  ;;  %v11130_v16 = vcombine.low %v81_v4, %v89_v6  ;;  %v113_v19 = vld [vmem:[#allocation2 + $0x128] sm:$0xff] }
 0x1b4   :  { %3573 = vmatprep.subr.bf16.mxu1 %v11543_v21  ;;  %3831 = vmatprep.subr.bf16.mxu0 %v11549_v24  ;;  %v121_v20 = vld [vmem:[#allocation2 + $0x168] sm:$0xff]  ;;  %v11147_v21 = vcombine.high %v97_v12, %v105_v13  ;;  %v11146_v23 = vcombine.low %v97_v12, %v105_v13 }
 0x1b5   :  { %v12881_v24 = vld [vmem:[#allocation6 + $0x38] ss:$28 sps:$4 sm:$0xff]   ;;  %v11163_v25 = vcombine.high %v113_v19, %v121_v20  ;;  %v11162_v30 = vcombine.low %v113_v19, %v121_v20 }
 0x1b6   :  { %v161_v40 = vld [vmem:[#allocation2 + $0x2a8] sm:$0xff]  ;;  %v12910_v20 = vld [vmem:[#allocation6 + $0x234] ss:$28 sps:$4 sm:$0xff]  }
 0x1b7   :  { %3574 = vmatpush1.bf16.msra.mxu1 %v11542_v27  ;;  %3832 = vmatpush1.bf16.msra.mxu0 %v11548_v28  ;;  %v129_v27 = vld [vmem:[#allocation2 + $0x1a8] sm:$0xff] }
 0x1b8   :  { %3575 = vmatprep.subr.bf16.mxu1 %v11559_v29  ;;  %3833 = vmatprep.subr.bf16.mxu0 %v11565_v33  ;;  %v137_v28 = vld [vmem:[#allocation2 + $0x1e8] sm:$0xff]  ;;  %v14193_v29 = vld [vmem:[%s14741_s0 + $0x4] ss:$16 sps:$4 sm:$0xff]   ;;  %v12889_v33 = vld [vmem:[#allocation6 + $0xac] ss:$28 sps:$4 sm:$0xff]  }
 0x1b9   :  { %v11179_v32 = vcombine.high %v129_v27, %v137_v28  ;;  %v177_v45 = vld [vmem:[#allocation2 + $0x328] sm:$0xff] }
 0x1ba   :  { %v185_v46 = vld [vmem:[#allocation2 + $0x368] sm:$0xff] }
 0x1bb   :  { %3576 = vmatpush1.bf16.msra.mxu1 %v11558_v35  ;;  %3834 = vmatpush1.bf16.msra.mxu0 %v11564_v36  ;;  %v153_v35 = vld [vmem:[#allocation2 + $0x268] sm:$0xff]  ;;  %v11178_v36 = vcombine.low %v129_v27, %v137_v28  ;;  %v11227_v50 = vcombine.high %v177_v45, %v185_v46  ;;  %v11226_v54 = vcombine.low %v177_v45, %v185_v46 }
 0x1bc   :  { %3577 = vmatprep.subr.bf16.mxu1 %v11575_v37  ;;  %3835 = vmatprep.subr.bf16.mxu0 %v11581_v41  ;;  %v12887_v37 = vld [vmem:[#allocation6 + $0xa8] ss:$28 sps:$4 sm:$0xff]   ;;  %v11195_v38 = vcombine.high %v145_v34, %v153_v35  ;;  %v169_v41 = vld [vmem:[#allocation2 + $0x2e8] sm:$0xff]  ;;  %v11194_v42 = vcombine.low %v145_v34, %v153_v35 }
 0x1bd   :  { %v11210_v48 = vcombine.low %v161_v40, %v169_v41  ;;  %v209_v62 = vld [vmem:[#allocation2 + $0x428] sm:$0xff] }
 0x1be   :  { %v225_v6 = vld [vmem:[#allocation2 + $0x4a8] sm:$0xff] }
 0x1bf   :  { %3578 = vmatpush1.bf16.msra.mxu1 %v11574_v43  ;;  %3836 = vmatpush1.bf16.msra.mxu0 %v11580_v44  ;;  %v12890_v43 = vld [vmem:[#allocation6 + $0xe0] ss:$28 sps:$4 sm:$0xff]   ;;  %v11211_v44 = vcombine.high %v161_v40, %v169_v41 }
 0x1c0   :  { %3579 = vmatprep.subr.bf16.mxu1 %v11591_v56  ;;  %3837 = vmatprep.subr.bf16.mxu0 %v11597_v49  ;;  %v12895_v56 = vld [vmem:[#allocation6 + $0x11c] ss:$28 sps:$4 sm:$0xff]  }
 0x1c1   :  { %v12893_v49 = vld [vmem:[#allocation6 + $0x118] ss:$28 sps:$4 sm:$0xff]  }
 0x1c2   :  { %v12907_v12 = vld [vmem:[#allocation6 + $0x1fc] ss:$28 sps:$4 sm:$0xff]  }
 0x1c3   :  { %3580 = vmatpush1.bf16.msra.mxu1 %v11590_v51  ;;  %3838 = vmatpush1.bf16.msra.mxu0 %v11596_v52  ;;  %v12898_v51 = vld [vmem:[#allocation6 + $0x154] ss:$28 sps:$4 sm:$0xff]   ;;  %v193_v52 = vld [vmem:[#allocation2 + $0x3a8] sm:$0xff] }
 0x1c4   :  { %3581 = vmatprep.subr.bf16.mxu1 %v11607_v53  ;;  %3839 = vmatprep.subr.bf16.mxu0 %v11613_v59  ;;  %v201_v53 = vld [vmem:[#allocation2 + $0x3e8] sm:$0xff]  ;;  %v12901_v59 = vld [vmem:[#allocation6 + $0x18c] ss:$28 sps:$4 sm:$0xff]  }
 0x1c5   :  { %v11243_v57 = vcombine.high %v193_v52, %v201_v53  ;;  %v241_v13 = vld [vmem:[#allocation2 + $0x528] sm:$0xff] }
 0x1c6   :  { %v273_v27 = vld [vmem:[#allocation2 + $0x628] sm:$0xff] }
 0x1c7   :  { %3582 = vmatpush1.bf16.msra.mxu1 %v11606_v63  ;;  %3840 = vmatpush1.bf16.msra.mxu0 %v11612_v2  ;;  %v217_v63 = vld [vmem:[#allocation2 + $0x468] sm:$0xff]  ;;  %v11242_v2 = vcombine.low %v193_v52, %v201_v53 }
 0x1c8   :  { %3583 = vmatprep.subr.bf16.mxu1 %v11623_v3  ;;  %3841 = vmatprep.subr.bf16.mxu0 %v11629_v5  ;;  %v12899_v3 = vld [vmem:[#allocation6 + $0x188] ss:$28 sps:$4 sm:$0xff]   ;;  %v11259_v4 = vcombine.high %v209_v62, %v217_v63  ;;  %v281_v28 = vld [vmem:[#allocation2 + $0x668] sm:$0xff] }
 0x1c9   :  { %v12904_v5 = vld [vmem:[#allocation6 + $0x1c4] ss:$28 sps:$4 sm:$0xff]   ;;  %v297_v34 = vld [vmem:[#allocation2 + $0x6e8] sm:$0xff]  ;;  %v11322_v35 = vcombine.low %v273_v27, %v281_v28 }
 0x1ca   :  { %v313_v40 = vld [vmem:[#allocation2 + $0x768] sm:$0xff] }
 0x1cb   :  { %3584 = vmatpush1.bf16.msra.mxu1 %v11622_v7  ;;  %3842 = vmatpush1.bf16.msra.mxu0 %v11628_v8  ;;  %v233_v7 = vld [vmem:[#allocation2 + $0x4e8] sm:$0xff]  ;;  %v11258_v8 = vcombine.low %v209_v62, %v217_v63 }
 0x1cc   :  { %3682 = vmatprep.subr.bf16.mxu1 %v11131_v9  ;;  %9721 = vmatprep.subr.bf16.mxu0 %v12880_v11  ;;  %v12902_v9 = vld [vmem:[#allocation6 + $0x1c0] ss:$28 sps:$4 sm:$0xff]   ;;  %v11275_v11 = vcombine.high %v225_v6, %v233_v7 }
 0x1cd   :  { %v329_v45 = vld [vmem:[#allocation2 + $0x7e8] sm:$0xff] }
 0x1ce   :  { %3586 = vmatmul.mubr.bf16.vlgmr.msra.gmra.mrb[8].mxu1 %v14192_v22  ;;  %3844 = vmatmul.mubr.bf16.vlgmr.msra.gmra.mrb[8].mxu0 %v14192_v22  ;;  %v265_v22 = vld [vmem:[#allocation2 + $0x5e8] sm:$0xff] }
 0x1cf   :  { %3683 = vmatpush1.bf16.msra.mxu1 %v11130_v16  ;;  %9722 = vmatpush1.bf16.msra.mxu0 %v12878_v15  ;;  %v249_v15 = vld [vmem:[#allocation2 + $0x568] sm:$0xff]  ;;  %v11274_v16 = vcombine.low %v225_v6, %v233_v7  ;;  %v14194_v7 = vld [vmem:[%s14741_s0] ss:$16 sps:$4 sm:$0xff]  }
 0x1d0   :  { %9753 = vmatprep.mubr.bf16.mxu0 %v14500_v14  ;;  %3684 = vmatprep.subr.bf16.mxu1 %v11147_v21  ;;  %v11291_v19 = vcombine.high %v241_v13, %v249_v15  ;;  %v257_v21 = vld [vmem:[#allocation2 + $0x5a8] sm:$0xff] }
 0x1d1   :  { %9723 = vmatprep.subr.bf16.mxu0 %v12883_v17  ;;  %3714 = vmatprep.mubr.bf16.mxu1 %v14193_v29  ;;  %v12905_v17 = vld [vmem:[#allocation6 + $0x1f8] ss:$28 sps:$4 sm:$0xff]   ;;  %v11306_v29 = vcombine.low %v257_v21, %v265_v22  ;;  %v12926_v63 = vld [vmem:[#allocation6 + $0x380] ss:$28 sps:$4 sm:$0xff]  }
 0x1d2   :  { %v345_v52 = vld [vmem:[#allocation2 + $0x868] sm:$0xff] }
 0x1d3   :  { %3685 = vmatpush1.bf16.msra.mxu1 %v11146_v23  ;;  %9724 = vmatpush1.bf16.msra.mxu0 %v12881_v24  ;;  %v11290_v23 = vcombine.low %v241_v13, %v249_v15  ;;  %v12908_v24 = vld [vmem:[#allocation6 + $0x230] ss:$28 sps:$4 sm:$0xff]   ;;  %v361_v62 = vld [vmem:[#allocation2 + $0x8e8] sm:$0xff] }
 0x1d4   :  { %3686 = vmatprep.subr.bf16.mxu1 %v11163_v25  ;;  %9725 = vmatprep.subr.bf16.mxu0 %v12886_v26  ;;  %v11307_v25 = vcombine.high %v257_v21, %v265_v22  ;;  %v12913_v26 = vld [vmem:[#allocation6 + $0x26c] ss:$28 sps:$4 sm:$0xff]   ;;  %v377_v6 = vld [vmem:[#allocation2 + $0x968] sm:$0xff] }
 0x1d5   :  { %v385_v13 = vld [vmem:[#allocation2 + $0x9a8] sm:$0xff]  ;;  %v12937_v21 = vld [vmem:[#allocation6 + $0x42c] ss:$28 sps:$4 sm:$0xff]  }
 0x1d6   :  { %v393_v15 = vld [vmem:[#allocation2 + $0x9e8] sm:$0xff] }
 0x1d7   :  { %3687 = vmatpush1.bf16.msra.mxu1 %v11162_v30  ;;  %9726 = vmatpush1.bf16.msra.mxu0 %v12884_v31  ;;  %v12911_v30 = vld [vmem:[#allocation6 + $0x268] ss:$28 sps:$4 sm:$0xff]   ;;  %v11323_v31 = vcombine.high %v273_v27, %v281_v28  ;;  %v401_v22 = vld [vmem:[#allocation2 + $0xa28] sm:$0xff] }
 0x1d8   :  { %3688 = vmatprep.subr.bf16.mxu1 %v11179_v32  ;;  %9727 = vmatprep.subr.bf16.mxu0 %v12889_v33  ;;  %v12916_v32 = vld [vmem:[#allocation6 + $0x2a4] ss:$28 sps:$4 sm:$0xff]   ;;  %v289_v33 = vld [vmem:[#allocation2 + $0x6a8] sm:$0xff] }
 0x1d9   :  { %v11338_v41 = vcombine.low %v289_v33, %v297_v34  ;;  %v12940_v27 = vld [vmem:[#allocation6 + $0x464] ss:$28 sps:$4 sm:$0xff]   ;;  %v417_v28 = vld [vmem:[#allocation2 + $0xaa8] sm:$0xff] }
 0x1db   :  { %3689 = vmatpush1.bf16.msra.mxu1 %v11178_v36  ;;  %9728 = vmatpush1.bf16.msra.mxu0 %v12887_v37  ;;  %v12914_v36 = vld [vmem:[#allocation6 + $0x2a0] ss:$28 sps:$4 sm:$0xff]   ;;  %v11339_v37 = vcombine.high %v289_v33, %v297_v34 }
 0x1dc   :  { %3690 = vmatprep.subr.bf16.mxu1 %v11195_v38  ;;  %9729 = vmatprep.subr.bf16.mxu0 %v12892_v39  ;;  %v12919_v38 = vld [vmem:[#allocation6 + $0x2dc] ss:$28 sps:$4 sm:$0xff]  }
 0x1dd   :  { %v305_v39 = vld [vmem:[#allocation2 + $0x728] sm:$0xff] }
 0x1de   :  { %v11354_v46 = vcombine.low %v305_v39, %v313_v40  ;;  %v589_v34 = vld [vmem:[#allocation4 + $0x8] sm:$0xff] }
 0x1df   :  { %3691 = vmatpush1.bf16.msra.mxu1 %v11194_v42  ;;  %9730 = vmatpush1.bf16.msra.mxu0 %v12890_v43  ;;  %v12917_v42 = vld [vmem:[#allocation6 + $0x2d8] ss:$28 sps:$4 sm:$0xff]   ;;  %v11355_v43 = vcombine.high %v305_v39, %v313_v40 }
 0x1e0   :  { %3692 = vmatprep.subr.bf16.mxu1 %v11211_v44  ;;  %9731 = vmatprep.subr.bf16.mxu0 %v12895_v56  ;;  %v12922_v44 = vld [vmem:[#allocation6 + $0x314] ss:$28 sps:$4 sm:$0xff]   ;;  %v321_v56 = vld [vmem:[#allocation2 + $0x7a8] sm:$0xff] }
 0x1e1   :  { %v11370_v53 = vcombine.low %v321_v56, %v329_v45  ;;  %v14196_v39 = vld [vmem:[#allocation4] sm:$0xff] }
 0x1e3   :  { %3693 = vmatpush1.bf16.msra.mxu1 %v11210_v48  ;;  %9732 = vmatpush1.bf16.msra.mxu0 %v12893_v49  ;;  %v12920_v48 = vld [vmem:[#allocation6 + $0x310] ss:$28 sps:$4 sm:$0xff]   ;;  %v11371_v49 = vcombine.high %v321_v56, %v329_v45  ;;  %v14528_v45 = vld [vmem:[#allocation2 + $0xba8] sm:$0xff] }
 0x1e4   :  { %3694 = vmatprep.subr.bf16.mxu1 %v11227_v50  ;;  %9733 = vmatprep.subr.bf16.mxu0 %v12898_v51  ;;  %v12925_v50 = vld [vmem:[#allocation6 + $0x34c] ss:$28 sps:$4 sm:$0xff]   ;;  %v337_v51 = vld [vmem:[#allocation2 + $0x828] sm:$0xff]  ;;  %v12946_v56 = vld [vmem:[#allocation6 + $0x4d4] ss:$28 sps:$4 sm:$0xff]  }
 0x1e7   :  { %3695 = vmatpush1.bf16.msra.mxu1 %v11226_v54  ;;  %9734 = vmatpush1.bf16.msra.mxu0 %v12896_v55  ;;  %v12923_v54 = vld [vmem:[#allocation6 + $0x348] ss:$28 sps:$4 sm:$0xff]   ;;  %v11387_v55 = vcombine.high %v337_v51, %v345_v52 }
 0x1e8   :  { %3696 = vmatprep.subr.bf16.mxu1 %v11243_v57  ;;  %9735 = vmatprep.subr.bf16.mxu0 %v12901_v59  ;;  %v12928_v57 = vld [vmem:[#allocation6 + $0x384] ss:$28 sps:$4 sm:$0xff]   ;;  %v353_v59 = vld [vmem:[#allocation2 + $0x8a8] sm:$0xff] }
 0x1eb   :  { %3697 = vmatpush1.bf16.msra.mxu1 %v11242_v2  ;;  %9736 = vmatpush1.bf16.msra.mxu0 %v12899_v3  ;;  %v11386_v2 = vcombine.low %v337_v51, %v345_v52  ;;  %v12931_v3 = vld [vmem:[#allocation6 + $0x3bc] ss:$28 sps:$4 sm:$0xff]  }
 0x1ec   :  { %3698 = vmatprep.subr.bf16.mxu1 %v11259_v4  ;;  %9737 = vmatprep.subr.bf16.mxu0 %v12904_v5  ;;  %v11403_v4 = vcombine.high %v353_v59, %v361_v62  ;;  %v369_v5 = vld [vmem:[#allocation2 + $0x928] sm:$0xff] }
 0x1ed   :  { %v14535_v51 = vld [vmem:[#allocation2 + $0xc68] sm:$0xff] }
 0x1ef   :  { %3699 = vmatpush1.bf16.msra.mxu1 %v11258_v8  ;;  %9738 = vmatpush1.bf16.msra.mxu0 %v12902_v9  ;;  %v11402_v8 = vcombine.low %v353_v59, %v361_v62  ;;  %v12929_v9 = vld [vmem:[#allocation6 + $0x3b8] ss:$28 sps:$4 sm:$0xff]  }
 0x1f0   :  { %3700 = vmatprep.subr.bf16.mxu1 %v11275_v11  ;;  %9739 = vmatprep.subr.bf16.mxu0 %v12907_v12  ;;  %v11419_v11 = vcombine.high %v369_v5, %v377_v6  ;;  %v12934_v12 = vld [vmem:[#allocation6 + $0x3f4] ss:$28 sps:$4 sm:$0xff]  }
 0x1f3   :  { %3701 = vmatpush1.bf16.msra.mxu1 %v11274_v16  ;;  %9740 = vmatpush1.bf16.msra.mxu0 %v12905_v17  ;;  %v14195_v16 = vld [vmem:[%s14741_s0 + $0xc] ss:$16 sps:$4 sm:$0xff]   ;;  %v11418_v17 = vcombine.low %v369_v5, %v377_v6 }
 0x1f4   :  { %3702 = vmatprep.subr.bf16.mxu1 %v11291_v19  ;;  %9741 = vmatprep.subr.bf16.mxu0 %v12910_v20  ;;  %v12932_v19 = vld [vmem:[#allocation6 + $0x3f0] ss:$28 sps:$4 sm:$0xff]   ;;  %v11435_v20 = vcombine.high %v385_v13, %v393_v15 }
 0x1f7   :  { %3703 = vmatpush1.bf16.msra.mxu1 %v11290_v23  ;;  %9742 = vmatpush1.bf16.msra.mxu0 %v12908_v24  ;;  %v409_v23 = vld [vmem:[#allocation2 + $0xa68] sm:$0xff]  ;;  %v11434_v24 = vcombine.low %v385_v13, %v393_v15 }
 0x1f8   :  { %3704 = vmatprep.subr.bf16.mxu1 %v11307_v25  ;;  %9743 = vmatprep.subr.bf16.mxu0 %v12913_v26  ;;  %v12935_v25 = vld [vmem:[#allocation6 + $0x428] ss:$28 sps:$4 sm:$0xff]   ;;  %v11451_v26 = vcombine.high %v401_v22, %v409_v23  ;;  %v11450_v33 = vcombine.low %v401_v22, %v409_v23 }
 0x1fb   :  { %3705 = vmatpush1.bf16.msra.mxu1 %v11306_v29  ;;  %9744 = vmatpush1.bf16.msra.mxu0 %v12911_v30  ;;  %v425_v29 = vld [vmem:[#allocation2 + $0xae8] sm:$0xff] }
 0x1fc   :  { %3706 = vmatprep.subr.bf16.mxu1 %v11323_v31  ;;  %9745 = vmatprep.subr.bf16.mxu0 %v12916_v32  ;;  %v12938_v30 = vld [vmem:[#allocation6 + $0x460] ss:$28 sps:$4 sm:$0xff]   ;;  %v14520_v31 = vsub.s32 2, %v14429_v47  ;;  %v14523_v32 = vsub.s32 3, %v14429_v47 }
 0x1fe   :  { %v603_v40 = vrot.slane %v14196_v39, %v14520_v31 }
 0x1ff   :  { %3707 = vmatpush1.bf16.msra.mxu1 %v11322_v35  ;;  %9746 = vmatpush1.bf16.msra.mxu0 %v12914_v36  ;;  %v11467_v35 = vcombine.high %v417_v28, %v425_v29  ;;  %v12943_v36 = vld [vmem:[#allocation6 + $0x49c] ss:$28 sps:$4 sm:$0xff]  }
 0x200   :  { %3708 = vmatprep.subr.bf16.mxu1 %v11339_v37  ;;  %9747 = vmatprep.subr.bf16.mxu0 %v12919_v38  ;;  %v433_v37 = vld [vmem:[#allocation2 + $0xb28] sm:$0xff] }
 0x201   :  { %v441_v38 = vld [vmem:[#allocation2 + $0xb68] sm:$0xff] }
 0x203   :  { %3709 = vmatpush1.bf16.msra.mxu1 %v11338_v41  ;;  %9748 = vmatpush1.bf16.msra.mxu0 %v12917_v42  ;;  %v12941_v41 = vld [vmem:[#allocation6 + $0x498] ss:$28 sps:$4 sm:$0xff]   ;;  %v627_v42 = vrot.slane %v589_v34, %v14432_v58 }
 0x204   :  { %3710 = vmatprep.subr.bf16.mxu1 %v11355_v43  ;;  %9749 = vmatprep.subr.bf16.mxu0 %v12922_v44  ;;  %v607_v43 = vrot.slane %v14196_v39, %v14523_v32  ;;  %v11466_v44 = vcombine.low %v417_v28, %v425_v29  ;;  %v489_v28 = vld [vmem:[#allocation2 + $0xce8] sm:$0xff] }
 0x207   :  { %3711 = vmatpush1.bf16.msra.mxu1 %v11354_v46  ;;  %9750 = vmatpush1.bf16.msra.mxu0 %v12920_v48  ;;  %v14530_v46 = vld [vmem:[#allocation2 + $0xbe8] sm:$0xff]  ;;  %v631_v48 = vrot.slane %v589_v34, %v14438_v61 }
 0x208   :  { %3712 = vmatprep.subr.bf16.mxu1 %v11371_v49  ;;  %9751 = vmatprep.subr.bf16.mxu0 %v12925_v50  ;;  %v11483_v49 = vcombine.high %v433_v37, %v441_v38  ;;  %v14533_v50 = vld [vmem:[#allocation2 + $0xc28] sm:$0xff] }
 0x209   :  { %v11514_v13 = vcombine.low %v14533_v50, %v14535_v51 }
 0x20b   :  { %3713 = vmatpush1.bf16.msra.mxu1 %v11370_v53  ;;  %9752 = vmatpush1.bf16.msra.mxu0 %v12923_v54 }
 0x20c   :  { %3725 = vmatprep.subr.bf16.mxu1 %v11387_v55  ;;  %9764 = vmatprep.subr.bf16.mxu0 %v12928_v57 }
 0x20e   :  { %3715 = vmatmul.mubr.bf16.vlgmr.msra.gmra.mrb[12].mxu1 %v14194_v7  ;;  %9754 = vmatmul.mubr.bf16.vlgmr.msra.gmra.mrb[12].mxu0 %v14493_v1 }
 0x20f   :  { %3726 = vmatpush1.bf16.msra.mxu1 %v11386_v2  ;;  %9765 = vmatpush1.bf16.msra.mxu0 %v12926_v63  ;;  %v11482_v2 = vcombine.low %v433_v37, %v441_v38 }
 0x210   :  { %3727 = vmatprep.subr.bf16.mxu1 %v11403_v4  ;;  %9766 = vmatprep.subr.bf16.mxu0 %v12931_v3  ;;  %v12944_v3 = vld [vmem:[#allocation6 + $0x4d0] ss:$28 sps:$4 sm:$0xff]  }
 0x211   :  { %3757 = vmatprep.mubr.bf16.mxu1 %v14195_v16 }
 0x213   :  { %3728 = vmatpush1.bf16.msra.mxu1 %v11402_v8  ;;  %9767 = vmatpush1.bf16.msra.mxu0 %v12929_v9  ;;  %v11499_v9 = vcombine.high %v14528_v45, %v14530_v46 }
 0x214   :  { %3729 = vmatprep.subr.bf16.mxu1 %v11419_v11  ;;  %9768 = vmatprep.subr.bf16.mxu0 %v12934_v12  ;;  %v11498_v11 = vcombine.low %v14528_v45, %v14530_v46  ;;  %v12949_v12 = vld [vmem:[#allocation6 + $0x50c] ss:$28 sps:$4 sm:$0xff]  }
 0x217   :  { %3730 = vmatpush1.bf16.msra.mxu1 %v11418_v17  ;;  %9769 = vmatpush1.bf16.msra.mxu0 %v12932_v19  ;;  %v12947_v17 = vld [vmem:[#allocation6 + $0x508] ss:$28 sps:$4 sm:$0xff]   ;;  %v11515_v19 = vcombine.high %v14533_v50, %v14535_v51 }
 0x218   :  { %3731 = vmatprep.subr.bf16.mxu1 %v11435_v20  ;;  %9770 = vmatprep.subr.bf16.mxu0 %v12937_v21 }
 0x21b   :  { %3732 = vmatpush1.bf16.msra.mxu1 %v11434_v24  ;;  %9771 = vmatpush1.bf16.msra.mxu0 %v12935_v25 }
 0x21c   :  { %3733 = vmatprep.subr.bf16.mxu1 %v11451_v26  ;;  %9772 = vmatprep.subr.bf16.mxu0 %v12940_v27  ;;  %v12952_v26 = vld [vmem:[#allocation6 + $0x544] ss:$28 sps:$4 sm:$0xff]   ;;  %v481_v27 = vld [vmem:[#allocation2 + $0xca8] sm:$0xff] }
 0x21d   :  { %v11530_v51 = vcombine.low %v481_v27, %v489_v28 }
 0x21f   :  { %3734 = vmatpush1.bf16.msra.mxu1 %v11450_v33  ;;  %9773 = vmatpush1.bf16.msra.mxu0 %v12938_v30 }
 0x220   :  { %3735 = vmatprep.subr.bf16.mxu1 %v11467_v35  ;;  %9774 = vmatprep.subr.bf16.mxu0 %v12943_v36  ;;  %v12950_v36 = vld [vmem:[#allocation6 + $0x540] ss:$28 sps:$4 sm:$0xff]  }
 0x221   :  { %v3415_v52 = vpop.f32.mrb[4].mxu1  ;;  %v3673_v54 = vpop.f32.mrb[4].mxu0 }
 0x222   :  { %v12708_v53 = vadd.f32 %v3415_v52, %v603_v40  ;;  %v3417_v55 = vpop.f32.mrb[5].mxu1  ;;  %v12720_v57 = vadd.f32 %v3673_v54, %v627_v42  ;;  %v3675_v62 = vpop.f32.mrb[5].mxu0  ;;  %v12953_v52 = vld [vmem:[#allocation6 + $0x578] ss:$28 sps:$4 sm:$0xff]  }
 0x223   :  { %v12709_v59 = vadd.f32 %v3417_v55, %v607_v43  ;;  %v3419_v63 = vpop.f32.mrb[6].mxu1  ;;  %3736 = vmatpush1.bf16.msra.mxu1 %v11466_v44  ;;  %v12721_v5 = vadd.f32 %v3675_v62, %v631_v48  ;;  %v3677_v7 = vpop.f32.mrb[6].mxu0  ;;  %9775 = vmatpush1.bf16.msra.mxu0 %v12941_v41  ;;  %v12955_v41 = vld [vmem:[#allocation6 + $0x57c] ss:$28 sps:$4 sm:$0xff]   ;;  %v12958_v54 = vld [vmem:[#allocation6 + $0x5b4] ss:$28 sps:$4 sm:$0xff]  }
 0x224   :  { %v3974_v4 = vmul.f32 0.01, %v12708_v53  ;;  %v12710_v6 = vadd.f32 %v3419_v63, %v603_v40  ;;  %v3421_v8 = vpop.f32.mrb[7].mxu1  ;;  %3737 = vmatprep.subr.bf16.mxu1 %v11483_v49  ;;  %vm3942_vm8 = vcmp.gt.f32.partialorder %v12708_v53, 0.0  ;;  %9776 = vmatprep.subr.bf16.mxu0 %v12946_v56  ;;  %vm3948_vm9 = vcmp.gt.f32.partialorder %v12720_v57, 0.0  ;;  %v3679_v16 = vpop.f32.mrb[7].mxu0 }
 0x225   :  { %v3980_v15 = vmul.f32 0.01, %v12720_v57  ;;  %vm3943_vm11 = vcmp.gt.f32.partialorder %v12709_v59, 0.0  ;;  %v3975_v20 = vmul.f32 0.01, %v12709_v59  ;;  %v12722_v22 = vadd.f32 %v3677_v7, %v627_v42  ;;  %v497_v56 = vld [vmem:[#allocation2 + $0xd28] sm:$0xff] }
 0x226   :  { %vm3958_vm10 = vcmp.gt.f32.partialorder %v12710_v6, 0.0  ;;  %v3990_v21 = vmul.f32 0.01, %v12710_v6  ;;  %v4006_v23 = vsel %vm3942_vm8, %v12708_v53, %v3974_v4  ;;  %vm3949_vm12 = vcmp.gt.f32.partialorder %v12721_v5, 0.0  ;;  %v505_v49 = vld [vmem:[#allocation2 + $0xd68] sm:$0xff] }
 0x227   :  { %3738 = vmatpush1.bf16.msra.mxu1 %v11482_v2  ;;  %v12711_v24 = vadd.f32 %v3421_v8, %v607_v43  ;;  %v12723_v25 = vadd.f32 %v3679_v16, %v631_v48  ;;  %9777 = vmatpush1.bf16.msra.mxu0 %v12944_v3  ;;  %v3981_v29 = vmul.f32 0.01, %v12721_v5  ;;  %vm3964_vm13 = vcmp.gt.f32.partialorder %v12722_v22, 0.0  ;;  %v513_v55 = vld [vmem:[#allocation2 + $0xda8] sm:$0xff]  ;;  %v12956_v62 = vld [vmem:[#allocation6 + $0x5b0] ss:$28 sps:$4 sm:$0xff]  }
 0x228   :  { %3739 = vmatprep.subr.bf16.mxu1 %v11499_v9  ;;  %v4022_v30 = vsel %vm3958_vm10, %v12710_v6, %v3990_v21  ;;  %v3996_v33 = vmul.f32 0.01, %v12722_v22  ;;  %9778 = vmatprep.subr.bf16.mxu0 %v12949_v12  ;;  %v4012_v37 = vsel %vm3948_vm9, %v12720_v57, %v3980_v15  ;;  %v11531_v40 = vcombine.high %v481_v27, %v489_v28  ;;  %v521_v57 = vld [vmem:[#allocation2 + $0xde8] sm:$0xff]  ;;  %v12961_v2 = vld [vmem:[#allocation6 + $0x5ec] ss:$28 sps:$4 sm:$0xff]  }
 0x229   :  { %v14547_v34 = vpack.c.bf16 %v4022_v30, %v4006_v23  ;;  %vm3959_vm14 = vcmp.gt.f32.partialorder %v12711_v24, 0.0  ;;  %v3991_v35 = vmul.f32 0.01, %v12711_v24  ;;  %vm3965_vm15 = vcmp.gt.f32.partialorder %v12723_v25, 0.0  ;;  %v529_v3 = vld [vmem:[#allocation2 + $0xe28] sm:$0xff]  ;;  %v83_v30 = vld [vmem:[#allocation2 + $0x38] sm:$0xff] }
 0x22a   :  { %v4028_v38 = vsel %vm3964_vm13, %v12722_v22, %v3996_v33  ;;  %v3997_v39 = vmul.f32 0.01, %v12723_v25  ;;  %v4007_v42 = vsel %vm3943_vm11, %v12709_v59, %v3975_v20  ;;  %v4013_v45 = vsel %vm3949_vm12, %v12721_v5, %v3981_v29  ;;  %v537_v4 = vld [vmem:[#allocation2 + $0xe68] sm:$0xff]  ;;  %v12959_v6 = vld [vmem:[#allocation6 + $0x5e8] ss:$28 sps:$4 sm:$0xff]  }
 0x22b   :  { %3740 = vmatpush1.bf16.msra.mxu1 %v11498_v11  ;;  %v14551_v43 = vpack.c.bf16 %v4028_v38, %v4012_v37  ;;  %v4023_v44 = vsel %vm3959_vm14, %v12711_v24, %v3991_v35  ;;  %9779 = vmatpush1.bf16.msra.mxu0 %v12947_v17  ;;  %v11547_v53 = vcombine.high %v497_v56, %v505_v49  ;;  %v12964_v8 = vld [vmem:[#allocation6 + $0x624] ss:$28 sps:$4 sm:$0xff]   ;;  %v545_v9 = vld [vmem:[#allocation2 + $0xea8] sm:$0xff]  ;;  %v12970_v23 = vld [vmem:[#allocation6 + $0x694] ss:$28 sps:$4 sm:$0xff]  }
 0x22c   :  { %3741 = vmatprep.subr.bf16.mxu1 %v11515_v19  ;;  %v14554_v46 = vpack.c.bf16 %v4023_v44, %v4007_v42  ;;  %v4029_v48 = vsel %vm3965_vm15, %v12723_v25, %v3997_v39  ;;  %9780 = vmatprep.subr.bf16.mxu0 %v12952_v26  ;;  %v11546_v59 = vcombine.low %v497_v56, %v505_v49  ;;  %v553_v11 = vld [vmem:[#allocation2 + $0xee8] sm:$0xff]  ;;  %v12968_v27 = vld [vmem:[#allocation6 + $0x690] ss:$28 sps:$4 sm:$0xff]   ;;  %v12976_v38 = vld [vmem:[#allocation6 + $0x704] ss:$28 sps:$4 sm:$0xff]  }
 0x22d   :  { %v14557_v50 = vpack.c.bf16 %v4029_v48, %v4013_v45  ;;  %v11563_v63 = vcombine.high %v513_v55, %v521_v57  ;;  %v11562_v5 = vcombine.low %v513_v55, %v521_v57  ;;  %v11579_v7 = vcombine.high %v529_v3, %v537_v4  ;;  %v12967_v16 = vld [vmem:[#allocation6 + $0x65c] ss:$28 sps:$4 sm:$0xff]   ;;  %v12973_v29 = vld [vmem:[#allocation6 + $0x6cc] ss:$28 sps:$4 sm:$0xff]  }
 0x22e   :  { %9796 = vmatprep.mubr.bf16.mxu0 %v14554_v46  ;;  %v11578_v12 = vcombine.low %v529_v3, %v537_v4  ;;  %v11595_v15 = vcombine.high %v545_v9, %v553_v11  ;;  %v561_v17 = vld [vmem:[#allocation2 + $0xf28] sm:$0xff]  ;;  %v11594_v20 = vcombine.low %v545_v9, %v553_v11  ;;  %v91_v33 = vld [vmem:[#allocation2 + $0x78] sm:$0xff]  ;;  %v12988_v9 = vld [vmem:[#allocation6 + $0x7e4] ss:$28 sps:$4 sm:$0xff]  }
 0x22f   :  { %3742 = vmatpush1.bf16.msra.mxu1 %v11514_v13  ;;  %9781 = vmatpush1.bf16.msra.mxu0 %v12950_v36  ;;  %v12962_v13 = vld [vmem:[#allocation6 + $0x620] ss:$28 sps:$4 sm:$0xff]   ;;  %v12965_v21 = vld [vmem:[#allocation6 + $0x658] ss:$28 sps:$4 sm:$0xff]   ;;  %v12971_v36 = vld [vmem:[#allocation6 + $0x6c8] ss:$28 sps:$4 sm:$0xff]   ;;  %v11135_v37 = vcombine.high %v83_v30, %v91_v33  ;;  %v11134_v42 = vcombine.low %v83_v30, %v91_v33 }
 0x230   :  { %3743 = vmatprep.subr.bf16.mxu1 %v11531_v40  ;;  %9782 = vmatprep.subr.bf16.mxu0 %v12955_v41  ;;  %v569_v19 = vld [vmem:[#allocation2 + $0xf68] sm:$0xff]  ;;  %v99_v39 = vld [vmem:[#allocation2 + $0xb8] sm:$0xff] }
 0x231   :  { %v11611_v22 = vcombine.high %v561_v17, %v569_v19  ;;  %v577_v24 = vld [vmem:[#allocation2 + $0xfa8] sm:$0xff]  ;;  %v11610_v26 = vcombine.low %v561_v17, %v569_v19  ;;  %v107_v40 = vld [vmem:[#allocation2 + $0xf8] sm:$0xff] }
 0x232   :  { %v585_v25 = vld [vmem:[#allocation2 + $0xfe8] sm:$0xff]  ;;  %v115_v56 = vld [vmem:[#allocation2 + $0x138] sm:$0xff]  ;;  %v11151_v48 = vcombine.high %v99_v39, %v107_v40 }
 0x233   :  { %3744 = vmatpush1.bf16.msra.mxu1 %v11530_v51  ;;  %9783 = vmatpush1.bf16.msra.mxu0 %v12953_v52  ;;  %v11627_v28 = vcombine.high %v577_v24, %v585_v25  ;;  %v11626_v35 = vcombine.low %v577_v24, %v585_v25  ;;  %v12974_v41 = vld [vmem:[#allocation6 + $0x700] ss:$28 sps:$4 sm:$0xff]   ;;  %v123_v45 = vld [vmem:[#allocation2 + $0x178] sm:$0xff]  ;;  %v11150_v51 = vcombine.low %v99_v39, %v107_v40  ;;  %v12977_v52 = vld [vmem:[#allocation6 + $0x738] ss:$28 sps:$4 sm:$0xff]  }
 0x234   :  { %3745 = vmatprep.subr.bf16.mxu1 %v11547_v53  ;;  %9784 = vmatprep.subr.bf16.mxu0 %v12958_v54  ;;  %v12979_v44 = vld [vmem:[#allocation6 + $0x73c] ss:$28 sps:$4 sm:$0xff]   ;;  %v11167_v53 = vcombine.high %v115_v56, %v123_v45  ;;  %v12982_v54 = vld [vmem:[#allocation6 + $0x774] ss:$28 sps:$4 sm:$0xff]   ;;  %v131_v55 = vld [vmem:[#allocation2 + $0x1b8] sm:$0xff] }
 0x235   :  { %v14197_v49 = vld [vmem:[%s14741_s0 + $0x8] ss:$16 sps:$4 sm:$0xff]   ;;  %v12994_v24 = vld [vmem:[#allocation6 + $0x854] ss:$28 sps:$4 sm:$0xff]   ;;  %v13000_v39 = vld [vmem:[#allocation6 + $0x8c4] ss:$28 sps:$4 sm:$0xff]  }
 0x236   :  { %v139_v57 = vld [vmem:[#allocation2 + $0x1f8] sm:$0xff]  ;;  %v12991_v17 = vld [vmem:[#allocation6 + $0x81c] ss:$28 sps:$4 sm:$0xff]  }
 0x237   :  { %3746 = vmatpush1.bf16.msra.mxu1 %v11546_v59  ;;  %9785 = vmatpush1.bf16.msra.mxu0 %v12956_v62  ;;  %v14198_v59 = vld [vmem:[%s14741_s0 + $0x4] ss:$16 sps:$4 sm:$0xff]   ;;  %v11166_v62 = vcombine.low %v115_v56, %v123_v45  ;;  %v12985_v3 = vld [vmem:[#allocation6 + $0x7ac] ss:$28 sps:$4 sm:$0xff]   ;;  %v13003_v45 = vld [vmem:[#allocation6 + $0x8fc] ss:$28 sps:$4 sm:$0xff]  }
 0x238   :  { %3747 = vmatprep.subr.bf16.mxu1 %v11563_v63  ;;  %9786 = vmatprep.subr.bf16.mxu0 %v12961_v2  ;;  %v12980_v63 = vld [vmem:[#allocation6 + $0x770] ss:$28 sps:$4 sm:$0xff]   ;;  %v11183_v2 = vcombine.high %v131_v55, %v139_v57 }
 0x239   :  { %v147_v4 = vld [vmem:[#allocation2 + $0x238] sm:$0xff] }
 0x23a   :  { %v163_v11 = vld [vmem:[#allocation2 + $0x2b8] sm:$0xff] }
 0x23b   :  { %3748 = vmatpush1.bf16.msra.mxu1 %v11562_v5  ;;  %9787 = vmatpush1.bf16.msra.mxu0 %v12959_v6  ;;  %v155_v5 = vld [vmem:[#allocation2 + $0x278] sm:$0xff]  ;;  %v11182_v6 = vcombine.low %v131_v55, %v139_v57 }
 0x23c   :  { %3749 = vmatprep.subr.bf16.mxu1 %v11579_v7  ;;  %9788 = vmatprep.subr.bf16.mxu0 %v12964_v8  ;;  %v12983_v7 = vld [vmem:[#allocation6 + $0x7a8] ss:$28 sps:$4 sm:$0xff]   ;;  %v11199_v8 = vcombine.high %v147_v4, %v155_v5 }
 0x23d   :  { %v179_v19 = vld [vmem:[#allocation2 + $0x338] sm:$0xff] }
 0x23e   :  { %v195_v25 = vld [vmem:[#allocation2 + $0x3b8] sm:$0xff] }
 0x23f   :  { %3750 = vmatpush1.bf16.msra.mxu1 %v11578_v12  ;;  %9789 = vmatpush1.bf16.msra.mxu0 %v12962_v13  ;;  %v171_v12 = vld [vmem:[#allocation2 + $0x2f8] sm:$0xff]  ;;  %v11198_v13 = vcombine.low %v147_v4, %v155_v5 }
 0x240   :  { %3751 = vmatprep.subr.bf16.mxu1 %v11595_v15  ;;  %9790 = vmatprep.subr.bf16.mxu0 %v12967_v16  ;;  %v12986_v15 = vld [vmem:[#allocation6 + $0x7e0] ss:$28 sps:$4 sm:$0xff]   ;;  %v11215_v16 = vcombine.high %v163_v11, %v171_v12  ;;  %v12997_v30 = vld [vmem:[#allocation6 + $0x88c] ss:$28 sps:$4 sm:$0xff]  }
 0x241   :  { %v211_v33 = vld [vmem:[#allocation2 + $0x438] sm:$0xff] }
 0x242   :  { %v227_v40 = vld [vmem:[#allocation2 + $0x4b8] sm:$0xff] }
 0x243   :  { %3752 = vmatpush1.bf16.msra.mxu1 %v11594_v20  ;;  %9791 = vmatpush1.bf16.msra.mxu0 %v12965_v21  ;;  %v187_v20 = vld [vmem:[#allocation2 + $0x378] sm:$0xff]  ;;  %v11214_v21 = vcombine.low %v163_v11, %v171_v12 }
 0x244   :  { %3753 = vmatprep.subr.bf16.mxu1 %v11611_v22  ;;  %9792 = vmatprep.subr.bf16.mxu0 %v12970_v23  ;;  %v12989_v22 = vld [vmem:[#allocation6 + $0x818] ss:$28 sps:$4 sm:$0xff]   ;;  %v11231_v23 = vcombine.high %v179_v19, %v187_v20  ;;  %v259_v55 = vld [vmem:[#allocation2 + $0x5b8] sm:$0xff] }
 0x245   :  { %v267_v57 = vld [vmem:[#allocation2 + $0x5f8] sm:$0xff] }
 0x246   :  { %v283_v4 = vld [vmem:[#allocation2 + $0x678] sm:$0xff]  ;;  %v11310_v5 = vcombine.low %v259_v55, %v267_v57 }
 0x247   :  { %3754 = vmatpush1.bf16.msra.mxu1 %v11610_v26  ;;  %9793 = vmatpush1.bf16.msra.mxu0 %v12968_v27  ;;  %v203_v26 = vld [vmem:[#allocation2 + $0x3f8] sm:$0xff]  ;;  %v11230_v27 = vcombine.low %v179_v19, %v187_v20 }
 0x248   :  { %3755 = vmatprep.subr.bf16.mxu1 %v11627_v28  ;;  %9794 = vmatprep.subr.bf16.mxu0 %v12973_v29  ;;  %v12992_v28 = vld [vmem:[#allocation6 + $0x850] ss:$28 sps:$4 sm:$0xff]   ;;  %v11247_v29 = vcombine.high %v195_v25, %v203_v26 }
 0x249   :  { %v299_v11 = vld [vmem:[#allocation2 + $0x6f8] sm:$0xff] }
 0x24a   :  { %v315_v19 = vld [vmem:[#allocation2 + $0x778] sm:$0xff] }
 0x24b   :  { %3756 = vmatpush1.bf16.msra.mxu1 %v11626_v35  ;;  %9795 = vmatpush1.bf16.msra.mxu0 %v12971_v36  ;;  %v219_v35 = vld [vmem:[#allocation2 + $0x478] sm:$0xff]  ;;  %v11246_v36 = vcombine.low %v195_v25, %v203_v26 }
 0x24c   :  { %3854 = vmatprep.subr.bf16.mxu1 %v11135_v37  ;;  %9807 = vmatprep.subr.bf16.mxu0 %v12976_v38  ;;  %v12995_v37 = vld [vmem:[#allocation6 + $0x888] ss:$28 sps:$4 sm:$0xff]   ;;  %v11263_v38 = vcombine.high %v211_v33, %v219_v35 }
 0x24d   :  { %v331_v25 = vld [vmem:[#allocation2 + $0x7f8] sm:$0xff] }
 0x24e   :  { %3758 = vmatmul.mubr.bf16.vlgmr.msra.gmra.mrb[12].mxu1 %v14197_v49  ;;  %9797 = vmatmul.mubr.bf16.vlgmr.msra.gmra.mrb[12].mxu0 %v14547_v34  ;;  %v251_v49 = vld [vmem:[#allocation2 + $0x578] sm:$0xff] }
 0x24f   :  { %3855 = vmatpush1.bf16.msra.mxu1 %v11134_v42  ;;  %9808 = vmatpush1.bf16.msra.mxu0 %v12974_v41  ;;  %v235_v41 = vld [vmem:[#allocation2 + $0x4f8] sm:$0xff]  ;;  %v11262_v42 = vcombine.low %v211_v33, %v219_v35 }
 0x250   :  { %9839 = vmatprep.mubr.bf16.mxu0 %v14503_v18  ;;  %3856 = vmatprep.subr.bf16.mxu1 %v11151_v48  ;;  %v11279_v56 = vcombine.high %v227_v40, %v235_v41  ;;  %v243_v48 = vld [vmem:[#allocation2 + $0x538] sm:$0xff] }
 0x251   :  { %9809 = vmatprep.subr.bf16.mxu0 %v12979_v44  ;;  %3886 = vmatprep.mubr.bf16.mxu1 %v14198_v59  ;;  %v12998_v44 = vld [vmem:[#allocation6 + $0x8c0] ss:$28 sps:$4 sm:$0xff]   ;;  %v11294_v59 = vcombine.low %v243_v48, %v251_v49  ;;  %v347_v33 = vld [vmem:[#allocation2 + $0x878] sm:$0xff] }
 0x253   :  { %3857 = vmatpush1.bf16.msra.mxu1 %v11150_v51  ;;  %9810 = vmatpush1.bf16.msra.mxu0 %v12977_v52  ;;  %v11278_v51 = vcombine.low %v227_v40, %v235_v41  ;;  %v13001_v52 = vld [vmem:[#allocation6 + $0x8f8] ss:$28 sps:$4 sm:$0xff]   ;;  %v363_v40 = vld [vmem:[#allocation2 + $0x8f8] sm:$0xff]  ;;  %v13022_v41 = vld [vmem:[#allocation6 + $0xa80] ss:$28 sps:$4 sm:$0xff]  }
 0x254   :  { %3858 = vmatprep.subr.bf16.mxu1 %v11167_v53  ;;  %9811 = vmatprep.subr.bf16.mxu0 %v12982_v54  ;;  %v11295_v53 = vcombine.high %v243_v48, %v251_v49  ;;  %v13006_v54 = vld [vmem:[#allocation6 + $0x934] ss:$28 sps:$4 sm:$0xff]  }
 0x255   :  { %v14199_v49 = vld [vmem:[%s14741_s0] ss:$16 sps:$4 sm:$0xff]  }
 0x257   :  { %3859 = vmatpush1.bf16.msra.mxu1 %v11166_v62  ;;  %9812 = vmatpush1.bf16.msra.mxu0 %v12980_v63  ;;  %v13004_v62 = vld [vmem:[#allocation6 + $0x930] ss:$28 sps:$4 sm:$0xff]   ;;  %v11311_v63 = vcombine.high %v259_v55, %v267_v57 }
 0x258   :  { %3860 = vmatprep.subr.bf16.mxu1 %v11183_v2  ;;  %9813 = vmatprep.subr.bf16.mxu0 %v12985_v3  ;;  %v13009_v2 = vld [vmem:[#allocation6 + $0x96c] ss:$28 sps:$4 sm:$0xff]  }
 0x259   :  { %v275_v3 = vld [vmem:[#allocation2 + $0x638] sm:$0xff] }
 0x25a   :  { %v11326_v12 = vcombine.low %v275_v3, %v283_v4  ;;  %v387_v55 = vld [vmem:[#allocation2 + $0x9b8] sm:$0xff] }
 0x25b   :  { %3861 = vmatpush1.bf16.msra.mxu1 %v11182_v6  ;;  %9814 = vmatpush1.bf16.msra.mxu0 %v12983_v7  ;;  %v13007_v6 = vld [vmem:[#allocation6 + $0x968] ss:$28 sps:$4 sm:$0xff]   ;;  %v11327_v7 = vcombine.high %v275_v3, %v283_v4 }
 0x25c   :  { %3862 = vmatprep.subr.bf16.mxu1 %v11199_v8  ;;  %9815 = vmatprep.subr.bf16.mxu0 %v12988_v9  ;;  %v13012_v8 = vld [vmem:[#allocation6 + $0x9a4] ss:$28 sps:$4 sm:$0xff]   ;;  %v291_v9 = vld [vmem:[#allocation2 + $0x6b8] sm:$0xff] }
 0x25d   :  { %v11342_v20 = vcombine.low %v291_v9, %v299_v11  ;;  %v395_v57 = vld [vmem:[#allocation2 + $0x9f8] sm:$0xff] }
 0x25e   :  { %v13033_v3 = vld [vmem:[#allocation6 + $0xb2c] ss:$28 sps:$4 sm:$0xff]  }
 0x25f   :  { %3863 = vmatpush1.bf16.msra.mxu1 %v11198_v13  ;;  %9816 = vmatpush1.bf16.msra.mxu0 %v12986_v15  ;;  %v13010_v13 = vld [vmem:[#allocation6 + $0x9a0] ss:$28 sps:$4 sm:$0xff]   ;;  %v11343_v15 = vcombine.high %v291_v9, %v299_v11  ;;  %v403_v4 = vld [vmem:[#allocation2 + $0xa38] sm:$0xff] }
 0x260   :  { %3864 = vmatprep.subr.bf16.mxu1 %v11215_v16  ;;  %9817 = vmatprep.subr.bf16.mxu0 %v12991_v17  ;;  %v13015_v16 = vld [vmem:[#allocation6 + $0x9dc] ss:$28 sps:$4 sm:$0xff]   ;;  %v307_v17 = vld [vmem:[#allocation2 + $0x738] sm:$0xff]  ;;  %v13036_v9 = vld [vmem:[#allocation6 + $0xb64] ss:$28 sps:$4 sm:$0xff]  }
 0x261   :  { %v11358_v26 = vcombine.low %v307_v17, %v315_v19  ;;  %v419_v11 = vld [vmem:[#allocation2 + $0xab8] sm:$0xff] }
 0x263   :  { %3865 = vmatpush1.bf16.msra.mxu1 %v11214_v21  ;;  %9818 = vmatpush1.bf16.msra.mxu0 %v12989_v22  ;;  %v13013_v21 = vld [vmem:[#allocation6 + $0x9d8] ss:$28 sps:$4 sm:$0xff]   ;;  %v11359_v22 = vcombine.high %v307_v17, %v315_v19  ;;  %v13034_v17 = vld [vmem:[#allocation6 + $0xb60] ss:$28 sps:$4 sm:$0xff]  }
 0x264   :  { %3866 = vmatprep.subr.bf16.mxu1 %v11231_v23  ;;  %9819 = vmatprep.subr.bf16.mxu0 %v12994_v24  ;;  %v13018_v23 = vld [vmem:[#allocation6 + $0xa14] ss:$28 sps:$4 sm:$0xff]   ;;  %v323_v24 = vld [vmem:[#allocation2 + $0x7b8] sm:$0xff] }
 0x265   :  { %v11374_v35 = vcombine.low %v323_v24, %v331_v25 }
 0x267   :  { %3867 = vmatpush1.bf16.msra.mxu1 %v11230_v27  ;;  %9820 = vmatpush1.bf16.msra.mxu0 %v12992_v28  ;;  %v13016_v27 = vld [vmem:[#allocation6 + $0xa10] ss:$28 sps:$4 sm:$0xff]   ;;  %v11375_v28 = vcombine.high %v323_v24, %v331_v25  ;;  %v14580_v25 = vld [vmem:[#allocation4 + $0x8] sm:$0xff] }
 0x268   :  { %3868 = vmatprep.subr.bf16.mxu1 %v11247_v29  ;;  %9821 = vmatprep.subr.bf16.mxu0 %v12997_v30  ;;  %v13021_v29 = vld [vmem:[#allocation6 + $0xa4c] ss:$28 sps:$4 sm:$0xff]  }
 0x269   :  { %v339_v30 = vld [vmem:[#allocation2 + $0x838] sm:$0xff] }
 0x26b   :  { %3869 = vmatpush1.bf16.msra.mxu1 %v11246_v36  ;;  %9822 = vmatpush1.bf16.msra.mxu0 %v12995_v37  ;;  %v13019_v36 = vld [vmem:[#allocation6 + $0xa48] ss:$28 sps:$4 sm:$0xff]   ;;  %v11391_v37 = vcombine.high %v339_v30, %v347_v33 }
 0x26c   :  { %3870 = vmatprep.subr.bf16.mxu1 %v11263_v38  ;;  %9823 = vmatprep.subr.bf16.mxu0 %v13000_v39  ;;  %v13024_v38 = vld [vmem:[#allocation6 + $0xa84] ss:$28 sps:$4 sm:$0xff]   ;;  %v355_v39 = vld [vmem:[#allocation2 + $0x8b8] sm:$0xff] }
 0x26d   :  { %v11407_v48 = vcombine.high %v355_v39, %v363_v40 }
 0x26f   :  { %3871 = vmatpush1.bf16.msra.mxu1 %v11262_v42  ;;  %9824 = vmatpush1.bf16.msra.mxu0 %v12998_v44  ;;  %v11390_v42 = vcombine.low %v339_v30, %v347_v33  ;;  %v13027_v44 = vld [vmem:[#allocation6 + $0xabc] ss:$28 sps:$4 sm:$0xff]  }
 0x270   :  { %3872 = vmatprep.subr.bf16.mxu1 %v11279_v56  ;;  %9825 = vmatprep.subr.bf16.mxu0 %v13003_v45  ;;  %v371_v56 = vld [vmem:[#allocation2 + $0x938] sm:$0xff]  ;;  %v13037_v30 = vld [vmem:[#allocation6 + $0xb98] ss:$28 sps:$4 sm:$0xff]  }
 0x271   :  { %v379_v45 = vld [vmem:[#allocation2 + $0x978] sm:$0xff] }
 0x273   :  { %3873 = vmatpush1.bf16.msra.mxu1 %v11278_v51  ;;  %9826 = vmatpush1.bf16.msra.mxu0 %v13001_v52  ;;  %v11406_v51 = vcombine.low %v355_v39, %v363_v40  ;;  %v13025_v52 = vld [vmem:[#allocation6 + $0xab8] ss:$28 sps:$4 sm:$0xff]  }
 0x274   :  { %3874 = vmatprep.subr.bf16.mxu1 %v11295_v53  ;;  %9827 = vmatprep.subr.bf16.mxu0 %v13006_v54  ;;  %v11423_v53 = vcombine.high %v371_v56, %v379_v45  ;;  %v13030_v54 = vld [vmem:[#allocation6 + $0xaf4] ss:$28 sps:$4 sm:$0xff]  }
 0x277   :  { %3875 = vmatpush1.bf16.msra.mxu1 %v11294_v59  ;;  %9828 = vmatpush1.bf16.msra.mxu0 %v13004_v62  ;;  %v14200_v59 = vld [vmem:[%s14741_s0 + $0xc] ss:$16 sps:$4 sm:$0xff]   ;;  %v11422_v62 = vcombine.low %v371_v56, %v379_v45 }
 0x278   :  { %3876 = vmatprep.subr.bf16.mxu1 %v11311_v63  ;;  %9829 = vmatprep.subr.bf16.mxu0 %v13009_v2  ;;  %v13028_v63 = vld [vmem:[#allocation6 + $0xaf0] ss:$28 sps:$4 sm:$0xff]   ;;  %v11439_v2 = vcombine.high %v387_v55, %v395_v57 }
 0x27b   :  { %3877 = vmatpush1.bf16.msra.mxu1 %v11310_v5  ;;  %9830 = vmatpush1.bf16.msra.mxu0 %v13007_v6  ;;  %v411_v5 = vld [vmem:[#allocation2 + $0xa78] sm:$0xff]  ;;  %v11438_v6 = vcombine.low %v387_v55, %v395_v57 }
 0x27c   :  { %3878 = vmatprep.subr.bf16.mxu1 %v11327_v7  ;;  %9831 = vmatprep.subr.bf16.mxu0 %v13012_v8  ;;  %v13031_v7 = vld [vmem:[#allocation6 + $0xb28] ss:$28 sps:$4 sm:$0xff]   ;;  %v11455_v8 = vcombine.high %v403_v4, %v411_v5 }
 0x27f   :  { %3879 = vmatpush1.bf16.msra.mxu1 %v11326_v12  ;;  %9832 = vmatpush1.bf16.msra.mxu0 %v13010_v13  ;;  %v427_v12 = vld [vmem:[#allocation2 + $0xaf8] sm:$0xff]  ;;  %v14576_v13 = vsub.s32 6, %v14429_v47 }
 0x280   :  { %3880 = vmatprep.subr.bf16.mxu1 %v11343_v15  ;;  %9833 = vmatprep.subr.bf16.mxu0 %v13015_v16  ;;  %v11454_v15 = vcombine.low %v403_v4, %v411_v5  ;;  %v622_v16 = vsub.s32 7, %v14429_v47  ;;  %v11471_v19 = vcombine.high %v419_v11, %v427_v12 }
 0x283   :  { %3881 = vmatpush1.bf16.msra.mxu1 %v11342_v20  ;;  %9834 = vmatpush1.bf16.msra.mxu0 %v13013_v21  ;;  %v13039_v20 = vld [vmem:[#allocation6 + $0xb9c] ss:$28 sps:$4 sm:$0xff]   ;;  %v435_v21 = vld [vmem:[#allocation2 + $0xb38] sm:$0xff] }
 0x284   :  { %3882 = vmatprep.subr.bf16.mxu1 %v11359_v22  ;;  %9835 = vmatprep.subr.bf16.mxu0 %v13018_v23  ;;  %v443_v22 = vld [vmem:[#allocation2 + $0xb78] sm:$0xff]  ;;  %v14201_v23 = vld [vmem:[#allocation4] sm:$0xff] }
 0x285   :  { %v619_v24 = vrot.slane %v14201_v23, %v14576_v13  ;;  %v11487_v33 = vcombine.high %v435_v21, %v443_v22 }
 0x287   :  { %3883 = vmatpush1.bf16.msra.mxu1 %v11358_v26  ;;  %9836 = vmatpush1.bf16.msra.mxu0 %v13016_v27  ;;  %v643_v26 = vrot.slane %v14580_v25, %v14435_v60  ;;  %v623_v27 = vrot.slane %v14201_v23, %v622_v16 }
 0x288   :  { %3884 = vmatprep.subr.bf16.mxu1 %v11375_v28  ;;  %9837 = vmatprep.subr.bf16.mxu0 %v13021_v29  ;;  %v11470_v28 = vcombine.low %v419_v11, %v427_v12  ;;  %v647_v29 = vrot.slane %v14580_v25, %v14443_v0 }
 0x28b   :  { %3885 = vmatpush1.bf16.msra.mxu1 %v11374_v35  ;;  %9838 = vmatpush1.bf16.msra.mxu0 %v13019_v36  ;;  %v13042_v36 = vld [vmem:[#allocation6 + $0xbd4] ss:$28 sps:$4 sm:$0xff]  }
 0x28c   :  { %3897 = vmatprep.subr.bf16.mxu1 %v11391_v37  ;;  %9850 = vmatprep.subr.bf16.mxu0 %v13024_v38  ;;  %v451_v37 = vld [vmem:[#allocation2 + $0xbb8] sm:$0xff] }
 0x28d   :  { %v459_v38 = vld [vmem:[#allocation2 + $0xbf8] sm:$0xff] }
 0x28e   :  { %3887 = vmatmul.mubr.bf16.vlgmr.msra.gmra.mrb[16].mxu1 %v14199_v49  ;;  %9840 = vmatmul.mubr.bf16.vlgmr.msra.gmra.mrb[12].mxu0 %v14497_v10 }
 0x28f   :  { %3898 = vmatpush1.bf16.msra.mxu1 %v11390_v42  ;;  %9851 = vmatpush1.bf16.msra.mxu0 %v13022_v41  ;;  %v14588_v42 = vld [vmem:[#allocation2 + $0xc38] sm:$0xff] }
 0x290   :  { %3899 = vmatprep.subr.bf16.mxu1 %v11407_v48  ;;  %9852 = vmatprep.subr.bf16.mxu0 %v13027_v44  ;;  %v14590_v44 = vld [vmem:[#allocation2 + $0xc78] sm:$0xff] }
 0x291   :  { %3929 = vmatprep.mubr.bf16.mxu1 %v14200_v59  ;;  %v13040_v59 = vld [vmem:[#allocation6 + $0xbd0] ss:$28 sps:$4 sm:$0xff]  }
 0x293   :  { %3900 = vmatpush1.bf16.msra.mxu1 %v11406_v51  ;;  %9853 = vmatpush1.bf16.msra.mxu0 %v13025_v52  ;;  %v11486_v51 = vcombine.low %v435_v21, %v443_v22  ;;  %v491_v21 = vld [vmem:[#allocation2 + $0xcf8] sm:$0xff] }
 0x294   :  { %3901 = vmatprep.subr.bf16.mxu1 %v11423_v53  ;;  %9854 = vmatprep.subr.bf16.mxu0 %v13030_v54 }
 0x297   :  { %3902 = vmatpush1.bf16.msra.mxu1 %v11422_v62  ;;  %9855 = vmatpush1.bf16.msra.mxu0 %v13028_v63  ;;  %v11503_v62 = vcombine.high %v451_v37, %v459_v38  ;;  %v11502_v63 = vcombine.low %v451_v37, %v459_v38  ;;  %v13046_v38 = vld [vmem:[#allocation6 + $0xc40] ss:$28 sps:$4 sm:$0xff]  }
 0x298   :  { %3903 = vmatprep.subr.bf16.mxu1 %v11439_v2  ;;  %9856 = vmatprep.subr.bf16.mxu0 %v13033_v3  ;;  %v13045_v2 = vld [vmem:[#allocation6 + $0xc0c] ss:$28 sps:$4 sm:$0xff]   ;;  %v11518_v3 = vcombine.low %v14588_v42, %v14590_v44 }
 0x29b   :  { %3904 = vmatpush1.bf16.msra.mxu1 %v11438_v6  ;;  %9857 = vmatpush1.bf16.msra.mxu0 %v13031_v7  ;;  %v13043_v6 = vld [vmem:[#allocation6 + $0xc08] ss:$28 sps:$4 sm:$0xff]   ;;  %v11519_v7 = vcombine.high %v14588_v42, %v14590_v44  ;;  %v13051_v42 = vld [vmem:[#allocation6 + $0xc7c] ss:$28 sps:$4 sm:$0xff]  }
 0x29c   :  { %3905 = vmatprep.subr.bf16.mxu1 %v11455_v8  ;;  %9858 = vmatprep.subr.bf16.mxu0 %v13036_v9  ;;  %v499_v44 = vld [vmem:[#allocation2 + $0xd38] sm:$0xff] }
 0x29f   :  { %3906 = vmatpush1.bf16.msra.mxu1 %v11454_v15  ;;  %9859 = vmatpush1.bf16.msra.mxu0 %v13034_v17 }
 0x2a0   :  { %3907 = vmatprep.subr.bf16.mxu1 %v11471_v19  ;;  %9860 = vmatprep.subr.bf16.mxu0 %v13039_v20  ;;  %v13048_v19 = vld [vmem:[#allocation6 + $0xc44] ss:$28 sps:$4 sm:$0xff]   ;;  %v483_v20 = vld [vmem:[#allocation2 + $0xcb8] sm:$0xff] }
 0x2a1   :  { %v3587_v35 = vpop.f32.mrb[8].mxu1  ;;  %v3845_v40 = vpop.f32.mrb[8].mxu0 }
 0x2a2   :  { %v12716_v39 = vadd.f32 %v3587_v35, %v619_v24  ;;  %v3589_v41 = vpop.f32.mrb[9].mxu1  ;;  %v12728_v56 = vadd.f32 %v3845_v40, %v643_v26  ;;  %v3847_v48 = vpop.f32.mrb[9].mxu0 }
 0x2a3   :  { %v12717_v45 = vadd.f32 %v3589_v41, %v623_v27  ;;  %v3591_v49 = vpop.f32.mrb[10].mxu1  ;;  %3908 = vmatpush1.bf16.msra.mxu1 %v11470_v28  ;;  %v12729_v53 = vadd.f32 %v3847_v48, %v647_v29  ;;  %v3849_v55 = vpop.f32.mrb[10].mxu0  ;;  %9861 = vmatpush1.bf16.msra.mxu0 %v13037_v30 }
 0x2a4   :  { %v3978_v52 = vmul.f32 0.01, %v12716_v39  ;;  %v12718_v54 = vadd.f32 %v3591_v49, %v619_v24  ;;  %v3593_v57 = vpop.f32.mrb[11].mxu1  ;;  %3909 = vmatprep.subr.bf16.mxu1 %v11487_v33  ;;  %vm3946_vm0 = vcmp.gt.f32.partialorder %v12716_v39, 0.0  ;;  %9862 = vmatprep.subr.bf16.mxu0 %v13042_v36  ;;  %vm3952_vm1 = vcmp.gt.f32.partialorder %v12728_v56, 0.0  ;;  %v3851_v5 = vpop.f32.mrb[11].mxu0 }
 0x2a5   :  { %v3984_v4 = vmul.f32 0.01, %v12728_v56  ;;  %vm3947_vm3 = vcmp.gt.f32.partialorder %v12717_v45, 0.0  ;;  %v3979_v8 = vmul.f32 0.01, %v12717_v45  ;;  %v12730_v11 = vadd.f32 %v3849_v55, %v643_v26 }
 0x2a6   :  { %vm3962_vm2 = vcmp.gt.f32.partialorder %v12718_v54, 0.0  ;;  %v3994_v9 = vmul.f32 0.01, %v12718_v54  ;;  %v4010_v12 = vsel %vm3946_vm0, %v12716_v39, %v3978_v52  ;;  %vm3953_vm4 = vcmp.gt.f32.partialorder %v12729_v53, 0.0  ;;  %v13049_v49 = vld [vmem:[#allocation6 + $0xc78] ss:$28 sps:$4 sm:$0xff]  }
 0x2a7   :  { %3910 = vmatpush1.bf16.msra.mxu1 %v11486_v51  ;;  %v12719_v15 = vadd.f32 %v3593_v57, %v623_v27  ;;  %v12731_v17 = vadd.f32 %v3851_v5, %v647_v29  ;;  %9863 = vmatpush1.bf16.msra.mxu0 %v13040_v59  ;;  %v3985_v22 = vmul.f32 0.01, %v12729_v53  ;;  %vm3968_vm5 = vcmp.gt.f32.partialorder %v12730_v11, 0.0  ;;  %v13054_v52 = vld [vmem:[#allocation6 + $0xcb4] ss:$28 sps:$4 sm:$0xff]  }
 0x2a8   :  { %3911 = vmatprep.subr.bf16.mxu1 %v11503_v62  ;;  %v4026_v23 = vsel %vm3962_vm2, %v12718_v54, %v3994_v9  ;;  %v4000_v24 = vmul.f32 0.01, %v12730_v11  ;;  %9864 = vmatprep.subr.bf16.mxu0 %v13045_v2  ;;  %v4016_v30 = vsel %vm3952_vm1, %v12728_v56, %v3984_v4  ;;  %v11535_v33 = vcombine.high %v483_v20, %v491_v21  ;;  %v507_v56 = vld [vmem:[#allocation2 + $0xd78] sm:$0xff] }
 0x2a9   :  { %v14598_v28 = vpack.c.bf16 %v4026_v23, %v4010_v12  ;;  %vm3963_vm6 = vcmp.gt.f32.partialorder %v12719_v15, 0.0  ;;  %v3995_v26 = vmul.f32 0.01, %v12719_v15  ;;  %vm3969_vm7 = vcmp.gt.f32.partialorder %v12731_v17, 0.0  ;;  %v523_v54 = vld [vmem:[#allocation2 + $0xdf8] sm:$0xff] }
 0x2aa   :  { %v4032_v27 = vsel %vm3968_vm5, %v12730_v11, %v4000_v24  ;;  %v4001_v29 = vmul.f32 0.01, %v12731_v17  ;;  %v4011_v35 = vsel %vm3947_vm3, %v12717_v45, %v3979_v8  ;;  %v4017_v39 = vsel %vm3953_vm4, %v12729_v53, %v3985_v22  ;;  %v515_v53 = vld [vmem:[#allocation2 + $0xdb8] sm:$0xff]  ;;  %v13058_v11 = vld [vmem:[#allocation6 + $0xd20] ss:$28 sps:$4 sm:$0xff]  }
 0x2ab   :  { %3912 = vmatpush1.bf16.msra.mxu1 %v11502_v63  ;;  %v14602_v36 = vpack.c.bf16 %v4032_v27, %v4016_v30  ;;  %v4027_v37 = vsel %vm3963_vm6, %v12719_v15, %v3995_v26  ;;  %9865 = vmatpush1.bf16.msra.mxu0 %v13043_v6  ;;  %v11534_v45 = vcombine.low %v483_v20, %v491_v21  ;;  %v13052_v57 = vld [vmem:[#allocation6 + $0xcb0] ss:$28 sps:$4 sm:$0xff]   ;;  %v13055_v4 = vld [vmem:[#allocation6 + $0xce8] ss:$28 sps:$4 sm:$0xff]   ;;  %v13063_v15 = vld [vmem:[#allocation6 + $0xd5c] ss:$28 sps:$4 sm:$0xff]  }
 0x2ac   :  { %3913 = vmatprep.subr.bf16.mxu1 %v11519_v7  ;;  %v14605_v40 = vpack.c.bf16 %v4027_v37, %v4011_v35  ;;  %v4033_v41 = vsel %vm3969_vm7, %v12731_v17, %v4001_v29  ;;  %9866 = vmatprep.subr.bf16.mxu0 %v13048_v19  ;;  %v11551_v51 = vcombine.high %v499_v44, %v507_v56  ;;  %v13057_v62 = vld [vmem:[#allocation6 + $0xcec] ss:$28 sps:$4 sm:$0xff]   ;;  %v13060_v6 = vld [vmem:[#allocation6 + $0xd24] ss:$28 sps:$4 sm:$0xff]   ;;  %v13061_v21 = vld [vmem:[#allocation6 + $0xd58] ss:$28 sps:$4 sm:$0xff]  }
 0x2ad   :  { %v14607_v48 = vpack.c.bf16 %v4033_v41, %v4017_v39  ;;  %v11550_v55 = vcombine.low %v499_v44, %v507_v56  ;;  %v11567_v59 = vcombine.high %v515_v53, %v523_v54  ;;  %v531_v63 = vld [vmem:[#allocation2 + $0xe38] sm:$0xff]  ;;  %v13066_v23 = vld [vmem:[#allocation6 + $0xd94] ss:$28 sps:$4 sm:$0xff]   ;;  %v13072_v39 = vld [vmem:[#allocation6 + $0xe04] ss:$28 sps:$4 sm:$0xff]  }
 0x2ae   :  { %9882 = vmatprep.mubr.bf16.mxu0 %v14605_v40  ;;  %v539_v2 = vld [vmem:[#allocation2 + $0xe78] sm:$0xff]  ;;  %v13078_v44 = vld [vmem:[#allocation6 + $0xe3c] ss:$28 sps:$4 sm:$0xff]  }
 0x2af   :  { %3914 = vmatpush1.bf16.msra.mxu1 %v11518_v3  ;;  %9867 = vmatpush1.bf16.msra.mxu0 %v13046_v38  ;;  %v11566_v3 = vcombine.low %v515_v53, %v523_v54  ;;  %v11583_v5 = vcombine.high %v531_v63, %v539_v2  ;;  %v547_v7 = vld [vmem:[#allocation2 + $0xeb8] sm:$0xff]  ;;  %v11582_v9 = vcombine.low %v531_v63, %v539_v2  ;;  %v13084_v53 = vld [vmem:[#allocation6 + $0xe74] ss:$28 sps:$4 sm:$0xff]  }
 0x2b0   :  { %3915 = vmatprep.subr.bf16.mxu1 %v11535_v33  ;;  %9868 = vmatprep.subr.bf16.mxu0 %v13051_v42  ;;  %v555_v8 = vld [vmem:[#allocation2 + $0xef8] sm:$0xff]  ;;  %v13070_v42 = vld [vmem:[#allocation6 + $0xe00] ss:$28 sps:$4 sm:$0xff]   ;;  %v13085_v54 = vld [vmem:[#allocation6 + $0x78] ss:$28 sps:$4 sm:$0xff]  }
 0x2b1   :  { %v11599_v12 = vcombine.high %v547_v7, %v555_v8  ;;  %v563_v17 = vld [vmem:[#allocation2 + $0xf38] sm:$0xff]  ;;  %v11598_v20 = vcombine.low %v547_v7, %v555_v8  ;;  %v13102_v7 = vld [vmem:[#allocation6 + $0xf1c] ss:$28 sps:$4 sm:$0xff]  }
 0x2b2   :  { %v571_v19 = vld [vmem:[#allocation2 + $0xf78] sm:$0xff]  ;;  %v13103_v8 = vld [vmem:[#allocation6 + $0x120] ss:$28 sps:$4 sm:$0xff]  }
 0x2b3   :  { %3916 = vmatpush1.bf16.msra.mxu1 %v11534_v45  ;;  %9869 = vmatpush1.bf16.msra.mxu0 %v13049_v49  ;;  %v11615_v22 = vcombine.high %v563_v17, %v571_v19  ;;  %v579_v24 = vld [vmem:[#allocation2 + $0xfb8] sm:$0xff]  ;;  %v11614_v30 = vcombine.low %v563_v17, %v571_v19  ;;  %v13081_v45 = vld [vmem:[#allocation6 + $0x44] ss:$28 sps:$4 sm:$0xff]   ;;  %v13117_v19 = vld [vmem:[#allocation6 + $0x194] ss:$28 sps:$4 sm:$0xff]  }
 0x2b4   :  { %3917 = vmatprep.subr.bf16.mxu1 %v11551_v51  ;;  %9870 = vmatprep.subr.bf16.mxu0 %v13054_v52  ;;  %v587_v26 = vld [vmem:[#allocation2 + $0xff8] sm:$0xff]  ;;  %v13079_v49 = vld [vmem:[#allocation6 + $0x40] ss:$28 sps:$4 sm:$0xff]   ;;  %v13076_v51 = vld [vmem:[#allocation6 + $0xe38] ss:$28 sps:$4 sm:$0xff]  }
 0x2b5   :  { %v13064_v27 = vld [vmem:[#allocation6 + $0xd90] ss:$28 sps:$4 sm:$0xff]   ;;  %v11631_v29 = vcombine.high %v579_v24, %v587_v26  ;;  %v11630_v35 = vcombine.low %v579_v24, %v587_v26  ;;  %v13067_v37 = vld [vmem:[#allocation6 + $0xdc8] ss:$28 sps:$4 sm:$0xff]   ;;  %v13087_v52 = vld [vmem:[#allocation6 + $0x7c] ss:$28 sps:$4 sm:$0xff]  }
 0x2b6   :  { %v13069_v33 = vld [vmem:[#allocation6 + $0xdcc] ss:$28 sps:$4 sm:$0xff]   ;;  %v13120_v24 = vld [vmem:[#allocation6 + $0xfc4] ss:$28 sps:$4 sm:$0xff]  }
 0x2b7   :  { %3918 = vmatpush1.bf16.msra.mxu1 %v11550_v55  ;;  %9871 = vmatpush1.bf16.msra.mxu0 %v13052_v57  ;;  %v13075_v38 = vld [vmem:[#allocation6 + $0xc] ss:$28 sps:$4 sm:$0xff]   ;;  %v13093_v57 = vld [vmem:[#allocation6 + $0xb4] ss:$28 sps:$4 sm:$0xff]  }
 0x2b8   :  { %3919 = vmatprep.subr.bf16.mxu1 %v11567_v59  ;;  %9872 = vmatprep.subr.bf16.mxu0 %v13057_v62  ;;  %v13073_v41 = vld [vmem:[#allocation6 + $0x8] ss:$28 sps:$4 sm:$0xff]   ;;  %v13082_v55 = vld [vmem:[#allocation6 + $0xe70] ss:$28 sps:$4 sm:$0xff]  }
 0x2b9   :  { %v14203_v56 = vld [vmem:[%s14741_s0 + $0x8] ss:$16 sps:$4 sm:$0xff]   ;;  %v13091_v62 = vld [vmem:[#allocation6 + $0xb0] ss:$28 sps:$4 sm:$0xff]  }
 0x2ba   :  { %v13090_v59 = vld [vmem:[#allocation6 + $0xeac] ss:$28 sps:$4 sm:$0xff]  }
 0x2bb   :  { %3920 = vmatpush1.bf16.msra.mxu1 %v11566_v3  ;;  %9873 = vmatpush1.bf16.msra.mxu0 %v13055_v4  ;;  %v13088_v63 = vld [vmem:[#allocation6 + $0xea8] ss:$28 sps:$4 sm:$0xff]   ;;  %v13106_v17 = vld [vmem:[#allocation6 + $0xf50] ss:$28 sps:$4 sm:$0xff]  }
 0x2bc   :  { %3921 = vmatprep.subr.bf16.mxu1 %v11583_v5  ;;  %9874 = vmatprep.subr.bf16.mxu0 %v13060_v6  ;;  %v13099_v2 = vld [vmem:[#allocation6 + $0xec] ss:$28 sps:$4 sm:$0xff]   ;;  %v13096_v3 = vld [vmem:[#allocation6 + $0xee4] ss:$28 sps:$4 sm:$0xff]  }
 0x2bd   :  { %v13097_v4 = vld [vmem:[#allocation6 + $0xe8] ss:$28 sps:$4 sm:$0xff]   ;;  %v13094_v5 = vld [vmem:[#allocation6 + $0xee0] ss:$28 sps:$4 sm:$0xff]  }
 0x2be   :  { %v13105_v6 = vld [vmem:[#allocation6 + $0x124] ss:$28 sps:$4 sm:$0xff]  }
 0x2bf   :  { %3922 = vmatpush1.bf16.msra.mxu1 %v11582_v9  ;;  %9875 = vmatpush1.bf16.msra.mxu0 %v13058_v11  ;;  %v13100_v9 = vld [vmem:[#allocation6 + $0xf18] ss:$28 sps:$4 sm:$0xff]   ;;  %v13121_v26 = vld [vmem:[#allocation6 + $0x1c8] ss:$28 sps:$4 sm:$0xff]  }
 0x2c0   :  { %3923 = vmatprep.subr.bf16.mxu1 %v11599_v12  ;;  %9876 = vmatprep.subr.bf16.mxu0 %v13063_v15  ;;  %v13111_v11 = vld [vmem:[#allocation6 + $0x15c] ss:$28 sps:$4 sm:$0xff]   ;;  %v13108_v12 = vld [vmem:[#allocation6 + $0xf54] ss:$28 sps:$4 sm:$0xff]  }
 0x2c1   :  { %v13109_v15 = vld [vmem:[#allocation6 + $0x158] ss:$28 sps:$4 sm:$0xff]  }
 0x2c3   :  { %3924 = vmatpush1.bf16.msra.mxu1 %v11598_v20  ;;  %9877 = vmatpush1.bf16.msra.mxu0 %v13061_v21  ;;  %v13114_v20 = vld [vmem:[#allocation6 + $0xf8c] ss:$28 sps:$4 sm:$0xff]  }
 0x2c4   :  { %3925 = vmatprep.subr.bf16.mxu1 %v11615_v22  ;;  %9878 = vmatprep.subr.bf16.mxu0 %v13066_v23  ;;  %v13115_v21 = vld [vmem:[#allocation6 + $0x190] ss:$28 sps:$4 sm:$0xff]   ;;  %v13112_v22 = vld [vmem:[#allocation6 + $0xf88] ss:$28 sps:$4 sm:$0xff]  }
 0x2c5   :  { %v13123_v23 = vld [vmem:[#allocation6 + $0x1cc] ss:$28 sps:$4 sm:$0xff]  }
 0x2c7   :  { %3926 = vmatpush1.bf16.msra.mxu1 %v11614_v30  ;;  %9879 = vmatpush1.bf16.msra.mxu0 %v13064_v27  ;;  %v13118_v30 = vld [vmem:[#allocation6 + $0xfc0] ss:$28 sps:$4 sm:$0xff]  }
 0x2c8   :  { %3927 = vmatprep.subr.bf16.mxu1 %v11631_v29  ;;  %9880 = vmatprep.subr.bf16.mxu0 %v13069_v33  ;;  %v13129_v27 = vld [vmem:[#allocation6 + $0x204] ss:$28 sps:$4 sm:$0xff]   ;;  %v13126_v29 = vld [vmem:[#allocation6 + $0xffc] ss:$28 sps:$4 sm:$0xff]  }
 0x2c9   :  { %v13127_v33 = vld [vmem:[#allocation6 + $0x200] ss:$28 sps:$4 sm:$0xff]  }
 0x2cb   :  { %3928 = vmatpush1.bf16.msra.mxu1 %v11630_v35  ;;  %9881 = vmatpush1.bf16.msra.mxu0 %v13067_v37  ;;  %v13124_v35 = vld [vmem:[#allocation6 + $0xff8] ss:$28 sps:$4 sm:$0xff]  }
 0x2cc   :  { %10065 = vmatprep.subr.bf16.mxu1 %v13075_v38  ;;  %9893 = vmatprep.subr.bf16.mxu0 %v13072_v39  ;;  %v13135_v37 = vld [vmem:[#allocation6 + $0x23c] ss:$28 sps:$4 sm:$0xff]   ;;  %v13132_v38 = vld [vmem:[#allocation6 + $0x1034] ss:$28 sps:$4 sm:$0xff]  }
 0x2cd   :  { %v13133_v39 = vld [vmem:[#allocation6 + $0x238] ss:$28 sps:$4 sm:$0xff]  }
 0x2ce   :  { %3930 = vmatmul.mubr.bf16.vlgmr.msra.gmra.mrb[16].mxu1 %v14203_v56  ;;  %9883 = vmatmul.mubr.bf16.vlgmr.msra.gmra.mrb[12].mxu0 %v14598_v28  ;;  %v13139_v56 = vld [vmem:[#allocation6 + $0x270] ss:$28 sps:$4 sm:$0xff]  }
 0x2cf   :  { %10066 = vmatpush1.bf16.msra.mxu1 %v13073_v41  ;;  %9894 = vmatpush1.bf16.msra.mxu0 %v13070_v42  ;;  %v13130_v41 = vld [vmem:[#allocation6 + $0x1030] ss:$28 sps:$4 sm:$0xff]  }
 0x2d0   :  { %9925 = vmatprep.mubr.bf16.mxu0 %v14557_v50  ;;  %10097 = vmatprep.mubr.bf16.mxu1 %v14500_v14  ;;  %v13141_v42 = vld [vmem:[#allocation6 + $0x274] ss:$28 sps:$4 sm:$0xff]  }
 0x2d1   :  { %9895 = vmatprep.subr.bf16.mxu0 %v13078_v44  ;;  %10067 = vmatprep.subr.bf16.mxu1 %v13081_v45  ;;  %v13138_v44 = vld [vmem:[#allocation6 + $0x106c] ss:$28 sps:$4 sm:$0xff]  }
 0x2d2   :  { %v13136_v45 = vld [vmem:[#allocation6 + $0x1068] ss:$28 sps:$4 sm:$0xff]  }
 0x2d3   :  { %10068 = vmatpush1.bf16.msra.mxu1 %v13079_v49  ;;  %9896 = vmatpush1.bf16.msra.mxu0 %v13076_v51  ;;  %v13147_v49 = vld [vmem:[#allocation6 + $0x2ac] ss:$28 sps:$4 sm:$0xff]   ;;  %v13144_v51 = vld [vmem:[#allocation6 + $0x10a4] ss:$28 sps:$4 sm:$0xff]  }
 0x2d4   :  { %10069 = vmatprep.subr.bf16.mxu1 %v13087_v52  ;;  %9897 = vmatprep.subr.bf16.mxu0 %v13084_v53  ;;  %v13145_v52 = vld [vmem:[#allocation6 + $0x2a8] ss:$28 sps:$4 sm:$0xff]   ;;  %v13142_v53 = vld [vmem:[#allocation6 + $0x10a0] ss:$28 sps:$4 sm:$0xff]  }
 0x2d7   :  { %10070 = vmatpush1.bf16.msra.mxu1 %v13085_v54  ;;  %9898 = vmatpush1.bf16.msra.mxu0 %v13082_v55  ;;  %v13153_v54 = vld [vmem:[#allocation6 + $0x2e4] ss:$28 sps:$4 sm:$0xff]   ;;  %v13150_v55 = vld [vmem:[#allocation6 + $0x10dc] ss:$28 sps:$4 sm:$0xff]  }
 0x2d8   :  { %10071 = vmatprep.subr.bf16.mxu1 %v13093_v57  ;;  %9899 = vmatprep.subr.bf16.mxu0 %v13090_v59  ;;  %v13151_v57 = vld [vmem:[#allocation6 + $0x2e0] ss:$28 sps:$4 sm:$0xff]   ;;  %v13148_v59 = vld [vmem:[#allocation6 + $0x10d8] ss:$28 sps:$4 sm:$0xff]  }
 0x2db   :  { %10072 = vmatpush1.bf16.msra.mxu1 %v13091_v62  ;;  %9900 = vmatpush1.bf16.msra.mxu0 %v13088_v63  ;;  %v13159_v62 = vld [vmem:[#allocation6 + $0x31c] ss:$28 sps:$4 sm:$0xff]   ;;  %v13156_v63 = vld [vmem:[#allocation6 + $0x1114] ss:$28 sps:$4 sm:$0xff]  }
 0x2dc   :  { %10073 = vmatprep.subr.bf16.mxu1 %v13099_v2  ;;  %9901 = vmatprep.subr.bf16.mxu0 %v13096_v3  ;;  %v13157_v2 = vld [vmem:[#allocation6 + $0x318] ss:$28 sps:$4 sm:$0xff]   ;;  %v13154_v3 = vld [vmem:[#allocation6 + $0x1110] ss:$28 sps:$4 sm:$0xff]  }
 0x2df   :  { %10074 = vmatpush1.bf16.msra.mxu1 %v13097_v4  ;;  %9902 = vmatpush1.bf16.msra.mxu0 %v13094_v5  ;;  %v13165_v4 = vld [vmem:[#allocation6 + $0x354] ss:$28 sps:$4 sm:$0xff]   ;;  %v13162_v5 = vld [vmem:[#allocation6 + $0x114c] ss:$28 sps:$4 sm:$0xff]  }
 0x2e0   :  { %10075 = vmatprep.subr.bf16.mxu1 %v13105_v6  ;;  %9903 = vmatprep.subr.bf16.mxu0 %v13102_v7  ;;  %v13163_v6 = vld [vmem:[#allocation6 + $0x350] ss:$28 sps:$4 sm:$0xff]   ;;  %v13160_v7 = vld [vmem:[#allocation6 + $0x1148] ss:$28 sps:$4 sm:$0xff]  }
 0x2e3   :  { %10076 = vmatpush1.bf16.msra.mxu1 %v13103_v8  ;;  %9904 = vmatpush1.bf16.msra.mxu0 %v13100_v9  ;;  %v13171_v8 = vld [vmem:[#allocation6 + $0x38c] ss:$28 sps:$4 sm:$0xff]   ;;  %v13168_v9 = vld [vmem:[#allocation6 + $0x1184] ss:$28 sps:$4 sm:$0xff]  }
 0x2e4   :  { %10077 = vmatprep.subr.bf16.mxu1 %v13111_v11  ;;  %9905 = vmatprep.subr.bf16.mxu0 %v13108_v12  ;;  %v13169_v11 = vld [vmem:[#allocation6 + $0x388] ss:$28 sps:$4 sm:$0xff]   ;;  %v13166_v12 = vld [vmem:[#allocation6 + $0x1180] ss:$28 sps:$4 sm:$0xff]  }
 0x2e7   :  { %10078 = vmatpush1.bf16.msra.mxu1 %v13109_v15  ;;  %9906 = vmatpush1.bf16.msra.mxu0 %v13106_v17  ;;  %v13174_v15 = vld [vmem:[#allocation6 + $0x11bc] ss:$28 sps:$4 sm:$0xff]   ;;  %v13177_v17 = vld [vmem:[#allocation6 + $0x3c4] ss:$28 sps:$4 sm:$0xff]  }
 0x2e8   :  { %10079 = vmatprep.subr.bf16.mxu1 %v13117_v19  ;;  %9907 = vmatprep.subr.bf16.mxu0 %v13114_v20  ;;  %v13175_v19 = vld [vmem:[#allocation6 + $0x3c0] ss:$28 sps:$4 sm:$0xff]   ;;  %v13172_v20 = vld [vmem:[#allocation6 + $0x11b8] ss:$28 sps:$4 sm:$0xff]  }
 0x2eb   :  { %10080 = vmatpush1.bf16.msra.mxu1 %v13115_v21  ;;  %9908 = vmatpush1.bf16.msra.mxu0 %v13112_v22  ;;  %v13183_v21 = vld [vmem:[#allocation6 + $0x3fc] ss:$28 sps:$4 sm:$0xff]   ;;  %v13180_v22 = vld [vmem:[#allocation6 + $0x11f4] ss:$28 sps:$4 sm:$0xff]  }
 0x2ec   :  { %10081 = vmatprep.subr.bf16.mxu1 %v13123_v23  ;;  %9909 = vmatprep.subr.bf16.mxu0 %v13120_v24  ;;  %v13181_v23 = vld [vmem:[#allocation6 + $0x3f8] ss:$28 sps:$4 sm:$0xff]   ;;  %v13178_v24 = vld [vmem:[#allocation6 + $0x11f0] ss:$28 sps:$4 sm:$0xff]  }
 0x2ef   :  { %10082 = vmatpush1.bf16.msra.mxu1 %v13121_v26  ;;  %9910 = vmatpush1.bf16.msra.mxu0 %v13118_v30  ;;  %v13189_v26 = vld [vmem:[#allocation6 + $0x434] ss:$28 sps:$4 sm:$0xff]   ;;  %v13186_v30 = vld [vmem:[#allocation6 + $0x122c] ss:$28 sps:$4 sm:$0xff]  }
 0x2f0   :  { %10083 = vmatprep.subr.bf16.mxu1 %v13129_v27  ;;  %9911 = vmatprep.subr.bf16.mxu0 %v13126_v29  ;;  %v13187_v27 = vld [vmem:[#allocation6 + $0x430] ss:$28 sps:$4 sm:$0xff]   ;;  %v13184_v29 = vld [vmem:[#allocation6 + $0x1228] ss:$28 sps:$4 sm:$0xff]  }
 0x2f3   :  { %10084 = vmatpush1.bf16.msra.mxu1 %v13127_v33  ;;  %9912 = vmatpush1.bf16.msra.mxu0 %v13124_v35  ;;  %v13195_v33 = vld [vmem:[#allocation6 + $0x46c] ss:$28 sps:$4 sm:$0xff]   ;;  %v13192_v35 = vld [vmem:[#allocation6 + $0x1264] ss:$28 sps:$4 sm:$0xff]  }
 0x2f4   :  { %10085 = vmatprep.subr.bf16.mxu1 %v13135_v37  ;;  %9913 = vmatprep.subr.bf16.mxu0 %v13132_v38  ;;  %v13193_v37 = vld [vmem:[#allocation6 + $0x468] ss:$28 sps:$4 sm:$0xff]   ;;  %v13190_v38 = vld [vmem:[#allocation6 + $0x1260] ss:$28 sps:$4 sm:$0xff]  }
 0x2f7   :  { %10086 = vmatpush1.bf16.msra.mxu1 %v13133_v39  ;;  %9914 = vmatpush1.bf16.msra.mxu0 %v13130_v41  ;;  %v13201_v39 = vld [vmem:[#allocation6 + $0x4a4] ss:$28 sps:$4 sm:$0xff]   ;;  %v13198_v41 = vld [vmem:[#allocation6 + $0x129c] ss:$28 sps:$4 sm:$0xff]  }
 0x2f8   :  { %10087 = vmatprep.subr.bf16.mxu1 %v13141_v42  ;;  %9915 = vmatprep.subr.bf16.mxu0 %v13138_v44  ;;  %v635_v42 = vrot.slane %v14580_v25, %v14520_v31  ;;  %v639_v44 = vrot.slane %v14580_v25, %v14523_v32  ;;  %v13213_v25 = vld [vmem:[#allocation6 + $0x514] ss:$28 sps:$4 sm:$0xff]  }
 0x2fb   :  { %10088 = vmatpush1.bf16.msra.mxu1 %v13139_v56  ;;  %9916 = vmatpush1.bf16.msra.mxu0 %v13136_v45  ;;  %v13199_v56 = vld [vmem:[#allocation6 + $0x4a0] ss:$28 sps:$4 sm:$0xff]   ;;  %v13196_v45 = vld [vmem:[#allocation6 + $0x1298] ss:$28 sps:$4 sm:$0xff]  }
 0x2fc   :  { %10089 = vmatprep.subr.bf16.mxu1 %v13147_v49  ;;  %9917 = vmatprep.subr.bf16.mxu0 %v13144_v51  ;;  %v13207_v49 = vld [vmem:[#allocation6 + $0x4dc] ss:$28 sps:$4 sm:$0xff]  }
 0x2ff   :  { %10090 = vmatpush1.bf16.msra.mxu1 %v13145_v52  ;;  %9918 = vmatpush1.bf16.msra.mxu0 %v13142_v53  ;;  %v13204_v52 = vld [vmem:[#allocation6 + $0x12d4] ss:$28 sps:$4 sm:$0xff]  }
 0x300   :  { %10091 = vmatprep.subr.bf16.mxu1 %v13153_v54  ;;  %9919 = vmatprep.subr.bf16.mxu0 %v13150_v55 }
 0x303   :  { %10092 = vmatpush1.bf16.msra.mxu1 %v13151_v57  ;;  %9920 = vmatpush1.bf16.msra.mxu0 %v13148_v59  ;;  %v13202_v59 = vld [vmem:[#allocation6 + $0x12d0] ss:$28 sps:$4 sm:$0xff]  }
 0x304   :  { %10093 = vmatprep.subr.bf16.mxu1 %v13159_v62  ;;  %9921 = vmatprep.subr.bf16.mxu0 %v13156_v63  ;;  %v13205_v62 = vld [vmem:[#allocation6 + $0x4d8] ss:$28 sps:$4 sm:$0xff]  }
 0x307   :  { %10094 = vmatpush1.bf16.msra.mxu1 %v13157_v2  ;;  %9922 = vmatpush1.bf16.msra.mxu0 %v13154_v3 }
 0x308   :  { %10095 = vmatprep.subr.bf16.mxu1 %v13165_v4  ;;  %9923 = vmatprep.subr.bf16.mxu0 %v13162_v5 }
 0x30b   :  { %10096 = vmatpush1.bf16.msra.mxu1 %v13163_v6  ;;  %9924 = vmatpush1.bf16.msra.mxu0 %v13160_v7  ;;  %v13210_v6 = vld [vmem:[#allocation6 + $0x130c] ss:$28 sps:$4 sm:$0xff]  }
 0x30c   :  { %10108 = vmatprep.subr.bf16.mxu1 %v13171_v8  ;;  %9936 = vmatprep.subr.bf16.mxu0 %v13168_v9  ;;  %v13211_v9 = vld [vmem:[#allocation6 + $0x510] ss:$28 sps:$4 sm:$0xff]  }
 0x30e   :  { %10098 = vmatmul.mubr.bf16.vlgmr.msra.gmra.mrb[20].mxu1 %v14493_v1  ;;  %9926 = vmatmul.mubr.bf16.vlgmr.msra.gmra.mrb[12].mxu0 %v14551_v43 }
 0x30f   :  { %10109 = vmatpush1.bf16.msra.mxu1 %v13169_v11  ;;  %9937 = vmatpush1.bf16.msra.mxu0 %v13166_v12 }
 0x310   :  { %10140 = vmatprep.mubr.bf16.mxu1 %v14554_v46  ;;  %9938 = vmatprep.subr.bf16.mxu0 %v13174_v15  ;;  %v13208_v15 = vld [vmem:[#allocation6 + $0x1308] ss:$28 sps:$4 sm:$0xff]  }
 0x311   :  { %10110 = vmatprep.subr.bf16.mxu1 %v13177_v17 }
 0x313   :  { %10111 = vmatpush1.bf16.msra.mxu1 %v13175_v19  ;;  %9939 = vmatpush1.bf16.msra.mxu0 %v13172_v20 }
 0x314   :  { %10112 = vmatprep.subr.bf16.mxu1 %v13183_v21  ;;  %9940 = vmatprep.subr.bf16.mxu0 %v13180_v22  ;;  %v13216_v21 = vld [vmem:[#allocation6 + $0x1344] ss:$28 sps:$4 sm:$0xff]   ;;  %v13219_v22 = vld [vmem:[#allocation6 + $0x54c] ss:$28 sps:$4 sm:$0xff]  }
 0x317   :  { %10113 = vmatpush1.bf16.msra.mxu1 %v13181_v23  ;;  %9941 = vmatpush1.bf16.msra.mxu0 %v13178_v24  ;;  %v13217_v24 = vld [vmem:[#allocation6 + $0x548] ss:$28 sps:$4 sm:$0xff]  }
 0x318   :  { %10114 = vmatprep.subr.bf16.mxu1 %v13189_v26  ;;  %9942 = vmatprep.subr.bf16.mxu0 %v13186_v30  ;;  %v13214_v26 = vld [vmem:[#allocation6 + $0x1340] ss:$28 sps:$4 sm:$0xff]  }
 0x319   :  { %v13225_v30 = vld [vmem:[#allocation6 + $0x584] ss:$28 sps:$4 sm:$0xff]  }
 0x31b   :  { %10115 = vmatpush1.bf16.msra.mxu1 %v13187_v27  ;;  %9943 = vmatpush1.bf16.msra.mxu0 %v13184_v29  ;;  %v13222_v27 = vld [vmem:[#allocation6 + $0x137c] ss:$28 sps:$4 sm:$0xff]  }
 0x31c   :  { %10116 = vmatprep.subr.bf16.mxu1 %v13195_v33  ;;  %9944 = vmatprep.subr.bf16.mxu0 %v13192_v35  ;;  %v13223_v29 = vld [vmem:[#allocation6 + $0x580] ss:$28 sps:$4 sm:$0xff]   ;;  %v13220_v33 = vld [vmem:[#allocation6 + $0x1378] ss:$28 sps:$4 sm:$0xff]  }
 0x31d   :  { %v13231_v35 = vld [vmem:[#allocation6 + $0x5bc] ss:$28 sps:$4 sm:$0xff]  }
 0x31f   :  { %10117 = vmatpush1.bf16.msra.mxu1 %v13193_v37  ;;  %9945 = vmatpush1.bf16.msra.mxu0 %v13190_v38  ;;  %v13228_v37 = vld [vmem:[#allocation6 + $0x13b4] ss:$28 sps:$4 sm:$0xff]  }
 0x320   :  { %10118 = vmatprep.subr.bf16.mxu1 %v13201_v39  ;;  %9946 = vmatprep.subr.bf16.mxu0 %v13198_v41  ;;  %v13229_v38 = vld [vmem:[#allocation6 + $0x5b8] ss:$28 sps:$4 sm:$0xff]   ;;  %v13226_v39 = vld [vmem:[#allocation6 + $0x13b0] ss:$28 sps:$4 sm:$0xff]  }
 0x321   :  { %v3759_v51 = vpop.f32.mrb[12].mxu1  ;;  %v13237_v41 = vld [vmem:[#allocation6 + $0x5f4] ss:$28 sps:$4 sm:$0xff]  }
 0x322   :  { %v12724_v53 = vadd.f32 %v3759_v51, %v635_v42  ;;  %v3761_v54 = vpop.f32.mrb[13].mxu1  ;;  %v13241_v51 = vld [vmem:[#allocation6 + $0x628] ss:$28 sps:$4 sm:$0xff]  }
 0x323   :  { %v12725_v55 = vadd.f32 %v3761_v54, %v639_v44  ;;  %v3763_v57 = vpop.f32.mrb[14].mxu1  ;;  %10119 = vmatpush1.bf16.msra.mxu1 %v13199_v56  ;;  %9947 = vmatpush1.bf16.msra.mxu0 %v13196_v45  ;;  %v13232_v56 = vld [vmem:[#allocation6 + $0x13e8] ss:$28 sps:$4 sm:$0xff]   ;;  %v13246_v54 = vld [vmem:[#allocation6 + $0x145c] ss:$28 sps:$4 sm:$0xff]  }
 0x324   :  { %v3982_v63 = vmul.f32 0.01, %v12724_v53  ;;  %v12726_v2 = vadd.f32 %v3763_v57, %v635_v42  ;;  %v3765_v3 = vpop.f32.mrb[15].mxu1  ;;  %10120 = vmatprep.subr.bf16.mxu1 %v13207_v49  ;;  %vm3950_vm8 = vcmp.gt.f32.partialorder %v12724_v53, 0.0  ;;  %9948 = vmatprep.subr.bf16.mxu0 %v13204_v52  ;;  %v13234_v42 = vld [vmem:[#allocation6 + $0x13ec] ss:$28 sps:$4 sm:$0xff]  }
 0x325   :  { %v3983_v4 = vmul.f32 0.01, %v12725_v55  ;;  %v12727_v5 = vadd.f32 %v3765_v3, %v639_v44  ;;  %vm3951_vm9 = vcmp.gt.f32.partialorder %v12725_v55, 0.0  ;;  %v13235_v44 = vld [vmem:[#allocation6 + $0x5f0] ss:$28 sps:$4 sm:$0xff]  }
 0x326   :  { %vm3966_vm10 = vcmp.gt.f32.partialorder %v12726_v2, 0.0  ;;  %v3998_v7 = vmul.f32 0.01, %v12726_v2  ;;  %v4014_v11 = vsel %vm3950_vm8, %v12724_v53, %v3982_v63  ;;  %v13243_v45 = vld [vmem:[#allocation6 + $0x62c] ss:$28 sps:$4 sm:$0xff]  }
 0x327   :  { %vm3967_vm11 = vcmp.gt.f32.partialorder %v12727_v5, 0.0  ;;  %v3999_v8 = vmul.f32 0.01, %v12727_v5  ;;  %10121 = vmatpush1.bf16.msra.mxu1 %v13205_v62  ;;  %9949 = vmatpush1.bf16.msra.mxu0 %v13202_v59  ;;  %v4015_v17 = vsel %vm3951_vm9, %v12725_v55, %v3983_v4  ;;  %v13240_v49 = vld [vmem:[#allocation6 + $0x1424] ss:$28 sps:$4 sm:$0xff]  }
 0x328   :  { %v4030_v12 = vsel %vm3966_vm10, %v12726_v2, %v3998_v7  ;;  %10122 = vmatprep.subr.bf16.mxu1 %v13213_v25  ;;  %9950 = vmatprep.subr.bf16.mxu0 %v13210_v6  ;;  %v13238_v52 = vld [vmem:[#allocation6 + $0x1420] ss:$28 sps:$4 sm:$0xff]   ;;  %v13244_v57 = vld [vmem:[#allocation6 + $0x1458] ss:$28 sps:$4 sm:$0xff]   ;;  %v13250_v2 = vld [vmem:[#allocation6 + $0x1490] ss:$28 sps:$4 sm:$0xff]  }
 0x329   :  { %v14623_v19 = vpack.c.bf16 %v4030_v12, %v4014_v11  ;;  %v4031_v20 = vsel %vm3967_vm11, %v12727_v5, %v3999_v8  ;;  %v13249_v53 = vld [vmem:[#allocation6 + $0x664] ss:$28 sps:$4 sm:$0xff]   ;;  %v13255_v59 = vld [vmem:[#allocation6 + $0x69c] ss:$28 sps:$4 sm:$0xff]   ;;  %v13252_v62 = vld [vmem:[#allocation6 + $0x1494] ss:$28 sps:$4 sm:$0xff]  }
 0x32a   :  { %v14625_v23 = vpack.c.bf16 %v4031_v20, %v4015_v17  ;;  %v13247_v55 = vld [vmem:[#allocation6 + $0x660] ss:$28 sps:$4 sm:$0xff]   ;;  %v13253_v63 = vld [vmem:[#allocation6 + $0x698] ss:$28 sps:$4 sm:$0xff]   ;;  %v13258_v25 = vld [vmem:[#allocation6 + $0x14cc] ss:$28 sps:$4 sm:$0xff]  }
 0x32b   :  { %10123 = vmatpush1.bf16.msra.mxu1 %v13211_v9  ;;  %9951 = vmatpush1.bf16.msra.mxu0 %v13208_v15  ;;  %v13261_v3 = vld [vmem:[#allocation6 + $0x6d4] ss:$28 sps:$4 sm:$0xff]   ;;  %v13256_v5 = vld [vmem:[#allocation6 + $0x14c8] ss:$28 sps:$4 sm:$0xff]   ;;  %v13262_v9 = vld [vmem:[#allocation6 + $0x1500] ss:$28 sps:$4 sm:$0xff]  }
 0x32c   :  { %9968 = vmatprep.mubr.bf16.mxu0 %v14625_v23  ;;  %9952 = vmatprep.subr.bf16.mxu0 %v13216_v21  ;;  %v13259_v4 = vld [vmem:[#allocation6 + $0x6d0] ss:$28 sps:$4 sm:$0xff]   ;;  %v13264_v7 = vld [vmem:[#allocation6 + $0x1504] ss:$28 sps:$4 sm:$0xff]   ;;  %v13270_v11 = vld [vmem:[#allocation6 + $0x153c] ss:$28 sps:$4 sm:$0xff]  }
 0x32d   :  { %10124 = vmatprep.subr.bf16.mxu1 %v13219_v22  ;;  %v13267_v6 = vld [vmem:[#allocation6 + $0x70c] ss:$28 sps:$4 sm:$0xff]   ;;  %v13273_v12 = vld [vmem:[#allocation6 + $0x744] ss:$28 sps:$4 sm:$0xff]   ;;  %v13268_v17 = vld [vmem:[#allocation6 + $0x1538] ss:$28 sps:$4 sm:$0xff]  }
 0x32e   :  { %v13265_v8 = vld [vmem:[#allocation6 + $0x708] ss:$28 sps:$4 sm:$0xff]   ;;  %v13271_v15 = vld [vmem:[#allocation6 + $0x740] ss:$28 sps:$4 sm:$0xff]   ;;  %v13276_v21 = vld [vmem:[#allocation6 + $0x1574] ss:$28 sps:$4 sm:$0xff]  }
 0x32f   :  { %10125 = vmatpush1.bf16.msra.mxu1 %v13217_v24  ;;  %9953 = vmatpush1.bf16.msra.mxu0 %v13214_v26  ;;  %v13279_v20 = vld [vmem:[#allocation6 + $0x77c] ss:$28 sps:$4 sm:$0xff]   ;;  %v13274_v24 = vld [vmem:[#allocation6 + $0x1570] ss:$28 sps:$4 sm:$0xff]  }
 0x330   :  { %10126 = vmatprep.subr.bf16.mxu1 %v13225_v30  ;;  %9954 = vmatprep.subr.bf16.mxu0 %v13222_v27  ;;  %v13277_v22 = vld [vmem:[#allocation6 + $0x778] ss:$28 sps:$4 sm:$0xff]   ;;  %v13282_v30 = vld [vmem:[#allocation6 + $0x15ac] ss:$28 sps:$4 sm:$0xff]  }
 0x331   :  { %v13285_v26 = vld [vmem:[#allocation6 + $0x7b4] ss:$28 sps:$4 sm:$0xff]  }
 0x332   :  { %v13283_v27 = vld [vmem:[#allocation6 + $0x7b0] ss:$28 sps:$4 sm:$0xff]  }
 0x333   :  { %10127 = vmatpush1.bf16.msra.mxu1 %v13223_v29  ;;  %9955 = vmatpush1.bf16.msra.mxu0 %v13220_v33  ;;  %v13280_v29 = vld [vmem:[#allocation6 + $0x15a8] ss:$28 sps:$4 sm:$0xff]  }
 0x334   :  { %10128 = vmatprep.subr.bf16.mxu1 %v13231_v35  ;;  %9956 = vmatprep.subr.bf16.mxu0 %v13228_v37  ;;  %v13291_v33 = vld [vmem:[#allocation6 + $0x7ec] ss:$28 sps:$4 sm:$0xff]   ;;  %v13288_v35 = vld [vmem:[#allocation6 + $0x15e4] ss:$28 sps:$4 sm:$0xff]  }
 0x335   :  { %v13289_v37 = vld [vmem:[#allocation6 + $0x7e8] ss:$28 sps:$4 sm:$0xff]  }
 0x337   :  { %10129 = vmatpush1.bf16.msra.mxu1 %v13229_v38  ;;  %9957 = vmatpush1.bf16.msra.mxu0 %v13226_v39  ;;  %v13286_v38 = vld [vmem:[#allocation6 + $0x15e0] ss:$28 sps:$4 sm:$0xff]  }
 0x338   :  { %10130 = vmatprep.subr.bf16.mxu1 %v13237_v41  ;;  %9958 = vmatprep.subr.bf16.mxu0 %v13234_v42  ;;  %v13297_v39 = vld [vmem:[#allocation6 + $0x824] ss:$28 sps:$4 sm:$0xff]   ;;  %v13294_v41 = vld [vmem:[#allocation6 + $0x161c] ss:$28 sps:$4 sm:$0xff]  }
 0x339   :  { %v13295_v42 = vld [vmem:[#allocation6 + $0x820] ss:$28 sps:$4 sm:$0xff]  }
 0x33b   :  { %10131 = vmatpush1.bf16.msra.mxu1 %v13235_v44  ;;  %9959 = vmatpush1.bf16.msra.mxu0 %v13232_v56  ;;  %v13292_v44 = vld [vmem:[#allocation6 + $0x1618] ss:$28 sps:$4 sm:$0xff]  }
 0x33c   :  { %10132 = vmatprep.subr.bf16.mxu1 %v13243_v45  ;;  %9960 = vmatprep.subr.bf16.mxu0 %v13240_v49  ;;  %v13303_v56 = vld [vmem:[#allocation6 + $0x85c] ss:$28 sps:$4 sm:$0xff]   ;;  %v13300_v45 = vld [vmem:[#allocation6 + $0x1654] ss:$28 sps:$4 sm:$0xff]  }
 0x33d   :  { %v13301_v49 = vld [vmem:[#allocation6 + $0x858] ss:$28 sps:$4 sm:$0xff]  }
 0x33f   :  { %10133 = vmatpush1.bf16.msra.mxu1 %v13241_v51  ;;  %9961 = vmatpush1.bf16.msra.mxu0 %v13238_v52  ;;  %v13298_v51 = vld [vmem:[#allocation6 + $0x1650] ss:$28 sps:$4 sm:$0xff]  }
 0x340   :  { %10134 = vmatprep.subr.bf16.mxu1 %v13249_v53  ;;  %9962 = vmatprep.subr.bf16.mxu0 %v13246_v54  ;;  %v13309_v52 = vld [vmem:[#allocation6 + $0x894] ss:$28 sps:$4 sm:$0xff]   ;;  %v13306_v53 = vld [vmem:[#allocation6 + $0x168c] ss:$28 sps:$4 sm:$0xff]  }
 0x341   :  { %v13307_v54 = vld [vmem:[#allocation6 + $0x890] ss:$28 sps:$4 sm:$0xff]  }
 0x343   :  { %10135 = vmatpush1.bf16.msra.mxu1 %v13247_v55  ;;  %9963 = vmatpush1.bf16.msra.mxu0 %v13244_v57  ;;  %v13304_v55 = vld [vmem:[#allocation6 + $0x1688] ss:$28 sps:$4 sm:$0xff]  }
 0x344   :  { %10136 = vmatprep.subr.bf16.mxu1 %v13255_v59  ;;  %9964 = vmatprep.subr.bf16.mxu0 %v13252_v62  ;;  %v13315_v57 = vld [vmem:[#allocation6 + $0x8cc] ss:$28 sps:$4 sm:$0xff]   ;;  %v13312_v59 = vld [vmem:[#allocation6 + $0x16c4] ss:$28 sps:$4 sm:$0xff]  }
 0x345   :  { %v13313_v62 = vld [vmem:[#allocation6 + $0x8c8] ss:$28 sps:$4 sm:$0xff]  }
 0x347   :  { %10137 = vmatpush1.bf16.msra.mxu1 %v13253_v63  ;;  %9965 = vmatpush1.bf16.msra.mxu0 %v13250_v2  ;;  %v13310_v63 = vld [vmem:[#allocation6 + $0x16c0] ss:$28 sps:$4 sm:$0xff]  }
 0x348   :  { %10138 = vmatprep.subr.bf16.mxu1 %v13261_v3  ;;  %9966 = vmatprep.subr.bf16.mxu0 %v13258_v25  ;;  %v13321_v2 = vld [vmem:[#allocation6 + $0x904] ss:$28 sps:$4 sm:$0xff]   ;;  %v13318_v3 = vld [vmem:[#allocation6 + $0x16fc] ss:$28 sps:$4 sm:$0xff]  }
 0x349   :  { %v13319_v25 = vld [vmem:[#allocation6 + $0x900] ss:$28 sps:$4 sm:$0xff]  }
 0x34b   :  { %10139 = vmatpush1.bf16.msra.mxu1 %v13259_v4  ;;  %9967 = vmatpush1.bf16.msra.mxu0 %v13256_v5  ;;  %v13316_v4 = vld [vmem:[#allocation6 + $0x16f8] ss:$28 sps:$4 sm:$0xff]  }
 0x34c   :  { %10151 = vmatprep.subr.bf16.mxu1 %v13267_v6  ;;  %9979 = vmatprep.subr.bf16.mxu0 %v13264_v7  ;;  %v13327_v5 = vld [vmem:[#allocation6 + $0x93c] ss:$28 sps:$4 sm:$0xff]   ;;  %v13324_v6 = vld [vmem:[#allocation6 + $0x1734] ss:$28 sps:$4 sm:$0xff]  }
 0x34d   :  { %v13325_v7 = vld [vmem:[#allocation6 + $0x938] ss:$28 sps:$4 sm:$0xff]  }
 0x34e   :  { %10141 = vmatmul.mubr.bf16.vlgmr.msra.gmra.mrb[20].mxu1 %v14547_v34  ;;  %9969 = vmatmul.mubr.bf16.vlgmr.msra.gmra.mrb[12].mxu0 %v14623_v19 }
 0x34f   :  { %10152 = vmatpush1.bf16.msra.mxu1 %v13265_v8  ;;  %9980 = vmatpush1.bf16.msra.mxu0 %v13262_v9  ;;  %v13322_v8 = vld [vmem:[#allocation6 + $0x1730] ss:$28 sps:$4 sm:$0xff]  }
 0x350   :  { %10011 = vmatprep.mubr.bf16.mxu0 %v14607_v48  ;;  %10183 = vmatprep.mubr.bf16.mxu1 %v14503_v18  ;;  %v13333_v9 = vld [vmem:[#allocation6 + $0x974] ss:$28 sps:$4 sm:$0xff]  }
 0x351   :  { %9981 = vmatprep.subr.bf16.mxu0 %v13270_v11  ;;  %10153 = vmatprep.subr.bf16.mxu1 %v13273_v12  ;;  %v13330_v11 = vld [vmem:[#allocation6 + $0x176c] ss:$28 sps:$4 sm:$0xff]  }
 0x352   :  { %v13331_v12 = vld [vmem:[#allocation6 + $0x970] ss:$28 sps:$4 sm:$0xff]  }
 0x353   :  { %10154 = vmatpush1.bf16.msra.mxu1 %v13271_v15  ;;  %9982 = vmatpush1.bf16.msra.mxu0 %v13268_v17  ;;  %v13328_v15 = vld [vmem:[#allocation6 + $0x1768] ss:$28 sps:$4 sm:$0xff]  }
 0x354   :  { %10155 = vmatprep.subr.bf16.mxu1 %v13279_v20  ;;  %9983 = vmatprep.subr.bf16.mxu0 %v13276_v21  ;;  %v13339_v17 = vld [vmem:[#allocation6 + $0x9ac] ss:$28 sps:$4 sm:$0xff]   ;;  %v13336_v20 = vld [vmem:[#allocation6 + $0x17a4] ss:$28 sps:$4 sm:$0xff]  }
 0x355   :  { %v13337_v21 = vld [vmem:[#allocation6 + $0x9a8] ss:$28 sps:$4 sm:$0xff]  }
 0x357   :  { %10156 = vmatpush1.bf16.msra.mxu1 %v13277_v22  ;;  %9984 = vmatpush1.bf16.msra.mxu0 %v13274_v24  ;;  %v13334_v22 = vld [vmem:[#allocation6 + $0x17a0] ss:$28 sps:$4 sm:$0xff]  }
 0x358   :  { %10157 = vmatprep.subr.bf16.mxu1 %v13285_v26  ;;  %9985 = vmatprep.subr.bf16.mxu0 %v13282_v30  ;;  %v13345_v24 = vld [vmem:[#allocation6 + $0x9e4] ss:$28 sps:$4 sm:$0xff]   ;;  %v13342_v26 = vld [vmem:[#allocation6 + $0x17dc] ss:$28 sps:$4 sm:$0xff]  }
 0x359   :  { %v13343_v30 = vld [vmem:[#allocation6 + $0x9e0] ss:$28 sps:$4 sm:$0xff]  }
 0x35b   :  { %10158 = vmatpush1.bf16.msra.mxu1 %v13283_v27  ;;  %9986 = vmatpush1.bf16.msra.mxu0 %v13280_v29  ;;  %v13340_v27 = vld [vmem:[#allocation6 + $0x17d8] ss:$28 sps:$4 sm:$0xff]  }
 0x35c   :  { %10159 = vmatprep.subr.bf16.mxu1 %v13291_v33  ;;  %9987 = vmatprep.subr.bf16.mxu0 %v13288_v35  ;;  %v13351_v29 = vld [vmem:[#allocation6 + $0xa1c] ss:$28 sps:$4 sm:$0xff]   ;;  %v13348_v33 = vld [vmem:[#allocation6 + $0x1814] ss:$28 sps:$4 sm:$0xff]  }
 0x35d   :  { %v13349_v35 = vld [vmem:[#allocation6 + $0xa18] ss:$28 sps:$4 sm:$0xff]  }
 0x35f   :  { %10160 = vmatpush1.bf16.msra.mxu1 %v13289_v37  ;;  %9988 = vmatpush1.bf16.msra.mxu0 %v13286_v38  ;;  %v13346_v37 = vld [vmem:[#allocation6 + $0x1810] ss:$28 sps:$4 sm:$0xff]  }
 0x360   :  { %10161 = vmatprep.subr.bf16.mxu1 %v13297_v39  ;;  %9989 = vmatprep.subr.bf16.mxu0 %v13294_v41  ;;  %v13357_v38 = vld [vmem:[#allocation6 + $0xa54] ss:$28 sps:$4 sm:$0xff]   ;;  %v13354_v39 = vld [vmem:[#allocation6 + $0x184c] ss:$28 sps:$4 sm:$0xff]  }
 0x361   :  { %v13355_v41 = vld [vmem:[#allocation6 + $0xa50] ss:$28 sps:$4 sm:$0xff]  }
 0x363   :  { %10162 = vmatpush1.bf16.msra.mxu1 %v13295_v42  ;;  %9990 = vmatpush1.bf16.msra.mxu0 %v13292_v44  ;;  %v13352_v42 = vld [vmem:[#allocation6 + $0x1848] ss:$28 sps:$4 sm:$0xff]  }
 0x364   :  { %10163 = vmatprep.subr.bf16.mxu1 %v13303_v56  ;;  %9991 = vmatprep.subr.bf16.mxu0 %v13300_v45  ;;  %v13363_v44 = vld [vmem:[#allocation6 + $0xa8c] ss:$28 sps:$4 sm:$0xff]   ;;  %v13360_v56 = vld [vmem:[#allocation6 + $0x1884] ss:$28 sps:$4 sm:$0xff]  }
 0x365   :  { %v13361_v45 = vld [vmem:[#allocation6 + $0xa88] ss:$28 sps:$4 sm:$0xff]  }
 0x367   :  { %10164 = vmatpush1.bf16.msra.mxu1 %v13301_v49  ;;  %9992 = vmatpush1.bf16.msra.mxu0 %v13298_v51  ;;  %v13358_v49 = vld [vmem:[#allocation6 + $0x1880] ss:$28 sps:$4 sm:$0xff]  }
 0x368   :  { %10165 = vmatprep.subr.bf16.mxu1 %v13309_v52  ;;  %9993 = vmatprep.subr.bf16.mxu0 %v13306_v53  ;;  %v13366_v51 = vld [vmem:[#allocation6 + $0x18bc] ss:$28 sps:$4 sm:$0xff]   ;;  %v13369_v52 = vld [vmem:[#allocation6 + $0xac4] ss:$28 sps:$4 sm:$0xff]  }
 0x369   :  { %v13367_v53 = vld [vmem:[#allocation6 + $0xac0] ss:$28 sps:$4 sm:$0xff]  }
 0x36b   :  { %10166 = vmatpush1.bf16.msra.mxu1 %v13307_v54  ;;  %9994 = vmatpush1.bf16.msra.mxu0 %v13304_v55  ;;  %v13364_v54 = vld [vmem:[#allocation6 + $0x18b8] ss:$28 sps:$4 sm:$0xff]  }
 0x36c   :  { %10167 = vmatprep.subr.bf16.mxu1 %v13315_v57  ;;  %9995 = vmatprep.subr.bf16.mxu0 %v13312_v59  ;;  %v13375_v55 = vld [vmem:[#allocation6 + $0xafc] ss:$28 sps:$4 sm:$0xff]   ;;  %v13372_v57 = vld [vmem:[#allocation6 + $0x18f4] ss:$28 sps:$4 sm:$0xff]  }
 0x36d   :  { %v13373_v59 = vld [vmem:[#allocation6 + $0xaf8] ss:$28 sps:$4 sm:$0xff]  }
 0x36f   :  { %10168 = vmatpush1.bf16.msra.mxu1 %v13313_v62  ;;  %9996 = vmatpush1.bf16.msra.mxu0 %v13310_v63  ;;  %v13370_v62 = vld [vmem:[#allocation6 + $0x18f0] ss:$28 sps:$4 sm:$0xff]  }
 0x370   :  { %10169 = vmatprep.subr.bf16.mxu1 %v13321_v2  ;;  %9997 = vmatprep.subr.bf16.mxu0 %v13318_v3  ;;  %v13381_v63 = vld [vmem:[#allocation6 + $0xb34] ss:$28 sps:$4 sm:$0xff]   ;;  %v13378_v2 = vld [vmem:[#allocation6 + $0x192c] ss:$28 sps:$4 sm:$0xff]  }
 0x371   :  { %v13379_v3 = vld [vmem:[#allocation6 + $0xb30] ss:$28 sps:$4 sm:$0xff]  }
 0x373   :  { %10170 = vmatpush1.bf16.msra.mxu1 %v13319_v25  ;;  %9998 = vmatpush1.bf16.msra.mxu0 %v13316_v4  ;;  %v13376_v25 = vld [vmem:[#allocation6 + $0x1928] ss:$28 sps:$4 sm:$0xff]  }
 0x374   :  { %10171 = vmatprep.subr.bf16.mxu1 %v13327_v5  ;;  %9999 = vmatprep.subr.bf16.mxu0 %v13324_v6  ;;  %v13387_v4 = vld [vmem:[#allocation6 + $0xb6c] ss:$28 sps:$4 sm:$0xff]   ;;  %v13384_v5 = vld [vmem:[#allocation6 + $0x1964] ss:$28 sps:$4 sm:$0xff]  }
 0x375   :  { %v13385_v6 = vld [vmem:[#allocation6 + $0xb68] ss:$28 sps:$4 sm:$0xff]  }
 0x377   :  { %10172 = vmatpush1.bf16.msra.mxu1 %v13325_v7  ;;  %10000 = vmatpush1.bf16.msra.mxu0 %v13322_v8  ;;  %v13382_v7 = vld [vmem:[#allocation6 + $0x1960] ss:$28 sps:$4 sm:$0xff]  }
 0x378   :  { %10173 = vmatprep.subr.bf16.mxu1 %v13333_v9  ;;  %10001 = vmatprep.subr.bf16.mxu0 %v13330_v11  ;;  %v13393_v8 = vld [vmem:[#allocation6 + $0xba4] ss:$28 sps:$4 sm:$0xff]   ;;  %v13390_v9 = vld [vmem:[#allocation6 + $0x199c] ss:$28 sps:$4 sm:$0xff]  }
 0x379   :  { %v14204_v11 = vld [vmem:[#allocation4 + $0x8] sm:$0xff] }
 0x37b   :  { %10174 = vmatpush1.bf16.msra.mxu1 %v13331_v12  ;;  %10002 = vmatpush1.bf16.msra.mxu0 %v13328_v15  ;;  %v651_v12 = vrot.slane %v14204_v11, %v14576_v13  ;;  %v655_v15 = vrot.slane %v14204_v11, %v622_v16  ;;  %v13405_v16 = vld [vmem:[#allocation6 + $0xc14] ss:$28 sps:$4 sm:$0xff]  }
 0x37c   :  { %10175 = vmatprep.subr.bf16.mxu1 %v13339_v17  ;;  %10003 = vmatprep.subr.bf16.mxu0 %v13336_v20  ;;  %v13391_v17 = vld [vmem:[#allocation6 + $0xba0] ss:$28 sps:$4 sm:$0xff]   ;;  %v13388_v20 = vld [vmem:[#allocation6 + $0x1998] ss:$28 sps:$4 sm:$0xff]  }
 0x37d   :  { %v13429_v11 = vld [vmem:[#allocation6 + $0xcf4] ss:$28 sps:$4 sm:$0xff]  }
 0x37f   :  { %10176 = vmatpush1.bf16.msra.mxu1 %v13337_v21  ;;  %10004 = vmatpush1.bf16.msra.mxu0 %v13334_v22  ;;  %v13399_v21 = vld [vmem:[#allocation6 + $0xbdc] ss:$28 sps:$4 sm:$0xff]  }
 0x380   :  { %10177 = vmatprep.subr.bf16.mxu1 %v13345_v24  ;;  %10005 = vmatprep.subr.bf16.mxu0 %v13342_v26  ;;  %v13396_v24 = vld [vmem:[#allocation6 + $0x19d4] ss:$28 sps:$4 sm:$0xff]  }
 0x383   :  { %10178 = vmatpush1.bf16.msra.mxu1 %v13343_v30  ;;  %10006 = vmatpush1.bf16.msra.mxu0 %v13340_v27 }
 0x384   :  { %10179 = vmatprep.subr.bf16.mxu1 %v13351_v29  ;;  %10007 = vmatprep.subr.bf16.mxu0 %v13348_v33  ;;  %v13394_v33 = vld [vmem:[#allocation6 + $0x19d0] ss:$28 sps:$4 sm:$0xff]  }
 0x387   :  { %10180 = vmatpush1.bf16.msra.mxu1 %v13349_v35  ;;  %10008 = vmatpush1.bf16.msra.mxu0 %v13346_v37  ;;  %v13397_v35 = vld [vmem:[#allocation6 + $0xbd8] ss:$28 sps:$4 sm:$0xff]  }
 0x388   :  { %10181 = vmatprep.subr.bf16.mxu1 %v13357_v38  ;;  %10009 = vmatprep.subr.bf16.mxu0 %v13354_v39 }
 0x38b   :  { %10182 = vmatpush1.bf16.msra.mxu1 %v13355_v41  ;;  %10010 = vmatpush1.bf16.msra.mxu0 %v13352_v42  ;;  %v13402_v42 = vld [vmem:[#allocation6 + $0x1a0c] ss:$28 sps:$4 sm:$0xff]  }
 0x38c   :  { %10194 = vmatprep.subr.bf16.mxu1 %v13363_v44  ;;  %10022 = vmatprep.subr.bf16.mxu0 %v13360_v56 }
 0x38e   :  { %10184 = vmatmul.mubr.bf16.vlgmr.msra.gmra.mrb[20].mxu1 %v14497_v10  ;;  %10012 = vmatmul.mubr.bf16.vlgmr.msra.gmra.mrb[12].mxu0 %v14602_v36 }
 0x38f   :  { %10195 = vmatpush1.bf16.msra.mxu1 %v13361_v45  ;;  %10023 = vmatpush1.bf16.msra.mxu0 %v13358_v49  ;;  %v13403_v45 = vld [vmem:[#allocation6 + $0xc10] ss:$28 sps:$4 sm:$0xff]  }
 0x390   :  { %10226 = vmatprep.mubr.bf16.mxu1 %v14605_v40  ;;  %10024 = vmatprep.subr.bf16.mxu0 %v13366_v51 }
 0x391   :  { %10196 = vmatprep.subr.bf16.mxu1 %v13369_v52  ;;  %v13400_v52 = vld [vmem:[#allocation6 + $0x1a08] ss:$28 sps:$4 sm:$0xff]  }
 0x393   :  { %10197 = vmatpush1.bf16.msra.mxu1 %v13367_v53  ;;  %10025 = vmatpush1.bf16.msra.mxu0 %v13364_v54 }
 0x394   :  { %10198 = vmatprep.subr.bf16.mxu1 %v13375_v55  ;;  %10026 = vmatprep.subr.bf16.mxu0 %v13372_v57  ;;  %v13408_v57 = vld [vmem:[#allocation6 + $0x1a44] ss:$28 sps:$4 sm:$0xff]  }
 0x397   :  { %10199 = vmatpush1.bf16.msra.mxu1 %v13373_v59  ;;  %10027 = vmatpush1.bf16.msra.mxu0 %v13370_v62  ;;  %v13411_v59 = vld [vmem:[#allocation6 + $0xc4c] ss:$28 sps:$4 sm:$0xff]  }
 0x398   :  { %10200 = vmatprep.subr.bf16.mxu1 %v13381_v63  ;;  %10028 = vmatprep.subr.bf16.mxu0 %v13378_v2  ;;  %v13409_v63 = vld [vmem:[#allocation6 + $0xc48] ss:$28 sps:$4 sm:$0xff]   ;;  %v13406_v2 = vld [vmem:[#allocation6 + $0x1a40] ss:$28 sps:$4 sm:$0xff]  }
 0x39b   :  { %10201 = vmatpush1.bf16.msra.mxu1 %v13379_v3  ;;  %10029 = vmatpush1.bf16.msra.mxu0 %v13376_v25  ;;  %v13417_v3 = vld [vmem:[#allocation6 + $0xc84] ss:$28 sps:$4 sm:$0xff]   ;;  %v13414_v25 = vld [vmem:[#allocation6 + $0x1a7c] ss:$28 sps:$4 sm:$0xff]  }
 0x39c   :  { %10202 = vmatprep.subr.bf16.mxu1 %v13387_v4  ;;  %10030 = vmatprep.subr.bf16.mxu0 %v13384_v5  ;;  %v13415_v4 = vld [vmem:[#allocation6 + $0xc80] ss:$28 sps:$4 sm:$0xff]   ;;  %v13412_v5 = vld [vmem:[#allocation6 + $0x1a78] ss:$28 sps:$4 sm:$0xff]  }
 0x39f   :  { %10203 = vmatpush1.bf16.msra.mxu1 %v13385_v6  ;;  %10031 = vmatpush1.bf16.msra.mxu0 %v13382_v7  ;;  %v13423_v6 = vld [vmem:[#allocation6 + $0xcbc] ss:$28 sps:$4 sm:$0xff]   ;;  %v13420_v7 = vld [vmem:[#allocation6 + $0x1ab4] ss:$28 sps:$4 sm:$0xff]  }
 0x3a0   :  { %10204 = vmatprep.subr.bf16.mxu1 %v13393_v8  ;;  %10032 = vmatprep.subr.bf16.mxu0 %v13390_v9  ;;  %v13421_v8 = vld [vmem:[#allocation6 + $0xcb8] ss:$28 sps:$4 sm:$0xff]   ;;  %v13418_v9 = vld [vmem:[#allocation6 + $0x1ab0] ss:$28 sps:$4 sm:$0xff]  }
 0x3a1   :  { %v3931_v22 = vpop.f32.mrb[16].mxu1 }
 0x3a2   :  { %v12732_v26 = vadd.f32 %v3931_v22, %v651_v12  ;;  %v3933_v30 = vpop.f32.mrb[17].mxu1  ;;  %v13433_v22 = vld [vmem:[#allocation6 + $0xd28] ss:$28 sps:$4 sm:$0xff]  }
 0x3a3   :  { %v12733_v27 = vadd.f32 %v3933_v30, %v655_v15  ;;  %v3935_v29 = vpop.f32.mrb[18].mxu1  ;;  %10205 = vmatpush1.bf16.msra.mxu1 %v13391_v17  ;;  %10033 = vmatpush1.bf16.msra.mxu0 %v13388_v20  ;;  %v13424_v17 = vld [vmem:[#allocation6 + $0x1ae8] ss:$28 sps:$4 sm:$0xff]   ;;  %v13438_v30 = vld [vmem:[#allocation6 + $0x1b5c] ss:$28 sps:$4 sm:$0xff]  }
 0x3a4   :  { %v3986_v37 = vmul.f32 0.01, %v12732_v26  ;;  %v12734_v38 = vadd.f32 %v3935_v29, %v651_v12  ;;  %v3937_v47 = vpop.f32.mrb[19].mxu1  ;;  %10206 = vmatprep.subr.bf16.mxu1 %v13399_v21  ;;  %vm3954_vm12 = vcmp.gt.f32.partialorder %v12732_v26, 0.0  ;;  %10034 = vmatprep.subr.bf16.mxu0 %v13396_v24  ;;  %v13426_v12 = vld [vmem:[#allocation6 + $0x1aec] ss:$28 sps:$4 sm:$0xff]  }
 0x3a5   :  { %v3987_v39 = vmul.f32 0.01, %v12733_v27  ;;  %v12735_v41 = vadd.f32 %v3937_v47, %v655_v15  ;;  %vm3955_vm13 = vcmp.gt.f32.partialorder %v12733_v27, 0.0  ;;  %v13427_v15 = vld [vmem:[#allocation6 + $0xcf0] ss:$28 sps:$4 sm:$0xff]  }
 0x3a6   :  { %vm3970_vm14 = vcmp.gt.f32.partialorder %v12734_v38, 0.0  ;;  %v4002_v44 = vmul.f32 0.01, %v12734_v38  ;;  %v4018_v49 = vsel %vm3954_vm12, %v12732_v26, %v3986_v37  ;;  %v13435_v20 = vld [vmem:[#allocation6 + $0xd2c] ss:$28 sps:$4 sm:$0xff]  }
 0x3a7   :  { %vm3971_vm15 = vcmp.gt.f32.partialorder %v12735_v41, 0.0  ;;  %v4003_v56 = vmul.f32 0.01, %v12735_v41  ;;  %10207 = vmatpush1.bf16.msra.mxu1 %v13397_v35  ;;  %10035 = vmatpush1.bf16.msra.mxu0 %v13394_v33  ;;  %v4019_v53 = vsel %vm3955_vm13, %v12733_v27, %v3987_v39  ;;  %v13432_v21 = vld [vmem:[#allocation6 + $0x1b24] ss:$28 sps:$4 sm:$0xff]  }
 0x3a8   :  { %v4034_v51 = vsel %vm3970_vm14, %v12734_v38, %v4002_v44  ;;  %10208 = vmatprep.subr.bf16.mxu1 %v13405_v16  ;;  %10036 = vmatprep.subr.bf16.mxu0 %v13402_v42  ;;  %v13430_v24 = vld [vmem:[#allocation6 + $0x1b20] ss:$28 sps:$4 sm:$0xff]   ;;  %v13436_v29 = vld [vmem:[#allocation6 + $0x1b58] ss:$28 sps:$4 sm:$0xff]   ;;  %v13442_v38 = vld [vmem:[#allocation6 + $0x1b90] ss:$28 sps:$4 sm:$0xff]  }
 0x3a9   :  { %v14638_v54 = vpack.c.bf16 %v4034_v51, %v4018_v49  ;;  %v4035_v55 = vsel %vm3971_vm15, %v12735_v41, %v4003_v56  ;;  %v13441_v26 = vld [vmem:[#allocation6 + $0xd64] ss:$28 sps:$4 sm:$0xff]   ;;  %v13447_v33 = vld [vmem:[#allocation6 + $0xd9c] ss:$28 sps:$4 sm:$0xff]   ;;  %v13444_v35 = vld [vmem:[#allocation6 + $0x1b94] ss:$28 sps:$4 sm:$0xff]  }
 0x3aa   :  { %v14640_v62 = vpack.c.bf16 %v4035_v55, %v4019_v53  ;;  %v13439_v27 = vld [vmem:[#allocation6 + $0xd60] ss:$28 sps:$4 sm:$0xff]   ;;  %v13445_v37 = vld [vmem:[#allocation6 + $0xd98] ss:$28 sps:$4 sm:$0xff]   ;;  %v13450_v16 = vld [vmem:[#allocation6 + $0x1bcc] ss:$28 sps:$4 sm:$0xff]  }
 0x3ab   :  { %10209 = vmatpush1.bf16.msra.mxu1 %v13403_v45  ;;  %10037 = vmatpush1.bf16.msra.mxu0 %v13400_v52  ;;  %v13453_v47 = vld [vmem:[#allocation6 + $0xdd4] ss:$28 sps:$4 sm:$0xff]   ;;  %v13448_v41 = vld [vmem:[#allocation6 + $0x1bc8] ss:$28 sps:$4 sm:$0xff]   ;;  %v13460_v52 = vld [vmem:[#allocation6 + $0xe40] ss:$28 sps:$4 sm:$0xff]  }
 0x3ac   :  { %10054 = vmatprep.mubr.bf16.mxu0 %v14640_v62  ;;  %10038 = vmatprep.subr.bf16.mxu0 %v13408_v57  ;;  %v13451_v39 = vld [vmem:[#allocation6 + $0xdd0] ss:$28 sps:$4 sm:$0xff]   ;;  %v13454_v56 = vld [vmem:[#allocation6 + $0xe08] ss:$28 sps:$4 sm:$0xff]   ;;  %v13468_v55 = vld [vmem:[#allocation6 + $0xe7c] ss:$28 sps:$4 sm:$0xff]  }
 0x3ad   :  { %10210 = vmatprep.subr.bf16.mxu1 %v13411_v59  ;;  %v13456_v42 = vld [vmem:[#allocation6 + $0xe0c] ss:$28 sps:$4 sm:$0xff]   ;;  %v13459_v44 = vld [vmem:[#allocation6 + $0x14] ss:$28 sps:$4 sm:$0xff]   ;;  %v13462_v49 = vld [vmem:[#allocation6 + $0xe44] ss:$28 sps:$4 sm:$0xff]  }
 0x3ae   :  { %v13457_v45 = vld [vmem:[#allocation6 + $0x10] ss:$28 sps:$4 sm:$0xff]   ;;  %v13463_v53 = vld [vmem:[#allocation6 + $0x48] ss:$28 sps:$4 sm:$0xff]   ;;  %v13466_v59 = vld [vmem:[#allocation6 + $0xe78] ss:$28 sps:$4 sm:$0xff]  }
 0x3af   :  { %10211 = vmatpush1.bf16.msra.mxu1 %v13409_v63  ;;  %10039 = vmatpush1.bf16.msra.mxu0 %v13406_v2  ;;  %v13465_v51 = vld [vmem:[#allocation6 + $0x4c] ss:$28 sps:$4 sm:$0xff]   ;;  %v13471_v57 = vld [vmem:[#allocation6 + $0x84] ss:$28 sps:$4 sm:$0xff]   ;;  %v13474_v2 = vld [vmem:[#allocation6 + $0xeb4] ss:$28 sps:$4 sm:$0xff]  }
 0x3b0   :  { %10212 = vmatprep.subr.bf16.mxu1 %v13417_v3  ;;  %10040 = vmatprep.subr.bf16.mxu0 %v13414_v25  ;;  %v13469_v63 = vld [vmem:[#allocation6 + $0x80] ss:$28 sps:$4 sm:$0xff]   ;;  %v13472_v25 = vld [vmem:[#allocation6 + $0xeb0] ss:$28 sps:$4 sm:$0xff]  }
 0x3b1   :  { %v13477_v3 = vld [vmem:[#allocation6 + $0xbc] ss:$28 sps:$4 sm:$0xff]  }
 0x3b3   :  { %10213 = vmatpush1.bf16.msra.mxu1 %v13415_v4  ;;  %10041 = vmatpush1.bf16.msra.mxu0 %v13412_v5  ;;  %v13475_v4 = vld [vmem:[#allocation6 + $0xb8] ss:$28 sps:$4 sm:$0xff]   ;;  %v13480_v5 = vld [vmem:[#allocation6 + $0xeec] ss:$28 sps:$4 sm:$0xff]  }
 0x3b4   :  { %10214 = vmatprep.subr.bf16.mxu1 %v13423_v6  ;;  %10042 = vmatprep.subr.bf16.mxu0 %v13420_v7  ;;  %v13483_v6 = vld [vmem:[#allocation6 + $0xf4] ss:$28 sps:$4 sm:$0xff]   ;;  %v13478_v7 = vld [vmem:[#allocation6 + $0xee8] ss:$28 sps:$4 sm:$0xff]  }
 0x3b7   :  { %10215 = vmatpush1.bf16.msra.mxu1 %v13421_v8  ;;  %10043 = vmatpush1.bf16.msra.mxu0 %v13418_v9  ;;  %v13481_v8 = vld [vmem:[#allocation6 + $0xf0] ss:$28 sps:$4 sm:$0xff]   ;;  %v13486_v9 = vld [vmem:[#allocation6 + $0xf24] ss:$28 sps:$4 sm:$0xff]  }
 0x3b8   :  { %10216 = vmatprep.subr.bf16.mxu1 %v13429_v11  ;;  %10044 = vmatprep.subr.bf16.mxu0 %v13426_v12  ;;  %v13489_v11 = vld [vmem:[#allocation6 + $0x12c] ss:$28 sps:$4 sm:$0xff]   ;;  %v13484_v12 = vld [vmem:[#allocation6 + $0xf20] ss:$28 sps:$4 sm:$0xff]  }
 0x3bb   :  { %10217 = vmatpush1.bf16.msra.mxu1 %v13427_v15  ;;  %10045 = vmatpush1.bf16.msra.mxu0 %v13424_v17  ;;  %v13487_v15 = vld [vmem:[#allocation6 + $0x128] ss:$28 sps:$4 sm:$0xff]   ;;  %v13492_v17 = vld [vmem:[#allocation6 + $0xf5c] ss:$28 sps:$4 sm:$0xff]  }
 0x3bc   :  { %10218 = vmatprep.subr.bf16.mxu1 %v13435_v20  ;;  %10046 = vmatprep.subr.bf16.mxu0 %v13432_v21  ;;  %v13495_v20 = vld [vmem:[#allocation6 + $0x164] ss:$28 sps:$4 sm:$0xff]   ;;  %v13490_v21 = vld [vmem:[#allocation6 + $0xf58] ss:$28 sps:$4 sm:$0xff]  }
 0x3bf   :  { %10219 = vmatpush1.bf16.msra.mxu1 %v13433_v22  ;;  %10047 = vmatpush1.bf16.msra.mxu0 %v13430_v24  ;;  %v13493_v22 = vld [vmem:[#allocation6 + $0x160] ss:$28 sps:$4 sm:$0xff]   ;;  %v13498_v24 = vld [vmem:[#allocation6 + $0xf94] ss:$28 sps:$4 sm:$0xff]  }
 0x3c0   :  { %10220 = vmatprep.subr.bf16.mxu1 %v13441_v26  ;;  %10048 = vmatprep.subr.bf16.mxu0 %v13438_v30  ;;  %v13501_v26 = vld [vmem:[#allocation6 + $0x19c] ss:$28 sps:$4 sm:$0xff]   ;;  %v13496_v30 = vld [vmem:[#allocation6 + $0xf90] ss:$28 sps:$4 sm:$0xff]  }
 0x3c3   :  { %10221 = vmatpush1.bf16.msra.mxu1 %v13439_v27  ;;  %10049 = vmatpush1.bf16.msra.mxu0 %v13436_v29  ;;  %v13499_v27 = vld [vmem:[#allocation6 + $0x198] ss:$28 sps:$4 sm:$0xff]   ;;  %v13504_v29 = vld [vmem:[#allocation6 + $0xfcc] ss:$28 sps:$4 sm:$0xff]  }
 0x3c4   :  { %10222 = vmatprep.subr.bf16.mxu1 %v13447_v33  ;;  %10050 = vmatprep.subr.bf16.mxu0 %v13444_v35  ;;  %v13507_v33 = vld [vmem:[#allocation6 + $0x1d4] ss:$28 sps:$4 sm:$0xff]   ;;  %v13502_v35 = vld [vmem:[#allocation6 + $0xfc8] ss:$28 sps:$4 sm:$0xff]  }
 0x3c7   :  { %10223 = vmatpush1.bf16.msra.mxu1 %v13445_v37  ;;  %10051 = vmatpush1.bf16.msra.mxu0 %v13442_v38  ;;  %v13505_v37 = vld [vmem:[#allocation6 + $0x1d0] ss:$28 sps:$4 sm:$0xff]   ;;  %v13510_v38 = vld [vmem:[#allocation6 + $0x1004] ss:$28 sps:$4 sm:$0xff]  }
 0x3c8   :  { %10224 = vmatprep.subr.bf16.mxu1 %v13453_v47  ;;  %10052 = vmatprep.subr.bf16.mxu0 %v13450_v16  ;;  %v13513_v47 = vld [vmem:[#allocation6 + $0x20c] ss:$28 sps:$4 sm:$0xff]   ;;  %v13508_v16 = vld [vmem:[#allocation6 + $0x1000] ss:$28 sps:$4 sm:$0xff]  }
 0x3cb   :  { %10225 = vmatpush1.bf16.msra.mxu1 %v13451_v39  ;;  %10053 = vmatpush1.bf16.msra.mxu0 %v13448_v41  ;;  %v13511_v39 = vld [vmem:[#allocation6 + $0x208] ss:$28 sps:$4 sm:$0xff]   ;;  %v13516_v41 = vld [vmem:[#allocation6 + $0x103c] ss:$28 sps:$4 sm:$0xff]  }
 0x3cc   :  { %10237 = vmatprep.subr.bf16.mxu1 %v13456_v42  ;;  %10409 = vmatprep.subr.bf16.mxu0 %v13459_v44  ;;  %v13519_v42 = vld [vmem:[#allocation6 + $0x244] ss:$28 sps:$4 sm:$0xff]   ;;  %v13514_v44 = vld [vmem:[#allocation6 + $0x1038] ss:$28 sps:$4 sm:$0xff]  }
 0x3ce   :  { %10227 = vmatmul.mubr.bf16.vlgmr.msra.gmra.mrb[20].mxu1 %v14598_v28  ;;  %10055 = vmatmul.mubr.bf16.vlgmr.msra.gmra.mrb[12].mxu0 %v14638_v54 }
 0x3cf   :  { %10238 = vmatpush1.bf16.msra.mxu1 %v13454_v56  ;;  %10269 = vmatprep.mubr.bf16.mxu1 %v14557_v50  ;;  %v13517_v56 = vld [vmem:[#allocation6 + $0x240] ss:$28 sps:$4 sm:$0xff]  }
 0x3d0   :  { %10410 = vmatpush1.bf16.msra.mxu0 %v13457_v45  ;;  %10441 = vmatprep.mubr.bf16.mxu0 %v14500_v14  ;;  %v13522_v45 = vld [vmem:[#allocation6 + $0x1074] ss:$28 sps:$4 sm:$0xff]  }
 0x3d1   :  { %10239 = vmatprep.subr.bf16.mxu1 %v13462_v49  ;;  %10411 = vmatprep.subr.bf16.mxu0 %v13465_v51  ;;  %v13525_v49 = vld [vmem:[#allocation6 + $0x27c] ss:$28 sps:$4 sm:$0xff]   ;;  %v13520_v51 = vld [vmem:[#allocation6 + $0x1070] ss:$28 sps:$4 sm:$0xff]  }
 0x3d3   :  { %10240 = vmatpush1.bf16.msra.mxu1 %v13460_v52  ;;  %v13523_v52 = vld [vmem:[#allocation6 + $0x278] ss:$28 sps:$4 sm:$0xff]  }
 0x3d4   :  { %10412 = vmatpush1.bf16.msra.mxu0 %v13463_v53  ;;  %10241 = vmatprep.subr.bf16.mxu1 %v13468_v55  ;;  %v13528_v53 = vld [vmem:[#allocation6 + $0x10ac] ss:$28 sps:$4 sm:$0xff]   ;;  %v13531_v55 = vld [vmem:[#allocation6 + $0x2b4] ss:$28 sps:$4 sm:$0xff]  }
 0x3d5   :  { %10413 = vmatprep.subr.bf16.mxu0 %v13471_v57  ;;  %v13526_v57 = vld [vmem:[#allocation6 + $0x10a8] ss:$28 sps:$4 sm:$0xff]  }
 0x3d7   :  { %10242 = vmatpush1.bf16.msra.mxu1 %v13466_v59  ;;  %v13529_v59 = vld [vmem:[#allocation6 + $0x2b0] ss:$28 sps:$4 sm:$0xff]  }
 0x3d8   :  { %10414 = vmatpush1.bf16.msra.mxu0 %v13469_v63  ;;  %10243 = vmatprep.subr.bf16.mxu1 %v13474_v2  ;;  %v13534_v63 = vld [vmem:[#allocation6 + $0x10e4] ss:$28 sps:$4 sm:$0xff]   ;;  %v13537_v2 = vld [vmem:[#allocation6 + $0x2ec] ss:$28 sps:$4 sm:$0xff]  }
 0x3d9   :  { %10415 = vmatprep.subr.bf16.mxu0 %v13477_v3  ;;  %v13532_v3 = vld [vmem:[#allocation6 + $0x10e0] ss:$28 sps:$4 sm:$0xff]  }
 0x3db   :  { %10244 = vmatpush1.bf16.msra.mxu1 %v13472_v25  ;;  %v13535_v25 = vld [vmem:[#allocation6 + $0x2e8] ss:$28 sps:$4 sm:$0xff]  }
 0x3dc   :  { %10416 = vmatpush1.bf16.msra.mxu0 %v13475_v4  ;;  %10245 = vmatprep.subr.bf16.mxu1 %v13480_v5  ;;  %v13540_v4 = vld [vmem:[#allocation6 + $0x111c] ss:$28 sps:$4 sm:$0xff]   ;;  %v13543_v5 = vld [vmem:[#allocation6 + $0x324] ss:$28 sps:$4 sm:$0xff]  }
 0x3dd   :  { %10417 = vmatprep.subr.bf16.mxu0 %v13483_v6  ;;  %v13538_v6 = vld [vmem:[#allocation6 + $0x1118] ss:$28 sps:$4 sm:$0xff]  }
 0x3df   :  { %10246 = vmatpush1.bf16.msra.mxu1 %v13478_v7  ;;  %v13541_v7 = vld [vmem:[#allocation6 + $0x320] ss:$28 sps:$4 sm:$0xff]  }
 0x3e0   :  { %10418 = vmatpush1.bf16.msra.mxu0 %v13481_v8  ;;  %10247 = vmatprep.subr.bf16.mxu1 %v13486_v9  ;;  %v13546_v8 = vld [vmem:[#allocation6 + $0x1154] ss:$28 sps:$4 sm:$0xff]   ;;  %v13549_v9 = vld [vmem:[#allocation6 + $0x35c] ss:$28 sps:$4 sm:$0xff]  }
 0x3e1   :  { %10419 = vmatprep.subr.bf16.mxu0 %v13489_v11  ;;  %v13544_v11 = vld [vmem:[#allocation6 + $0x1150] ss:$28 sps:$4 sm:$0xff]  }
 0x3e3   :  { %10248 = vmatpush1.bf16.msra.mxu1 %v13484_v12  ;;  %v13547_v12 = vld [vmem:[#allocation6 + $0x358] ss:$28 sps:$4 sm:$0xff]  }
 0x3e4   :  { %10420 = vmatpush1.bf16.msra.mxu0 %v13487_v15  ;;  %10249 = vmatprep.subr.bf16.mxu1 %v13492_v17  ;;  %v13552_v15 = vld [vmem:[#allocation6 + $0x118c] ss:$28 sps:$4 sm:$0xff]   ;;  %v13555_v17 = vld [vmem:[#allocation6 + $0x394] ss:$28 sps:$4 sm:$0xff]  }
 0x3e5   :  { %10421 = vmatprep.subr.bf16.mxu0 %v13495_v20  ;;  %v13550_v20 = vld [vmem:[#allocation6 + $0x1188] ss:$28 sps:$4 sm:$0xff]  }
 0x3e7   :  { %10250 = vmatpush1.bf16.msra.mxu1 %v13490_v21  ;;  %v13553_v21 = vld [vmem:[#allocation6 + $0x390] ss:$28 sps:$4 sm:$0xff]  }
 0x3e8   :  { %10422 = vmatpush1.bf16.msra.mxu0 %v13493_v22  ;;  %10251 = vmatprep.subr.bf16.mxu1 %v13498_v24  ;;  %v13558_v22 = vld [vmem:[#allocation6 + $0x11c4] ss:$28 sps:$4 sm:$0xff]   ;;  %v13561_v24 = vld [vmem:[#allocation6 + $0x3cc] ss:$28 sps:$4 sm:$0xff]  }
 0x3e9   :  { %10423 = vmatprep.subr.bf16.mxu0 %v13501_v26  ;;  %v13556_v26 = vld [vmem:[#allocation6 + $0x11c0] ss:$28 sps:$4 sm:$0xff]  }
 0x3eb   :  { %10252 = vmatpush1.bf16.msra.mxu1 %v13496_v30  ;;  %v13559_v30 = vld [vmem:[#allocation6 + $0x3c8] ss:$28 sps:$4 sm:$0xff]  }
 0x3ec   :  { %10424 = vmatpush1.bf16.msra.mxu0 %v13499_v27  ;;  %10253 = vmatprep.subr.bf16.mxu1 %v13504_v29  ;;  %v13564_v27 = vld [vmem:[#allocation6 + $0x11fc] ss:$28 sps:$4 sm:$0xff]   ;;  %v13567_v29 = vld [vmem:[#allocation6 + $0x404] ss:$28 sps:$4 sm:$0xff]  }
 0x3ed   :  { %10425 = vmatprep.subr.bf16.mxu0 %v13507_v33  ;;  %v13562_v33 = vld [vmem:[#allocation6 + $0x11f8] ss:$28 sps:$4 sm:$0xff]  }
 0x3ef   :  { %10254 = vmatpush1.bf16.msra.mxu1 %v13502_v35  ;;  %v13565_v35 = vld [vmem:[#allocation6 + $0x400] ss:$28 sps:$4 sm:$0xff]  }
 0x3f0   :  { %10426 = vmatpush1.bf16.msra.mxu0 %v13505_v37  ;;  %10255 = vmatprep.subr.bf16.mxu1 %v13510_v38  ;;  %v13570_v37 = vld [vmem:[#allocation6 + $0x1234] ss:$28 sps:$4 sm:$0xff]   ;;  %v13573_v38 = vld [vmem:[#allocation6 + $0x43c] ss:$28 sps:$4 sm:$0xff]  }
 0x3f1   :  { %10427 = vmatprep.subr.bf16.mxu0 %v13513_v47  ;;  %v13568_v47 = vld [vmem:[#allocation6 + $0x1230] ss:$28 sps:$4 sm:$0xff]  }
 0x3f3   :  { %10256 = vmatpush1.bf16.msra.mxu1 %v13508_v16  ;;  %v13571_v16 = vld [vmem:[#allocation6 + $0x438] ss:$28 sps:$4 sm:$0xff]  }
 0x3f4   :  { %10428 = vmatpush1.bf16.msra.mxu0 %v13511_v39  ;;  %10257 = vmatprep.subr.bf16.mxu1 %v13516_v41  ;;  %v13576_v39 = vld [vmem:[#allocation6 + $0x126c] ss:$28 sps:$4 sm:$0xff]   ;;  %v13579_v41 = vld [vmem:[#allocation6 + $0x474] ss:$28 sps:$4 sm:$0xff]  }
 0x3f5   :  { %10429 = vmatprep.subr.bf16.mxu0 %v13519_v42  ;;  %v13574_v42 = vld [vmem:[#allocation6 + $0x1268] ss:$28 sps:$4 sm:$0xff]  }
 0x3f7   :  { %10258 = vmatpush1.bf16.msra.mxu1 %v13514_v44  ;;  %v13577_v44 = vld [vmem:[#allocation6 + $0x470] ss:$28 sps:$4 sm:$0xff]  }
 0x3f8   :  { %10430 = vmatpush1.bf16.msra.mxu0 %v13517_v56  ;;  %10259 = vmatprep.subr.bf16.mxu1 %v13522_v45  ;;  %v13582_v56 = vld [vmem:[#allocation6 + $0x12a4] ss:$28 sps:$4 sm:$0xff]   ;;  %v13585_v45 = vld [vmem:[#allocation6 + $0x4ac] ss:$28 sps:$4 sm:$0xff]  }
 0x3f9   :  { %10431 = vmatprep.subr.bf16.mxu0 %v13525_v49  ;;  %v13580_v49 = vld [vmem:[#allocation6 + $0x12a0] ss:$28 sps:$4 sm:$0xff]  }
 0x3fb   :  { %10260 = vmatpush1.bf16.msra.mxu1 %v13520_v51  ;;  %v13583_v51 = vld [vmem:[#allocation6 + $0x4a8] ss:$28 sps:$4 sm:$0xff]  }
 0x3fc   :  { %10432 = vmatpush1.bf16.msra.mxu0 %v13523_v52  ;;  %10261 = vmatprep.subr.bf16.mxu1 %v13528_v53  ;;  %v13588_v52 = vld [vmem:[#allocation6 + $0x12dc] ss:$28 sps:$4 sm:$0xff]   ;;  %v13591_v53 = vld [vmem:[#allocation6 + $0x4e4] ss:$28 sps:$4 sm:$0xff]  }
 0x3fd   :  { %10433 = vmatprep.subr.bf16.mxu0 %v13531_v55  ;;  %v13586_v55 = vld [vmem:[#allocation6 + $0x12d8] ss:$28 sps:$4 sm:$0xff]  }
 0x3ff   :  { %10262 = vmatpush1.bf16.msra.mxu1 %v13526_v57  ;;  %v13589_v57 = vld [vmem:[#allocation6 + $0x4e0] ss:$28 sps:$4 sm:$0xff]  }
 0x400   :  { %10434 = vmatpush1.bf16.msra.mxu0 %v13529_v59  ;;  %10263 = vmatprep.subr.bf16.mxu1 %v13534_v63  ;;  %v13594_v59 = vld [vmem:[#allocation6 + $0x1314] ss:$28 sps:$4 sm:$0xff]   ;;  %v13597_v63 = vld [vmem:[#allocation6 + $0x51c] ss:$28 sps:$4 sm:$0xff]  }
 0x401   :  { %10435 = vmatprep.subr.bf16.mxu0 %v13537_v2  ;;  %v13592_v2 = vld [vmem:[#allocation6 + $0x1310] ss:$28 sps:$4 sm:$0xff]  }
 0x403   :  { %10264 = vmatpush1.bf16.msra.mxu1 %v13532_v3  ;;  %v13595_v3 = vld [vmem:[#allocation6 + $0x518] ss:$28 sps:$4 sm:$0xff]  }
 0x404   :  { %10436 = vmatpush1.bf16.msra.mxu0 %v13535_v25  ;;  %10265 = vmatprep.subr.bf16.mxu1 %v13540_v4  ;;  %v13600_v25 = vld [vmem:[#allocation6 + $0x134c] ss:$28 sps:$4 sm:$0xff]   ;;  %v13603_v4 = vld [vmem:[#allocation6 + $0x554] ss:$28 sps:$4 sm:$0xff]  }
 0x405   :  { %10437 = vmatprep.subr.bf16.mxu0 %v13543_v5  ;;  %v13598_v5 = vld [vmem:[#allocation6 + $0x1348] ss:$28 sps:$4 sm:$0xff]  }
 0x407   :  { %10266 = vmatpush1.bf16.msra.mxu1 %v13538_v6  ;;  %v13601_v6 = vld [vmem:[#allocation6 + $0x550] ss:$28 sps:$4 sm:$0xff]  }
 0x408   :  { %10438 = vmatpush1.bf16.msra.mxu0 %v13541_v7  ;;  %10267 = vmatprep.subr.bf16.mxu1 %v13546_v8  ;;  %v13606_v7 = vld [vmem:[#allocation6 + $0x1384] ss:$28 sps:$4 sm:$0xff]   ;;  %v13609_v8 = vld [vmem:[#allocation6 + $0x58c] ss:$28 sps:$4 sm:$0xff]  }
 0x409   :  { %10439 = vmatprep.subr.bf16.mxu0 %v13549_v9  ;;  %v13604_v9 = vld [vmem:[#allocation6 + $0x1380] ss:$28 sps:$4 sm:$0xff]  }
 0x40b   :  { %10268 = vmatpush1.bf16.msra.mxu1 %v13544_v11  ;;  %v13607_v11 = vld [vmem:[#allocation6 + $0x588] ss:$28 sps:$4 sm:$0xff]  }
 0x40c   :  { %10440 = vmatpush1.bf16.msra.mxu0 %v13547_v12  ;;  %10280 = vmatprep.subr.bf16.mxu1 %v13552_v15  ;;  %v13612_v12 = vld [vmem:[#allocation6 + $0x13bc] ss:$28 sps:$4 sm:$0xff]   ;;  %v13615_v15 = vld [vmem:[#allocation6 + $0x5c4] ss:$28 sps:$4 sm:$0xff]  }
 0x40d   :  { %10452 = vmatprep.subr.bf16.mxu0 %v13555_v17  ;;  %v13610_v17 = vld [vmem:[#allocation6 + $0x13b8] ss:$28 sps:$4 sm:$0xff]  }
 0x40e   :  { %10270 = vmatmul.mubr.bf16.vlgmr.msra.gmra.mrb[20].mxu1 %v14551_v43 }
 0x40f   :  { %10442 = vmatmul.mubr.bf16.vlgmr.msra.gmra.mrb[16].mxu0 %v14493_v1  ;;  %10281 = vmatpush1.bf16.msra.mxu1 %v13550_v20  ;;  %v13613_v20 = vld [vmem:[#allocation6 + $0x5c0] ss:$28 sps:$4 sm:$0xff]  }
 0x410   :  { %10312 = vmatprep.mubr.bf16.mxu1 %v14625_v23  ;;  %10453 = vmatpush1.bf16.msra.mxu0 %v13553_v21  ;;  %v13618_v21 = vld [vmem:[#allocation6 + $0x13f4] ss:$28 sps:$4 sm:$0xff]  }
 0x411   :  { %10484 = vmatprep.mubr.bf16.mxu0 %v14554_v46  ;;  %10282 = vmatprep.subr.bf16.mxu1 %v13558_v22  ;;  %v13621_v22 = vld [vmem:[#allocation6 + $0x5fc] ss:$28 sps:$4 sm:$0xff]  }
 0x412   :  { %10454 = vmatprep.subr.bf16.mxu0 %v13561_v24  ;;  %v13616_v24 = vld [vmem:[#allocation6 + $0x13f0] ss:$28 sps:$4 sm:$0xff]  }
 0x413   :  { %10283 = vmatpush1.bf16.msra.mxu1 %v13556_v26  ;;  %v13619_v26 = vld [vmem:[#allocation6 + $0x5f8] ss:$28 sps:$4 sm:$0xff]  }
 0x414   :  { %10455 = vmatpush1.bf16.msra.mxu0 %v13559_v30  ;;  %10284 = vmatprep.subr.bf16.mxu1 %v13564_v27  ;;  %v13624_v30 = vld [vmem:[#allocation6 + $0x142c] ss:$28 sps:$4 sm:$0xff]   ;;  %v13627_v27 = vld [vmem:[#allocation6 + $0x634] ss:$28 sps:$4 sm:$0xff]  }
 0x415   :  { %10456 = vmatprep.subr.bf16.mxu0 %v13567_v29  ;;  %v13622_v29 = vld [vmem:[#allocation6 + $0x1428] ss:$28 sps:$4 sm:$0xff]  }
 0x417   :  { %10285 = vmatpush1.bf16.msra.mxu1 %v13562_v33  ;;  %v13625_v33 = vld [vmem:[#allocation6 + $0x630] ss:$28 sps:$4 sm:$0xff]  }
 0x418   :  { %10457 = vmatpush1.bf16.msra.mxu0 %v13565_v35  ;;  %10286 = vmatprep.subr.bf16.mxu1 %v13570_v37  ;;  %v13630_v35 = vld [vmem:[#allocation6 + $0x1464] ss:$28 sps:$4 sm:$0xff]   ;;  %v13633_v37 = vld [vmem:[#allocation6 + $0x66c] ss:$28 sps:$4 sm:$0xff]  }
 0x419   :  { %10458 = vmatprep.subr.bf16.mxu0 %v13573_v38  ;;  %v13628_v38 = vld [vmem:[#allocation6 + $0x1460] ss:$28 sps:$4 sm:$0xff]  }
 0x41b   :  { %10287 = vmatpush1.bf16.msra.mxu1 %v13568_v47  ;;  %v13631_v47 = vld [vmem:[#allocation6 + $0x668] ss:$28 sps:$4 sm:$0xff]  }
 0x41c   :  { %10459 = vmatpush1.bf16.msra.mxu0 %v13571_v16  ;;  %10288 = vmatprep.subr.bf16.mxu1 %v13576_v39  ;;  %v13636_v16 = vld [vmem:[#allocation6 + $0x149c] ss:$28 sps:$4 sm:$0xff]   ;;  %v13639_v39 = vld [vmem:[#allocation6 + $0x6a4] ss:$28 sps:$4 sm:$0xff]  }
 0x41d   :  { %10460 = vmatprep.subr.bf16.mxu0 %v13579_v41  ;;  %v13634_v41 = vld [vmem:[#allocation6 + $0x1498] ss:$28 sps:$4 sm:$0xff]  }
 0x41f   :  { %10289 = vmatpush1.bf16.msra.mxu1 %v13574_v42  ;;  %v13637_v42 = vld [vmem:[#allocation6 + $0x6a0] ss:$28 sps:$4 sm:$0xff]  }
 0x420   :  { %10461 = vmatpush1.bf16.msra.mxu0 %v13577_v44  ;;  %10290 = vmatprep.subr.bf16.mxu1 %v13582_v56  ;;  %v13642_v44 = vld [vmem:[#allocation6 + $0x14d4] ss:$28 sps:$4 sm:$0xff]   ;;  %v13645_v56 = vld [vmem:[#allocation6 + $0x6dc] ss:$28 sps:$4 sm:$0xff]  }
 0x421   :  { %10462 = vmatprep.subr.bf16.mxu0 %v13585_v45  ;;  %v13640_v45 = vld [vmem:[#allocation6 + $0x14d0] ss:$28 sps:$4 sm:$0xff]  }
 0x423   :  { %10291 = vmatpush1.bf16.msra.mxu1 %v13580_v49  ;;  %v13643_v49 = vld [vmem:[#allocation6 + $0x6d8] ss:$28 sps:$4 sm:$0xff]  }
 0x424   :  { %10463 = vmatpush1.bf16.msra.mxu0 %v13583_v51  ;;  %10292 = vmatprep.subr.bf16.mxu1 %v13588_v52  ;;  %v13648_v51 = vld [vmem:[#allocation6 + $0x150c] ss:$28 sps:$4 sm:$0xff]   ;;  %v13651_v52 = vld [vmem:[#allocation6 + $0x714] ss:$28 sps:$4 sm:$0xff]  }
 0x425   :  { %10464 = vmatprep.subr.bf16.mxu0 %v13591_v53  ;;  %v13646_v53 = vld [vmem:[#allocation6 + $0x1508] ss:$28 sps:$4 sm:$0xff]  }
 0x427   :  { %10293 = vmatpush1.bf16.msra.mxu1 %v13586_v55  ;;  %v13649_v55 = vld [vmem:[#allocation6 + $0x710] ss:$28 sps:$4 sm:$0xff]  }
 0x428   :  { %10465 = vmatpush1.bf16.msra.mxu0 %v13589_v57  ;;  %10294 = vmatprep.subr.bf16.mxu1 %v13594_v59  ;;  %v13654_v57 = vld [vmem:[#allocation6 + $0x1544] ss:$28 sps:$4 sm:$0xff]   ;;  %v13657_v59 = vld [vmem:[#allocation6 + $0x74c] ss:$28 sps:$4 sm:$0xff]  }
 0x429   :  { %10466 = vmatprep.subr.bf16.mxu0 %v13597_v63  ;;  %v13652_v63 = vld [vmem:[#allocation6 + $0x1540] ss:$28 sps:$4 sm:$0xff]  }
 0x42b   :  { %10295 = vmatpush1.bf16.msra.mxu1 %v13592_v2  ;;  %v13655_v2 = vld [vmem:[#allocation6 + $0x748] ss:$28 sps:$4 sm:$0xff]  }
 0x42c   :  { %10467 = vmatpush1.bf16.msra.mxu0 %v13595_v3  ;;  %10296 = vmatprep.subr.bf16.mxu1 %v13600_v25  ;;  %v13660_v3 = vld [vmem:[#allocation6 + $0x157c] ss:$28 sps:$4 sm:$0xff]   ;;  %v13663_v25 = vld [vmem:[#allocation6 + $0x784] ss:$28 sps:$4 sm:$0xff]  }
 0x42d   :  { %10468 = vmatprep.subr.bf16.mxu0 %v13603_v4  ;;  %v13658_v4 = vld [vmem:[#allocation6 + $0x1578] ss:$28 sps:$4 sm:$0xff]  }
 0x42f   :  { %10297 = vmatpush1.bf16.msra.mxu1 %v13598_v5  ;;  %v13661_v5 = vld [vmem:[#allocation6 + $0x780] ss:$28 sps:$4 sm:$0xff]  }
 0x430   :  { %10469 = vmatpush1.bf16.msra.mxu0 %v13601_v6  ;;  %10298 = vmatprep.subr.bf16.mxu1 %v13606_v7  ;;  %v13666_v6 = vld [vmem:[#allocation6 + $0x15b4] ss:$28 sps:$4 sm:$0xff]   ;;  %v13669_v7 = vld [vmem:[#allocation6 + $0x7bc] ss:$28 sps:$4 sm:$0xff]  }
 0x431   :  { %10470 = vmatprep.subr.bf16.mxu0 %v13609_v8  ;;  %v13664_v8 = vld [vmem:[#allocation6 + $0x15b0] ss:$28 sps:$4 sm:$0xff]  }
 0x433   :  { %10299 = vmatpush1.bf16.msra.mxu1 %v13604_v9  ;;  %v13667_v9 = vld [vmem:[#allocation6 + $0x7b8] ss:$28 sps:$4 sm:$0xff]  }
 0x434   :  { %10471 = vmatpush1.bf16.msra.mxu0 %v13607_v11  ;;  %10300 = vmatprep.subr.bf16.mxu1 %v13612_v12  ;;  %v13672_v11 = vld [vmem:[#allocation6 + $0x15ec] ss:$28 sps:$4 sm:$0xff]   ;;  %v13675_v12 = vld [vmem:[#allocation6 + $0x7f4] ss:$28 sps:$4 sm:$0xff]  }
 0x435   :  { %10472 = vmatprep.subr.bf16.mxu0 %v13615_v15  ;;  %v13670_v15 = vld [vmem:[#allocation6 + $0x15e8] ss:$28 sps:$4 sm:$0xff]  }
 0x437   :  { %10301 = vmatpush1.bf16.msra.mxu1 %v13610_v17  ;;  %v13673_v17 = vld [vmem:[#allocation6 + $0x7f0] ss:$28 sps:$4 sm:$0xff]  }
 0x438   :  { %10473 = vmatpush1.bf16.msra.mxu0 %v13613_v20  ;;  %10302 = vmatprep.subr.bf16.mxu1 %v13618_v21  ;;  %v13678_v20 = vld [vmem:[#allocation6 + $0x1624] ss:$28 sps:$4 sm:$0xff]   ;;  %v13681_v21 = vld [vmem:[#allocation6 + $0x82c] ss:$28 sps:$4 sm:$0xff]  }
 0x439   :  { %10474 = vmatprep.subr.bf16.mxu0 %v13621_v22  ;;  %v13676_v22 = vld [vmem:[#allocation6 + $0x1620] ss:$28 sps:$4 sm:$0xff]  }
 0x43b   :  { %10303 = vmatpush1.bf16.msra.mxu1 %v13616_v24  ;;  %v13679_v24 = vld [vmem:[#allocation6 + $0x828] ss:$28 sps:$4 sm:$0xff]  }
 0x43c   :  { %10475 = vmatpush1.bf16.msra.mxu0 %v13619_v26  ;;  %10304 = vmatprep.subr.bf16.mxu1 %v13624_v30  ;;  %v13684_v26 = vld [vmem:[#allocation6 + $0x165c] ss:$28 sps:$4 sm:$0xff]   ;;  %v13687_v30 = vld [vmem:[#allocation6 + $0x864] ss:$28 sps:$4 sm:$0xff]  }
 0x43d   :  { %10476 = vmatprep.subr.bf16.mxu0 %v13627_v27  ;;  %v13682_v27 = vld [vmem:[#allocation6 + $0x1658] ss:$28 sps:$4 sm:$0xff]  }
 0x43f   :  { %10305 = vmatpush1.bf16.msra.mxu1 %v13622_v29  ;;  %v13685_v29 = vld [vmem:[#allocation6 + $0x860] ss:$28 sps:$4 sm:$0xff]  }
 0x440   :  { %10477 = vmatpush1.bf16.msra.mxu0 %v13625_v33  ;;  %10306 = vmatprep.subr.bf16.mxu1 %v13630_v35  ;;  %v13690_v33 = vld [vmem:[#allocation6 + $0x1694] ss:$28 sps:$4 sm:$0xff]   ;;  %v13693_v35 = vld [vmem:[#allocation6 + $0x89c] ss:$28 sps:$4 sm:$0xff]  }
 0x441   :  { %10478 = vmatprep.subr.bf16.mxu0 %v13633_v37  ;;  %v13688_v37 = vld [vmem:[#allocation6 + $0x1690] ss:$28 sps:$4 sm:$0xff]  }
 0x443   :  { %10307 = vmatpush1.bf16.msra.mxu1 %v13628_v38  ;;  %v13691_v38 = vld [vmem:[#allocation6 + $0x898] ss:$28 sps:$4 sm:$0xff]  }
 0x444   :  { %10479 = vmatpush1.bf16.msra.mxu0 %v13631_v47  ;;  %10308 = vmatprep.subr.bf16.mxu1 %v13636_v16  ;;  %v13696_v47 = vld [vmem:[#allocation6 + $0x16cc] ss:$28 sps:$4 sm:$0xff]   ;;  %v13699_v16 = vld [vmem:[#allocation6 + $0x8d4] ss:$28 sps:$4 sm:$0xff]  }
 0x445   :  { %10480 = vmatprep.subr.bf16.mxu0 %v13639_v39  ;;  %v13694_v39 = vld [vmem:[#allocation6 + $0x16c8] ss:$28 sps:$4 sm:$0xff]  }
 0x447   :  { %10309 = vmatpush1.bf16.msra.mxu1 %v13634_v41  ;;  %v13697_v41 = vld [vmem:[#allocation6 + $0x8d0] ss:$28 sps:$4 sm:$0xff]  }
 0x448   :  { %10481 = vmatpush1.bf16.msra.mxu0 %v13637_v42  ;;  %10310 = vmatprep.subr.bf16.mxu1 %v13642_v44  ;;  %v13702_v42 = vld [vmem:[#allocation6 + $0x1704] ss:$28 sps:$4 sm:$0xff]   ;;  %v13705_v44 = vld [vmem:[#allocation6 + $0x90c] ss:$28 sps:$4 sm:$0xff]  }
 0x449   :  { %10482 = vmatprep.subr.bf16.mxu0 %v13645_v56  ;;  %v13700_v56 = vld [vmem:[#allocation6 + $0x1700] ss:$28 sps:$4 sm:$0xff]  }
 0x44b   :  { %10311 = vmatpush1.bf16.msra.mxu1 %v13640_v45  ;;  %v13703_v45 = vld [vmem:[#allocation6 + $0x908] ss:$28 sps:$4 sm:$0xff]  }
 0x44c   :  { %10483 = vmatpush1.bf16.msra.mxu0 %v13643_v49  ;;  %10323 = vmatprep.subr.bf16.mxu1 %v13648_v51  ;;  %v13708_v49 = vld [vmem:[#allocation6 + $0x173c] ss:$28 sps:$4 sm:$0xff]   ;;  %v13711_v51 = vld [vmem:[#allocation6 + $0x944] ss:$28 sps:$4 sm:$0xff]  }
 0x44d   :  { %10495 = vmatprep.subr.bf16.mxu0 %v13651_v52  ;;  %v13706_v52 = vld [vmem:[#allocation6 + $0x1738] ss:$28 sps:$4 sm:$0xff]  }
 0x44e   :  { %10313 = vmatmul.mubr.bf16.vlgmr.msra.gmra.mrb[20].mxu1 %v14623_v19 }
 0x44f   :  { %10485 = vmatmul.mubr.bf16.vlgmr.msra.gmra.mrb[16].mxu0 %v14547_v34  ;;  %10324 = vmatpush1.bf16.msra.mxu1 %v13646_v53  ;;  %v13709_v53 = vld [vmem:[#allocation6 + $0x940] ss:$28 sps:$4 sm:$0xff]  }
 0x450   :  { %10355 = vmatprep.mubr.bf16.mxu1 %v14607_v48  ;;  %10496 = vmatpush1.bf16.msra.mxu0 %v13649_v55  ;;  %v13714_v55 = vld [vmem:[#allocation6 + $0x1774] ss:$28 sps:$4 sm:$0xff]  }
 0x451   :  { %10527 = vmatprep.mubr.bf16.mxu0 %v14503_v18  ;;  %10325 = vmatprep.subr.bf16.mxu1 %v13654_v57  ;;  %v13717_v57 = vld [vmem:[#allocation6 + $0x97c] ss:$28 sps:$4 sm:$0xff]  }
 0x452   :  { %10497 = vmatprep.subr.bf16.mxu0 %v13657_v59  ;;  %v13712_v59 = vld [vmem:[#allocation6 + $0x1770] ss:$28 sps:$4 sm:$0xff]  }
 0x453   :  { %10326 = vmatpush1.bf16.msra.mxu1 %v13652_v63  ;;  %v13715_v63 = vld [vmem:[#allocation6 + $0x978] ss:$28 sps:$4 sm:$0xff]  }
 0x454   :  { %10498 = vmatpush1.bf16.msra.mxu0 %v13655_v2  ;;  %10327 = vmatprep.subr.bf16.mxu1 %v13660_v3  ;;  %v13720_v2 = vld [vmem:[#allocation6 + $0x17ac] ss:$28 sps:$4 sm:$0xff]   ;;  %v13723_v3 = vld [vmem:[#allocation6 + $0x9b4] ss:$28 sps:$4 sm:$0xff]  }
 0x455   :  { %10499 = vmatprep.subr.bf16.mxu0 %v13663_v25  ;;  %v13718_v25 = vld [vmem:[#allocation6 + $0x17a8] ss:$28 sps:$4 sm:$0xff]  }
 0x457   :  { %10328 = vmatpush1.bf16.msra.mxu1 %v13658_v4  ;;  %v13721_v4 = vld [vmem:[#allocation6 + $0x9b0] ss:$28 sps:$4 sm:$0xff]  }
 0x458   :  { %10500 = vmatpush1.bf16.msra.mxu0 %v13661_v5  ;;  %10329 = vmatprep.subr.bf16.mxu1 %v13666_v6  ;;  %v13726_v5 = vld [vmem:[#allocation6 + $0x17e4] ss:$28 sps:$4 sm:$0xff]   ;;  %v13729_v6 = vld [vmem:[#allocation6 + $0x9ec] ss:$28 sps:$4 sm:$0xff]  }
 0x459   :  { %10501 = vmatprep.subr.bf16.mxu0 %v13669_v7  ;;  %v13724_v7 = vld [vmem:[#allocation6 + $0x17e0] ss:$28 sps:$4 sm:$0xff]  }
 0x45b   :  { %10330 = vmatpush1.bf16.msra.mxu1 %v13664_v8  ;;  %v13727_v8 = vld [vmem:[#allocation6 + $0x9e8] ss:$28 sps:$4 sm:$0xff]  }
 0x45c   :  { %10502 = vmatpush1.bf16.msra.mxu0 %v13667_v9  ;;  %10331 = vmatprep.subr.bf16.mxu1 %v13672_v11  ;;  %v13732_v9 = vld [vmem:[#allocation6 + $0x181c] ss:$28 sps:$4 sm:$0xff]   ;;  %v13735_v11 = vld [vmem:[#allocation6 + $0xa24] ss:$28 sps:$4 sm:$0xff]  }
 0x45d   :  { %10503 = vmatprep.subr.bf16.mxu0 %v13675_v12  ;;  %v13730_v12 = vld [vmem:[#allocation6 + $0x1818] ss:$28 sps:$4 sm:$0xff]  }
 0x45f   :  { %10332 = vmatpush1.bf16.msra.mxu1 %v13670_v15  ;;  %v13733_v15 = vld [vmem:[#allocation6 + $0xa20] ss:$28 sps:$4 sm:$0xff]  }
 0x460   :  { %10504 = vmatpush1.bf16.msra.mxu0 %v13673_v17  ;;  %10333 = vmatprep.subr.bf16.mxu1 %v13678_v20  ;;  %v13738_v17 = vld [vmem:[#allocation6 + $0x1854] ss:$28 sps:$4 sm:$0xff]   ;;  %v13741_v20 = vld [vmem:[#allocation6 + $0xa5c] ss:$28 sps:$4 sm:$0xff]  }
 0x461   :  { %10505 = vmatprep.subr.bf16.mxu0 %v13681_v21  ;;  %v13736_v21 = vld [vmem:[#allocation6 + $0x1850] ss:$28 sps:$4 sm:$0xff]  }
 0x463   :  { %10334 = vmatpush1.bf16.msra.mxu1 %v13676_v22  ;;  %v13739_v22 = vld [vmem:[#allocation6 + $0xa58] ss:$28 sps:$4 sm:$0xff]  }
 0x464   :  { %10506 = vmatpush1.bf16.msra.mxu0 %v13679_v24  ;;  %10335 = vmatprep.subr.bf16.mxu1 %v13684_v26  ;;  %v13744_v24 = vld [vmem:[#allocation6 + $0x188c] ss:$28 sps:$4 sm:$0xff]   ;;  %v13747_v26 = vld [vmem:[#allocation6 + $0xa94] ss:$28 sps:$4 sm:$0xff]  }
 0x465   :  { %10507 = vmatprep.subr.bf16.mxu0 %v13687_v30  ;;  %v13742_v30 = vld [vmem:[#allocation6 + $0x1888] ss:$28 sps:$4 sm:$0xff]  }
 0x467   :  { %10336 = vmatpush1.bf16.msra.mxu1 %v13682_v27  ;;  %v13745_v27 = vld [vmem:[#allocation6 + $0xa90] ss:$28 sps:$4 sm:$0xff]  }
 0x468   :  { %10508 = vmatpush1.bf16.msra.mxu0 %v13685_v29  ;;  %10337 = vmatprep.subr.bf16.mxu1 %v13690_v33  ;;  %v13750_v29 = vld [vmem:[#allocation6 + $0x18c4] ss:$28 sps:$4 sm:$0xff]   ;;  %v13753_v33 = vld [vmem:[#allocation6 + $0xacc] ss:$28 sps:$4 sm:$0xff]  }
 0x469   :  { %10509 = vmatprep.subr.bf16.mxu0 %v13693_v35  ;;  %v13748_v35 = vld [vmem:[#allocation6 + $0x18c0] ss:$28 sps:$4 sm:$0xff]  }
 0x46b   :  { %10338 = vmatpush1.bf16.msra.mxu1 %v13688_v37  ;;  %v13751_v37 = vld [vmem:[#allocation6 + $0xac8] ss:$28 sps:$4 sm:$0xff]  }
 0x46c   :  { %10510 = vmatpush1.bf16.msra.mxu0 %v13691_v38  ;;  %10339 = vmatprep.subr.bf16.mxu1 %v13696_v47  ;;  %v13756_v38 = vld [vmem:[#allocation6 + $0x18fc] ss:$28 sps:$4 sm:$0xff]   ;;  %v13759_v47 = vld [vmem:[#allocation6 + $0xb04] ss:$28 sps:$4 sm:$0xff]  }
 0x46d   :  { %10511 = vmatprep.subr.bf16.mxu0 %v13699_v16  ;;  %v13754_v16 = vld [vmem:[#allocation6 + $0x18f8] ss:$28 sps:$4 sm:$0xff]  }
 0x46f   :  { %10340 = vmatpush1.bf16.msra.mxu1 %v13694_v39  ;;  %v13757_v39 = vld [vmem:[#allocation6 + $0xb00] ss:$28 sps:$4 sm:$0xff]  }
 0x470   :  { %10512 = vmatpush1.bf16.msra.mxu0 %v13697_v41  ;;  %10341 = vmatprep.subr.bf16.mxu1 %v13702_v42  ;;  %v13762_v41 = vld [vmem:[#allocation6 + $0x1934] ss:$28 sps:$4 sm:$0xff]   ;;  %v13765_v42 = vld [vmem:[#allocation6 + $0xb3c] ss:$28 sps:$4 sm:$0xff]  }
 0x471   :  { %10513 = vmatprep.subr.bf16.mxu0 %v13705_v44  ;;  %v13760_v44 = vld [vmem:[#allocation6 + $0x1930] ss:$28 sps:$4 sm:$0xff]  }
 0x473   :  { %10342 = vmatpush1.bf16.msra.mxu1 %v13700_v56  ;;  %v13763_v56 = vld [vmem:[#allocation6 + $0xb38] ss:$28 sps:$4 sm:$0xff]  }
 0x474   :  { %10514 = vmatpush1.bf16.msra.mxu0 %v13703_v45  ;;  %10343 = vmatprep.subr.bf16.mxu1 %v13708_v49  ;;  %v13768_v45 = vld [vmem:[#allocation6 + $0x196c] ss:$28 sps:$4 sm:$0xff]   ;;  %v13771_v49 = vld [vmem:[#allocation6 + $0xb74] ss:$28 sps:$4 sm:$0xff]  }
 0x475   :  { %10515 = vmatprep.subr.bf16.mxu0 %v13711_v51  ;;  %v13766_v51 = vld [vmem:[#allocation6 + $0x1968] ss:$28 sps:$4 sm:$0xff]  }
 0x477   :  { %10344 = vmatpush1.bf16.msra.mxu1 %v13706_v52  ;;  %v13769_v52 = vld [vmem:[#allocation6 + $0xb70] ss:$28 sps:$4 sm:$0xff]  }
 0x478   :  { %10516 = vmatpush1.bf16.msra.mxu0 %v13709_v53  ;;  %10345 = vmatprep.subr.bf16.mxu1 %v13714_v55  ;;  %v5076_v53 = vld [vmem:[#allocation7] sm:$0xff] }
 0x479   :  { %10517 = vmatprep.subr.bf16.mxu0 %v13717_v57  ;;  %v13774_v55 = vld [vmem:[#allocation6 + $0x19a4] ss:$28 sps:$4 sm:$0xff]   ;;  %v13777_v57 = vld [vmem:[#allocation6 + $0xbac] ss:$28 sps:$4 sm:$0xff]  }
 0x47b   :  { %10346 = vmatpush1.bf16.msra.mxu1 %v13712_v59  ;;  %v5081_v59 = vrot.slane %v5076_v53, %v14432_v58  ;;  %v13786_v58 = vld [vmem:[#allocation6 + $0x1a14] ss:$28 sps:$4 sm:$0xff]  }
 0x47c   :  { %10518 = vmatpush1.bf16.msra.mxu0 %v13715_v63  ;;  %10347 = vmatprep.subr.bf16.mxu1 %v13720_v2  ;;  %v13772_v63 = vld [vmem:[#allocation6 + $0x19a0] ss:$28 sps:$4 sm:$0xff]   ;;  %v5085_v2 = vrot.slane %v5076_v53, %v14438_v61  ;;  %v13816_v53 = vld [vmem:[#allocation6 + $0x1b2c] ss:$28 sps:$4 sm:$0xff]  }
 0x47d   :  { %10519 = vmatprep.subr.bf16.mxu0 %v13723_v3  ;;  %v13775_v3 = vld [vmem:[#allocation6 + $0xba8] ss:$28 sps:$4 sm:$0xff]   ;;  %v13789_v61 = vld [vmem:[#allocation6 + $0xc1c] ss:$28 sps:$4 sm:$0xff]  }
 0x47f   :  { %10348 = vmatpush1.bf16.msra.mxu1 %v13718_v25  ;;  %v13780_v25 = vld [vmem:[#allocation6 + $0x19dc] ss:$28 sps:$4 sm:$0xff]  }
 0x480   :  { %10520 = vmatpush1.bf16.msra.mxu0 %v13721_v4  ;;  %10349 = vmatprep.subr.bf16.mxu1 %v13726_v5  ;;  %v13783_v4 = vld [vmem:[#allocation6 + $0xbe4] ss:$28 sps:$4 sm:$0xff]  }
 0x481   :  { %10521 = vmatprep.subr.bf16.mxu0 %v13729_v6 }
 0x483   :  { %10350 = vmatpush1.bf16.msra.mxu1 %v13724_v7 }
 0x484   :  { %10522 = vmatpush1.bf16.msra.mxu0 %v13727_v8  ;;  %10351 = vmatprep.subr.bf16.mxu1 %v13732_v9  ;;  %v13778_v8 = vld [vmem:[#allocation6 + $0x19d8] ss:$28 sps:$4 sm:$0xff]  }
 0x485   :  { %10523 = vmatprep.subr.bf16.mxu0 %v13735_v11 }
 0x487   :  { %10352 = vmatpush1.bf16.msra.mxu1 %v13730_v12  ;;  %v13781_v12 = vld [vmem:[#allocation6 + $0xbe0] ss:$28 sps:$4 sm:$0xff]  }
 0x488   :  { %10524 = vmatpush1.bf16.msra.mxu0 %v13733_v15  ;;  %10353 = vmatprep.subr.bf16.mxu1 %v13738_v17 }
 0x489   :  { %10525 = vmatprep.subr.bf16.mxu0 %v13741_v20 }
 0x48b   :  { %10354 = vmatpush1.bf16.msra.mxu1 %v13736_v21  ;;  %v13784_v21 = vld [vmem:[#allocation6 + $0x1a10] ss:$28 sps:$4 sm:$0xff]  }
 0x48c   :  { %10526 = vmatpush1.bf16.msra.mxu0 %v13739_v22  ;;  %10366 = vmatprep.subr.bf16.mxu1 %v13744_v24  ;;  %v13787_v22 = vld [vmem:[#allocation6 + $0xc18] ss:$28 sps:$4 sm:$0xff]   ;;  %v13792_v24 = vld [vmem:[#allocation6 + $0x1a4c] ss:$28 sps:$4 sm:$0xff]  }
 0x48d   :  { %10538 = vmatprep.subr.bf16.mxu0 %v13747_v26  ;;  %v13795_v26 = vld [vmem:[#allocation6 + $0xc54] ss:$28 sps:$4 sm:$0xff]  }
 0x48e   :  { %10356 = vmatmul.mubr.bf16.vlgmr.msra.gmra.mrb[20].mxu1 %v14602_v36 }
 0x48f   :  { %10528 = vmatmul.mubr.bf16.vlgmr.msra.gmra.mrb[16].mxu0 %v14497_v10  ;;  %10367 = vmatpush1.bf16.msra.mxu1 %v13742_v30  ;;  %v13790_v30 = vld [vmem:[#allocation6 + $0x1a48] ss:$28 sps:$4 sm:$0xff]  }
 0x490   :  { %10398 = vmatprep.mubr.bf16.mxu1 %v14640_v62  ;;  %10539 = vmatpush1.bf16.msra.mxu0 %v13745_v27  ;;  %v13793_v27 = vld [vmem:[#allocation6 + $0xc50] ss:$28 sps:$4 sm:$0xff]  }
 0x491   :  { %10570 = vmatprep.mubr.bf16.mxu0 %v14605_v40  ;;  %10368 = vmatprep.subr.bf16.mxu1 %v13750_v29  ;;  %v13798_v29 = vld [vmem:[#allocation6 + $0x1a84] ss:$28 sps:$4 sm:$0xff]  }
 0x492   :  { %10540 = vmatprep.subr.bf16.mxu0 %v13753_v33  ;;  %v13801_v33 = vld [vmem:[#allocation6 + $0xc8c] ss:$28 sps:$4 sm:$0xff]  }
 0x493   :  { %10369 = vmatpush1.bf16.msra.mxu1 %v13748_v35 }
 0x494   :  { %10541 = vmatpush1.bf16.msra.mxu0 %v13751_v37  ;;  %10370 = vmatprep.subr.bf16.mxu1 %v13756_v38  ;;  %v13796_v37 = vld [vmem:[#allocation6 + $0x1a80] ss:$28 sps:$4 sm:$0xff]  }
 0x495   :  { %10542 = vmatprep.subr.bf16.mxu0 %v13759_v47  ;;  %v13799_v47 = vld [vmem:[#allocation6 + $0xc88] ss:$28 sps:$4 sm:$0xff]  }
 0x497   :  { %10371 = vmatpush1.bf16.msra.mxu1 %v13754_v16  ;;  %v13804_v16 = vld [vmem:[#allocation6 + $0x1abc] ss:$28 sps:$4 sm:$0xff]  }
 0x498   :  { %10543 = vmatpush1.bf16.msra.mxu0 %v13757_v39  ;;  %10372 = vmatprep.subr.bf16.mxu1 %v13762_v41  ;;  %v13807_v41 = vld [vmem:[#allocation6 + $0xcc4] ss:$28 sps:$4 sm:$0xff]  }
 0x499   :  { %10544 = vmatprep.subr.bf16.mxu0 %v13765_v42 }
 0x49b   :  { %10373 = vmatpush1.bf16.msra.mxu1 %v13760_v44  ;;  %v13802_v44 = vld [vmem:[#allocation6 + $0x1ab8] ss:$28 sps:$4 sm:$0xff]  }
 0x49c   :  { %10545 = vmatpush1.bf16.msra.mxu0 %v13763_v56  ;;  %10374 = vmatprep.subr.bf16.mxu1 %v13768_v45  ;;  %v13805_v56 = vld [vmem:[#allocation6 + $0xcc0] ss:$28 sps:$4 sm:$0xff]   ;;  %v13810_v45 = vld [vmem:[#allocation6 + $0x1af4] ss:$28 sps:$4 sm:$0xff]  }
 0x49d   :  { %10546 = vmatprep.subr.bf16.mxu0 %v13771_v49  ;;  %v13813_v49 = vld [vmem:[#allocation6 + $0xcfc] ss:$28 sps:$4 sm:$0xff]  }
 0x49f   :  { %10375 = vmatpush1.bf16.msra.mxu1 %v13766_v51  ;;  %v13808_v51 = vld [vmem:[#allocation6 + $0x1af0] ss:$28 sps:$4 sm:$0xff]  }
 0x4a0   :  { %10547 = vmatpush1.bf16.msra.mxu0 %v13769_v52  ;;  %10376 = vmatprep.subr.bf16.mxu1 %v13774_v55  ;;  %v13811_v52 = vld [vmem:[#allocation6 + $0xcf8] ss:$28 sps:$4 sm:$0xff]  }
 0x4a1   :  { %10548 = vmatprep.subr.bf16.mxu0 %v13777_v57  ;;  %v10056_v5 = vpop.f32.mrb[12].mxu0  ;;  %v13819_v55 = vld [vmem:[#allocation6 + $0xd34] ss:$28 sps:$4 sm:$0xff]   ;;  %v13814_v57 = vld [vmem:[#allocation6 + $0x1b28] ss:$28 sps:$4 sm:$0xff]  }
 0x4a2   :  { %v12736_v6 = vadd.f32 %v10056_v5, %v5081_v59  ;;  %v10058_v7 = vpop.f32.mrb[13].mxu0  ;;  %v13831_v5 = vld [vmem:[#allocation6 + $0xda4] ss:$28 sps:$4 sm:$0xff]  }
 0x4a3   :  { %10377 = vmatpush1.bf16.msra.mxu1 %v13772_v63  ;;  %v12737_v9 = vadd.f32 %v10058_v7, %v5085_v2  ;;  %v10060_v11 = vpop.f32.mrb[14].mxu0  ;;  %v13822_v63 = vld [vmem:[#allocation6 + $0x1b64] ss:$28 sps:$4 sm:$0xff]  }
 0x4a4   :  { %10549 = vmatpush1.bf16.msra.mxu0 %v13775_v3  ;;  %10378 = vmatprep.subr.bf16.mxu1 %v13780_v25  ;;  %14158 = vtanh.f32 %v12736_v6  ;;  %v12738_v15 = vadd.f32 %v10060_v11, %v5081_v59  ;;  %v10062_v17 = vpop.f32.mrb[15].mxu0  ;;  %v13817_v59 = vld [vmem:[#allocation6 + $0xd30] ss:$28 sps:$4 sm:$0xff]   ;;  %v13820_v3 = vld [vmem:[#allocation6 + $0x1b60] ss:$28 sps:$4 sm:$0xff]  }
 0x4a5   :  { %10550 = vmatprep.subr.bf16.mxu0 %v13783_v4  ;;  %14160 = vtanh.f32 %v12737_v9  ;;  %v12739_v20 = vadd.f32 %v10062_v17, %v5085_v2  ;;  %v13825_v2 = vld [vmem:[#allocation6 + $0xd6c] ss:$28 sps:$4 sm:$0xff]   ;;  %v13828_v4 = vld [vmem:[#allocation6 + $0x1b9c] ss:$28 sps:$4 sm:$0xff]  }
 0x4a6   :  { %14162 = vtanh.f32 %v12738_v15  ;;  %v13823_v25 = vld [vmem:[#allocation6 + $0xd68] ss:$28 sps:$4 sm:$0xff]   ;;  %v13826_v6 = vld [vmem:[#allocation6 + $0x1b98] ss:$28 sps:$4 sm:$0xff]   ;;  %v13829_v7 = vld [vmem:[#allocation6 + $0xda0] ss:$28 sps:$4 sm:$0xff]  }
 0x4a7   :  { %10379 = vmatpush1.bf16.msra.mxu1 %v13778_v8  ;;  %14164 = vtanh.f32 %v12739_v20  ;;  %v13834_v8 = vld [vmem:[#allocation6 + $0x1bd4] ss:$28 sps:$4 sm:$0xff]   ;;  %v13837_v9 = vld [vmem:[#allocation6 + $0xddc] ss:$28 sps:$4 sm:$0xff]   ;;  %v13845_v20 = vld [vmem:[#allocation6 + $0xe4c] ss:$28 sps:$4 sm:$0xff]  }
 0x4a8   :  { %10551 = vmatpush1.bf16.msra.mxu0 %v13781_v12  ;;  %10380 = vmatprep.subr.bf16.mxu1 %v13786_v58  ;;  %v13832_v11 = vld [vmem:[#allocation6 + $0x1bd0] ss:$28 sps:$4 sm:$0xff]   ;;  %v13835_v12 = vld [vmem:[#allocation6 + $0xdd8] ss:$28 sps:$4 sm:$0xff]  }
 0x4a9   :  { %10552 = vmatprep.subr.bf16.mxu0 %v13789_v61  ;;  %v13841_v58 = vld [vmem:[#allocation6 + $0x1d8] ss:$28 sps:$4 sm:$0xff]   ;;  %v13838_v61 = vld [vmem:[#allocation6 + $0xe10] ss:$28 sps:$4 sm:$0xff]  }
 0x4aa   :  { %v13840_v15 = vld [vmem:[#allocation6 + $0xe14] ss:$28 sps:$4 sm:$0xff]  }
 0x4ab   :  { %10381 = vmatpush1.bf16.msra.mxu1 %v13784_v21  ;;  %v13842_v17 = vld [vmem:[#allocation6 + $0x18] ss:$28 sps:$4 sm:$0xff]   ;;  %v13846_v21 = vld [vmem:[#allocation6 + $0x210] ss:$28 sps:$4 sm:$0xff]  }
 0x4ac   :  { %10553 = vmatpush1.bf16.msra.mxu0 %v13787_v22  ;;  %10382 = vmatprep.subr.bf16.mxu1 %v13792_v24  ;;  %v13847_v22 = vld [vmem:[#allocation6 + $0x50] ss:$28 sps:$4 sm:$0xff]   ;;  %v13843_v24 = vld [vmem:[#allocation6 + $0xe48] ss:$28 sps:$4 sm:$0xff]  }
 0x4ad   :  { %10554 = vmatprep.subr.bf16.mxu0 %v13795_v26  ;;  %v13851_v26 = vld [vmem:[#allocation6 + $0x248] ss:$28 sps:$4 sm:$0xff]  }
 0x4ae   :  { %v14159_v35 = vpop.eup %14158 }
 0x4af   :  { %10383 = vmatpush1.bf16.msra.mxu1 %v13790_v30  ;;  %v14161_v38 = vpop.eup %14160  ;;  %11095 = vst [vmem:[%s14746_s5] sm:$0xff] %v14159_v35  ;;  %v13850_v30 = vld [vmem:[#allocation6 + $0xe84] ss:$28 sps:$4 sm:$0xff]   ;;  %v13855_v35 = vld [vmem:[#allocation6 + $0xebc] ss:$28 sps:$4 sm:$0xff]  }
 0x4b0   :  { %10555 = vmatpush1.bf16.msra.mxu0 %v13793_v27  ;;  %10384 = vmatprep.subr.bf16.mxu1 %v13798_v29  ;;  %v14163_v39 = vpop.eup %14162  ;;  %11096 = vst [vmem:[%s14746_s5 + $0x8] sm:$0xff] %v14161_v38  ;;  %v13852_v27 = vld [vmem:[#allocation6 + $0x88] ss:$28 sps:$4 sm:$0xff]   ;;  %v13848_v29 = vld [vmem:[#allocation6 + $0xe80] ss:$28 sps:$4 sm:$0xff]  }
 0x4b1   :  { %10556 = vmatprep.subr.bf16.mxu0 %v13801_v33  ;;  %v14165_v42 = vpop.eup %14164  ;;  %11102 = vst [vmem:[%s14746_s5 + $0x38] sm:$0xff] %v14163_v39  ;;  %v13856_v33 = vld [vmem:[#allocation6 + $0x280] ss:$28 sps:$4 sm:$0xff]   ;;  %v13853_v38 = vld [vmem:[#allocation6 + $0xeb8] ss:$28 sps:$4 sm:$0xff]  }
 0x4b2   :  { %11103 = vst [vmem:[%s14746_s5 + $0x40] sm:$0xff] %v14165_v42  ;;  %v13858_v39 = vld [vmem:[#allocation6 + $0xef0] ss:$28 sps:$4 sm:$0xff]  }
 0x4b3   :  { %10385 = vmatpush1.bf16.msra.mxu1 %v13796_v37  ;;  %v13857_v37 = vld [vmem:[#allocation6 + $0xc0] ss:$28 sps:$4 sm:$0xff]   ;;  %v13865_v42 = vld [vmem:[#allocation6 + $0xf2c] ss:$28 sps:$4 sm:$0xff]  }
 0x4b4   :  { %10557 = vmatpush1.bf16.msra.mxu0 %v13799_v47  ;;  %10386 = vmatprep.subr.bf16.mxu1 %v13804_v16  ;;  %v13861_v47 = vld [vmem:[#allocation6 + $0x2b8] ss:$28 sps:$4 sm:$0xff]  }
 0x4b5   :  { %10558 = vmatprep.subr.bf16.mxu0 %v13807_v41  ;;  %v13860_v16 = vld [vmem:[#allocation6 + $0xef4] ss:$28 sps:$4 sm:$0xff]  }
 0x4b6   :  { %v13866_v41 = vld [vmem:[#allocation6 + $0x2f0] ss:$28 sps:$4 sm:$0xff]  }
 0x4b7   :  { %10387 = vmatpush1.bf16.msra.mxu1 %v13802_v44  ;;  %v13867_v44 = vld [vmem:[#allocation6 + $0x130] ss:$28 sps:$4 sm:$0xff]  }
 0x4b8   :  { %10559 = vmatpush1.bf16.msra.mxu0 %v13805_v56  ;;  %10388 = vmatprep.subr.bf16.mxu1 %v13810_v45  ;;  %v13863_v56 = vld [vmem:[#allocation6 + $0xf28] ss:$28 sps:$4 sm:$0xff]  }
 0x4b9   :  { %10560 = vmatprep.subr.bf16.mxu0 %v13813_v49  ;;  %v13871_v45 = vld [vmem:[#allocation6 + $0x328] ss:$28 sps:$4 sm:$0xff]  }
 0x4ba   :  { %v13870_v49 = vld [vmem:[#allocation6 + $0xf64] ss:$28 sps:$4 sm:$0xff]  }
 0x4bb   :  { %10389 = vmatpush1.bf16.msra.mxu1 %v13808_v51  ;;  %v13872_v51 = vld [vmem:[#allocation6 + $0x168] ss:$28 sps:$4 sm:$0xff]  }
 0x4bc   :  { %10561 = vmatpush1.bf16.msra.mxu0 %v13811_v52  ;;  %10390 = vmatprep.subr.bf16.mxu1 %v13816_v53  ;;  %v13868_v52 = vld [vmem:[#allocation6 + $0xf60] ss:$28 sps:$4 sm:$0xff]  }
 0x4bd   :  { %10562 = vmatprep.subr.bf16.mxu0 %v13819_v55  ;;  %v13876_v53 = vld [vmem:[#allocation6 + $0x360] ss:$28 sps:$4 sm:$0xff]  }
 0x4be   :  { %v13875_v55 = vld [vmem:[#allocation6 + $0xf9c] ss:$28 sps:$4 sm:$0xff]  }
 0x4bf   :  { %10391 = vmatpush1.bf16.msra.mxu1 %v13814_v57  ;;  %v13877_v57 = vld [vmem:[#allocation6 + $0x1a0] ss:$28 sps:$4 sm:$0xff]  }
 0x4c0   :  { %10563 = vmatpush1.bf16.msra.mxu0 %v13817_v59  ;;  %10392 = vmatprep.subr.bf16.mxu1 %v13822_v63  ;;  %v13873_v59 = vld [vmem:[#allocation6 + $0xf98] ss:$28 sps:$4 sm:$0xff]  }
 0x4c1   :  { %10564 = vmatprep.subr.bf16.mxu0 %v13825_v2  ;;  %v13881_v63 = vld [vmem:[#allocation6 + $0x558] ss:$28 sps:$4 sm:$0xff]  }
 0x4c2   :  { %v13880_v2 = vld [vmem:[#allocation6 + $0xfd4] ss:$28 sps:$4 sm:$0xff]  }
 0x4c3   :  { %10393 = vmatpush1.bf16.msra.mxu1 %v13820_v3  ;;  %v13882_v3 = vld [vmem:[#allocation6 + $0x398] ss:$28 sps:$4 sm:$0xff]  }
 0x4c4   :  { %10565 = vmatpush1.bf16.msra.mxu0 %v13823_v25  ;;  %10394 = vmatprep.subr.bf16.mxu1 %v13828_v4  ;;  %v13878_v25 = vld [vmem:[#allocation6 + $0xfd0] ss:$28 sps:$4 sm:$0xff]  }
 0x4c5   :  { %10566 = vmatprep.subr.bf16.mxu0 %v13831_v5  ;;  %v13886_v4 = vld [vmem:[#allocation6 + $0x590] ss:$28 sps:$4 sm:$0xff]  }
 0x4c6   :  { %v13885_v5 = vld [vmem:[#allocation6 + $0x100c] ss:$28 sps:$4 sm:$0xff]  }
 0x4c7   :  { %10395 = vmatpush1.bf16.msra.mxu1 %v13826_v6  ;;  %v13887_v6 = vld [vmem:[#allocation6 + $0x3d0] ss:$28 sps:$4 sm:$0xff]  }
 0x4c8   :  { %10567 = vmatpush1.bf16.msra.mxu0 %v13829_v7  ;;  %10396 = vmatprep.subr.bf16.mxu1 %v13834_v8  ;;  %v13883_v7 = vld [vmem:[#allocation6 + $0x1008] ss:$28 sps:$4 sm:$0xff]  }
 0x4c9   :  { %10568 = vmatprep.subr.bf16.mxu0 %v13837_v9  ;;  %v13891_v8 = vld [vmem:[#allocation6 + $0x5c8] ss:$28 sps:$4 sm:$0xff]  }
 0x4ca   :  { %v13890_v9 = vld [vmem:[#allocation6 + $0x1044] ss:$28 sps:$4 sm:$0xff]  }
 0x4cb   :  { %10397 = vmatpush1.bf16.msra.mxu1 %v13832_v11  ;;  %v13892_v11 = vld [vmem:[#allocation6 + $0x408] ss:$28 sps:$4 sm:$0xff]  }
 0x4cc   :  { %10569 = vmatpush1.bf16.msra.mxu0 %v13835_v12  ;;  %12528 = vmatprep.subr.bf16.mxu1 %v13841_v58  ;;  %v13888_v12 = vld [vmem:[#allocation6 + $0x1040] ss:$28 sps:$4 sm:$0xff]  }
 0x4cd   :  { %10581 = vmatprep.subr.bf16.mxu0 %v13840_v15  ;;  %v13896_v58 = vld [vmem:[#allocation6 + $0x600] ss:$28 sps:$4 sm:$0xff]  }
 0x4ce   :  { %10399 = vmatmul.mubr.bf16.vlgmr.msra.gmra.mrb[20].mxu1 %v14638_v54  ;;  %v13895_v15 = vld [vmem:[#allocation6 + $0x107c] ss:$28 sps:$4 sm:$0xff]  }
 0x4cf   :  { %10571 = vmatmul.mubr.bf16.vlgmr.msra.gmra.mrb[16].mxu0 %v14598_v28  ;;  %12529 = vmatpush3.bf16.msra.mxu1 %v13842_v17  ;;  %v13893_v17 = vld [vmem:[#allocation6 + $0x1078] ss:$28 sps:$4 sm:$0xff]  }
 0x4d0   :  { %10582 = vmatpush1.bf16.msra.mxu0 %v13838_v61  ;;  %10613 = vmatprep.mubr.bf16.mxu0 %v14557_v50  ;;  %v13900_v61 = vld [vmem:[#allocation6 + $0x10b4] ss:$28 sps:$4 sm:$0xff]  }
 0x4d1   :  { %10785 = vmatprep.mubr.bf16.mxu1 %v14500_v14  ;;  %10583 = vmatprep.subr.bf16.mxu0 %v13845_v20  ;;  %v13862_v14 = vld [vmem:[#allocation6 + $0xf8] ss:$28 sps:$4 sm:$0xff]  }
 0x4d2   :  { %12530 = vmatprep.subr.bf16.mxu1 %v13846_v21  ;;  %v13902_v20 = vld [vmem:[#allocation6 + $0x478] ss:$28 sps:$4 sm:$0xff]   ;;  %v13898_v21 = vld [vmem:[#allocation6 + $0x10b0] ss:$28 sps:$4 sm:$0xff]  }
 0x4d3   :  { %12531 = vmatpush3.bf16.msra.mxu1 %v13847_v22  ;;  %v13906_v22 = vld [vmem:[#allocation6 + $0x670] ss:$28 sps:$4 sm:$0xff]  }
 0x4d4   :  { %10584 = vmatpush1.bf16.msra.mxu0 %v13843_v24  ;;  %12532 = vmatprep.subr.bf16.mxu1 %v13851_v26  ;;  %v13905_v24 = vld [vmem:[#allocation6 + $0x10ec] ss:$28 sps:$4 sm:$0xff]  }
 0x4d5   :  { %10585 = vmatprep.subr.bf16.mxu0 %v13850_v30  ;;  %v13907_v26 = vld [vmem:[#allocation6 + $0x4b0] ss:$28 sps:$4 sm:$0xff]   ;;  %v13903_v30 = vld [vmem:[#allocation6 + $0x10e8] ss:$28 sps:$4 sm:$0xff]  }
 0x4d7   :  { %12533 = vmatpush3.bf16.msra.mxu1 %v13852_v27  ;;  %v13911_v27 = vld [vmem:[#allocation6 + $0x6a8] ss:$28 sps:$4 sm:$0xff]  }
 0x4d8   :  { %10586 = vmatpush1.bf16.msra.mxu0 %v13848_v29  ;;  %12534 = vmatprep.subr.bf16.mxu1 %v13856_v33  ;;  %v13910_v29 = vld [vmem:[#allocation6 + $0x1124] ss:$28 sps:$4 sm:$0xff]  }
 0x4d9   :  { %10587 = vmatprep.subr.bf16.mxu0 %v13855_v35  ;;  %v13912_v33 = vld [vmem:[#allocation6 + $0x4e8] ss:$28 sps:$4 sm:$0xff]   ;;  %v13908_v35 = vld [vmem:[#allocation6 + $0x1120] ss:$28 sps:$4 sm:$0xff]  }
 0x4db   :  { %12535 = vmatpush3.bf16.msra.mxu1 %v13857_v37  ;;  %v13916_v37 = vld [vmem:[#allocation6 + $0x6e0] ss:$28 sps:$4 sm:$0xff]  }
 0x4dc   :  { %10588 = vmatpush1.bf16.msra.mxu0 %v13853_v38  ;;  %12536 = vmatprep.subr.bf16.mxu1 %v13861_v47  ;;  %v13915_v38 = vld [vmem:[#allocation6 + $0x115c] ss:$28 sps:$4 sm:$0xff]  }
 0x4dd   :  { %10589 = vmatprep.subr.bf16.mxu0 %v13860_v16  ;;  %v13917_v47 = vld [vmem:[#allocation6 + $0x520] ss:$28 sps:$4 sm:$0xff]   ;;  %v13913_v16 = vld [vmem:[#allocation6 + $0x1158] ss:$28 sps:$4 sm:$0xff]  }
 0x4df   :  { %12537 = vmatpush3.bf16.msra.mxu1 %v13862_v14  ;;  %v13921_v14 = vld [vmem:[#allocation6 + $0x8d8] ss:$28 sps:$4 sm:$0xff]  }
 0x4e0   :  { %10590 = vmatpush1.bf16.msra.mxu0 %v13858_v39  ;;  %12538 = vmatprep.subr.bf16.mxu1 %v13866_v41  ;;  %v13920_v39 = vld [vmem:[#allocation6 + $0x1194] ss:$28 sps:$4 sm:$0xff]  }
 0x4e1   :  { %10591 = vmatprep.subr.bf16.mxu0 %v13865_v42  ;;  %v13922_v41 = vld [vmem:[#allocation6 + $0x718] ss:$28 sps:$4 sm:$0xff]   ;;  %v13918_v42 = vld [vmem:[#allocation6 + $0x1190] ss:$28 sps:$4 sm:$0xff]  }
 0x4e3   :  { %12539 = vmatpush3.bf16.msra.mxu1 %v13867_v44  ;;  %v13925_v44 = vld [vmem:[#allocation6 + $0x11cc] ss:$28 sps:$4 sm:$0xff]  }
 0x4e4   :  { %10592 = vmatpush1.bf16.msra.mxu0 %v13863_v56  ;;  %12540 = vmatprep.subr.bf16.mxu1 %v13871_v45  ;;  %v13926_v56 = vld [vmem:[#allocation6 + $0x910] ss:$28 sps:$4 sm:$0xff]  }
 0x4e5   :  { %10593 = vmatprep.subr.bf16.mxu0 %v13870_v49  ;;  %v13927_v45 = vld [vmem:[#allocation6 + $0x750] ss:$28 sps:$4 sm:$0xff]   ;;  %v13923_v49 = vld [vmem:[#allocation6 + $0x11c8] ss:$28 sps:$4 sm:$0xff]  }
 0x4e7   :  { %12541 = vmatpush3.bf16.msra.mxu1 %v13872_v51  ;;  %v13931_v51 = vld [vmem:[#allocation6 + $0x948] ss:$28 sps:$4 sm:$0xff]  }
 0x4e8   :  { %10594 = vmatpush1.bf16.msra.mxu0 %v13868_v52  ;;  %12542 = vmatprep.subr.bf16.mxu1 %v13876_v53  ;;  %v13930_v52 = vld [vmem:[#allocation6 + $0x1204] ss:$28 sps:$4 sm:$0xff]  }
 0x4e9   :  { %10595 = vmatprep.subr.bf16.mxu0 %v13875_v55  ;;  %v13932_v53 = vld [vmem:[#allocation6 + $0x788] ss:$28 sps:$4 sm:$0xff]   ;;  %v13928_v55 = vld [vmem:[#allocation6 + $0x1200] ss:$28 sps:$4 sm:$0xff]  }
 0x4eb   :  { %12543 = vmatpush3.bf16.msra.mxu1 %v13877_v57  ;;  %v13935_v57 = vld [vmem:[#allocation6 + $0x123c] ss:$28 sps:$4 sm:$0xff]  }
 0x4ec   :  { %10596 = vmatpush1.bf16.msra.mxu0 %v13873_v59  ;;  %12550 = vmatprep.subr.bf16.mxu1 %v13881_v63  ;;  %v13937_v59 = vld [vmem:[#allocation6 + $0x7c0] ss:$28 sps:$4 sm:$0xff]   ;;  %v13933_v63 = vld [vmem:[#allocation6 + $0x1238] ss:$28 sps:$4 sm:$0xff]  }
 0x4ed   :  { %10597 = vmatprep.subr.bf16.mxu0 %v13880_v2  ;;  %v13941_v2 = vld [vmem:[#allocation6 + $0x9b8] ss:$28 sps:$4 sm:$0xff]  }
 0x4ee   :  { %10786 = vmatmul.mubr.bf16.vlgmr.msra.gmra.mrb[24].mxu1 %v14493_v1  ;;  %v13897_v1 = vld [vmem:[#allocation6 + $0x440] ss:$28 sps:$4 sm:$0xff]  }
 0x4ef   :  { %12551 = vmatpush3.bf16.msra.mxu1 %v13882_v3  ;;  %10826 = vmatprep.mubr.bf16.mxu1 %v14554_v46  ;;  %v13901_v46 = vld [vmem:[#allocation6 + $0x638] ss:$28 sps:$4 sm:$0xff]  }
 0x4f0   :  { %10598 = vmatpush1.bf16.msra.mxu0 %v13878_v25  ;;  %12552 = vmatprep.subr.bf16.mxu1 %v13886_v4  ;;  %v13940_v3 = vld [vmem:[#allocation6 + $0x1274] ss:$28 sps:$4 sm:$0xff]  }
 0x4f1   :  { %10599 = vmatprep.subr.bf16.mxu0 %v13885_v5  ;;  %v13938_v25 = vld [vmem:[#allocation6 + $0x1270] ss:$28 sps:$4 sm:$0xff]  }
 0x4f2   :  { %v13946_v4 = vld [vmem:[#allocation6 + $0x9f0] ss:$28 sps:$4 sm:$0xff]  }
 0x4f3   :  { %12553 = vmatpush3.bf16.msra.mxu1 %v13887_v6  ;;  %v13945_v5 = vld [vmem:[#allocation6 + $0x12ac] ss:$28 sps:$4 sm:$0xff]  }
 0x4f4   :  { %10600 = vmatpush1.bf16.msra.mxu0 %v13883_v7  ;;  %12554 = vmatprep.subr.bf16.mxu1 %v13891_v8  ;;  %v13947_v6 = vld [vmem:[#allocation6 + $0x830] ss:$28 sps:$4 sm:$0xff]   ;;  %v13943_v7 = vld [vmem:[#allocation6 + $0x12a8] ss:$28 sps:$4 sm:$0xff]  }
 0x4f5   :  { %10601 = vmatprep.subr.bf16.mxu0 %v13890_v9  ;;  %v13951_v8 = vld [vmem:[#allocation6 + $0xa28] ss:$28 sps:$4 sm:$0xff]  }
 0x4f6   :  { %v13950_v9 = vld [vmem:[#allocation6 + $0x12e4] ss:$28 sps:$4 sm:$0xff]  }
 0x4f7   :  { %12555 = vmatpush3.bf16.msra.mxu1 %v13892_v11  ;;  %v13952_v11 = vld [vmem:[#allocation6 + $0x868] ss:$28 sps:$4 sm:$0xff]  }
 0x4f8   :  { %10602 = vmatpush1.bf16.msra.mxu0 %v13888_v12  ;;  %12556 = vmatprep.subr.bf16.mxu1 %v13896_v58  ;;  %v13948_v12 = vld [vmem:[#allocation6 + $0x12e0] ss:$28 sps:$4 sm:$0xff]  }
 0x4f9   :  { %10603 = vmatprep.subr.bf16.mxu0 %v13895_v15  ;;  %v13956_v58 = vld [vmem:[#allocation6 + $0xa60] ss:$28 sps:$4 sm:$0xff]  }
 0x4fa   :  { %v13955_v15 = vld [vmem:[#allocation6 + $0x131c] ss:$28 sps:$4 sm:$0xff]  }
 0x4fb   :  { %12557 = vmatpush3.bf16.msra.mxu1 %v13897_v1  ;;  %v13957_v1 = vld [vmem:[#allocation6 + $0x8a0] ss:$28 sps:$4 sm:$0xff]  }
 0x4fc   :  { %10604 = vmatpush1.bf16.msra.mxu0 %v13893_v17  ;;  %12558 = vmatprep.subr.bf16.mxu1 %v13901_v46  ;;  %v13953_v17 = vld [vmem:[#allocation6 + $0x1318] ss:$28 sps:$4 sm:$0xff]  }
 0x4fd   :  { %10605 = vmatprep.subr.bf16.mxu0 %v13900_v61  ;;  %v13961_v46 = vld [vmem:[#allocation6 + $0xc58] ss:$28 sps:$4 sm:$0xff]  }
 0x4fe   :  { %v13960_v61 = vld [vmem:[#allocation6 + $0x1354] ss:$28 sps:$4 sm:$0xff]  }
 0x4ff   :  { %12559 = vmatpush3.bf16.msra.mxu1 %v13902_v20  ;;  %v13962_v20 = vld [vmem:[#allocation6 + $0xa98] ss:$28 sps:$4 sm:$0xff]  }
 0x500   :  { %10606 = vmatpush1.bf16.msra.mxu0 %v13898_v21  ;;  %12560 = vmatprep.subr.bf16.mxu1 %v13906_v22  ;;  %v13958_v21 = vld [vmem:[#allocation6 + $0x1350] ss:$28 sps:$4 sm:$0xff]  }
 0x501   :  { %10607 = vmatprep.subr.bf16.mxu0 %v13905_v24  ;;  %v13966_v22 = vld [vmem:[#allocation6 + $0xc90] ss:$28 sps:$4 sm:$0xff]  }
 0x502   :  { %v13965_v24 = vld [vmem:[#allocation6 + $0x138c] ss:$28 sps:$4 sm:$0xff]  }
 0x503   :  { %12561 = vmatpush3.bf16.msra.mxu1 %v13907_v26  ;;  %v13967_v26 = vld [vmem:[#allocation6 + $0xad0] ss:$28 sps:$4 sm:$0xff]  }
 0x504   :  { %10608 = vmatpush1.bf16.msra.mxu0 %v13903_v30  ;;  %12562 = vmatprep.subr.bf16.mxu1 %v13911_v27  ;;  %v13963_v30 = vld [vmem:[#allocation6 + $0x1388] ss:$28 sps:$4 sm:$0xff]  }
 0x505   :  { %10609 = vmatprep.subr.bf16.mxu0 %v13910_v29  ;;  %v13971_v27 = vld [vmem:[#allocation6 + $0xcc8] ss:$28 sps:$4 sm:$0xff]  }
 0x506   :  { %v13970_v29 = vld [vmem:[#allocation6 + $0x13c4] ss:$28 sps:$4 sm:$0xff]  }
 0x507   :  { %12563 = vmatpush3.bf16.msra.mxu1 %v13912_v33  ;;  %v13972_v33 = vld [vmem:[#allocation6 + $0xb08] ss:$28 sps:$4 sm:$0xff]  }
 0x508   :  { %10610 = vmatpush1.bf16.msra.mxu0 %v13908_v35  ;;  %12564 = vmatprep.subr.bf16.mxu1 %v13916_v37  ;;  %v13968_v35 = vld [vmem:[#allocation6 + $0x13c0] ss:$28 sps:$4 sm:$0xff]  }
 0x509   :  { %10611 = vmatprep.subr.bf16.mxu0 %v13915_v38  ;;  %v13976_v37 = vld [vmem:[#allocation6 + $0xd00] ss:$28 sps:$4 sm:$0xff]  }
 0x50a   :  { %v13975_v38 = vld [vmem:[#allocation6 + $0x13fc] ss:$28 sps:$4 sm:$0xff]  }
 0x50b   :  { %12565 = vmatpush3.bf16.msra.mxu1 %v13917_v47  ;;  %v13973_v47 = vld [vmem:[#allocation6 + $0x13f8] ss:$28 sps:$4 sm:$0xff]  }
 0x50c   :  { %10612 = vmatpush1.bf16.msra.mxu0 %v13913_v16  ;;  %12572 = vmatprep.subr.bf16.mxu1 %v13921_v14  ;;  %v13980_v16 = vld [vmem:[#allocation6 + $0x1434] ss:$28 sps:$4 sm:$0xff]  }
 0x50d   :  { %10624 = vmatprep.subr.bf16.mxu0 %v13920_v39  ;;  %v13982_v14 = vld [vmem:[#allocation6 + $0xb78] ss:$28 sps:$4 sm:$0xff]   ;;  %v13978_v39 = vld [vmem:[#allocation6 + $0x1430] ss:$28 sps:$4 sm:$0xff]  }
 0x50e   :  { %10827 = vmatmul.mubr.bf16.vlgmr.msra.gmra.mrb[28].mxu1 %v14547_v34  ;;  %v13936_v34 = vld [vmem:[#allocation6 + $0x980] ss:$28 sps:$4 sm:$0xff]  }
 0x50f   :  { %10614 = vmatmul.mubr.bf16.vlgmr.msra.gmra.mrb[16].mxu0 %v14551_v43  ;;  %12573 = vmatpush3.bf16.msra.mxu1 %v13922_v41  ;;  %v13986_v41 = vld [vmem:[#allocation6 + $0xd70] ss:$28 sps:$4 sm:$0xff]  }
 0x510   :  { %10625 = vmatpush1.bf16.msra.mxu0 %v13918_v42  ;;  %10656 = vmatprep.mubr.bf16.mxu0 %v14625_v23  ;;  %v13985_v42 = vld [vmem:[#allocation6 + $0x146c] ss:$28 sps:$4 sm:$0xff]  }
 0x511   :  { %10867 = vmatprep.mubr.bf16.mxu1 %v14503_v18  ;;  %10626 = vmatprep.subr.bf16.mxu0 %v13925_v44  ;;  %v13942_v18 = vld [vmem:[#allocation6 + $0x7f8] ss:$28 sps:$4 sm:$0xff]   ;;  %v13987_v44 = vld [vmem:[#allocation6 + $0xbb0] ss:$28 sps:$4 sm:$0xff]  }
 0x512   :  { %12574 = vmatprep.subr.bf16.mxu1 %v13926_v56  ;;  %v13983_v56 = vld [vmem:[#allocation6 + $0x1468] ss:$28 sps:$4 sm:$0xff]  }
 0x513   :  { %12575 = vmatpush3.bf16.msra.mxu1 %v13927_v45  ;;  %v13991_v45 = vld [vmem:[#allocation6 + $0xda8] ss:$28 sps:$4 sm:$0xff]  }
 0x514   :  { %10627 = vmatpush1.bf16.msra.mxu0 %v13923_v49  ;;  %12576 = vmatprep.subr.bf16.mxu1 %v13931_v51  ;;  %v13990_v49 = vld [vmem:[#allocation6 + $0x14a4] ss:$28 sps:$4 sm:$0xff]  }
 0x515   :  { %10628 = vmatprep.subr.bf16.mxu0 %v13930_v52  ;;  %v13992_v51 = vld [vmem:[#allocation6 + $0xbe8] ss:$28 sps:$4 sm:$0xff]   ;;  %v13988_v52 = vld [vmem:[#allocation6 + $0x14a0] ss:$28 sps:$4 sm:$0xff]  }
 0x517   :  { %12577 = vmatpush3.bf16.msra.mxu1 %v13932_v53  ;;  %v13996_v53 = vld [vmem:[#allocation6 + $0xde0] ss:$28 sps:$4 sm:$0xff]  }
 0x518   :  { %10629 = vmatpush1.bf16.msra.mxu0 %v13928_v55  ;;  %12578 = vmatprep.subr.bf16.mxu1 %v13936_v34  ;;  %v13995_v55 = vld [vmem:[#allocation6 + $0x14dc] ss:$28 sps:$4 sm:$0xff]  }
 0x519   :  { %10630 = vmatprep.subr.bf16.mxu0 %v13935_v57  ;;  %v13997_v34 = vld [vmem:[#allocation6 + $0xc20] ss:$28 sps:$4 sm:$0xff]   ;;  %v13993_v57 = vld [vmem:[#allocation6 + $0x14d8] ss:$28 sps:$4 sm:$0xff]  }
 0x51b   :  { %12579 = vmatpush3.bf16.msra.mxu1 %v13937_v59  ;;  %v14001_v59 = vld [vmem:[#allocation6 + $0xfd8] ss:$28 sps:$4 sm:$0xff]  }
 0x51c   :  { %10631 = vmatpush1.bf16.msra.mxu0 %v13933_v63  ;;  %12580 = vmatprep.subr.bf16.mxu1 %v13941_v2  ;;  %v14000_v63 = vld [vmem:[#allocation6 + $0x1514] ss:$28 sps:$4 sm:$0xff]  }
 0x51d   :  { %10632 = vmatprep.subr.bf16.mxu0 %v13940_v3  ;;  %v14002_v2 = vld [vmem:[#allocation6 + $0xe18] ss:$28 sps:$4 sm:$0xff]   ;;  %v13998_v3 = vld [vmem:[#allocation6 + $0x1510] ss:$28 sps:$4 sm:$0xff]  }
 0x51f   :  { %12581 = vmatpush3.bf16.msra.mxu1 %v13942_v18  ;;  %v14005_v18 = vld [vmem:[#allocation6 + $0x154c] ss:$28 sps:$4 sm:$0xff]  }
 0x520   :  { %10633 = vmatpush1.bf16.msra.mxu0 %v13938_v25  ;;  %12582 = vmatprep.subr.bf16.mxu1 %v13946_v4  ;;  %v14006_v25 = vld [vmem:[#allocation6 + $0x1010] ss:$28 sps:$4 sm:$0xff]  }
 0x521   :  { %10634 = vmatprep.subr.bf16.mxu0 %v13945_v5  ;;  %v14007_v4 = vld [vmem:[#allocation6 + $0xe50] ss:$28 sps:$4 sm:$0xff]   ;;  %v14003_v5 = vld [vmem:[#allocation6 + $0x1548] ss:$28 sps:$4 sm:$0xff]  }
 0x523   :  { %12583 = vmatpush3.bf16.msra.mxu1 %v13947_v6  ;;  %v14011_v6 = vld [vmem:[#allocation6 + $0x1048] ss:$28 sps:$4 sm:$0xff]  }
 0x524   :  { %10635 = vmatpush1.bf16.msra.mxu0 %v13943_v7  ;;  %12584 = vmatprep.subr.bf16.mxu1 %v13951_v8  ;;  %v14010_v7 = vld [vmem:[#allocation6 + $0x1584] ss:$28 sps:$4 sm:$0xff]  }
 0x525   :  { %10636 = vmatprep.subr.bf16.mxu0 %v13950_v9  ;;  %v14012_v8 = vld [vmem:[#allocation6 + $0xe88] ss:$28 sps:$4 sm:$0xff]   ;;  %v14008_v9 = vld [vmem:[#allocation6 + $0x1580] ss:$28 sps:$4 sm:$0xff]  }
 0x527   :  { %12585 = vmatpush3.bf16.msra.mxu1 %v13952_v11  ;;  %v14015_v11 = vld [vmem:[#allocation6 + $0x15bc] ss:$28 sps:$4 sm:$0xff]  }
 0x528   :  { %10637 = vmatpush1.bf16.msra.mxu0 %v13948_v12  ;;  %12586 = vmatprep.subr.bf16.mxu1 %v13956_v58  ;;  %v14017_v12 = vld [vmem:[#allocation6 + $0xec0] ss:$28 sps:$4 sm:$0xff]   ;;  %v14013_v58 = vld [vmem:[#allocation6 + $0x15b8] ss:$28 sps:$4 sm:$0xff]  }
 0x529   :  { %10638 = vmatprep.subr.bf16.mxu0 %v13955_v15  ;;  %v14021_v15 = vld [vmem:[#allocation6 + $0x10b8] ss:$28 sps:$4 sm:$0xff]  }
 0x52b   :  { %12587 = vmatpush3.bf16.msra.mxu1 %v13957_v1  ;;  %v14020_v1 = vld [vmem:[#allocation6 + $0x15f4] ss:$28 sps:$4 sm:$0xff]  }
 0x52c   :  { %10639 = vmatpush1.bf16.msra.mxu0 %v13953_v17  ;;  %12594 = vmatprep.subr.bf16.mxu1 %v13961_v46  ;;  %v14018_v17 = vld [vmem:[#allocation6 + $0x15f0] ss:$28 sps:$4 sm:$0xff]  }
 0x52d   :  { %10640 = vmatprep.subr.bf16.mxu0 %v13960_v61  ;;  %v14026_v46 = vld [vmem:[#allocation6 + $0x10f0] ss:$28 sps:$4 sm:$0xff]  }
 0x52e   :  { %10868 = vmatmul.mubr.bf16.vlgmr.msra.gmra.mrb[32].mxu1 %v14497_v10  ;;  %v13977_v10 = vld [vmem:[#allocation6 + $0xb40] ss:$28 sps:$4 sm:$0xff]   ;;  %v14025_v61 = vld [vmem:[#allocation6 + $0x162c] ss:$28 sps:$4 sm:$0xff]  }
 0x52f   :  { %12595 = vmatpush3.bf16.msra.mxu1 %v13962_v20  ;;  %10908 = vmatprep.mubr.bf16.mxu1 %v14605_v40  ;;  %v13981_v40 = vld [vmem:[#allocation6 + $0xd38] ss:$28 sps:$4 sm:$0xff]   ;;  %v14027_v20 = vld [vmem:[#allocation6 + $0xf30] ss:$28 sps:$4 sm:$0xff]  }
 0x530   :  { %10641 = vmatpush1.bf16.msra.mxu0 %v13958_v21  ;;  %12596 = vmatprep.subr.bf16.mxu1 %v13966_v22  ;;  %v14023_v21 = vld [vmem:[#allocation6 + $0x1628] ss:$28 sps:$4 sm:$0xff]  }
 0x531   :  { %10642 = vmatprep.subr.bf16.mxu0 %v13965_v24  ;;  %v14031_v22 = vld [vmem:[#allocation6 + $0x1128] ss:$28 sps:$4 sm:$0xff]  }
 0x532   :  { %v14030_v24 = vld [vmem:[#allocation6 + $0x1664] ss:$28 sps:$4 sm:$0xff]  }
 0x533   :  { %12597 = vmatpush3.bf16.msra.mxu1 %v13967_v26  ;;  %v14032_v26 = vld [vmem:[#allocation6 + $0xf68] ss:$28 sps:$4 sm:$0xff]  }
 0x534   :  { %10643 = vmatpush1.bf16.msra.mxu0 %v13963_v30  ;;  %12598 = vmatprep.subr.bf16.mxu1 %v13971_v27  ;;  %v14028_v30 = vld [vmem:[#allocation6 + $0x1660] ss:$28 sps:$4 sm:$0xff]  }
 0x535   :  { %10644 = vmatprep.subr.bf16.mxu0 %v13970_v29  ;;  %v14036_v27 = vld [vmem:[#allocation6 + $0x1160] ss:$28 sps:$4 sm:$0xff]  }
 0x536   :  { %v14035_v29 = vld [vmem:[#allocation6 + $0x169c] ss:$28 sps:$4 sm:$0xff]  }
 0x537   :  { %12599 = vmatpush3.bf16.msra.mxu1 %v13972_v33  ;;  %v14037_v33 = vld [vmem:[#allocation6 + $0xfa0] ss:$28 sps:$4 sm:$0xff]  }
 0x538   :  { %10645 = vmatpush1.bf16.msra.mxu0 %v13968_v35  ;;  %12600 = vmatprep.subr.bf16.mxu1 %v13976_v37  ;;  %v14033_v35 = vld [vmem:[#allocation6 + $0x1698] ss:$28 sps:$4 sm:$0xff]  }
 0x539   :  { %10646 = vmatprep.subr.bf16.mxu0 %v13975_v38  ;;  %v14041_v37 = vld [vmem:[#allocation6 + $0x1358] ss:$28 sps:$4 sm:$0xff]  }
 0x53a   :  { %v14040_v38 = vld [vmem:[#allocation6 + $0x16d4] ss:$28 sps:$4 sm:$0xff]  }
 0x53b   :  { %12601 = vmatpush3.bf16.msra.mxu1 %v13977_v10  ;;  %v14042_v10 = vld [vmem:[#allocation6 + $0x1198] ss:$28 sps:$4 sm:$0xff]  }
 0x53c   :  { %10647 = vmatpush1.bf16.msra.mxu0 %v13973_v47  ;;  %12602 = vmatprep.subr.bf16.mxu1 %v13981_v40  ;;  %v14038_v47 = vld [vmem:[#allocation6 + $0x16d0] ss:$28 sps:$4 sm:$0xff]  }
 0x53d   :  { %10648 = vmatprep.subr.bf16.mxu0 %v13980_v16  ;;  %v14046_v40 = vld [vmem:[#allocation6 + $0x1390] ss:$28 sps:$4 sm:$0xff]  }
 0x53e   :  { %v14045_v16 = vld [vmem:[#allocation6 + $0x170c] ss:$28 sps:$4 sm:$0xff]  }
 0x53f   :  { %12603 = vmatpush3.bf16.msra.mxu1 %v13982_v14  ;;  %v14047_v14 = vld [vmem:[#allocation6 + $0x11d0] ss:$28 sps:$4 sm:$0xff]  }
 0x540   :  { %10649 = vmatpush1.bf16.msra.mxu0 %v13978_v39  ;;  %12604 = vmatprep.subr.bf16.mxu1 %v13986_v41  ;;  %v14043_v39 = vld [vmem:[#allocation6 + $0x1708] ss:$28 sps:$4 sm:$0xff]  }
 0x541   :  { %10650 = vmatprep.subr.bf16.mxu0 %v13985_v42  ;;  %v14051_v41 = vld [vmem:[#allocation6 + $0x13c8] ss:$28 sps:$4 sm:$0xff]  }
 0x542   :  { %v14050_v42 = vld [vmem:[#allocation6 + $0x1744] ss:$28 sps:$4 sm:$0xff]  }
 0x543   :  { %12605 = vmatpush3.bf16.msra.mxu1 %v13987_v44  ;;  %v14052_v44 = vld [vmem:[#allocation6 + $0x1208] ss:$28 sps:$4 sm:$0xff]  }
 0x544   :  { %10651 = vmatpush1.bf16.msra.mxu0 %v13983_v56  ;;  %12606 = vmatprep.subr.bf16.mxu1 %v13991_v45  ;;  %v14048_v56 = vld [vmem:[#allocation6 + $0x1740] ss:$28 sps:$4 sm:$0xff]  }
 0x545   :  { %10652 = vmatprep.subr.bf16.mxu0 %v13990_v49  ;;  %v14056_v45 = vld [vmem:[#allocation6 + $0x1400] ss:$28 sps:$4 sm:$0xff]  }
 0x546   :  { %v14055_v49 = vld [vmem:[#allocation6 + $0x177c] ss:$28 sps:$4 sm:$0xff]  }
 0x547   :  { %12607 = vmatpush3.bf16.msra.mxu1 %v13992_v51  ;;  %v14053_v51 = vld [vmem:[#allocation6 + $0x1778] ss:$28 sps:$4 sm:$0xff]  }
 0x548   :  { %10653 = vmatpush1.bf16.msra.mxu0 %v13988_v52  ;;  %12608 = vmatprep.subr.bf16.mxu1 %v13996_v53  ;;  %v14060_v52 = vld [vmem:[#allocation6 + $0x17b4] ss:$28 sps:$4 sm:$0xff]  }
 0x549   :  { %10654 = vmatprep.subr.bf16.mxu0 %v13995_v55  ;;  %v14062_v53 = vld [vmem:[#allocation6 + $0x1278] ss:$28 sps:$4 sm:$0xff]   ;;  %v14058_v55 = vld [vmem:[#allocation6 + $0x17b0] ss:$28 sps:$4 sm:$0xff]  }
 0x54b   :  { %12609 = vmatpush3.bf16.msra.mxu1 %v13997_v34  ;;  %v14066_v34 = vld [vmem:[#allocation6 + $0x1470] ss:$28 sps:$4 sm:$0xff]  }
 0x54c   :  { %10655 = vmatpush1.bf16.msra.mxu0 %v13993_v57  ;;  %12616 = vmatprep.subr.bf16.mxu1 %v14001_v59  ;;  %v14065_v57 = vld [vmem:[#allocation6 + $0x17ec] ss:$28 sps:$4 sm:$0xff]  }
 0x54d   :  { %10667 = vmatprep.subr.bf16.mxu0 %v14000_v63  ;;  %v14067_v59 = vld [vmem:[#allocation6 + $0x12b0] ss:$28 sps:$4 sm:$0xff]   ;;  %v14063_v63 = vld [vmem:[#allocation6 + $0x17e8] ss:$28 sps:$4 sm:$0xff]  }
 0x54e   :  { %10909 = vmatmul.mubr.bf16.vlgmr.msra.gmra.mrb[36].mxu1 %v14598_v28  ;;  %v14016_v28 = vld [vmem:[#allocation6 + $0x1080] ss:$28 sps:$4 sm:$0xff]  }
 0x54f   :  { %10657 = vmatmul.mubr.bf16.vlgmr.msra.gmra.mrb[16].mxu0 %v14623_v19  ;;  %12617 = vmatpush3.bf16.msra.mxu1 %v14002_v2  ;;  %v14071_v2 = vld [vmem:[#allocation6 + $0x14a8] ss:$28 sps:$4 sm:$0xff]  }
 0x550   :  { %10668 = vmatpush1.bf16.msra.mxu0 %v13998_v3  ;;  %10699 = vmatprep.mubr.bf16.mxu0 %v14607_v48  ;;  %v14070_v3 = vld [vmem:[#allocation6 + $0x1824] ss:$28 sps:$4 sm:$0xff]  }
 0x551   :  { %10949 = vmatprep.mubr.bf16.mxu1 %v14557_v50  ;;  %10669 = vmatprep.subr.bf16.mxu0 %v14005_v18  ;;  %v14022_v50 = vld [vmem:[#allocation6 + $0xef8] ss:$28 sps:$4 sm:$0xff]   ;;  %v14072_v18 = vld [vmem:[#allocation6 + $0x12e8] ss:$28 sps:$4 sm:$0xff]  }
 0x552   :  { %12618 = vmatprep.subr.bf16.mxu1 %v14006_v25  ;;  %v14068_v25 = vld [vmem:[#allocation6 + $0x1820] ss:$28 sps:$4 sm:$0xff]  }
 0x553   :  { %12619 = vmatpush3.bf16.msra.mxu1 %v14007_v4  ;;  %v14076_v4 = vld [vmem:[#allocation6 + $0x14e0] ss:$28 sps:$4 sm:$0xff]  }
 0x554   :  { %10670 = vmatpush1.bf16.msra.mxu0 %v14003_v5  ;;  %12620 = vmatprep.subr.bf16.mxu1 %v14011_v6  ;;  %v14075_v5 = vld [vmem:[#allocation6 + $0x185c] ss:$28 sps:$4 sm:$0xff]  }
 0x555   :  { %10671 = vmatprep.subr.bf16.mxu0 %v14010_v7  ;;  %v14077_v6 = vld [vmem:[#allocation6 + $0x1320] ss:$28 sps:$4 sm:$0xff]   ;;  %v14073_v7 = vld [vmem:[#allocation6 + $0x1858] ss:$28 sps:$4 sm:$0xff]  }
 0x557   :  { %12621 = vmatpush3.bf16.msra.mxu1 %v14012_v8  ;;  %v14081_v8 = vld [vmem:[#allocation6 + $0x16d8] ss:$28 sps:$4 sm:$0xff]  }
 0x558   :  { %10672 = vmatpush1.bf16.msra.mxu0 %v14008_v9  ;;  %12622 = vmatprep.subr.bf16.mxu1 %v14016_v28  ;;  %v14080_v9 = vld [vmem:[#allocation6 + $0x1894] ss:$28 sps:$4 sm:$0xff]  }
 0x559   :  { %10673 = vmatprep.subr.bf16.mxu0 %v14015_v11  ;;  %v14082_v28 = vld [vmem:[#allocation6 + $0x1518] ss:$28 sps:$4 sm:$0xff]   ;;  %v14078_v11 = vld [vmem:[#allocation6 + $0x1890] ss:$28 sps:$4 sm:$0xff]  }
 0x55b   :  { %12623 = vmatpush3.bf16.msra.mxu1 %v14017_v12  ;;  %v14085_v12 = vld [vmem:[#allocation6 + $0x18cc] ss:$28 sps:$4 sm:$0xff]  }
 0x55c   :  { %10674 = vmatpush1.bf16.msra.mxu0 %v14013_v58  ;;  %12624 = vmatprep.subr.bf16.mxu1 %v14021_v15  ;;  %v14086_v58 = vld [vmem:[#allocation6 + $0x1710] ss:$28 sps:$4 sm:$0xff]  }
 0x55d   :  { %10675 = vmatprep.subr.bf16.mxu0 %v14020_v1  ;;  %v14087_v15 = vld [vmem:[#allocation6 + $0x1550] ss:$28 sps:$4 sm:$0xff]   ;;  %v14083_v1 = vld [vmem:[#allocation6 + $0x18c8] ss:$28 sps:$4 sm:$0xff]  }
 0x55f   :  { %12625 = vmatpush3.bf16.msra.mxu1 %v14022_v50  ;;  %v14091_v50 = vld [vmem:[#allocation6 + $0x1748] ss:$28 sps:$4 sm:$0xff]  }
 0x560   :  { %10676 = vmatpush1.bf16.msra.mxu0 %v14018_v17  ;;  %12626 = vmatprep.subr.bf16.mxu1 %v14026_v46  ;;  %v14090_v17 = vld [vmem:[#allocation6 + $0x1904] ss:$28 sps:$4 sm:$0xff]  }
 0x561   :  { %10677 = vmatprep.subr.bf16.mxu0 %v14025_v61  ;;  %v14092_v46 = vld [vmem:[#allocation6 + $0x1588] ss:$28 sps:$4 sm:$0xff]   ;;  %v14088_v61 = vld [vmem:[#allocation6 + $0x1900] ss:$28 sps:$4 sm:$0xff]  }
 0x563   :  { %12627 = vmatpush3.bf16.msra.mxu1 %v14027_v20  ;;  %v14095_v20 = vld [vmem:[#allocation6 + $0x193c] ss:$28 sps:$4 sm:$0xff]  }
 0x564   :  { %10678 = vmatpush1.bf16.msra.mxu0 %v14023_v21  ;;  %12628 = vmatprep.subr.bf16.mxu1 %v14031_v22  ;;  %v14097_v21 = vld [vmem:[#allocation6 + $0x15c0] ss:$28 sps:$4 sm:$0xff]   ;;  %v14093_v22 = vld [vmem:[#allocation6 + $0x1938] ss:$28 sps:$4 sm:$0xff]  }
 0x565   :  { %10679 = vmatprep.subr.bf16.mxu0 %v14030_v24  ;;  %v14101_v24 = vld [vmem:[#allocation6 + $0x17b8] ss:$28 sps:$4 sm:$0xff]  }
 0x567   :  { %12629 = vmatpush3.bf16.msra.mxu1 %v14032_v26  ;;  %v14100_v26 = vld [vmem:[#allocation6 + $0x1974] ss:$28 sps:$4 sm:$0xff]  }
 0x568   :  { %10680 = vmatpush1.bf16.msra.mxu0 %v14028_v30  ;;  %12630 = vmatprep.subr.bf16.mxu1 %v14036_v27  ;;  %v14098_v30 = vld [vmem:[#allocation6 + $0x1970] ss:$28 sps:$4 sm:$0xff]  }
 0x569   :  { %10681 = vmatprep.subr.bf16.mxu0 %v14035_v29  ;;  %v14106_v27 = vld [vmem:[#allocation6 + $0x17f0] ss:$28 sps:$4 sm:$0xff]  }
 0x56a   :  { %v14105_v29 = vld [vmem:[#allocation6 + $0x19ac] ss:$28 sps:$4 sm:$0xff]  }
 0x56b   :  { %12631 = vmatpush3.bf16.msra.mxu1 %v14037_v33  ;;  %v14695_v33 = vld [vmem:[#allocation7] sm:$0xff] }
 0x56c   :  { %10682 = vmatpush1.bf16.msra.mxu0 %v14033_v35  ;;  %12638 = vmatprep.subr.bf16.mxu1 %v14041_v37  ;;  %v5089_v35 = vrot.slane %v14695_v33, %v14520_v31  ;;  %v5093_v37 = vrot.slane %v14695_v33, %v14523_v32  ;;  %v14116_v32 = vld [vmem:[#allocation6 + $0x1860] ss:$28 sps:$4 sm:$0xff]  }
 0x56d   :  { %10683 = vmatprep.subr.bf16.mxu0 %v14040_v38  ;;  %v14107_v38 = vld [vmem:[#allocation6 + $0x1630] ss:$28 sps:$4 sm:$0xff]  }
 0x56e   :  { %10950 = vmatmul.mubr.bf16.vlgmr.msra.gmra.mrb[40].mxu1 %v14551_v43  ;;  %v14057_v43 = vld [vmem:[#allocation6 + $0x1240] ss:$28 sps:$4 sm:$0xff]  }
 0x56f   :  { %12639 = vmatpush3.bf16.msra.mxu1 %v14042_v10  ;;  %10990 = vmatprep.mubr.bf16.mxu1 %v14625_v23  ;;  %v14061_v23 = vld [vmem:[#allocation6 + $0x1438] ss:$28 sps:$4 sm:$0xff]   ;;  %v14103_v10 = vld [vmem:[#allocation6 + $0x19a8] ss:$28 sps:$4 sm:$0xff]  }
 0x570   :  { %10684 = vmatpush1.bf16.msra.mxu0 %v14038_v47  ;;  %12640 = vmatprep.subr.bf16.mxu1 %v14046_v40  ;;  %v14111_v47 = vld [vmem:[#allocation6 + $0x1828] ss:$28 sps:$4 sm:$0xff]  }
 0x571   :  { %10685 = vmatprep.subr.bf16.mxu0 %v14045_v16  ;;  %v14110_v16 = vld [vmem:[#allocation6 + $0x19e4] ss:$28 sps:$4 sm:$0xff]  }
 0x573   :  { %12641 = vmatpush3.bf16.msra.mxu1 %v14047_v14 }
 0x574   :  { %10686 = vmatpush1.bf16.msra.mxu0 %v14043_v39  ;;  %12642 = vmatprep.subr.bf16.mxu1 %v14051_v41 }
 0x575   :  { %10687 = vmatprep.subr.bf16.mxu0 %v14050_v42 }
 0x577   :  { %12643 = vmatpush3.bf16.msra.mxu1 %v14052_v44  ;;  %v14112_v44 = vld [vmem:[#allocation6 + $0x1668] ss:$28 sps:$4 sm:$0xff]  }
 0x578   :  { %10688 = vmatpush1.bf16.msra.mxu0 %v14048_v56  ;;  %12644 = vmatprep.subr.bf16.mxu1 %v14056_v45  ;;  %v14108_v45 = vld [vmem:[#allocation6 + $0x19e0] ss:$28 sps:$4 sm:$0xff]  }
 0x579   :  { %10689 = vmatprep.subr.bf16.mxu0 %v14055_v49 }
 0x57b   :  { %12645 = vmatpush3.bf16.msra.mxu1 %v14057_v43  ;;  %v14115_v43 = vld [vmem:[#allocation6 + $0x1a1c] ss:$28 sps:$4 sm:$0xff]  }
 0x57c   :  { %10690 = vmatpush1.bf16.msra.mxu0 %v14053_v51  ;;  %12646 = vmatprep.subr.bf16.mxu1 %v14061_v23  ;;  %v14117_v51 = vld [vmem:[#allocation6 + $0x16a0] ss:$28 sps:$4 sm:$0xff]   ;;  %v14113_v23 = vld [vmem:[#allocation6 + $0x1a18] ss:$28 sps:$4 sm:$0xff]  }
 0x57d   :  { %10691 = vmatprep.subr.bf16.mxu0 %v14060_v52  ;;  %v14121_v52 = vld [vmem:[#allocation6 + $0x1a58] ss:$28 sps:$4 sm:$0xff]  }
 0x57f   :  { %12647 = vmatpush3.bf16.msra.mxu1 %v14062_v53  ;;  %v14120_v53 = vld [vmem:[#allocation6 + $0x1a54] ss:$28 sps:$4 sm:$0xff]  }
 0x580   :  { %10692 = vmatpush1.bf16.msra.mxu0 %v14058_v55  ;;  %12648 = vmatprep.subr.bf16.mxu1 %v14066_v34  ;;  %v14122_v55 = vld [vmem:[#allocation6 + $0x1898] ss:$28 sps:$4 sm:$0xff]   ;;  %v14118_v34 = vld [vmem:[#allocation6 + $0x1a50] ss:$28 sps:$4 sm:$0xff]  }
 0x581   :  { %10693 = vmatprep.subr.bf16.mxu0 %v14065_v57  ;;  %v14126_v57 = vld [vmem:[#allocation6 + $0x1a90] ss:$28 sps:$4 sm:$0xff]  }
 0x583   :  { %12649 = vmatpush3.bf16.msra.mxu1 %v14067_v59  ;;  %v14125_v59 = vld [vmem:[#allocation6 + $0x1a8c] ss:$28 sps:$4 sm:$0xff]  }
 0x584   :  { %10694 = vmatpush1.bf16.msra.mxu0 %v14063_v63  ;;  %12650 = vmatprep.subr.bf16.mxu1 %v14071_v2 }
 0x585   :  { %10695 = vmatprep.subr.bf16.mxu0 %v14070_v3  ;;  %v14127_v3 = vld [vmem:[#allocation6 + $0x18d0] ss:$28 sps:$4 sm:$0xff]  }
 0x587   :  { %12651 = vmatpush3.bf16.msra.mxu1 %v14072_v18 }
 0x588   :  { %10696 = vmatpush1.bf16.msra.mxu0 %v14068_v25  ;;  %12652 = vmatprep.subr.bf16.mxu1 %v14076_v4  ;;  %v14123_v25 = vld [vmem:[#allocation6 + $0x1a88] ss:$28 sps:$4 sm:$0xff]  }
 0x589   :  { %10697 = vmatprep.subr.bf16.mxu0 %v14075_v5  ;;  %v14131_v4 = vld [vmem:[#allocation6 + $0x1ac8] ss:$28 sps:$4 sm:$0xff]  }
 0x58b   :  { %12653 = vmatpush3.bf16.msra.mxu1 %v14077_v6  ;;  %v14128_v6 = vld [vmem:[#allocation6 + $0x1ac0] ss:$28 sps:$4 sm:$0xff]  }
 0x58c   :  { %10698 = vmatpush1.bf16.msra.mxu0 %v14073_v7  ;;  %12660 = vmatprep.subr.bf16.mxu1 %v14081_v8  ;;  %v14136_v7 = vld [vmem:[#allocation6 + $0x1b00] ss:$28 sps:$4 sm:$0xff]  }
 0x58d   :  { %10710 = vmatprep.subr.bf16.mxu0 %v14080_v9  ;;  %v14135_v8 = vld [vmem:[#allocation6 + $0x1afc] ss:$28 sps:$4 sm:$0xff]  }
 0x58e   :  { %10991 = vmatmul.mubr.bf16.vlgmr.msra.gmra.mrb[44].mxu1 %v14623_v19  ;;  %v14096_v19 = vld [vmem:[#allocation6 + $0x1780] ss:$28 sps:$4 sm:$0xff]  }
 0x58f   :  { %10700 = vmatmul.mubr.bf16.vlgmr.msra.gmra.mrb[16].mxu0 %v14602_v36  ;;  %12661 = vmatpush3.bf16.msra.mxu1 %v14082_v28  ;;  %v14137_v9 = vld [vmem:[#allocation6 + $0x1940] ss:$28 sps:$4 sm:$0xff]   ;;  %v14133_v28 = vld [vmem:[#allocation6 + $0x1af8] ss:$28 sps:$4 sm:$0xff]  }
 0x590   :  { %10711 = vmatpush1.bf16.msra.mxu0 %v14078_v11  ;;  %10742 = vmatprep.mubr.bf16.mxu0 %v14640_v62  ;;  %v14141_v11 = vld [vmem:[#allocation6 + $0x1b38] ss:$28 sps:$4 sm:$0xff]  }
 0x591   :  { %11031 = vmatprep.mubr.bf16.mxu1 %v14607_v48  ;;  %10712 = vmatprep.subr.bf16.mxu0 %v14085_v12  ;;  %v14102_v48 = vld [vmem:[#allocation6 + $0x15f8] ss:$28 sps:$4 sm:$0xff]  }
 0x592   :  { %12662 = vmatprep.subr.bf16.mxu1 %v14086_v58  ;;  %v14140_v12 = vld [vmem:[#allocation6 + $0x1b34] ss:$28 sps:$4 sm:$0xff]  }
 0x593   :  { %12663 = vmatpush3.bf16.msra.mxu1 %v14087_v15  ;;  %v14142_v58 = vld [vmem:[#allocation6 + $0x1978] ss:$28 sps:$4 sm:$0xff]   ;;  %v14138_v15 = vld [vmem:[#allocation6 + $0x1b30] ss:$28 sps:$4 sm:$0xff]  }
 0x594   :  { %10713 = vmatpush1.bf16.msra.mxu0 %v14083_v1  ;;  %12664 = vmatprep.subr.bf16.mxu1 %v14091_v50  ;;  %v14146_v1 = vld [vmem:[#allocation6 + $0x1b70] ss:$28 sps:$4 sm:$0xff]  }
 0x595   :  { %10714 = vmatprep.subr.bf16.mxu0 %v14090_v17  ;;  %v14145_v50 = vld [vmem:[#allocation6 + $0x1b6c] ss:$28 sps:$4 sm:$0xff]  }
 0x596   :  { %v14147_v17 = vld [vmem:[#allocation6 + $0x19b0] ss:$28 sps:$4 sm:$0xff]  }
 0x597   :  { %12665 = vmatpush3.bf16.msra.mxu1 %v14092_v46  ;;  %v14143_v46 = vld [vmem:[#allocation6 + $0x1b68] ss:$28 sps:$4 sm:$0xff]  }
 0x598   :  { %10715 = vmatpush1.bf16.msra.mxu0 %v14088_v61  ;;  %12666 = vmatprep.subr.bf16.mxu1 %v14096_v19  ;;  %v14151_v61 = vld [vmem:[#allocation6 + $0x1ba8] ss:$28 sps:$4 sm:$0xff]  }
 0x599   :  { %10716 = vmatprep.subr.bf16.mxu0 %v14095_v20  ;;  %v14150_v20 = vld [vmem:[#allocation6 + $0x1ba4] ss:$28 sps:$4 sm:$0xff]  }
 0x59b   :  { %12667 = vmatpush3.bf16.msra.mxu1 %v14097_v21 }
 0x59c   :  { %10717 = vmatpush1.bf16.msra.mxu0 %v14093_v22  ;;  %12668 = vmatprep.subr.bf16.mxu1 %v14101_v24 }
 0x59d   :  { %10718 = vmatprep.subr.bf16.mxu0 %v14100_v26  ;;  %v14152_v26 = vld [vmem:[#allocation6 + $0x19e8] ss:$28 sps:$4 sm:$0xff]  }
 0x59f   :  { %12669 = vmatpush3.bf16.msra.mxu1 %v14102_v48 }
 0x5a0   :  { %10719 = vmatpush1.bf16.msra.mxu0 %v14098_v30  ;;  %12670 = vmatprep.subr.bf16.mxu1 %v14106_v27  ;;  %v14148_v30 = vld [vmem:[#allocation6 + $0x1ba0] ss:$28 sps:$4 sm:$0xff]  }
 0x5a1   :  { %v10400_v40 = vpop.f32.mrb[20].mxu1  ;;  %10720 = vmatprep.subr.bf16.mxu0 %v14105_v29  ;;  %v14156_v27 = vld [vmem:[#allocation6 + $0x1be0] ss:$28 sps:$4 sm:$0xff]  }
 0x5a2   :  { %v12740_v14 = vadd.f32 %v10400_v40, %v5089_v35  ;;  %v10402_v39 = vpop.f32.mrb[21].mxu1 }
 0x5a3   :  { %v12741_v41 = vadd.f32 %v10402_v39, %v5093_v37  ;;  %v10404_v42 = vpop.f32.mrb[22].mxu1  ;;  %12671 = vmatpush3.bf16.msra.mxu1 %v14107_v38  ;;  %v14153_v38 = vld [vmem:[#allocation6 + $0x1bd8] ss:$28 sps:$4 sm:$0xff]  }
 0x5a4   :  { %14166 = vtanh.f32 %v12740_v14  ;;  %v12742_v31 = vadd.f32 %v10404_v42, %v5089_v35  ;;  %10721 = vmatpush1.bf16.msra.mxu0 %v14103_v10  ;;  %v10406_v56 = vpop.f32.mrb[23].mxu1  ;;  %12672 = vmatprep.subr.bf16.mxu1 %v14111_v47  ;;  %v14155_v35 = vld [vmem:[#allocation6 + $0x1bdc] ss:$28 sps:$4 sm:$0xff]   ;;  %v5105_v10 = vrot.slane %v14695_v33, %v14576_v13 }
 0x5a5   :  { %14168 = vtanh.f32 %v12741_v41  ;;  %v12743_v49 = vadd.f32 %v10406_v56, %v5093_v37  ;;  %10722 = vmatprep.subr.bf16.mxu0 %v14110_v16  ;;  %v14157_v37 = vld [vmem:[#allocation6 + $0x1a20] ss:$28 sps:$4 sm:$0xff]  }
 0x5a6   :  { %14170 = vtanh.f32 %v12742_v31 }
 0x5a7   :  { %14172 = vtanh.f32 %v12743_v49  ;;  %12673 = vmatpush3.bf16.msra.mxu1 %v14112_v44 }
 0x5a8   :  { %10723 = vmatpush1.bf16.msra.mxu0 %v14108_v45  ;;  %12674 = vmatprep.subr.bf16.mxu1 %v14116_v32 }
 0x5a9   :  { %10724 = vmatprep.subr.bf16.mxu0 %v14115_v43 }
 0x5ab   :  { %12675 = vmatpush3.bf16.msra.mxu1 %v14117_v51 }
 0x5ac   :  { %10725 = vmatpush1.bf16.msra.mxu0 %v14113_v23  ;;  %12682 = vmatprep.subr.bf16.mxu1 %v14121_v52 }
 0x5ad   :  { %10726 = vmatprep.subr.bf16.mxu0 %v14120_v53 }
 0x5ae   :  { %v14167_v63 = vpop.eup %14166  ;;  %11032 = vmatmul.mubr.bf16.vlgmr.msra.gmra.mrb[48].mxu1 %v14602_v36  ;;  %v14130_v36 = vld [vmem:[#allocation6 + $0x1ac4] ss:$28 sps:$4 sm:$0xff]  }
 0x5af   :  { %v14169_v2 = vpop.eup %14168  ;;  %11097 = vst [vmem:[%s14746_s5 + $0x10] sm:$0xff] %v14167_v63  ;;  %12683 = vmatpush3.bf16.msra.mxu1 %v14122_v55  ;;  %11072 = vmatprep.mubr.bf16.mxu1 %v14640_v62  ;;  %v14132_v62 = vld [vmem:[#allocation6 + $0x1908] ss:$28 sps:$4 sm:$0xff]  }
 0x5b0   :  { %v14171_v18 = vpop.eup %14170  ;;  %11098 = vst [vmem:[%s14746_s5 + $0x18] sm:$0xff] %v14169_v2  ;;  %10727 = vmatpush1.bf16.msra.mxu0 %v14118_v34  ;;  %12684 = vmatprep.subr.bf16.mxu1 %v14126_v57 }
 0x5b1   :  { %v14173_v5 = vpop.eup %14172  ;;  %11104 = vst [vmem:[%s14746_s5 + $0x48] sm:$0xff] %v14171_v18  ;;  %10728 = vmatprep.subr.bf16.mxu0 %v14125_v59 }
 0x5b2   :  { %11105 = vst [vmem:[%s14746_s5 + $0x50] sm:$0xff] %v14173_v5 }
 0x5b3   :  { %12685 = vmatpush3.bf16.msra.mxu1 %v14127_v3 }
 0x5b4   :  { %10729 = vmatpush1.bf16.msra.mxu0 %v14123_v25  ;;  %12686 = vmatprep.subr.bf16.mxu1 %v14131_v4 }
 0x5b5   :  { %10730 = vmatprep.subr.bf16.mxu0 %v14130_v36 }
 0x5b7   :  { %12687 = vmatpush3.bf16.msra.mxu1 %v14132_v62 }
 0x5b8   :  { %10731 = vmatpush1.bf16.msra.mxu0 %v14128_v6  ;;  %12688 = vmatprep.subr.bf16.mxu1 %v14136_v7 }
 0x5b9   :  { %10732 = vmatprep.subr.bf16.mxu0 %v14135_v8 }
 0x5bb   :  { %12689 = vmatpush3.bf16.msra.mxu1 %v14137_v9 }
 0x5bc   :  { %10733 = vmatpush1.bf16.msra.mxu0 %v14133_v28  ;;  %12690 = vmatprep.subr.bf16.mxu1 %v14141_v11 }
 0x5bd   :  { %10734 = vmatprep.subr.bf16.mxu0 %v14140_v12 }
 0x5bf   :  { %12691 = vmatpush3.bf16.msra.mxu1 %v14142_v58 }
 0x5c0   :  { %10735 = vmatpush1.bf16.msra.mxu0 %v14138_v15  ;;  %12692 = vmatprep.subr.bf16.mxu1 %v14146_v1 }
 0x5c1   :  { %v12544_v19 = vpop.f32.mrb[24].mxu1  ;;  %10736 = vmatprep.subr.bf16.mxu0 %v14145_v50 }
 0x5c2   :  { %v12545_v21 = vpop.f32.mrb[25].mxu1 }
 0x5c3   :  { %v12546_v22 = vadd.f32 %v12545_v21, %v12544_v19  ;;  %v12547_v24 = vpop.f32.mrb[26].mxu1  ;;  %12693 = vmatpush3.bf16.msra.mxu1 %v14147_v17 }
 0x5c4   :  { %10737 = vmatpush1.bf16.msra.mxu0 %v14143_v46  ;;  %v12548_v48 = vpop.f32.mrb[27].mxu1  ;;  %12694 = vmatprep.subr.bf16.mxu1 %v14151_v61 }
 0x5c5   :  { %v12549_v29 = vadd.f32 %v12548_v48, %v12547_v24  ;;  %10738 = vmatprep.subr.bf16.mxu0 %v14150_v20  ;;  %v10788_v16 = vadd.f32 %v12546_v22, %v5105_v10  ;;  %v5097_v22 = vrot.slane %v14695_v33, %v14435_v60  ;;  %v5101_v24 = vrot.slane %v14695_v33, %v14443_v0 }
 0x5c7   :  { %12695 = vmatpush3.bf16.msra.mxu1 %v14152_v26  ;;  %v10791_v42 = vadd.f32 %v12549_v29, %v5105_v10 }
 0x5c8   :  { %10739 = vmatpush1.bf16.msra.mxu0 %v14148_v30  ;;  %12696 = vmatprep.subr.bf16.mxu1 %v14156_v27 }
 0x5c9   :  { %10740 = vmatprep.subr.bf16.mxu0 %v14155_v35 }
 0x5cb   :  { %12697 = vmatpush3.bf16.msra.mxu1 %v14157_v37 }
 0x5cc   :  { %10741 = vmatpush1.bf16.msra.mxu0 %v14153_v38 }
 0x5ce   :  { %11073 = vmatmul.mubr.bf16.vlgmr.msra.gmra.mrb[52].mxu1 %v14638_v54 }
 0x5cf   :  { %10743 = vmatmul.mubr.bf16.vlgmr.msra.gmra.mrb[16].mxu0 %v14638_v54 }
 0x5e1   :  { %v12566_v47 = vpop.f32.mrb[28].mxu1 }
 0x5e2   :  { %v12567_v40 = vpop.f32.mrb[29].mxu1 }
 0x5e3   :  { %v12568_v14 = vadd.f32 %v12567_v40, %v12566_v47  ;;  %v12569_v39 = vpop.f32.mrb[30].mxu1 }
 0x5e4   :  { %v12570_v41 = vpop.f32.mrb[31].mxu1 }
 0x5e5   :  { %v10829_v44 = vadd.f32 %v12568_v14, %v10788_v16  ;;  %v12571_v31 = vadd.f32 %v12570_v41, %v12569_v39 }
 0x5e7   :  { %v10832_v56 = vadd.f32 %v12571_v31, %v10791_v42 }
 0x601   :  { %v12588_v45 = vpop.f32.mrb[32].mxu1 }
 0x602   :  { %v12589_v32 = vpop.f32.mrb[33].mxu1 }
 0x603   :  { %v12590_v49 = vadd.f32 %v12589_v32, %v12588_v45  ;;  %v12591_v43 = vpop.f32.mrb[34].mxu1 }
 0x604   :  { %v12592_v51 = vpop.f32.mrb[35].mxu1 }
 0x605   :  { %v10870_v23 = vadd.f32 %v12590_v49, %v10829_v44  ;;  %v12593_v54 = vadd.f32 %v12592_v51, %v12591_v43 }
 0x607   :  { %v10873_v52 = vadd.f32 %v12593_v54, %v10832_v56 }
 0x621   :  { %v12610_v53 = vpop.f32.mrb[36].mxu1 }
 0x622   :  { %v12611_v13 = vpop.f32.mrb[37].mxu1 }
 0x623   :  { %v12612_v55 = vadd.f32 %v12611_v13, %v12610_v53  ;;  %v12613_v34 = vpop.f32.mrb[38].mxu1 }
 0x624   :  { %v12614_v57 = vpop.f32.mrb[39].mxu1 }
 0x625   :  { %v10911_v59 = vadd.f32 %v12612_v55, %v10870_v23  ;;  %v12615_v63 = vadd.f32 %v12614_v57, %v12613_v34 }
 0x627   :  { %v10914_v2 = vadd.f32 %v12615_v63, %v10873_v52 }
 0x641   :  { %v12632_v3 = vpop.f32.mrb[40].mxu1 }
 0x642   :  { %v12633_v18 = vpop.f32.mrb[41].mxu1 }
 0x643   :  { %v12634_v25 = vadd.f32 %v12633_v18, %v12632_v3  ;;  %v12635_v4 = vpop.f32.mrb[42].mxu1 }
 0x644   :  { %v12636_v5 = vpop.f32.mrb[43].mxu1 }
 0x645   :  { %v10952_v36 = vadd.f32 %v12634_v25, %v10911_v59  ;;  %v12637_v62 = vadd.f32 %v12636_v5, %v12635_v4 }
 0x647   :  { %v10955_v6 = vadd.f32 %v12637_v62, %v10914_v2 }
 0x661   :  { %v12654_v7 = vpop.f32.mrb[44].mxu1 }
 0x662   :  { %v12655_v8 = vpop.f32.mrb[45].mxu1 }
 0x663   :  { %v12656_v9 = vadd.f32 %v12655_v8, %v12654_v7  ;;  %v12657_v28 = vpop.f32.mrb[46].mxu1 }
 0x664   :  { %v12658_v11 = vpop.f32.mrb[47].mxu1 }
 0x665   :  { %v10993_v12 = vadd.f32 %v12656_v9, %v10952_v36  ;;  %v12659_v58 = vadd.f32 %v12658_v11, %v12657_v28 }
 0x667   :  { %v10996_v15 = vadd.f32 %v12659_v58, %v10955_v6 }
 0x681   :  { %v12676_v1 = vpop.f32.mrb[48].mxu1 }
 0x682   :  { %v12677_v50 = vpop.f32.mrb[49].mxu1 }
 0x683   :  { %v12678_v17 = vadd.f32 %v12677_v50, %v12676_v1  ;;  %v12679_v46 = vpop.f32.mrb[50].mxu1 }
 0x684   :  { %v12680_v61 = vpop.f32.mrb[51].mxu1 }
 0x685   :  { %v11034_v19 = vadd.f32 %v12678_v17, %v10993_v12  ;;  %v12681_v20 = vadd.f32 %v12680_v61, %v12679_v46 }
 0x687   :  { %v11037_v21 = vadd.f32 %v12681_v20, %v10996_v15 }
 0x6a1   :  { %v12698_v26 = vpop.f32.mrb[52].mxu1 }
 0x6a2   :  { %v10744_v48 = vpop.f32.mrb[16].mxu0  ;;  %v12699_v30 = vpop.f32.mrb[53].mxu1 }
 0x6a3   :  { %v12744_v27 = vadd.f32 %v10744_v48, %v5097_v22  ;;  %v10746_v29 = vpop.f32.mrb[17].mxu0  ;;  %v12700_v35 = vadd.f32 %v12699_v30, %v12698_v26  ;;  %v12701_v37 = vpop.f32.mrb[54].mxu1 }
 0x6a4   :  { %v12745_v38 = vadd.f32 %v10746_v29, %v5101_v24  ;;  %v10748_v10 = vpop.f32.mrb[18].mxu0  ;;  %v12702_v47 = vpop.f32.mrb[55].mxu1 }
 0x6a5   :  { %14174 = vtanh.f32 %v12744_v27  ;;  %v11075_v40 = vadd.f32 %v12700_v35, %v11034_v19  ;;  %v12746_v16 = vadd.f32 %v10748_v10, %v5097_v22  ;;  %v10750_v14 = vpop.f32.mrb[19].mxu0  ;;  %v12703_v39 = vadd.f32 %v12702_v47, %v12701_v37 }
 0x6a6   :  { %14176 = vtanh.f32 %v12745_v38  ;;  %v12747_v60 = vadd.f32 %v10750_v14, %v5101_v24 }
 0x6a7   :  { %14178 = vtanh.f32 %v11075_v40  ;;  %v11078_v41 = vadd.f32 %v12703_v39, %v11037_v21 }
 0x6a8   :  { %14180 = vtanh.f32 %v12746_v16 }
 0x6a9   :  { %14182 = vtanh.f32 %v12747_v60 }
 0x6aa   :  { %14184 = vtanh.f32 %v11078_v41 }
 0x6af   :  { %v14175_v0 = vpop.eup %14174 }
 0x6b0   :  { %v14177_v33 = vpop.eup %14176  ;;  %11099 = vst [vmem:[%s14746_s5 + $0x20] sm:$0xff] %v14175_v0 }
 0x6b1   :  { %v14179_v42 = vpop.eup %14178  ;;  %11100 = vst [vmem:[%s14746_s5 + $0x28] sm:$0xff] %v14177_v33 }
 0x6b2   :  { %v14181_v44 = vpop.eup %14180  ;;  %11101 = vst [vmem:[%s14746_s5 + $0x30] sm:$0xff] %v14179_v42 }
 0x6b3   :  { %v14183_v31 = vpop.eup %14182  ;;  %11106 = vst [vmem:[%s14746_s5 + $0x58] sm:$0xff] %v14181_v44 }
 0x6b4   :  { %v14185_v56 = vpop.eup %14184  ;;  %11107 = vst [vmem:[%s14746_s5 + $0x60] sm:$0xff] %v14183_v31 }
 0x6b5   :  { %11108 = vst [vmem:[%s14746_s5 + $0x68] sm:$0xff] %v14185_v56 }
 0x6b6   :  { %11113 = vsyncpa [#allocation3], 1 }
 0x6b7   :  { %11114 = vsyncpa [#allocation5], 1 }
 0x6b8   :  { %11115 = vsyncpa [#allocation8], 1 }

</bundles_post_ra>
